<compile_context>
chip_gen: v7x
topology: tpu7x:2x2x1
jax: 0.10.0
libtpu: 0.0.40
codegen_flags: <defaults>
</compile_context>

<pallas_src>
import jax
import jax.numpy as jnp
from jax import lax
from jax.experimental import pallas as pl
from jax.experimental.pallas import tpu as pltpu

LANE = 128
SUBLANE = 8
PREC = lax.Precision.HIGHEST


def _round_up(x, m):
    return ((x + m - 1) // m) * m


def _vmem_limit(elem_count, floor=16 << 20, cap=48 << 20, headroom=4):
    # Size the scoped-VMEM request from the actual footprint, with headroom,
    # capped below v7x's 64 MiB physical VMEM.
    return int(min(max(elem_count * 4 * headroom, floor), cap))


# ---------------------------------------------------------------------------
# Pallas kernels
# ---------------------------------------------------------------------------

def gnn_layers_kernel(src_col_ref, dst_col_ref, src_row_ref, dst_row_ref,
                      h0_ref,
                      wm_top_ref, wm_bot_ref, b_msg_ref,
                      wr_top_ref, wr_bot_ref, b_rev_ref,
                      w_ih_ref, b_ih_ref, w_hh_ref, b_hh_ref,
                      h_out_ref, aggr_ref):
    """All GNN layers fused.  grid = (num_layers, num_edge_tiles).

    src/dst col: [TE, 1] int32 edge endpoints (sentinel >= NP for padding).
    src/dst row: [1, TE] same data, row layout (for scatter one-hots).
    h0:          [NP, DP] initial node features (lane-padded).
    wm_*/wr_*:   [DP, 2DP] split message weights, biases [1, 2DP].
    w_ih: [2DP, 3DP], w_hh: [DP, 3DP]  (gates r,z,n in separate DP blocks).
    h_out:       [NP, DP] resident carry of the hidden state across layers.
    aggr_ref:    VMEM scratch [NP, 2DP] accumulated over edge tiles.
    """
    layer = pl.program_id(0)
    etile = pl.program_id(1)
    n_etiles = pl.num_programs(1)

    @pl.when((layer == 0) & (etile == 0))
    def _():
        h_out_ref[...] = h0_ref[...]

    @pl.when(etile == 0)
    def _():
        aggr_ref[...] = jnp.zeros_like(aggr_ref)

    h = h_out_ref[...]                        # [NP, DP] current hidden state
    np_, dp = h.shape
    te = src_col_ref.shape[0]

    # Gather one-hots [TE, NP] and scatter one-hots [NP, TE], built
    # in-register (never stored in HBM).  Padded edges (sentinel >= NP)
    # produce all-zero rows/cols -> no contribution.
    iota_en = lax.broadcasted_iota(jnp.int32, (te, np_), 1)
    a_src = (iota_en == src_col_ref[...]).astype(jnp.float32)       # [TE, NP]
    a_dst = (iota_en == dst_col_ref[...]).astype(jnp.float32)       # [TE, NP]
    iota_ne = lax.broadcasted_iota(jnp.int32, (np_, te), 0)
    s_src = (iota_ne == src_row_ref[...]).astype(jnp.float32)       # [NP, TE]
    s_dst = (iota_ne == dst_row_ref[...]).astype(jnp.float32)       # [NP, TE]

    # Gather endpoint features on the MXU.
    h_src = jnp.dot(a_src, h, precision=PREC,
                    preferred_element_type=jnp.float32)             # h[src]
    h_dst = jnp.dot(a_dst, h, precision=PREC,
                    preferred_element_type=jnp.float32)             # h[dst]

    # Messages: split weights -> no [TE, 2DP] concatenation materialized.
    # forward edges (src->dst): msg([h_j, h_i]) = msg([h_src, h_dst])
    msg_fwd = (jnp.dot(h_src, wm_top_ref[...], precision=PREC,
                       preferred_element_type=jnp.float32)
               + jnp.dot(h_dst, wm_bot_ref[...], precision=PREC,
                         preferred_element_type=jnp.float32)
               + b_msg_ref[...])
    # reversed edges (dst->src): msg_rev([h_j, h_i]) = msg_rev([h_dst, h_src])
    msg_rev = (jnp.dot(h_dst, wr_top_ref[...], precision=PREC,
                       preferred_element_type=jnp.float32)
               + jnp.dot(h_src, wr_bot_ref[...], precision=PREC,
                         preferred_element_type=jnp.float32)
               + b_rev_ref[...])

    # Scatter-add: plain matmuls with the pre-transposed scatter one-hots.
    aggr_ref[...] += (
        jnp.dot(s_dst, msg_fwd, precision=PREC,
                preferred_element_type=jnp.float32)
        + jnp.dot(s_src, msg_rev, precision=PREC,
                  preferred_element_type=jnp.float32))

    @pl.when(etile == n_etiles - 1)
    def _():
        # GRUCell update (PyTorch gate order r, z, n), elementwise math in f32.
        aggr = aggr_ref[...]
        gi = jnp.dot(aggr, w_ih_ref[...], precision=PREC,
                     preferred_element_type=jnp.float32) + b_ih_ref[...]
        gh = jnp.dot(h, w_hh_ref[...], precision=PREC,
                     preferred_element_type=jnp.float32) + b_hh_ref[...]
        # dp is a multiple of 128 -> these lane slices are tile-aligned.
        r = jax.nn.sigmoid(gi[:, :dp] + gh[:, :dp])
        z = jax.nn.sigmoid(gi[:, dp:2 * dp] + gh[:, dp:2 * dp])
        n = jnp.tanh(gi[:, 2 * dp:] + r * gh[:, 2 * dp:])
        h_out_ref[...] = (1.0 - z) * n + z * h


def graph_emb_pair_kernel(batch_ref, hp_ref,
                          wf_m_ref, bf_m_ref, wg_m_ref, bg_m_ref,
                          wf_v_ref, bf_v_ref, wg_v_ref, bg_v_ref,
                          out_m_ref, out_v_ref):
    """Fused GraphEmb_mean + GraphEmb_var (aggr='gsum') sharing hp and batch.

    batch: [1, NP] int32 graph assignment (sentinel >= GP for padded nodes).
    hp:    [NP, HP] lane-padded node features.
    wf:    [HP, SP] (transposed, padded), bf: [1, SP], wg: [1, HP], bg: [1,1].
    out:   [GP, SP] per-graph sums (GP = num_graphs padded to sublanes).
    """
    hp = hp_ref[...]
    np_ = hp.shape[0]
    gp = out_m_ref.shape[0]

    # [GP, NP] one-hot pooling matrix built in-register.
    iota_g = lax.broadcasted_iota(jnp.int32, (gp, np_), 0)
    pool = (iota_g == batch_ref[...]).astype(jnp.float32)

    def head(wf, bf, wg, bg, out_ref):
        h_vg = jnp.dot(hp, wf, precision=PREC,
                       preferred_element_type=jnp.float32) + bf     # [NP, SP]
        gate = jax.nn.sigmoid(jnp.sum(hp * wg, axis=1, keepdims=True) + bg)
        out_ref[...] = jnp.dot(pool, h_vg * gate, precision=PREC,
                               preferred_element_type=jnp.float32)  # [GP, SP]

    head(wf_m_ref[...], bf_m_ref[...], wg_m_ref[...], bg_m_ref[...], out_m_ref)
    head(wf_v_ref[...], bf_v_ref[...], wg_v_ref[...], bg_v_ref[...], out_v_ref)


# ---------------------------------------------------------------------------
# Wrappers around pallas_call
# ---------------------------------------------------------------------------

def run_node_emb(src_col, dst_col, src_row, dst_row, h0, lp, *, edge_tile):
    """One fused pallas_call over grid (num_layers, num_edge_tiles)."""
    num_layers = lp["wm_top"].shape[0]
    np_, dp = h0.shape
    ep = src_col.shape[0]
    n_etiles = ep // edge_tile

    full = lambda l, e: (0, 0)
    per_layer = lambda l, e: (l, 0, 0)
    per_edge_col = lambda l, e: (e, 0)
    per_edge_row = lambda l, e: (0, e)

    in_specs = [
        pl.BlockSpec((edge_tile, 1), per_edge_col),        # src (column)
        pl.BlockSpec((edge_tile, 1), per_edge_col),        # dst (column)
        pl.BlockSpec((1, edge_tile), per_edge_row),        # src (row)
        pl.BlockSpec((1, edge_tile), per_edge_row),        # dst (row)
        pl.BlockSpec((np_, dp), full),                     # h0
        pl.BlockSpec((None, dp, 2 * dp), per_layer),       # wm_top
        pl.BlockSpec((None, dp, 2 * dp), per_layer),       # wm_bot
        pl.BlockSpec((None, 1, 2 * dp), per_layer),        # b_msg
        pl.BlockSpec((None, dp, 2 * dp), per_layer),       # wr_top
        pl.BlockSpec((None, dp, 2 * dp), per_layer),       # wr_bot
        pl.BlockSpec((None, 1, 2 * dp), per_layer),        # b_rev
        pl.BlockSpec((None, 2 * dp, 3 * dp), per_layer),   # w_ih
        pl.BlockSpec((None, 1, 3 * dp), per_layer),        # b_ih
        pl.BlockSpec((None, dp, 3 * dp), per_layer),       # w_hh
        pl.BlockSpec((None, 1, 3 * dp), per_layer),        # b_hh
    ]
    out_spec = pl.BlockSpec((np_, dp), full)

    weight_elems = (4 * dp * 2 * dp + 2 * dp * 3 * dp + dp * 3 * dp
                    + 2 * 2 * dp + 2 * 3 * dp)
    act_elems = (np_ * dp * 2 + np_ * 2 * dp
                 + edge_tile * (4 * np_ + 2 * dp + 2 * 2 * dp))

    return pl.pallas_call(
        gnn_layers_kernel,
        out_shape=jax.ShapeDtypeStruct((np_, dp), jnp.float32),
        grid_spec=pltpu.PrefetchScalarGridSpec(
            num_scalar_prefetch=0,
            grid=(num_layers, n_etiles),
            in_specs=in_specs,
            out_specs=out_spec,
            scratch_shapes=[pltpu.VMEM((np_, 2 * dp), jnp.float32)]),
        compiler_params=pltpu.CompilerParams(
            dimension_semantics=("arbitrary", "arbitrary"),
            vmem_limit_bytes=_vmem_limit(2 * weight_elems + act_elems)),
    )(src_col, dst_col, src_row, dst_row, h0,
      lp["wm_top"], lp["wm_bot"], lp["b_msg"],
      lp["wr_top"], lp["wr_bot"], lp["b_rev"],
      lp["w_ih"], lp["b_ih"], lp["w_hh"], lp["b_hh"])


def run_graph_emb_pair(batch_row, hp, ge_mean, ge_var, gp):
    np_, hp_dim = hp.shape
    sp = ge_mean["w_f"].shape[1]
    vspec = pl.BlockSpec(memory_space=pltpu.MemorySpace.VMEM)
    elems = (np_ * hp_dim + 2 * (hp_dim * sp + sp + hp_dim + 1)
             + 3 * np_ * sp + 2 * gp * sp)
    return pl.pallas_call(
        graph_emb_pair_kernel,
        out_shape=(jax.ShapeDtypeStruct((gp, sp), jnp.float32),
                   jax.ShapeDtypeStruct((gp, sp), jnp.float32)),
        in_specs=[vspec] * 10,
        out_specs=(vspec, vspec),
        compiler_params=pltpu.CompilerParams(
            vmem_limit_bytes=_vmem_limit(elems)),
    )(batch_row, hp,
      ge_mean["w_f"], ge_mean["b_f"], ge_mean["w_g"], ge_mean["b_g"],
      ge_var["w_f"], ge_var["b_f"], ge_var["w_g"], ge_var["b_g"])


# ---------------------------------------------------------------------------
# Parameter packing: pad to lane multiples, stack per-layer weights
# ---------------------------------------------------------------------------

def pack_kernel_params(params, dp, hp_dim, sp):
    d = params["emb"].shape[1]

    def pad2(a, rows, cols):
        return jnp.zeros((rows, cols), jnp.float32).at[:a.shape[0], :a.shape[1]].set(a)

    acc = {k: [] for k in ("wm_top", "wm_bot", "b_msg", "wr_top", "wr_bot",
                           "b_rev", "w_ih", "b_ih", "w_hh", "b_hh")}
    for p in params["layers"]:
        wm_t = p["w_msg"].T                       # [2D_in, 2D_out]
        wr_t = p["w_rev"].T
        acc["wm_top"].append(pad2(wm_t[:d], dp, 2 * dp))
        acc["wm_bot"].append(pad2(wm_t[d:], dp, 2 * dp))
        acc["b_msg"].append(pad2(p["b_msg"][None, :], 1, 2 * dp))
        acc["wr_top"].append(pad2(wr_t[:d], dp, 2 * dp))
        acc["wr_bot"].append(pad2(wr_t[d:], dp, 2 * dp))
        acc["b_rev"].append(pad2(p["b_rev"][None, :], 1, 2 * dp))

        w_ih_t = p["w_ih"].T                      # [2D, 3D] gate cols (r,z,n)
        w_hh_t = p["w_hh"].T                      # [D, 3D]
        w_ih_p = jnp.zeros((2 * dp, 3 * dp), jnp.float32)
        w_hh_p = jnp.zeros((dp, 3 * dp), jnp.float32)
        b_ih_p = jnp.zeros((1, 3 * dp), jnp.float32)
        b_hh_p = jnp.zeros((1, 3 * dp), jnp.float32)
        for g in range(3):  # each gate in its own 128-aligned lane block
            w_ih_p = w_ih_p.at[:2 * d, g * dp:g * dp + d].set(w_ih_t[:, g * d:(g + 1) * d])
            w_hh_p = w_hh_p.at[:d, g * dp:g * dp + d].set(w_hh_t[:, g * d:(g + 1) * d])
            b_ih_p = b_ih_p.at[0, g * dp:g * dp + d].set(p["b_ih"][g * d:(g + 1) * d])
            b_hh_p = b_hh_p.at[0, g * dp:g * dp + d].set(p["b_hh"][g * d:(g + 1) * d])
        acc["w_ih"].append(w_ih_p)
        acc["b_ih"].append(b_ih_p)
        acc["w_hh"].append(w_hh_p)
        acc["b_hh"].append(b_hh_p)

    layers = {k: jnp.stack(v) for k, v in acc.items()}

    def ge(p):
        return {"w_f": pad2(p["w_f"].T, hp_dim, sp),
                "b_f": pad2(p["b_f"][None, :], 1, sp),
                "w_g": pad2(p["w_g"], 1, hp_dim),
                "b_g": p["b_g"].reshape(1, 1)}

    return {"layers": layers,
            "ge_mean": ge(params["ge_mean"]),
            "ge_var": ge(params["ge_var"])}


# ---------------------------------------------------------------------------
# Full forward
# ---------------------------------------------------------------------------

def gnn_encoder_forward(edge_index, node_atts, batch, params, num_graphs,
                        *, edge_tile=128):
    ndim = params["emb"].shape[1]
    sdim = params["ge_mean"]["w_f"].shape[0]

    dp = _round_up(ndim, LANE)
    hp_dim = _round_up(ndim + 5, LANE)
    sp = _round_up(sdim, LANE)

    n_nodes = node_atts.shape[0]
    np_ = _round_up(max(n_nodes, SUBLANE), SUBLANE)
    n_edges = edge_index.shape[1]

    # Edge-tile sizing: a single tile if edges are few, otherwise a multiple
    # of 128 so the [1, tile] row blocks stay lane-aligned.
    ep_min = _round_up(max(n_edges, SUBLANE), SUBLANE)
    tile = _round_up(max(edge_tile, 1), LANE)
    if ep_min <= tile:
        tile = ep_min
    ep = _round_up(max(n_edges, tile), tile)

    kp = pack_kernel_params(params, dp, hp_dim, sp)

    # NodeInit embedding lookup + lane/sublane zero-padding (glue).
    emb_p = jnp.zeros((params["emb"].shape[0], dp), jnp.float32).at[:, :ndim].set(params["emb"])
    h0 = jnp.zeros((np_, dp), jnp.float32).at[:n_nodes].set(emb_p[node_atts])

    # Edge endpoints in both column [EP,1] and row [1,EP] layouts; padded
    # edges use the out-of-range sentinel np_ -> all-zero one-hot rows/cols.
    src = jnp.full((ep,), np_, jnp.int32).at[:n_edges].set(edge_index[0])
    dst = jnp.full((ep,), np_, jnp.int32).at[:n_edges].set(edge_index[1])
    src_col, dst_col = src[:, None], dst[:, None]
    src_row, dst_row = src[None, :], dst[None, :]

    h = run_node_emb(src_col, dst_col, src_row, dst_row, h0, kp["layers"],
                     edge_tile=tile)

    # TODO(synk): the reference module declares f_m/g_m with input width ndim+5
    # while NodeEmb produces width ndim; we keep the declared parameter shapes
    # and feed zeros for the extra 5 features (lane padding already covers it).
    hp = h if hp_dim == dp else jnp.zeros((np_, hp_dim), jnp.float32).at[:, :dp].set(h)

    # Padded nodes get an out-of-range graph id -> excluded from pooling.
    gp = _round_up(max(num_graphs, SUBLANE), SUBLANE)
    batch_row = jnp.full((1, np_), gp, jnp.int32).at[0, :n_nodes].set(batch)

    gm, gv = run_graph_emb_pair(batch_row, hp, kp["ge_mean"], kp["ge_var"], gp)
    return gm[:num_graphs, :sdim], gv[:num_graphs, :sdim]


# ---------------------------------------------------------------------------
# Deterministic parameter init (PyTorch-default-style uniform bounds)
# ---------------------------------------------------------------------------

def _linear_init(key, in_dim, out_dim):
    k_w, k_b = jax.random.split(key)
    bound = 1.0 / (in_dim ** 0.5)
    w = jax.random.uniform(k_w, (out_dim, in_dim), jnp.float32, -bound, bound)
    b = jax.random.uniform(k_b, (out_dim,), jnp.float32, -bound, bound)
    return w, b


def init_params(key, ndim, sdim, num_layers):
    keys = jax.random.split(key, 3 + num_layers)
    params = {"emb": jax.random.normal(keys[0], (11, ndim), jnp.float32)}
    layers = []
    for li in range(num_layers):
        k = jax.random.split(keys[1 + li], 3)
        w_msg, b_msg = _linear_init(k[0], 2 * ndim, 2 * ndim)
        w_rev, b_rev = _linear_init(k[1], 2 * ndim, 2 * ndim)
        bound = 1.0 / (ndim ** 0.5)
        kk = jax.random.split(k[2], 4)
        w_ih = jax.random.uniform(kk[0], (3 * ndim, 2 * ndim), jnp.float32, -bound, bound)
        w_hh = jax.random.uniform(kk[1], (3 * ndim, ndim), jnp.float32, -bound, bound)
        b_ih = jax.random.uniform(kk[2], (3 * ndim,), jnp.float32, -bound, bound)
        b_hh = jax.random.uniform(kk[3], (3 * ndim,), jnp.float32, -bound, bound)
        layers.append({"w_msg": w_msg, "b_msg": b_msg,
                       "w_rev": w_rev, "b_rev": b_rev,
                       "w_ih": w_ih, "w_hh": w_hh, "b_ih": b_ih, "b_hh": b_hh})
    params["layers"] = layers

    def ge(key):
        k_f, k_g = jax.random.split(key)
        w_f, b_f = _linear_init(k_f, ndim + 5, sdim)
        w_g, b_g = _linear_init(k_g, ndim + 5, 1)
        return {"w_f": w_f, "b_f": b_f, "w_g": w_g, "b_g": b_g}

    params["ge_mean"] = ge(keys[1 + num_layers])
    params["ge_var"] = ge(keys[2 + num_layers])
    return params


# ---------------------------------------------------------------------------
# Pure-JAX reference (scatter-based) for a cross-check
# ---------------------------------------------------------------------------

def reference_forward(edge_index, node_atts, batch, params, num_graphs):
    n_nodes = node_atts.shape[0]
    src, dst = edge_index[0], edge_index[1]
    h = params["emb"][node_atts]
    d = h.shape[1]
    for p in params["layers"]:
        h_src, h_dst = h[src], h[dst]
        m_fwd = jnp.concatenate([h_src, h_dst], axis=1)
        m_rev = jnp.concatenate([h_dst, h_src], axis=1)
        msg_f = jnp.dot(m_fwd, p["w_msg"].T, precision=PREC) + p["b_msg"]
        msg_r = jnp.dot(m_rev, p["w_rev"].T, precision=PREC) + p["b_rev"]
        aggr = (jax.ops.segment_sum(msg_f, dst, n_nodes)
                + jax.ops.segment_sum(msg_r, src, n_nodes))
        gi = jnp.dot(aggr, p["w_ih"].T, precision=PREC) + p["b_ih"]
        gh = jnp.dot(h, p["w_hh"].T, precision=PREC) + p["b_hh"]
        r = jax.nn.sigmoid(gi[:, :d] + gh[:, :d])
        z = jax.nn.sigmoid(gi[:, d:2 * d] + gh[:, d:2 * d])
        n = jnp.tanh(gi[:, 2 * d:] + r * gh[:, 2 * d:])
        h = (1.0 - z) * n + z * h

    hp = jnp.concatenate([h, jnp.zeros((n_nodes, 5), jnp.float32)], axis=1)

    def ge(p):
        h_vg = jnp.dot(hp, p["w_f"].T, precision=PREC) + p["b_f"]
        gate = jax.nn.sigmoid(jnp.dot(hp, p["w_g"].T, precision=PREC) + p["b_g"])
        return jax.ops.segment_sum(h_vg * gate, batch, num_graphs)

    return ge(params["ge_mean"]), ge(params["ge_var"])


# ---------------------------------------------------------------------------
# Main
# ---------------------------------------------------------------------------

if __name__ == "__main__":
    key = jax.random.PRNGKey(0)
    k_edge, k_atts, k_param = jax.random.split(key, 3)

    n_nodes, n_edges, num_graphs = 8, 10, 2
    ndim, sdim, num_layers = 16, 32, 2

    edge_index = jax.random.randint(k_edge, (2, n_edges), 0, n_nodes, jnp.int32)
    node_atts = jax.random.randint(k_atts, (n_nodes,), 0, 11, jnp.int32)
    batch = jnp.array([0, 0, 0, 0, 1, 1, 1, 1], jnp.int32)

    params = init_params(k_param, ndim, sdim, num_layers)

    h_g_mean, h_g_var = gnn_encoder_forward(edge_index, node_atts, batch,
                                            params, num_graphs)
    jax.block_until_ready((h_g_mean, h_g_var))

    ref_mean, ref_var = reference_forward(edge_index, node_atts, batch,
                                          params, num_graphs)
    assert h_g_mean.shape == (num_graphs, sdim)
    assert h_g_var.shape == (num_graphs, sdim)
    assert jnp.allclose(h_g_mean, ref_mean, atol=1e-3, rtol=1e-3)
    assert jnp.allclose(h_g_var, ref_var, atol=1e-3, rtol=1e-3)

    print("KERNEL_OK")
</pallas_src>

<mosaic_0001>
module attributes {stable_mosaic.version = 11 : i64} {
  func.func @gnn_layers_kernel(%arg0: i32, %arg1: i32, %arg2: memref<16x1xi32, #tpu.memory_space<vmem>>, %arg3: memref<16x1xi32, #tpu.memory_space<vmem>>, %arg4: memref<1x16xi32, #tpu.memory_space<vmem>>, %arg5: memref<1x16xi32, #tpu.memory_space<vmem>>, %arg6: memref<8x128xf32, #tpu.memory_space<vmem>>, %arg7: memref<1x128x256xf32, #tpu.memory_space<vmem>>, %arg8: memref<1x128x256xf32, #tpu.memory_space<vmem>>, %arg9: memref<1x1x256xf32, #tpu.memory_space<vmem>>, %arg10: memref<1x128x256xf32, #tpu.memory_space<vmem>>, %arg11: memref<1x128x256xf32, #tpu.memory_space<vmem>>, %arg12: memref<1x1x256xf32, #tpu.memory_space<vmem>>, %arg13: memref<1x256x384xf32, #tpu.memory_space<vmem>>, %arg14: memref<1x1x384xf32, #tpu.memory_space<vmem>>, %arg15: memref<1x128x384xf32, #tpu.memory_space<vmem>>, %arg16: memref<1x1x384xf32, #tpu.memory_space<vmem>>, %arg17: memref<8x128xf32, #tpu.memory_space<vmem>>, %arg18: memref<8x256xf32, #tpu.memory_space<vmem>>) attributes {dimension_semantics = [#tpu.dimension_semantics<arbitrary>, #tpu.dimension_semantics<arbitrary>], iteration_bounds = array<i64: 2, 1>, scalar_prefetch = 0 : i64, scratch_operands = 1 : i64, tpu.core_type = #tpu.core_type<tc>, window_params = [{transform_indices = @transform_0, window_bounds = array<i64: 16, 1>}, {transform_indices = @transform_1, window_bounds = array<i64: 16, 1>}, {transform_indices = @transform_2, window_bounds = array<i64: 1, 16>}, {transform_indices = @transform_3, window_bounds = array<i64: 1, 16>}, {pipeline_mode = #tpu.pipeline_mode<synchronous>, transform_indices = @transform_4, window_bounds = array<i64: 8, 128>}, {transform_indices = @transform_5, window_bounds = array<i64: 1, 128, 256>}, {transform_indices = @transform_6, window_bounds = array<i64: 1, 128, 256>}, {transform_indices = @transform_7, window_bounds = array<i64: 1, 1, 256>}, {transform_indices = @transform_8, window_bounds = array<i64: 1, 128, 256>}, {transform_indices = @transform_9, window_bounds = array<i64: 1, 128, 256>}, {transform_indices = @transform_10, window_bounds = array<i64: 1, 1, 256>}, {transform_indices = @transform_11, window_bounds = array<i64: 1, 256, 384>}, {transform_indices = @transform_12, window_bounds = array<i64: 1, 1, 384>}, {transform_indices = @transform_13, window_bounds = array<i64: 1, 128, 384>}, {transform_indices = @transform_14, window_bounds = array<i64: 1, 1, 384>}, {pipeline_mode = #tpu.pipeline_mode<synchronous>, transform_indices = @transform_15, window_bounds = array<i64: 8, 128>}]} {
    %c0_i32 = arith.constant 0 : i32
    %0 = arith.cmpi eq, %arg0, %c0_i32 : i32
    %c0_i32_0 = arith.constant 0 : i32
    %1 = arith.cmpi eq, %arg1, %c0_i32_0 : i32
    %2 = arith.andi %0, %1 : i1
    %3 = arith.extui %2 : i1 to i32
    %c0_i32_1 = arith.constant 0 : i32
    %4 = arith.cmpi ne, %3, %c0_i32_1 : i32
    scf.if %4 {
      %c0_44 = arith.constant 0 : index
      %c0_45 = arith.constant 0 : index
      %64 = vector.load %arg6[%c0_44, %c0_45] : memref<8x128xf32, #tpu.memory_space<vmem>>, vector<8x128xf32>
      %c0_46 = arith.constant 0 : index
      %c0_47 = arith.constant 0 : index
      %65 = vector.load %arg17[%c0_46, %c0_47] : memref<8x128xf32, #tpu.memory_space<vmem>>, vector<8x128xf32>
      tpu.vector_store %arg17[%c0_46, %c0_47], %64 {strides = array<i32>} : memref<8x128xf32, #tpu.memory_space<vmem>>, vector<8x128xf32>,
    } else {
    }
    %c0_i32_2 = arith.constant 0 : i32
    %5 = arith.cmpi eq, %arg1, %c0_i32_2 : i32
    %6 = arith.extui %5 : i1 to i32
    %c0_i32_3 = arith.constant 0 : i32
    %7 = arith.cmpi ne, %6, %c0_i32_3 : i32
    scf.if %7 {
      %cst_44 = arith.constant 0.000000e+00 : f32
      %64 = vector.broadcast %cst_44 : f32 to vector<8x256xf32>
      %c0_45 = arith.constant 0 : index
      %c0_46 = arith.constant 0 : index
      %65 = vector.load %arg18[%c0_45, %c0_46] : memref<8x256xf32, #tpu.memory_space<vmem>>, vector<8x256xf32>
      tpu.vector_store %arg18[%c0_45, %c0_46], %64 {strides = array<i32>} : memref<8x256xf32, #tpu.memory_space<vmem>>, vector<8x256xf32>,
    } else {
    }
    %c0 = arith.constant 0 : index
    %c0_4 = arith.constant 0 : index
    %8 = vector.load %arg17[%c0, %c0_4] : memref<8x128xf32, #tpu.memory_space<vmem>>, vector<8x128xf32>
    %9 = tpu.iota {dimensions = array<i32: 1>} : vector<16x8xi32>
    %c0_5 = arith.constant 0 : index
    %c0_6 = arith.constant 0 : index
    %10 = vector.load %arg2[%c0_5, %c0_6] : memref<16x1xi32, #tpu.memory_space<vmem>>, vector<16x1xi32>
    %11 = vector.broadcast %10 : vector<16x1xi32> to vector<16x8xi32>
    %12 = arith.cmpi eq, %9, %11 : vector<16x8xi32>
    %13 = arith.extui %12 : vector<16x8xi1> to vector<16x8xi32>
    %14 = arith.sitofp %13 : vector<16x8xi32> to vector<16x8xf32>
    %c0_7 = arith.constant 0 : index
    %c0_8 = arith.constant 0 : index
    %15 = vector.load %arg3[%c0_7, %c0_8] : memref<16x1xi32, #tpu.memory_space<vmem>>, vector<16x1xi32>
    %16 = vector.broadcast %15 : vector<16x1xi32> to vector<16x8xi32>
    %17 = arith.cmpi eq, %9, %16 : vector<16x8xi32>
    %18 = arith.extui %17 : vector<16x8xi1> to vector<16x8xi32>
    %19 = arith.sitofp %18 : vector<16x8xi32> to vector<16x8xf32>
    %20 = tpu.iota {dimensions = array<i32: 0>} : vector<8x16xi32>
    %c0_9 = arith.constant 0 : index
    %c0_10 = arith.constant 0 : index
    %21 = vector.load %arg4[%c0_9, %c0_10] : memref<1x16xi32, #tpu.memory_space<vmem>>, vector<1x16xi32>
    %22 = vector.broadcast %21 : vector<1x16xi32> to vector<8x16xi32>
    %23 = arith.cmpi eq, %20, %22 : vector<8x16xi32>
    %24 = arith.extui %23 : vector<8x16xi1> to vector<8x16xi32>
    %25 = arith.sitofp %24 : vector<8x16xi32> to vector<8x16xf32>
    %c0_11 = arith.constant 0 : index
    %c0_12 = arith.constant 0 : index
    %26 = vector.load %arg5[%c0_11, %c0_12] : memref<1x16xi32, #tpu.memory_space<vmem>>, vector<1x16xi32>
    %27 = vector.broadcast %26 : vector<1x16xi32> to vector<8x16xi32>
    %28 = arith.cmpi eq, %20, %27 : vector<8x16xi32>
    %29 = arith.extui %28 : vector<8x16xi1> to vector<8x16xi32>
    %30 = arith.sitofp %29 : vector<8x16xi32> to vector<8x16xf32>
    %cst = arith.constant dense<0.000000e+00> : vector<16x128xf32>
    %31 = tpu.matmul %14, %8, %cst {dimension_numbers = #tpu.dot_dimension_numbers<[1], [0], [0], [1], [0, 0, 1, 1], [], []>, precision = #tpu.contract_precision<fp32>} : vector<16x8xf32>, vector<8x128xf32>, vector<16x128xf32> -> vector<16x128xf32>
    %cst_13 = arith.constant dense<0.000000e+00> : vector<16x128xf32>
    %32 = tpu.matmul %19, %8, %cst_13 {dimension_numbers = #tpu.dot_dimension_numbers<[1], [0], [0], [1], [0, 0, 1, 1], [], []>, precision = #tpu.contract_precision<fp32>} : vector<16x8xf32>, vector<8x128xf32>, vector<16x128xf32> -> vector<16x128xf32>
    %c0_14 = arith.constant 0 : index
    %c0_15 = arith.constant 0 : index
    %c0_16 = arith.constant 0 : index
    %33 = vector.load %arg7[%c0_14, %c0_15, %c0_16] : memref<1x128x256xf32, #tpu.memory_space<vmem>>, vector<1x128x256xf32>
    %34 = vector.shape_cast %33 : vector<1x128x256xf32> to vector<128x256xf32>
    %cst_17 = arith.constant dense<0.000000e+00> : vector<16x256xf32>
    %35 = tpu.matmul %31, %34, %cst_17 {dimension_numbers = #tpu.dot_dimension_numbers<[1], [0], [0], [1], [0, 0, 1, 1], [], []>, precision = #tpu.contract_precision<fp32>} : vector<16x128xf32>, vector<128x256xf32>, vector<16x256xf32> -> vector<16x256xf32>
    %c0_18 = arith.constant 0 : index
    %c0_19 = arith.constant 0 : index
    %c0_20 = arith.constant 0 : index
    %36 = vector.load %arg8[%c0_18, %c0_19, %c0_20] : memref<1x128x256xf32, #tpu.memory_space<vmem>>, vector<1x128x256xf32>
    %37 = vector.shape_cast %36 : vector<1x128x256xf32> to vector<128x256xf32>
    %cst_21 = arith.constant dense<0.000000e+00> : vector<16x256xf32>
    %38 = tpu.matmul %32, %37, %cst_21 {dimension_numbers = #tpu.dot_dimension_numbers<[1], [0], [0], [1], [0, 0, 1, 1], [], []>, precision = #tpu.contract_precision<fp32>} : vector<16x128xf32>, vector<128x256xf32>, vector<16x256xf32> -> vector<16x256xf32>
    %39 = arith.addf %35, %38 : vector<16x256xf32>
    %c0_22 = arith.constant 0 : index
    %c0_23 = arith.constant 0 : index
    %c0_24 = arith.constant 0 : index
    %40 = vector.load %arg9[%c0_22, %c0_23, %c0_24] : memref<1x1x256xf32, #tpu.memory_space<vmem>>, vector<1x1x256xf32>
    %41 = vector.shape_cast %40 : vector<1x1x256xf32> to vector<1x256xf32>
    %42 = vector.broadcast %41 : vector<1x256xf32> to vector<16x256xf32>
    %43 = arith.addf %39, %42 : vector<16x256xf32>
    %c0_25 = arith.constant 0 : index
    %c0_26 = arith.constant 0 : index
    %c0_27 = arith.constant 0 : index
    %44 = vector.load %arg10[%c0_25, %c0_26, %c0_27] : memref<1x128x256xf32, #tpu.memory_space<vmem>>, vector<1x128x256xf32>
    %45 = vector.shape_cast %44 : vector<1x128x256xf32> to vector<128x256xf32>
    %cst_28 = arith.constant dense<0.000000e+00> : vector<16x256xf32>
    %46 = tpu.matmul %32, %45, %cst_28 {dimension_numbers = #tpu.dot_dimension_numbers<[1], [0], [0], [1], [0, 0, 1, 1], [], []>, precision = #tpu.contract_precision<fp32>} : vector<16x128xf32>, vector<128x256xf32>, vector<16x256xf32> -> vector<16x256xf32>
    %c0_29 = arith.constant 0 : index
    %c0_30 = arith.constant 0 : index
    %c0_31 = arith.constant 0 : index
    %47 = vector.load %arg11[%c0_29, %c0_30, %c0_31] : memref<1x128x256xf32, #tpu.memory_space<vmem>>, vector<1x128x256xf32>
    %48 = vector.shape_cast %47 : vector<1x128x256xf32> to vector<128x256xf32>
    %cst_32 = arith.constant dense<0.000000e+00> : vector<16x256xf32>
    %49 = tpu.matmul %31, %48, %cst_32 {dimension_numbers = #tpu.dot_dimension_numbers<[1], [0], [0], [1], [0, 0, 1, 1], [], []>, precision = #tpu.contract_precision<fp32>} : vector<16x128xf32>, vector<128x256xf32>, vector<16x256xf32> -> vector<16x256xf32>
    %50 = arith.addf %46, %49 : vector<16x256xf32>
    %c0_33 = arith.constant 0 : index
    %c0_34 = arith.constant 0 : index
    %c0_35 = arith.constant 0 : index
    %51 = vector.load %arg12[%c0_33, %c0_34, %c0_35] : memref<1x1x256xf32, #tpu.memory_space<vmem>>, vector<1x1x256xf32>
    %52 = vector.shape_cast %51 : vector<1x1x256xf32> to vector<1x256xf32>
    %53 = vector.broadcast %52 : vector<1x256xf32> to vector<16x256xf32>
    %54 = arith.addf %50, %53 : vector<16x256xf32>
    %c0_36 = arith.constant 0 : index
    %c0_37 = arith.constant 0 : index
    %55 = vector.load %arg18[%c0_36, %c0_37] : memref<8x256xf32, #tpu.memory_space<vmem>>, vector<8x256xf32>
    %cst_38 = arith.constant dense<0.000000e+00> : vector<8x256xf32>
    %56 = tpu.matmul %30, %43, %cst_38 {dimension_numbers = #tpu.dot_dimension_numbers<[1], [0], [0], [1], [0, 0, 1, 1], [], []>, precision = #tpu.contract_precision<fp32>} : vector<8x16xf32>, vector<16x256xf32>, vector<8x256xf32> -> vector<8x256xf32>
    %cst_39 = arith.constant dense<0.000000e+00> : vector<8x256xf32>
    %57 = tpu.matmul %25, %54, %cst_39 {dimension_numbers = #tpu.dot_dimension_numbers<[1], [0], [0], [1], [0, 0, 1, 1], [], []>, precision = #tpu.contract_precision<fp32>} : vector<8x16xf32>, vector<16x256xf32>, vector<8x256xf32> -> vector<8x256xf32>
    %58 = arith.addf %56, %57 : vector<8x256xf32>
    %59 = arith.addf %55, %58 : vector<8x256xf32>
    %c0_40 = arith.constant 0 : index
    %c0_41 = arith.constant 0 : index
    %60 = vector.load %arg18[%c0_40, %c0_41] : memref<8x256xf32, #tpu.memory_space<vmem>>, vector<8x256xf32>
    tpu.vector_store %arg18[%c0_40, %c0_41], %59 {strides = array<i32>} : memref<8x256xf32, #tpu.memory_space<vmem>>, vector<8x256xf32>,
    %c0_i32_42 = arith.constant 0 : i32
    %61 = arith.cmpi eq, %arg1, %c0_i32_42 : i32
    %62 = arith.extui %61 : i1 to i32
    %c0_i32_43 = arith.constant 0 : i32
    %63 = arith.cmpi ne, %62, %c0_i32_43 : i32
    scf.if %63 {
      %c0_44 = arith.constant 0 : index
      %c0_45 = arith.constant 0 : index
      %64 = vector.load %arg18[%c0_44, %c0_45] : memref<8x256xf32, #tpu.memory_space<vmem>>, vector<8x256xf32>
      %c0_46 = arith.constant 0 : index
      %c0_47 = arith.constant 0 : index
      %c0_48 = arith.constant 0 : index
      %65 = vector.load %arg13[%c0_46, %c0_47, %c0_48] : memref<1x256x384xf32, #tpu.memory_space<vmem>>, vector<1x256x384xf32>
      %66 = vector.shape_cast %65 : vector<1x256x384xf32> to vector<256x384xf32>
      %cst_49 = arith.constant dense<0.000000e+00> : vector<8x384xf32>
      %67 = tpu.matmul %64, %66, %cst_49 {dimension_numbers = #tpu.dot_dimension_numbers<[1], [0], [0], [1], [0, 0, 1, 1], [], []>, precision = #tpu.contract_precision<fp32>} : vector<8x256xf32>, vector<256x384xf32>, vector<8x384xf32> -> vector<8x384xf32>
      %c0_50 = arith.constant 0 : index
      %c0_51 = arith.constant 0 : index
      %c0_52 = arith.constant 0 : index
      %68 = vector.load %arg14[%c0_50, %c0_51, %c0_52] : memref<1x1x384xf32, #tpu.memory_space<vmem>>, vector<1x1x384xf32>
      %69 = vector.shape_cast %68 : vector<1x1x384xf32> to vector<1x384xf32>
      %70 = vector.broadcast %69 : vector<1x384xf32> to vector<8x384xf32>
      %71 = arith.addf %67, %70 : vector<8x384xf32>
      %c0_53 = arith.constant 0 : index
      %c0_54 = arith.constant 0 : index
      %c0_55 = arith.constant 0 : index
      %72 = vector.load %arg15[%c0_53, %c0_54, %c0_55] : memref<1x128x384xf32, #tpu.memory_space<vmem>>, vector<1x128x384xf32>
      %73 = vector.shape_cast %72 : vector<1x128x384xf32> to vector<128x384xf32>
      %cst_56 = arith.constant dense<0.000000e+00> : vector<8x384xf32>
      %74 = tpu.matmul %8, %73, %cst_56 {dimension_numbers = #tpu.dot_dimension_numbers<[1], [0], [0], [1], [0, 0, 1, 1], [], []>, precision = #tpu.contract_precision<fp32>} : vector<8x128xf32>, vector<128x384xf32>, vector<8x384xf32> -> vector<8x384xf32>
      %c0_57 = arith.constant 0 : index
      %c0_58 = arith.constant 0 : index
      %c0_59 = arith.constant 0 : index
      %75 = vector.load %arg16[%c0_57, %c0_58, %c0_59] : memref<1x1x384xf32, #tpu.memory_space<vmem>>, vector<1x1x384xf32>
      %76 = vector.shape_cast %75 : vector<1x1x384xf32> to vector<1x384xf32>
      %77 = vector.broadcast %76 : vector<1x384xf32> to vector<8x384xf32>
      %78 = arith.addf %74, %77 : vector<8x384xf32>
      %79 = vector.extract_strided_slice %71 {offsets = [0, 0], sizes = [8, 128], strides = [1, 1]} : vector<8x384xf32> to vector<8x128xf32>
      %80 = vector.extract_strided_slice %78 {offsets = [0, 0], sizes = [8, 128], strides = [1, 1]} : vector<8x384xf32> to vector<8x128xf32>
      %81 = arith.addf %79, %80 : vector<8x128xf32>
      %82 = arith.negf %81 : vector<8x128xf32>
      %83 = math.exp %82 : vector<8x128xf32>
      %cst_60 = arith.constant 1.000000e+00 : f32
      %84 = vector.broadcast %cst_60 : f32 to vector<8x128xf32>
      %85 = arith.addf %84, %83 : vector<8x128xf32>
      %86 = arith.divf %84, %85 : vector<8x128xf32>
      %87 = vector.extract_strided_slice %71 {offsets = [0, 128], sizes = [8, 128], strides = [1, 1]} : vector<8x384xf32> to vector<8x128xf32>
      %88 = vector.extract_strided_slice %78 {offsets = [0, 128], sizes = [8, 128], strides = [1, 1]} : vector<8x384xf32> to vector<8x128xf32>
      %89 = arith.addf %87, %88 : vector<8x128xf32>
      %90 = arith.negf %89 : vector<8x128xf32>
      %91 = math.exp %90 : vector<8x128xf32>
      %cst_61 = arith.constant 1.000000e+00 : f32
      %92 = vector.broadcast %cst_61 : f32 to vector<8x128xf32>
      %93 = arith.addf %92, %91 : vector<8x128xf32>
      %94 = arith.divf %92, %93 : vector<8x128xf32>
      %95 = vector.extract_strided_slice %71 {offsets = [0, 256], sizes = [8, 128], strides = [1, 1]} : vector<8x384xf32> to vector<8x128xf32>
      %96 = vector.extract_strided_slice %78 {offsets = [0, 256], sizes = [8, 128], strides = [1, 1]} : vector<8x384xf32> to vector<8x128xf32>
      %97 = arith.mulf %86, %96 : vector<8x128xf32>
      %98 = arith.addf %95, %97 : vector<8x128xf32>
      %99 = math.tanh %98 : vector<8x128xf32>
      %cst_62 = arith.constant 1.000000e+00 : f32
      %100 = vector.broadcast %cst_62 : f32 to vector<8x128xf32>
      %101 = arith.subf %100, %94 : vector<8x128xf32>
      %102 = arith.mulf %101, %99 : vector<8x128xf32>
      %103 = arith.mulf %94, %8 : vector<8x128xf32>
      %104 = arith.addf %102, %103 : vector<8x128xf32>
      %c0_63 = arith.constant 0 : index
      %c0_64 = arith.constant 0 : index
      %105 = vector.load %arg17[%c0_63, %c0_64] : memref<8x128xf32, #tpu.memory_space<vmem>>, vector<8x128xf32>
      tpu.vector_store %arg17[%c0_63, %c0_64], %104 {strides = array<i32>} : memref<8x128xf32, #tpu.memory_space<vmem>>, vector<8x128xf32>,
    } else {
    }
    return
  }
  func.func @transform_0(%arg0: i32, %arg1: i32) -> (i32, i32) {
    %c0_i32 = arith.constant 0 : i32
    %c0_i32_0 = arith.constant 0 : i32
    return %arg1, %c0_i32 : i32, i32
  }
  func.func @transform_1(%arg0: i32, %arg1: i32) -> (i32, i32) {
    %c0_i32 = arith.constant 0 : i32
    %c0_i32_0 = arith.constant 0 : i32
    return %arg1, %c0_i32 : i32, i32
  }
  func.func @transform_2(%arg0: i32, %arg1: i32) -> (i32, i32) {
    %c0_i32 = arith.constant 0 : i32
    %c0_i32_0 = arith.constant 0 : i32
    return %c0_i32, %arg1 : i32, i32
  }
  func.func @transform_3(%arg0: i32, %arg1: i32) -> (i32, i32) {
    %c0_i32 = arith.constant 0 : i32
    %c0_i32_0 = arith.constant 0 : i32
    return %c0_i32, %arg1 : i32, i32
  }
  func.func @transform_4(%arg0: i32, %arg1: i32) -> (i32, i32) {
    %c0_i32 = arith.constant 0 : i32
    %c0_i32_0 = arith.constant 0 : i32
    %c0_i32_1 = arith.constant 0 : i32
    return %c0_i32, %c0_i32_0 : i32, i32
  }
  func.func @transform_5(%arg0: i32, %arg1: i32) -> (i32, i32, i32) {
    %c0_i32 = arith.constant 0 : i32
    %c0_i32_0 = arith.constant 0 : i32
    %c0_i32_1 = arith.constant 0 : i32
    return %arg0, %c0_i32, %c0_i32_0 : i32, i32, i32
  }
  func.func @transform_6(%arg0: i32, %arg1: i32) -> (i32, i32, i32) {
    %c0_i32 = arith.constant 0 : i32
    %c0_i32_0 = arith.constant 0 : i32
    %c0_i32_1 = arith.constant 0 : i32
    return %arg0, %c0_i32, %c0_i32_0 : i32, i32, i32
  }
  func.func @transform_7(%arg0: i32, %arg1: i32) -> (i32, i32, i32) {
    %c0_i32 = arith.constant 0 : i32
    %c0_i32_0 = arith.constant 0 : i32
    %c0_i32_1 = arith.constant 0 : i32
    return %arg0, %c0_i32, %c0_i32_0 : i32, i32, i32
  }
  func.func @transform_8(%arg0: i32, %arg1: i32) -> (i32, i32, i32) {
    %c0_i32 = arith.constant 0 : i32
    %c0_i32_0 = arith.constant 0 : i32
    %c0_i32_1 = arith.constant 0 : i32
    return %arg0, %c0_i32, %c0_i32_0 : i32, i32, i32
  }
  func.func @transform_9(%arg0: i32, %arg1: i32) -> (i32, i32, i32) {
    %c0_i32 = arith.constant 0 : i32
    %c0_i32_0 = arith.constant 0 : i32
    %c0_i32_1 = arith.constant 0 : i32
    return %arg0, %c0_i32, %c0_i32_0 : i32, i32, i32
  }
  func.func @transform_10(%arg0: i32, %arg1: i32) -> (i32, i32, i32) {
    %c0_i32 = arith.constant 0 : i32
    %c0_i32_0 = arith.constant 0 : i32
    %c0_i32_1 = arith.constant 0 : i32
    return %arg0, %c0_i32, %c0_i32_0 : i32, i32, i32
  }
  func.func @transform_11(%arg0: i32, %arg1: i32) -> (i32, i32, i32) {
    %c0_i32 = arith.constant 0 : i32
    %c0_i32_0 = arith.constant 0 : i32
    %c0_i32_1 = arith.constant 0 : i32
    return %arg0, %c0_i32, %c0_i32_0 : i32, i32, i32
  }
  func.func @transform_12(%arg0: i32, %arg1: i32) -> (i32, i32, i32) {
    %c0_i32 = arith.constant 0 : i32
    %c0_i32_0 = arith.constant 0 : i32
    %c0_i32_1 = arith.constant 0 : i32
    return %arg0, %c0_i32, %c0_i32_0 : i32, i32, i32
  }
  func.func @transform_13(%arg0: i32, %arg1: i32) -> (i32, i32, i32) {
    %c0_i32 = arith.constant 0 : i32
    %c0_i32_0 = arith.constant 0 : i32
    %c0_i32_1 = arith.constant 0 : i32
    return %arg0, %c0_i32, %c0_i32_0 : i32, i32, i32
  }
  func.func @transform_14(%arg0: i32, %arg1: i32) -> (i32, i32, i32) {
    %c0_i32 = arith.constant 0 : i32
    %c0_i32_0 = arith.constant 0 : i32
    %c0_i32_1 = arith.constant 0 : i32
    return %arg0, %c0_i32, %c0_i32_0 : i32, i32, i32
  }
  func.func @transform_15(%arg0: i32, %arg1: i32) -> (i32, i32) {
    %c0_i32 = arith.constant 0 : i32
    %c0_i32_0 = arith.constant 0 : i32
    %c0_i32_1 = arith.constant 0 : i32
    return %c0_i32, %c0_i32_0 : i32, i32
  }
}

</mosaic_0001>

<bundles_post_ra>
// kernel: tpu_custom_call.1
= control target key start
LH: loop header
LB: loop body
LE: loop exit
PB: predicated region body
PF: predicated region fallthrough
CT: control target
= control target key end

     0   :  { %s19197_s0 = inlined_call_operand.vmem [shape: s32[16,1], index: 0, kind: input, shape index: {}]   ;;  %s19198_s1 = inlined_call_operand.vmem [shape: s32[16,1], index: 1, kind: input, shape index: {}]   ;;  %s19199_s2 = inlined_call_operand.vmem [shape: s32[1,16], index: 2, kind: input, shape index: {}]   ;;  %s19200_s3 = inlined_call_operand.vmem [shape: s32[1,16], index: 3, kind: input, shape index: {}]   ;;  %s19201_s4 = inlined_call_operand.vmem [shape: f32[8,128], index: 4, kind: input, shape index: {}]   ;;  %s19202_s5 = inlined_call_operand.hbm [shape: f32[2,128,256], index: 5, kind: input, shape index: {}]   ;;  %s19203_s6 = inlined_call_operand.hbm [shape: f32[2,128,256], index: 6, kind: input, shape index: {}]   ;;  %s19204_s7 = inlined_call_operand.vmem [shape: f32[2,1,256], index: 7, kind: input, shape index: {}]   ;;  %s19205_s8 = inlined_call_operand.hbm [shape: f32[2,128,256], index: 8, kind: input, shape index: {}]   ;;  %s19206_s9 = inlined_call_operand.hbm [shape: f32[2,128,256], index: 9, kind: input, shape index: {}]   ;;  %s19207_s10 = inlined_call_operand.vmem [shape: f32[2,1,256], index: 10, kind: input, shape index: {}]   ;;  %s19208_s11 = inlined_call_operand.hbm [shape: f32[2,256,384], index: 11, kind: input, shape index: {}]   ;;  %s19209_s12 = inlined_call_operand.vmem [shape: f32[2,1,384], index: 12, kind: input, shape index: {}]   ;;  %s19210_s13 = inlined_call_operand.hbm [shape: f32[2,128,384], index: 13, kind: input, shape index: {}]   ;;  %s19211_s14 = inlined_call_operand.vmem [shape: f32[2,1,384], index: 14, kind: input, shape index: {}]   ;;  %s19212_s15 = inlined_call_operand.hbm [shape: f32[8,128], index: 15, kind: output, shape index: {}]  }
   0x1   :  { %20086 = sst [smem:[#allocation152_spill]] %s19197_s0 }
   0x2   :  { %20087 = sst [smem:[#allocation153_spill]] %s19198_s1 }
   0x3   :  { %20088 = sst [smem:[#allocation154_spill]] %s19199_s2 }
   0x4   :  { %20089 = sst [smem:[#allocation155_spill]] %s19200_s3 }
   0x5   :  { %20090 = sst [smem:[#allocation156_spill]] %s19201_s4 }
   0x6   :  { %20091 = sst [smem:[#allocation157_spill]] %s19202_s5 }
   0x7   :  { %20092 = sst [smem:[#allocation158_spill]] %s19203_s6 }
   0x8   :  { %20093 = sst [smem:[#allocation159_spill]] %s19204_s7 }
   0x9   :  { %20094 = sst [smem:[#allocation160_spill]] %s19206_s9 }
   0xa   :  { %20095 = sst [smem:[#allocation161_spill]] %s19207_s10 }
   0xb   :  { %20096 = sst [smem:[#allocation162_spill]] %s19209_s12 }
   0xc   :  { %20097 = sst [smem:[#allocation163_spill]] %s19211_s14 }
   0xd   :  { %20098 = sst [smem:[#allocation164_spill]] %s19212_s15 }
   0xe   :  { %20 = vsyncpa [#allocation4], 0 }
   0xf   :  { %22 = vsyncpa [#allocation4 + $0x1], 0 }
  0x10   :  { %23 = vsyncpa [#allocation7], 0 }
  0x11   :  { %25 = vsyncpa [#allocation7 + $0x1], 0 }
  0x12   :  { %26 = vsyncpa [#allocation10], 0 }
  0x13   :  { %28 = vsyncpa [#allocation10 + $0x1], 0 }
  0x14   :  { %29 = vsyncpa [#allocation13], 0 }
  0x15   :  { %31 = vsyncpa [#allocation13 + $0x1], 0 }
  0x16   :  { %32 = vsyncpa [#allocation5], 0  ;;  %s13858_s18 = smov 0   ;;  %s13860_s19 = smov 0  }
  0x17   :  { %s13862_s20 = smov 0   ;;  %s13864_s21 = smov 0  }
  0x18   :  { %s13866_s22 = smov 0   ;;  %s13868_s23 = smov 0  }
  0x19 LB: > { %20099 = sst [smem:[#allocation20_spill]] %s13749_s20  ;;  %s13887_s24 = sadd.s32 4294967295, %s13761_s23   ;;  %s13761_s23 = sphi %s13868_s23, %s38_s23   ;;  %s13757_s22 = sphi %s13866_s22, %s21614_s22   ;;  %s13753_s21 = sphi %s13864_s21, %s21613_s21   ;;  %s13749_s20 = sphi %s13862_s20, %s21609_s20   ;;  %s13745_s19 = sphi %s13860_s19, %s21612_s19   ;;  %s13741_s18 = sphi %s13858_s18, %s21611_s18  }
  0x1a   : > { %20100 = sst [smem:[#allocation21_spill]] %s13753_s21  ;;  %s50_s25 = sadd.s32 1, %s13757_s22 }
  0x1b   : > { %20101 = sst [smem:[#allocation22_spill]] %s13761_s23  ;;  %p52_p0 = scmp.ge.s32.totalorder %s50_s25, 2 }
  0x1c   : > { %s182_s26 = sadd.s32 1, %s13749_s20  ;;  %p189_p1 = scmp.ne.s32.totalorder %s13749_s20, %s13745_s19 }
  0x1d   : > { %p190_p2 = scmp.eq.s32.totalorder %s13761_s23, 0  ;;  %s21616_s25 = smov (%p52_p0, %s50_s25), 0 }
  0x1e   : > { %20102 = sst [smem:[#allocation23_spill]] %s21616_s25  ;;  %p195_p4 = scmp.ne.s32.totalorder %s13745_s19, %s13741_s18 }
  0x1f   : > { %p191_p3 = por %p190_p2, %p189_p1  ;;  %s179_s27 = ssub.s32 %s13757_s22, %s21616_s25 }
  0x20   : > { %p196_p5 = scmp.eq.s32.totalorder %s13887_s24, 0  ;;  %p180_p6 = scmp.eq.s32.totalorder %s179_s27, 0 }
  0x21   : > { %p13416_p8 = scmp.lt.s32.totalorder %s13761_s23, 2  ;;  %s13909_s30 = sand.u32 1, %s13749_s20  }
  0x22   : > { %p13900_p7 = por %p196_p5, %p195_p4  ;;  %s13912_s16 = sshll.u32 %s13757_s22, 12 }
  0x23   : > { %s13906_s29 = scalar_select %p180_p6, %s13749_s20, %s182_s26  }
  0x24   : > { %s20103_s28 = scalar_select %p13900_p7, 1, 0 }
  0x25   : > { %20104 = sst [smem:[#allocation24_spill]] %s13906_s29  ;;  %s13915_s17 = sshll.u32 %s13909_s30, 8 }
  0x26   : > { %p13917_p9 = pnand %p13416_p8, %p191_p3  ;;  %s19218_s27 = sand.u32 1, %s13761_s23  }
  0x27   : > { %s20106_s6 = sld [smem:[#allocation158_spill]]  ;;  %s532_s29 = scalar_lea.vmem [#allocation6], %s13915_s17 }
  0x28   : > { %s539_s20 = sshll.u32 %s532_s29, 4  ;;  %s13934_s3 = scalar_lea.sflag [#allocation7], %s19218_s27  ;;  %s13929_s20 = int_to_ptr.vmem [resolvable:$true] %s539_s20 }
  0x29   : > { %p13940_p12 = pneg %p13917_p9 }
  0x2d   : > { %s13926_s26 = scalar_lea.hbm %s20106_s6, %s13912_s16  ;;  %s13494_s29 = scalar_lea.hbm %s20106_s6, 8192 }
  0x2e   : > { %s13489_s2 = scalar_lea.hbm %s13926_s26, 4096  ;;  %p13495_p1 = scmp.lt.u32.totalorder %s13926_s26, %s20106_s6 }
  0x2f   : > { %p13490_p11 = scmp.ne.s32.totalorder %s13926_s26, %s13489_s2  ;;  %p13496_p2 = scmp.lt.u32.totalorder %s13494_s29, %s13489_s2 }
  0x30   : > { %p13498_p4 = scmp.lt.u32.totalorder %s13489_s2, %s13926_s26 }
  0x31   : > { %p13492_p13 = pnand %p13940_p12, %p13490_p11  ;;  %p13497_p3 = por %p13496_p2, %p13495_p1 }
  0x33   : > { %p13493_p0 = pneg %p13492_p13  ;;  %p13499_p5 = por %p13498_p4, %p13497_p3 }
  0x35   : > { %p13500_p6 = pnand %p13499_p5, %p13493_p0 }
  0x37   : > { %13503 = shalt.err (!%p13500_p6)
}
  0x38   : > { %s13504_s27 = scalar_lea.vmem %s13929_s20, 4096  ;;  %s13763_s15 = smov [#allocation6]  }
  0x39   : > { %p13505_p8 = scmp.ne.s32.totalorder %s13929_s20, %s13504_s27  ;;  %s13509_s25 = sshll.u32 %s13763_s15, 4  ;;  %s13510_s25 = int_to_ptr.vmem [resolvable:$false] %s13509_s25 }
  0x3a   : > { %s13511_s0 = scalar_lea.vmem %s13510_s25, 8192  ;;  %p13512_p10 = scmp.lt.s32.totalorder %s13929_s20, %s13510_s25 }
  0x3b   : > { %p13507_p11 = pnand %p13505_p8, %p13940_p12  ;;  %p13513_p7 = scmp.lt.s32.totalorder %s13511_s0, %s13504_s27 }
  0x3d   : > { %p13508_p13 = pneg %p13507_p11  ;;  %p13514_p1 = por %p13513_p7, %p13512_p10 }
  0x3f   : > { %p13515_p2 = pnand %p13514_p1, %p13508_p13 }
  0x41   : > { %13518 = shalt.err (!%p13515_p2)
}
  0x42   : > { %s19220_s2 = smov 256   ;;  %s19222_s4 = smov 16  }
  0x43   : > { %13403 = dma.hbm_to_vmem [thread:$0]  (!%p13917_p9), %s13926_s26, 4096, %s13929_s20, %s13934_s3, %s19220_s2, %s19220_s2, %s19222_s4  }
  0x44   : > { %p659_p7 = scmp.lt.s32.totalorder %s13761_s23, 3  ;;  %s20108_s9 = sld [smem:[#allocation160_spill]] }
  0x45   : > { %p20109_p10 = scmp.ge.s32.totalorder %s13761_s23, 1  ;;  %s581_s0 = scalar_lea.vmem [#allocation9], %s13915_s17 }
  0x46   : > { %s588_s6 = sshll.u32 %s581_s0, 4  ;;  %s20111_s20 = sand.u32 1, %s13761_s23   ;;  %s13981_s6 = int_to_ptr.vmem [resolvable:$true] %s588_s6 }
  0x47   : > { %p13976_p0 = pnand %p20109_p10, %p659_p7  ;;  %s13985_s26 = scalar_lea.sflag [#allocation10], %s20111_s20 }
  0x49   : > { %s20110_s25 = scalar_select %p13976_p0, 1, 0 }
  0x4a   : > { %s13972_s15 = scalar_lea.hbm %s20108_s9, %s13912_s16  ;;  %s13524_s4 = scalar_lea.hbm %s20108_s9, 8192 }
  0x4b   : > { %s13519_s2 = scalar_lea.hbm %s13972_s15, 4096  ;;  %p13525_p6 = scmp.lt.u32.totalorder %s13972_s15, %s20108_s9 }
  0x4c   : > { %p13520_p3 = scmp.ne.s32.totalorder %s13972_s15, %s13519_s2  ;;  %p13526_p8 = scmp.lt.u32.totalorder %s13524_s4, %s13519_s2 }
  0x4d   : > { %p13528_p13 = scmp.lt.u32.totalorder %s13519_s2, %s13972_s15 }
  0x4e   : > { %p13522_p4 = pnand %p13520_p3, %p13940_p12  ;;  %p13527_p11 = por %p13526_p8, %p13525_p6 }
  0x50   : > { %p13523_p5 = pneg %p13522_p4  ;;  %p13529_p1 = por %p13528_p13, %p13527_p11 }
  0x52   : > { %p13530_p2 = pnand %p13529_p1, %p13523_p5 }
  0x54   : > { %13533 = shalt.err (!%p13530_p2)
}
  0x55   : > { %s13534_s0 = scalar_lea.vmem %s13981_s6, 4096  ;;  %s13766_s20 = smov [#allocation9]  }
  0x56   : > { %p13535_p7 = scmp.ne.s32.totalorder %s13981_s6, %s13534_s0  ;;  %s13539_s27 = sshll.u32 %s13766_s20, 4  ;;  %s13540_s27 = int_to_ptr.vmem [resolvable:$false] %s13539_s27 }
  0x57   : > { %s13541_s12 = scalar_lea.vmem %s13540_s27, 8192  ;;  %p13542_p4 = scmp.lt.s32.totalorder %s13981_s6, %s13540_s27 }
  0x58   : > { %p13537_p10 = pnand %p13535_p7, %p13940_p12  ;;  %p13543_p0 = scmp.lt.s32.totalorder %s13541_s12, %s13534_s0 }
  0x5a   : > { %p13538_p3 = pneg %p13537_p10  ;;  %p13544_p6 = por %p13543_p0, %p13542_p4 }
  0x5c   : > { %p13545_p8 = pnand %p13544_p6, %p13538_p3 }
  0x5e   : > { %13548 = shalt.err (!%p13545_p8)
}
  0x5f   : > { %s20112_s14 = smov 16   ;;  %s20113_s2 = smov 256  }
  0x60   : > { %13409 = dma.hbm_to_vmem [thread:$0]  (!%p13917_p9), %s13972_s15, 4096, %s13981_s6, %s13985_s26, %s20113_s2, %s20113_s2, %s20112_s14  }
  0x61   : > { %s20114_s5 = sld [smem:[#allocation157_spill]]  ;;  %s511_s20 = scalar_lea.vmem [#allocation3], %s13915_s17 }
  0x62   : > { %s518_s27 = sshll.u32 %s511_s20, 4  ;;  %s14025_s23 = scalar_lea.hbm %s19205_s8, %s13912_s16  ;;  %s14019_s27 = int_to_ptr.vmem [resolvable:$true] %s518_s27 }
  0x63   : > { %s508_s10 = scalar_lea.sflag [#allocation4], %s13909_s30 }
  0x67   : > { %s14016_s0 = scalar_lea.hbm %s20114_s5, %s13912_s16  ;;  %s13554_s29 = scalar_lea.hbm %s20114_s5, 8192 }
  0x68   : > { %s13549_s6 = scalar_lea.hbm %s14016_s0, 4096  ;;  %p13555_p13 = scmp.lt.u32.totalorder %s14016_s0, %s20114_s5 }
  0x69   : > { %p13550_p0 = scmp.ne.s32.totalorder %s14016_s0, %s13549_s6  ;;  %p13556_p1 = scmp.lt.u32.totalorder %s13554_s29, %s13549_s6 }
  0x6a   : > { %p13558_p7 = scmp.lt.u32.totalorder %s13549_s6, %s14016_s0 }
  0x6b   : > { %p13552_p5 = pnand %p13550_p0, %p13940_p12  ;;  %p13557_p2 = por %p13556_p1, %p13555_p13 }
  0x6d   : > { %p13553_p11 = pneg %p13552_p5  ;;  %p13559_p10 = por %p13558_p7, %p13557_p2 }
  0x6f   : > { %p13560_p3 = pnand %p13559_p10, %p13553_p11 }
  0x71   : > { %13563 = shalt.err (!%p13560_p3)
}
  0x72   : > { %s13564_s9 = scalar_lea.vmem %s14019_s27, 4096  ;;  %s13767_s16 = smov [#allocation3]  }
  0x73   : > { %p13565_p4 = scmp.ne.s32.totalorder %s14019_s27, %s13564_s9  ;;  %s13569_s20 = sshll.u32 %s13767_s16, 4  ;;  %s13570_s20 = int_to_ptr.vmem [resolvable:$false] %s13569_s20 }
  0x74   : > { %s13571_s7 = scalar_lea.vmem %s13570_s20, 8192  ;;  %p13572_p0 = scmp.lt.s32.totalorder %s14019_s27, %s13570_s20 }
  0x75   : > { %p13567_p6 = pnand %p13565_p4, %p13940_p12  ;;  %p13573_p5 = scmp.lt.s32.totalorder %s13571_s7, %s13564_s9 }
  0x77   : > { %p13568_p8 = pneg %p13567_p6  ;;  %p13574_p13 = por %p13573_p5, %p13572_p0 }
  0x79   : > { %p13575_p1 = pnand %p13574_p13, %p13568_p8 }
  0x7b   : > { %13578 = shalt.err (!%p13575_p1)
}
  0x7c   : > { %13400 = dma.hbm_to_vmem [thread:$0]  (!%p13917_p9), %s14016_s0, 4096, %s14019_s27, %s508_s10, %s20113_s2, %s20113_s2, %s20112_s14  }
  0x7d   : > { %s560_s21 = scalar_lea.vmem [#allocation8], %s13915_s17  ;;  %s13374_s6 = smul.u32 768, %s13909_s30 }
  0x7e   : > { %s567_s12 = sshll.u32 %s560_s21, 4  ;;  %s13375_s15 = smul.u32 12288, %s13757_s22  ;;  %s14056_s12 = int_to_ptr.vmem [resolvable:$true] %s567_s12 }
  0x7f   : > { %s13579_s4 = scalar_lea.hbm %s14025_s23, 4096  ;;  %s13584_s16 = scalar_lea.hbm %s19205_s8, 8192 }
  0x80   : > { %p13580_p11 = scmp.ne.s32.totalorder %s14025_s23, %s13579_s4  ;;  %p13585_p10 = scmp.lt.u32.totalorder %s14025_s23, %s19205_s8 }
  0x81   : > { %p13586_p3 = scmp.lt.u32.totalorder %s13584_s16, %s13579_s4  ;;  %p13588_p6 = scmp.lt.u32.totalorder %s13579_s4, %s14025_s23 }
  0x82   : > { %p13582_p2 = pnand %p13580_p11, %p13940_p12 }
  0x83   : > { %p13587_p4 = por %p13586_p3, %p13585_p10 }
  0x84   : > { %p13583_p7 = pneg %p13582_p2 }
  0x85   : > { %p13589_p8 = por %p13588_p6, %p13587_p4 }
  0x87   : > { %p13590_p0 = pnand %p13589_p8, %p13583_p7 }
  0x89   : > { %13593 = shalt.err (!%p13590_p0)
}
  0x8a   : > { %s13594_s10 = scalar_lea.vmem %s14056_s12, 4096  ;;  %s13768_s17 = smov [#allocation8]  }
  0x8b   : > { %p13595_p5 = scmp.ne.s32.totalorder %s14056_s12, %s13594_s10  ;;  %s13599_s0 = sshll.u32 %s13768_s17, 4  ;;  %s13600_s0 = int_to_ptr.vmem [resolvable:$false] %s13599_s0 }
  0x8c   : > { %s13601_s27 = scalar_lea.vmem %s13600_s0, 8192  ;;  %p13602_p11 = scmp.lt.s32.totalorder %s14056_s12, %s13600_s0 }
  0x8d   : > { %p13597_p13 = pnand %p13595_p5, %p13940_p12  ;;  %p13603_p2 = scmp.lt.s32.totalorder %s13601_s27, %s13594_s10 }
  0x8f   : > { %p13598_p1 = pneg %p13597_p13  ;;  %p13604_p10 = por %p13603_p2, %p13602_p11 }
  0x91   : > { %p13605_p3 = pnand %p13604_p10, %p13598_p1 }
  0x93   : > { %13608 = shalt.err (!%p13605_p3)
}
  0x94   : > { %13406 = dma.hbm_to_vmem [thread:$0]  (!%p13917_p9), %s14025_s23, 4096, %s14056_s12, %s13934_s3, %s20113_s2, %s20113_s2, %s20112_s14  }
  0x95   : > { %s14089_s29 = scalar_lea.hbm %s19208_s11, %s13375_s15  ;;  %s609_s9 = scalar_lea.vmem [#allocation11], %s13374_s6 }
  0x96   : > { %s616_s16 = sshll.u32 %s609_s9, 4  ;;  %s13609_s20 = scalar_lea.hbm %s14089_s29, 12288  ;;  %s14093_s16 = int_to_ptr.vmem [resolvable:$true] %s616_s16 }
  0x97   : > { %p13610_p7 = scmp.ne.s32.totalorder %s14089_s29, %s13609_s20  ;;  %s13614_s14 = scalar_lea.hbm %s19208_s11, 24576 }
  0x98   : > { %p13615_p8 = scmp.lt.u32.totalorder %s14089_s29, %s19208_s11  ;;  %p13616_p0 = scmp.lt.u32.totalorder %s13614_s14, %s13609_s20 }
  0x99   : > { %p13612_p4 = pnand %p13610_p7, %p13940_p12  ;;  %p13618_p13 = scmp.lt.u32.totalorder %s13609_s20, %s14089_s29 }
  0x9a   : > { %p13617_p5 = por %p13616_p0, %p13615_p8 }
  0x9b   : > { %p13613_p6 = pneg %p13612_p4 }
  0x9c   : > { %p13619_p1 = por %p13618_p13, %p13617_p5 }
  0x9e   : > { %p13620_p11 = pnand %p13619_p1, %p13613_p6 }
  0xa0   : > { %13623 = shalt.err (!%p13620_p11)
}
  0xa1   : > { %s13624_s6 = scalar_lea.vmem %s14093_s16, 12288  ;;  %s13769_s15 = smov [#allocation11]  }
  0xa2   : > { %p13625_p2 = scmp.ne.s32.totalorder %s14093_s16, %s13624_s6  ;;  %s13629_s7 = sshll.u32 %s13769_s15, 4  ;;  %s13630_s7 = int_to_ptr.vmem [resolvable:$false] %s13629_s7 }
  0xa3   : > { %s13631_s10 = scalar_lea.vmem %s13630_s7, 24576  ;;  %p13632_p7 = scmp.lt.s32.totalorder %s14093_s16, %s13630_s7 }
  0xa4   : > { %p13627_p10 = pnand %p13625_p2, %p13940_p12  ;;  %p13633_p4 = scmp.lt.s32.totalorder %s13631_s10, %s13624_s6 }
  0xa6   : > { %p13628_p3 = pneg %p13627_p10  ;;  %p13634_p8 = por %p13633_p4, %p13632_p7 }
  0xa8   : > { %p13635_p0 = pnand %p13634_p8, %p13628_p3 }
  0xaa   : > { %13638 = shalt.err (!%p13635_p0)
}
  0xab   : > { %s13770_s17 = smov 384   ;;  %s13771_s0 = smov 24  }
  0xac   : > { %13412 = dma.hbm_to_vmem [thread:$0]  (!%p13917_p9), %s14089_s29, 12288, %s14093_s16, %s13985_s26, %s13770_s17, %s13770_s17, %s13771_s0  }
  0xad   : > { %s13376_s27 = smul.u32 384, %s13909_s30  ;;  %s634_s14 = scalar_lea.sflag [#allocation13], %s13909_s30 }
  0xae   : > { %s13377_s21 = smul.u32 6144, %s13757_s22  ;;  %s13644_s16 = scalar_lea.hbm %s19210_s13, 12288 }
  0xaf   : > { %s637_s3 = scalar_lea.vmem [#allocation12], %s13376_s27 }
  0xb0   : > { %s14125_s20 = scalar_lea.hbm %s19210_s13, %s13377_s21  ;;  %s644_s23 = sshll.u32 %s637_s3, 4  ;;  %s14127_s23 = int_to_ptr.vmem [resolvable:$true] %s644_s23 }
  0xb1   : > { %s13639_s2 = scalar_lea.hbm %s14125_s20, 6144  ;;  %p13645_p1 = scmp.lt.u32.totalorder %s14125_s20, %s19210_s13 }
  0xb2   : > { %p13640_p6 = scmp.ne.s32.totalorder %s14125_s20, %s13639_s2  ;;  %p13646_p11 = scmp.lt.u32.totalorder %s13644_s16, %s13639_s2 }
  0xb3   : > { %p13648_p10 = scmp.lt.u32.totalorder %s13639_s2, %s14125_s20 }
  0xb4   : > { %p13642_p5 = pnand %p13640_p6, %p13940_p12  ;;  %p13647_p2 = por %p13646_p11, %p13645_p1 }
  0xb6   : > { %p13643_p13 = pneg %p13642_p5  ;;  %p13649_p3 = por %p13648_p10, %p13647_p2 }
  0xb8   : > { %p13650_p7 = pnand %p13649_p3, %p13643_p13 }
  0xba   : > { %13653 = shalt.err (!%p13650_p7)
}
  0xbb   : > { %s13654_s15 = scalar_lea.vmem %s14127_s23, 6144  ;;  %s13772_s7 = smov [#allocation12]  }
  0xbc   : > { %p13655_p4 = scmp.ne.s32.totalorder %s14127_s23, %s13654_s15  ;;  %s13659_s10 = sshll.u32 %s13772_s7, 4  ;;  %s13660_s10 = int_to_ptr.vmem [resolvable:$false] %s13659_s10 }
  0xbd   : > { %s13661_s27 = scalar_lea.vmem %s13660_s10, 12288  ;;  %p13662_p6 = scmp.lt.s32.totalorder %s14127_s23, %s13660_s10 }
  0xbe   : > { %p13657_p8 = pnand %p13655_p4, %p13940_p12  ;;  %p13663_p5 = scmp.lt.s32.totalorder %s13661_s27, %s13654_s15 }
  0xc0   : > { %p13658_p0 = pneg %p13657_p8  ;;  %p13664_p1 = por %p13663_p5, %p13662_p6 }
  0xc2   : > { %p13665_p11 = pnand %p13664_p1, %p13658_p0 }
  0xc4   : > { %13668 = shalt.err (!%p13665_p11)
}
  0xc5   : > { %13415 = dma.hbm_to_vmem [thread:$0]  (!%p13917_p9), %s14125_s20, 6144, %s14127_s23, %s634_s14, %s13770_s17, %s13770_s17, %s13771_s0  }
  0xc6   : > { %p20115_p12 = scmp.ne.s32.totalorder %s20110_s25, 0 }
  0xc8   : > { %663 = sbr.rel (%p20115_p12) target bundleno = 2267 (0x8db), region = 80 }
  0xcf   : > { %s665_s1 = sand.u32 1, %s13745_s19   ;;  %p20116_p13 = scmp.ne.s32.totalorder %s20103_s28, 0 }
  0xd0   : > { %s10817_s21 = sshll.u32 %s665_s1, 8  ;;  %s666_s4 = scalar_lea.sflag [#allocation4], %s665_s1 }
  0xd1   : > { %s14159_s9 = scalar_lea.vmem [#allocation3], %s10817_s21 }
  0xd2   : > { %13720 = dma.done.wait (%p20116_p13), %s666_s4, 4096  }
  0xd3   : > { %13722 = vsyncadd (%p20116_p13), %s666_s4, 4294963200  ;;  %s674_s30 = sand.u32 1, %s13887_s24   ;;  %s14166_s17 = scalar_lea.vmem [#allocation6], %s10817_s21 }
  0xd4   : > { %s675_s18 = scalar_lea.sflag [#allocation7], %s674_s30 }
  0xd5   : > { %13724 = dma.done.wait (%p20116_p13), %s675_s18, 8192  }
  0xd6   : > { %13726 = vsyncadd (%p20116_p13), %s675_s18, 4294959104  ;;  %s14172_s25 = scalar_lea.vmem [#allocation8], %s10817_s21  ;;  %s693_s0 = scalar_lea.sflag [#allocation10], %s674_s30 }
  0xd7   : > { %s14174_s20 = scalar_lea.vmem [#allocation9], %s10817_s21 }
  0xd8   : > { %13728 = dma.done.wait (%p20116_p13), %s693_s0, 16384  }
  0xd9   : > { %13730 = vsyncadd (%p20116_p13), %s693_s0, 4294950912  ;;  %s13378_s3 = smul.u32 768, %s665_s1  ;;  %s711_s2 = scalar_lea.sflag [#allocation13], %s665_s1 }
  0xda   : > { %s13379_s23 = smul.u32 384, %s665_s1 }
  0xdb   : > { %s14180_s14 = scalar_lea.vmem [#allocation11], %s13378_s3 }
  0xdc   : > { %s14182_s26 = scalar_lea.vmem [#allocation12], %s13379_s23 }
  0xdd   : > { %13732 = dma.done.wait (%p20116_p13), %s711_s2, 6144  }
  0xde   : > { %13734 = vsyncadd (%p20116_p13), %s711_s2, 4294961152  ;;  %s20117_s29 = sld [smem:[#allocation21_spill]]  ;;  %s20118_s7 = sld [smem:[#allocation159_spill]] }
  0xdf   : > { %s20119_s21 = sld [smem:[#allocation161_spill]]  ;;  %s20120_s18 = sld [smem:[#allocation162_spill]] }
  0xe0   : > { %s20121_s2 = sld [smem:[#allocation163_spill]] }
  0xe4   : > { %p831_p9 = scmp.lt.s32.totalorder %s20117_s29, 1  ;;  %p847_p2 = scmp.eq.s32.totalorder %s20117_s29, 0 }
  0xe5   : > { %s20122_s15 = sld [smem:[#allocation156_spill]] (%p847_p2) }
  0xe6   : > { %s21618_s29 = smov (!%p831_p9, %s20117_s29), 1  ;;  %852 = sbr.rel (!%p847_p2) target bundleno = 237 (0xed), region = 108 }
  0xe7   : > { %s10821_s16 = sshll.u32 %s21618_s29, 1  ;;  %s13380_s12 = smul.u32 3, %s21618_s29 }
  0xe8   : > { %s14194_s10 = scalar_lea.vmem %s20118_s7, %s10821_s16  ;;  %s14199_s4 = scalar_lea.vmem %s20119_s21, %s10821_s16 }
  0xe9   : > { %s14204_s0 = scalar_lea.vmem %s20120_s18, %s13380_s12  ;;  %s14209_s5 = scalar_lea.vmem %s20121_s2, %s13380_s12 }
  0xeb   : > { %v853_v0 = vld [vmem:[%s20122_s15] sm:$0xff] (%p847_p2) }
  0xec   : > { %854 = vst [vmem:[#allocation14] sm:$0xff] (%p847_p2), %v853_v0 }
  0xed PF: > { %s20123_s27 = sld [smem:[#allocation152_spill]]  ;;  %s20124_s28 = sld [smem:[#allocation153_spill]]  ;;  %v13773_v3 = vmov 0   ;;  %v14245_v12 = vld [vmem:[%s14174_s20 + $0x8] sm:$0xff]  ;;  %v14248_v13 = vld [vmem:[%s14174_s20 + $0x18] sm:$0xff]  ;;  %v14251_v14 = vld [vmem:[%s14174_s20] sm:$0xff] }
  0xee   : > { %13476 = vset.pattern.permute.xlu0 %v13773_v3  ;;  %13477 = vset.pattern.permute.xlu1 %v13773_v3  ;;  %v19245_v15 = vand.u32 4294901760, %v14245_v12  ;;  %v19244_v16 = vand.u32 4294901760, %v14248_v13  ;;  %v14256_v17 = vld [vmem:[%s14174_s20 + $0x10] sm:$0xff]  ;;  %v19243_v18 = vand.u32 4294901760, %v14251_v14  ;;  %v14260_v19 = vld [vmem:[%s14174_s20 + $0x28] sm:$0xff]  ;;  %v14263_v20 = vld [vmem:[%s14174_s20 + $0x38] sm:$0xff] }
  0xef   : > { %v19242_v21 = vand.u32 4294901760, %v14256_v17  ;;  %v19241_v22 = vand.u32 4294901760, %v14260_v19  ;;  %v14268_v23 = vld [vmem:[%s14174_s20 + $0x20] sm:$0xff]  ;;  %v14271_v24 = vld [vmem:[%s14174_s20 + $0x30] sm:$0xff]  ;;  %v14274_v25 = vld [vmem:[%s14166_s17 + $0x8] sm:$0xff]  ;;  %v19240_v29 = vand.u32 4294901760, %v14263_v20 }
  0xf0   : > { %v14279_v26 = vsub.f32 %v14245_v12, %v19245_v15  ;;  %v14284_v27 = vsub.f32 %v14248_v13, %v19244_v16  ;;  %v14289_v28 = vsub.f32 %v14251_v14, %v19243_v18  ;;  %v14293_v30 = vld [vmem:[%s14166_s17 + $0x18] sm:$0xff]  ;;  %v14296_v31 = vld [vmem:[%s14166_s17] sm:$0xff]  ;;  %v14299_v32 = vld [vmem:[%s14166_s17 + $0x10] sm:$0xff]  ;;  %v19238_v37 = vand.u32 4294901760, %v14268_v23  ;;  %s20942_s2 = sld [smem:[#allocation155_spill]]  ;;  %p13417_p10 = scmp.eq.s32.totalorder %s13887_s24, 1 }
  0xf1   : > { %v14304_v33 = vsub.f32 %v14256_v17, %v19242_v21  ;;  %v14309_v34 = vsub.f32 %v14260_v19, %v19241_v22  ;;  %v14312_v35 = vld [vmem:[%s14174_s20 + $0x48] sm:$0xff]  ;;  %v14317_v36 = vsub.f32 %v14263_v20, %v19240_v29  ;;  %v19236_v38 = vand.u32 4294901760, %v14271_v24  ;;  %v14326_v43 = vld [vmem:[%s14174_s20 + $0x58] sm:$0xff]  ;;  %v14329_v44 = vld [vmem:[%s14174_s20 + $0x40] sm:$0xff] }
  0xf2   : > { %v19229_v39 = vand.u32 4294901760, %v14274_v25  ;;  %v19228_v40 = vand.u32 4294901760, %v14293_v30  ;;  %v19227_v41 = vand.u32 4294901760, %v14296_v31  ;;  %v19226_v42 = vand.u32 4294901760, %v14299_v32  ;;  %v14348_v49 = vld [vmem:[%s14174_s20 + $0x50] sm:$0xff]  ;;  %v14351_v50 = vld [vmem:[%s14166_s17 + $0x28] sm:$0xff] }
  0xf3   : > { %v863_v1 = vld [vmem:[%s20123_s27] sm:$0xff]  ;;  %v864_v4 = vld [vmem:[%s20123_s27 + $0x8] sm:$0xff]  ;;  %20129 = vst [vmem:[#allocation29_spill] sm:$0xff] %v14309_v34  ;;  %20130 = vst [vmem:[#allocation30_spill] sm:$0xff] %v14317_v36  ;;  %v14334_v45 = vsub.f32 %v14268_v23, %v19238_v37  ;;  %v14339_v46 = vsub.f32 %v14271_v24, %v19236_v38  ;;  %v19234_v48 = vand.u32 4294901760, %v14312_v35  ;;  %v19233_v57 = vand.u32 4294901760, %v14326_v43 }
  0xf4   : > { %v877_v2 = vld [vmem:[%s20124_s28] sm:$0xff]  ;;  %866 = vperm.xlu0 %13476, %v863_v1   ;;  %v878_v5 = vld [vmem:[%s20124_s28 + $0x8] sm:$0xff]  ;;  %v14344_v47 = vsub.f32 %v14274_v25, %v19229_v39  ;;  %v14359_v52 = vsub.f32 %v14293_v30, %v19228_v40  ;;  %v14364_v53 = vsub.f32 %v14296_v31, %v19227_v41  ;;  %v14370_v55 = vld [vmem:[%s14166_s17 + $0x30] sm:$0xff]  ;;  %v14375_v56 = vsub.f32 %v14299_v32, %v19226_v42 }
  0xf5   : > { %880 = vperm.xlu1 %13477, %v877_v2   ;;  %v860_v6 = vld [vmem:[#allocation14] sm:$0xff]  ;;  %20131 = vst [vmem:[#allocation31_spill] sm:$0xff] %v14334_v45  ;;  %20132 = vst [vmem:[#allocation32_spill] sm:$0xff] %v14339_v46  ;;  %v14354_v51 = vld [vmem:[%s14166_s17 + $0x38] sm:$0xff]  ;;  %v14381_v58 = vsub.f32 %v14312_v35, %v19234_v48  ;;  %v19232_v59 = vand.u32 4294901760, %v14329_v44  ;;  %v19230_v60 = vand.u32 4294901760, %v14348_v49  ;;  %v14390_v63 = vsub.f32 %v14326_v43, %v19233_v57 }
  0xf6   : > { %v14226_v7 = vand.u32 4294901760, %v860_v6  ;;  %20133 = vst [vmem:[#allocation33_spill] sm:$0xff] %v14344_v47  ;;  %20134 = vst [vmem:[#allocation34_spill] sm:$0xff] %v14359_v52  ;;  %v14367_v54 = vld [vmem:[%s14166_s17 + $0x20] sm:$0xff]  ;;  %v19231_v61 = vand.u32 4294901760, %v14351_v50  ;;  %v19235_v62 = vand.u32 4294901760, %v14354_v51 }
  0xf7   : > { %20135 = vst [vmem:[#allocation35_spill] sm:$0xff] %v14364_v53  ;;  %20136 = vst [vmem:[#allocation36_spill] sm:$0xff] %v14375_v56  ;;  %v14395_v0 = vsub.f32 %v14329_v44, %v19232_v59  ;;  %v19237_v1 = vand.u32 4294901760, %v14367_v54  ;;  %v19239_v2 = vand.u32 4294901760, %v14370_v55  ;;  %v14400_v3 = vld [vmem:[%s14174_s20 + $0x68] sm:$0xff]  ;;  %v14419_v42 = vld [vmem:[%s14174_s20 + $0x70] sm:$0xff] }
  0xf8   : > { %869 = vperm.xlu0 %13476, %v864_v4   ;;  %20125 = vst [vmem:[#allocation25_spill] sm:$0xff] %v14226_v7  ;;  %11209 = vmatprep.subr.mxu0 %v14226_v7  ;;  %v14230_v8 = vsub.f32 %v860_v6, %v14226_v7  ;;  %20137 = vst [vmem:[#allocation37_spill] sm:$0xff] %v14381_v58  ;;  %v14403_v4 = vld [vmem:[%s14174_s20 + $0x78] sm:$0xff]  ;;  %v14411_v6 = vsub.f32 %v14348_v49, %v19230_v60  ;;  %v14422_v41 = vld [vmem:[%s14166_s17 + $0x48] sm:$0xff]  ;;  %v19246_v48 = vand.u32 4294901760, %v14400_v3  ;;  %vm909_vm0 = vcmask 64512  }
  0xf9   : > { %883 = vperm.xlu1 %13477, %v878_v5   ;;  %11210 = vmatpush3.msra.mxu0 %v14226_v7  ;;  %20138 = vst [vmem:[#allocation38_spill] sm:$0xff] %v14390_v63  ;;  %20139 = vst [vmem:[#allocation39_spill] sm:$0xff] %v14395_v0  ;;  %v14406_v5 = vld [vmem:[%s14174_s20 + $0x60] sm:$0xff]  ;;  %v14425_v40 = vld [vmem:[%s14166_s17 + $0x58] sm:$0xff]  ;;  %v14430_v39 = vsub.f32 %v14354_v51, %v19235_v62  ;;  %v14435_v60 = vsub.f32 %v14367_v54, %v19237_v1  ;;  %v19247_v62 = vand.u32 4294901760, %v14403_v4  ;;  %vm5678_vm7 = vcmask 130048  }
  0xfa   : > { %20126 = vst [vmem:[#allocation26_spill] sm:$0xff] %v14230_v8  ;;  %v14234_v9 = vand.u32 4294901760, %v14230_v8  ;;  %20140 = vst [vmem:[#allocation40_spill] sm:$0xff] %v14411_v6  ;;  %v14443_v59 = vld [vmem:[%s14166_s17 + $0x40] sm:$0xff]  ;;  %v14446_v57 = vld [vmem:[%s14166_s17 + $0x50] sm:$0xff]  ;;  %v19251_v38 = vand.u32 4294901760, %v14406_v5  ;;  %v14457_v29 = vsub.f32 %v14400_v3, %v19246_v48 }
  0xfb   : > { %20142 = vst [vmem:[#allocation42_spill] sm:$0xff] %v14430_v39  ;;  %20143 = vst [vmem:[#allocation43_spill] sm:$0xff] %v14435_v60  ;;  %v19252_v1 = vand.u32 4294901760, %v14419_v42  ;;  %v19254_v37 = vand.u32 4294901760, %v14422_v41  ;;  %v14462_v22 = vsub.f32 %v14403_v4, %v19247_v62  ;;  %v14467_v16 = vld [vmem:[%s14174_s20 + $0x88] sm:$0xff]  ;;  %v14470_v15 = vld [vmem:[%s14174_s20 + $0x98] sm:$0xff] }
  0xfc   : > { %20127 = vst [vmem:[#allocation27_spill] sm:$0xff] %v14234_v9  ;;  %v1006_v10 = vsub.f32 %v14230_v8, %v14234_v9  ;;  %20145 = vst [vmem:[#allocation45_spill] sm:$0xff] %v14457_v29  ;;  %v14478_v48 = vsub.f32 %v14406_v5, %v19251_v38  ;;  %v14491_v21 = vld [vmem:[%s14174_s20 + $0x90] sm:$0xff]  ;;  %v14497_v29 = vld [vmem:[%s14166_s17 + $0x78] sm:$0xff]  ;;  %v19265_v39 = vand.u32 4294901760, %v14467_v16  ;;  %vm13776_vm8 = vmmov 0  }
  0xfd   : > { %20146 = vst [vmem:[#allocation46_spill] sm:$0xff] %v14462_v22  ;;  %v14483_v62 = vsub.f32 %v14419_v42, %v19252_v1  ;;  %v14488_v18 = vsub.f32 %v14422_v41, %v19254_v37  ;;  %v14494_v22 = vld [vmem:[%s14166_s17 + $0x68] sm:$0xff]  ;;  %v20152_v1 = vand.u32 4294901760, %v14443_v59  ;;  %v20154_v37 = vand.u32 4294901760, %v14446_v57  ;;  %v14518_v60 = vld [vmem:[%s14166_s17 + $0x70] sm:$0xff] }
  0xfe   : > { %v14238_v11 = vand.u32 4294901760, %v1006_v10  ;;  %v14416_v10 = vsub.f32 %v14351_v50, %v19231_v61  ;;  %v14440_v61 = vsub.f32 %v14370_v55, %v19239_v2  ;;  %v14473_v2 = vld [vmem:[%s14174_s20 + $0x80] sm:$0xff]  ;;  %20147 = vst [vmem:[#allocation47_spill] sm:$0xff] %v14478_v48  ;;  %v14539_v0 = vld [vmem:[%s14174_s20 + $0xa8] sm:$0xff] }
  0xff   : > { %20148 = vst [vmem:[#allocation48_spill] sm:$0xff] %v14483_v62  ;;  %20149 = vst [vmem:[#allocation49_spill] sm:$0xff] %v14488_v18  ;;  %v14507_v62 = vsub.f32 %v14443_v59, %v20152_v1  ;;  %v14512_v18 = vsub.f32 %v14446_v57, %v20154_v37  ;;  %v14515_v48 = vld [vmem:[%s14166_s17 + $0x60] sm:$0xff]  ;;  %v14529_v37 = vsub.f32 %v14467_v16, %v19265_v39  ;;  %v20160_v39 = vand.u32 4294901760, %v14491_v21 }
 0x100   : > { %20128 = vst [vmem:[#allocation28_spill] sm:$0xff] %v14238_v11  ;;  %11214 = vmatprep.subr.mxu0 %v14238_v11  ;;  %11244 = vmatprep.subr.mxu1 %v14238_v11  ;;  %20141 = vst [vmem:[#allocation41_spill] sm:$0xff] %v14416_v10  ;;  %v14542_v10 = vld [vmem:[%s14174_s20 + $0xb8] sm:$0xff]  ;;  %v20166_v63 = vand.u32 4294901760, %v14515_v48 }
 0x101   : > { %11245 = vmatpush3.msra.mxu1 %v14238_v11  ;;  %20144 = vst [vmem:[#allocation44_spill] sm:$0xff] %v14440_v61  ;;  %v20150_v61 = vand.u32 4294901760, %v14425_v40  ;;  %20153 = vst [vmem:[#allocation51_spill] sm:$0xff] %v14507_v62  ;;  %v20158_v62 = vand.u32 4294901760, %v14473_v2 }
 0x102   : > { %11249 = vmatprep.subr.mxu1 %v14230_v8  ;;  %20155 = vst [vmem:[#allocation52_spill] sm:$0xff] %v14512_v18  ;;  %20156 = vst [vmem:[#allocation53_spill] sm:$0xff] %v14529_v37  ;;  %v14552_v37 = vsub.f32 %v14491_v21, %v20160_v39 }
 0x103   : > { %v14502_v38 = vsub.f32 %v14425_v40, %v20150_v61  ;;  %v19267_v61 = vand.u32 4294901760, %v14470_v15  ;;  %v14547_v1 = vsub.f32 %v14473_v2, %v20158_v62  ;;  %v14567_v62 = vsub.f32 %v14515_v48, %v20166_v63 }
 0x104   : > { %20161 = vst [vmem:[#allocation56_spill] sm:$0xff] %v14552_v37  ;;  %v19277_v37 = vand.u32 4294901760, %v14539_v0  ;;  %v19281_v63 = vlaneseq }
 0x105   : > { %20151 = vst [vmem:[#allocation50_spill] sm:$0xff] %v14502_v38  ;;  %v14534_v18 = vsub.f32 %v14470_v15, %v19267_v61  ;;  %20159 = vst [vmem:[#allocation55_spill] sm:$0xff] %v14547_v1  ;;  %v20162_v61 = vand.u32 4294901760, %v14494_v22  ;;  %v20164_v38 = vand.u32 4294901760, %v14497_v29  ;;  %v20168_v1 = vand.u32 4294901760, %v14518_v60 }
 0x106   : > { %20167 = vst [vmem:[#allocation59_spill] sm:$0xff] %v14567_v62  ;;  %v862_v62 = vand.u32 127, %v19281_v63 }
 0x107   : > { %20157 = vst [vmem:[#allocation54_spill] sm:$0xff] %v14534_v18  ;;  %v14557_v6 = vsub.f32 %v14494_v22, %v20162_v61  ;;  %v14562_v18 = vsub.f32 %v14497_v29, %v20164_v38  ;;  %v14572_v39 = vsub.f32 %v14518_v60, %v20168_v1  ;;  %v19279_v61 = vand.u32 4294901760, %v14542_v10 }
 0x109   : > { %20163 = vst [vmem:[#allocation57_spill] sm:$0xff] %v14557_v6  ;;  %20165 = vst [vmem:[#allocation58_spill] sm:$0xff] %v14562_v18  ;;  %v14579_v6 = vsub.f32 %v14539_v0, %v19277_v37  ;;  %v14584_v38 = vsub.f32 %v14542_v10, %v19279_v61 }
 0x10a   : > { %20169 = vst [vmem:[#allocation60_spill] sm:$0xff] %v14572_v39  ;;  %v19288_v39 = vmov 0.0  }
 0x10b   : > { %20170 = vst [vmem:[#allocation61_spill] sm:$0xff] %v14579_v6  ;;  %20171 = vst [vmem:[#allocation62_spill] sm:$0xff] %v14584_v38 }
 0x173   : > { %v867_v18 = vpop.permute.xlu0 %866 }
 0x174   : > { %v881_v1 = vpop.permute.xlu1 %880  ;;  %vm871_vm1 = vcmp.eq.s32.totalorder %v862_v62, %v867_v18 }
 0x175   : > { %vm885_vm2 = vcmp.eq.s32.totalorder %v862_v62, %v881_v1  ;;  %v14588_v58 = vsel %vm871_vm1, 1.0, %v19288_v39 }
 0x176   : > { %v10826_v37 = vsel %vm885_vm2, 1.0, %v19288_v39  ;;  %v911_v6 = vsel %vm909_vm0, %v14588_v58, 0 }
 0x177   : > { %11246 = vmatprep.mubr.msk.f32.mxu1 %vm909_vm0, %v10826_v37  ;;  %v1406_v61 = vsel %vm909_vm0, %v10826_v37, 0  ;;  %v870_v38 = vpop.permute.xlu0 %869  ;;  %v983_v63 = vsub.f32 %v911_v6, %v911_v6 }
 0x178   : > { %v884_v56 = vpop.permute.xlu1 %883  ;;  %v14595_v53 = vsub.f32 %v1406_v61, %v1406_v61  ;;  %vm872_vm3 = vcmp.eq.s32.totalorder %v862_v62, %v870_v38 }
 0x179   : > { %vm886_vm4 = vcmp.eq.s32.totalorder %v862_v62, %v884_v56  ;;  %v14598_v18 = vsel %vm872_vm3, 1.0, %v19288_v39  ;;  %v984_v1 = vand.u32 4294901760, %v983_v63 }
 0x17a   : > { %v10827_v52 = vsel %vm886_vm4, 1.0, %v19288_v39  ;;  %v914_v47 = vsel %vm909_vm0, %v14598_v18, 0  ;;  %v1479_v36 = vand.u32 4294901760, %v14595_v53 }
 0x17b   : > { %11247 = vmatmul.mubr.msk.f32.vlgmr.msra.gmra.mrb[0].mxu1 %vm909_vm0, %v10827_v52  ;;  %v993_v46 = vsub.f32 %v914_v47, %v914_v47  ;;  %v985_v45 = vsub.f32 %v983_v63, %v984_v1  ;;  %v1409_v6 = vsel %vm909_vm0, %v10827_v52, 0  ;;  %v20172_v47 = vand.u32 4294901760, %v14245_v12 }
 0x17c   : > { %11250 = vmatpush3.msra.mxu1 %v14230_v8  ;;  %11251 = vmatprep.mubr.f32.mxu1 %v14595_v53  ;;  %v1488_v61 = vsub.f32 %v1409_v6, %v1409_v6  ;;  %v20176_v12 = vand.u32 4294901760, %v14256_v17  ;;  %v20184_v17 = vand.u32 4294901760, %v14312_v35  ;;  %v20191_v35 = vand.u32 4294901760, %v14400_v3 }
 0x17d   : > { %11254 = vmatprep.subr.mxu1 %v14226_v7  ;;  %v986_v56 = vand.u32 4294901760, %v985_v45  ;;  %v994_v62 = vand.u32 4294901760, %v993_v46  ;;  %v1480_v3 = vsub.f32 %v14595_v53, %v1479_v36 }
 0x17e   : > { %v1489_v45 = vand.u32 4294901760, %v1488_v61 }
 0x17f   : > { %11211 = vmatprep.mubr.f32.mxu0 %v986_v56  ;;  %v995_v38 = vsub.f32 %v993_v46, %v994_v62 }
 0x181   : > { %v996_v39 = vand.u32 4294901760, %v995_v38 }
 0x183   : > { %11252 = vmatmul.mubr.f32.vlgmr.msra.gmra.mrb[0].mxu1 %v1488_v61  ;;  %11212 = vmatmul.mubr.f32.vlgmr.msra.gmra.mrb[0].mxu0 %v996_v39  ;;  %v20173_v39 = vand.u32 4294901760, %v14248_v13  ;;  %v20178_v13 = vand.u32 4294901760, %v14260_v19  ;;  %v20185_v19 = vand.u32 4294901760, %v14326_v43  ;;  %v20192_v43 = vand.u32 4294901760, %v14403_v4 }
 0x184   : > { %11255 = vmatpush3.msra.mxu1 %v14226_v7  ;;  %11216 = vmatprep.mubr.msk.f32.mxu0 %vm909_vm0, %v14588_v58  ;;  %v20197_v4 = vand.u32 4294901760, %v14467_v16  ;;  %v20204_v16 = vand.u32 4294901760, %v14293_v30  ;;  %v20210_v30 = vand.u32 4294901760, %v14299_v32  ;;  %v20216_v32 = vand.u32 4294901760, %v14370_v55 }
 0x185   : > { %11215 = vmatpush3.msra.mxu0 %v14238_v11  ;;  %11256 = vmatprep.mubr.f32.mxu1 %v1479_v36  ;;  %v14627_v6 = vpack.c.bf16 %v20173_v39, %v20172_v47  ;;  %v14678_v47 = vpack.c.bf16 %v20192_v43, %v20191_v35  ;;  %v20194_v39 = vand.u32 4294901760, %v14406_v5  ;;  %v20200_v5 = vand.u32 4294901760, %v14473_v2  ;;  %v1949_v43 = vld [vmem:[%s14166_s17 + $0x88] sm:$0xff] }
 0x186   : > { %11219 = vmatprep.subr.mxu0 %v14230_v8  ;;  %11259 = vmatprep.subr.mxu1 %v14234_v9  ;;  %v1481_v36 = vand.u32 4294901760, %v1480_v3  ;;  %v20222_v55 = vand.u32 4294901760, %v14446_v57  ;;  %v3840_v57 = vld [vmem:[%s14174_s20 + $0xa0] sm:$0xff] }
 0x187   : > { %20174 = vst [vmem:[#allocation63_spill] sm:$0xff] %v14627_v6  ;;  %20193 = vst [vmem:[#allocation69_spill] sm:$0xff] %v14678_v47  ;;  %v3894_v35 = vand.u32 4294901760, %v3840_v57  ;;  %v1948_v3 = vld [vmem:[%s14166_s17 + $0x80] sm:$0xff] }
 0x18b   : > { %11257 = vmatmul.mubr.f32.vlgmr.msra.gmra.mrb[0].mxu1 %v1489_v45  ;;  %11217 = vmatmul.mubr.msk.f32.vlgmr.msra.gmra.mrb[0].mxu0 %vm909_vm0, %v14598_v18 }
 0x18c   : > { %11260 = vmatpush3.msra.mxu1 %v14234_v9  ;;  %11221 = vmatprep.mubr.f32.mxu0 %v983_v63  ;;  %v20175_v63 = vand.u32 4294901760, %v14251_v14 }
 0x18d   : > { %11220 = vmatpush3.msra.mxu0 %v14230_v8  ;;  %11261 = vmatprep.mubr.msk.f32.mxu1 %vm909_vm0, %v10826_v37 }
 0x18e   : > { %11224 = vmatprep.subr.mxu0 %v14226_v7  ;;  %11264 = vmatprep.subr.mxu1 %v14226_v7  ;;  %v14638_v56 = vpack.c.bf16 %v20176_v12, %v20175_v63  ;;  %v20198_v63 = vand.u32 4294901760, %v14470_v15  ;;  %v20203_v15 = vand.u32 4294901760, %v14274_v25  ;;  %v20209_v25 = vand.u32 4294901760, %v14296_v31 }
 0x18f   : > { %v20215_v31 = vand.u32 4294901760, %v14367_v54  ;;  %v20221_v54 = vand.u32 4294901760, %v14443_v59  ;;  %v20228_v59 = vand.u32 4294901760, %v14518_v60  ;;  %v1950_v60 = vld [vmem:[%s14166_s17 + $0x90] sm:$0xff] }
 0x190   : > { %20177 = vst [vmem:[#allocation64_spill] sm:$0xff] %v14638_v56  ;;  %v14697_v12 = vpack.c.bf16 %v20198_v63, %v20197_v4  ;;  %v14713_v53 = vpack.c.bf16 %v20204_v16, %v20203_v15  ;;  %v14729_v2 = vpack.c.bf16 %v20210_v30, %v20209_v25  ;;  %v1998_v63 = vand.u32 4294901760, %v1948_v3 }
 0x192   : > { %20199 = vst [vmem:[#allocation71_spill] sm:$0xff] %v14697_v12  ;;  %20205 = vst [vmem:[#allocation73_spill] sm:$0xff] %v14713_v53 }
 0x193   : > { %11262 = vmatmul.mubr.msk.f32.vlgmr.msra.gmra.mrb[0].mxu1 %vm909_vm0, %v10827_v52  ;;  %11222 = vmatmul.mubr.f32.vlgmr.msra.gmra.mrb[0].mxu0 %v993_v46  ;;  %v20179_v46 = vand.u32 4294901760, %v14263_v20  ;;  %v14661_v20 = vpack.c.bf16 %v20185_v19, %v20184_v17  ;;  %20211 = vst [vmem:[#allocation75_spill] sm:$0xff] %v14729_v2  ;;  %v14759_v17 = vpack.c.bf16 %v20222_v55, %v20221_v54  ;;  %v20224_v19 = vand.u32 4294901760, %v14494_v22  ;;  %v3842_v22 = vld [vmem:[%s14174_s20 + $0xb0] sm:$0xff] }
 0x194   : > { %11265 = vmatpush3.msra.mxu1 %v14226_v7  ;;  %11226 = vmatprep.mubr.f32.mxu0 %v984_v1  ;;  %v20182_v1 = vand.u32 4294901760, %v14271_v24  ;;  %v20188_v24 = vand.u32 4294901760, %v14329_v44  ;;  %v20195_v44 = vand.u32 4294901760, %v14419_v42  ;;  %v1490_v42 = vsub.f32 %v1488_v61, %v1489_v45  ;;  %v1954_v54 = vld [vmem:[%s14166_s17 + $0xb0] sm:$0xff] }
 0x195   : > { %11225 = vmatpush3.msra.mxu0 %v14226_v7  ;;  %11266 = vmatprep.mubr.msk.f32.mxu1 %vm909_vm0, %v10826_v37  ;;  %v14644_v38 = vpack.c.bf16 %v20179_v46, %v20178_v13  ;;  %v20181_v37 = vand.u32 4294901760, %v14268_v23  ;;  %20186 = vst [vmem:[#allocation67_spill] sm:$0xff] %v14661_v20  ;;  %v20187_v23 = vmov 0.0   ;;  %v20206_v46 = vand.u32 4294901760, %v14539_v0  ;;  %20223 = vst [vmem:[#allocation79_spill] sm:$0xff] %v14759_v17 }
 0x196   : > { %11229 = vmatprep.subr.mxu0 %v14234_v9  ;;  %11864 = vmatprep.subr.bf16.mxu1 %v14627_v6  ;;  %v20207_v61 = vand.u32 4294901760, %v14542_v10  ;;  %v20212_v0 = vand.u32 4294901760, %v14351_v50  ;;  %v20213_v10 = vand.u32 4294901760, %v14354_v51  ;;  %v20218_v50 = vand.u32 4294901760, %v14422_v41 }
 0x197   : > { %20180 = vst [vmem:[#allocation65_spill] sm:$0xff] %v14644_v38  ;;  %v14652_v14 = vpack.c.bf16 %v20182_v1, %v20181_v37  ;;  %v20219_v51 = vand.u32 4294901760, %v14425_v40  ;;  %v20225_v41 = vand.u32 4294901760, %v14497_v29  ;;  %v20227_v40 = vand.u32 4294901760, %v14515_v48 }
 0x198   : > { %v14719_v45 = vpack.c.bf16 %v20207_v61, %v20206_v46  ;;  %v14736_v37 = vpack.c.bf16 %v20213_v10, %v20212_v0  ;;  %v3898_v29 = vand.u32 4294901760, %v3842_v22  ;;  %v3844_v46 = vld [vmem:[%s14174_s20 + $0xc0] sm:$0xff]  ;;  %v3846_v61 = vld [vmem:[%s14174_s20 + $0xd0] sm:$0xff]  ;;  %v14795_v0 = vld [vmem:[%s14166_s17 + $0xa8] sm:$0xff] }
 0x199   : > { %20183 = vst [vmem:[#allocation66_spill] sm:$0xff] %v14652_v14  ;;  %v14752_v1 = vpack.c.bf16 %v20219_v51, %v20218_v50  ;;  %v3902_v25 = vand.u32 4294901760, %v3844_v46  ;;  %v3906_v30 = vand.u32 4294901760, %v3846_v61  ;;  %v14798_v10 = vld [vmem:[%s14166_s17 + $0xb8] sm:$0xff]  ;;  %v1952_v51 = vld [vmem:[%s14166_s17 + $0xa0] sm:$0xff] }
 0x19a   : > { %20208 = vst [vmem:[#allocation74_spill] sm:$0xff] %v14719_v45  ;;  %20214 = vst [vmem:[#allocation76_spill] sm:$0xff] %v14736_v37  ;;  %v14783_v4 = vpack.c.bf16 %v3898_v29, %v3894_v35  ;;  %v2008_v50 = vand.u32 4294901760, %v14798_v10  ;;  %v14814_v8 = vsub.f32 %v3842_v22, %v3898_v29 }
 0x19b   : > { %11267 = vmatmul.mubr.msk.f32.vlgmr.msra.gmra.mrb[0].mxu1 %vm909_vm0, %v10827_v52  ;;  %11227 = vmatmul.mubr.f32.vlgmr.msra.gmra.mrb[0].mxu0 %v994_v62  ;;  %v20189_v52 = vand.u32 4294901760, %v14348_v49  ;;  %v14687_v49 = vpack.c.bf16 %v20195_v44, %v20194_v39  ;;  %20220 = vst [vmem:[#allocation78_spill] sm:$0xff] %v14752_v1  ;;  %v1951_v39 = vld [vmem:[%s14166_s17 + $0x98] sm:$0xff]  ;;  %v1996_v44 = vand.u32 4294901760, %v1949_v43  ;;  %v14808_v55 = vpack.c.bf16 %v3906_v30, %v3902_v25 }
 0x19c   : > { %11866 = vmatpush1.bf16.msra.mxu1 %v14638_v56  ;;  %11231 = vmatprep.mubr.msk.f32.mxu0 %vm909_vm0, %v14588_v58  ;;  %v2000_v48 = vand.u32 4294901760, %v1951_v39  ;;  %20230 = vst [vmem:[#allocation82_spill] sm:$0xff] %v14783_v4 }
 0x19d   : > { %11230 = vmatpush3.msra.mxu0 %v14234_v9  ;;  %11868 = vmatprep.subr.bf16.mxu1 %v14644_v38  ;;  %v14671_v62 = vpack.c.bf16 %v20189_v52, %v20188_v24  ;;  %20196 = vst [vmem:[#allocation70_spill] sm:$0xff] %v14687_v49  ;;  %v14766_v24 = vpack.c.bf16 %v20225_v41, %v20224_v19  ;;  %20234 = vst [vmem:[#allocation86_spill] sm:$0xff] %v14808_v55  ;;  %v2006_v19 = vand.u32 4294901760, %v1952_v51 }
 0x19e   : > { %11234 = vmatprep.subr.mxu0 %v14226_v7  ;;  %3948 = vmatprep.mubr.f32.mxu1 %v20187_v23  ;;  %v14773_v52 = vpack.c.bf16 %v20228_v59, %v20227_v40  ;;  %v2010_v41 = vand.u32 4294901760, %v1954_v54  ;;  %v3849_v40 = vld [vmem:[%s14174_s20 + $0xe8] sm:$0xff]  ;;  %v3851_v59 = vld [vmem:[%s14174_s20 + $0xf8] sm:$0xff]  ;;  %v14812_v9 = vsub.f32 %v3840_v57, %v3894_v35 }
 0x19f   : > { %20190 = vst [vmem:[#allocation68_spill] sm:$0xff] %v14671_v62  ;;  %20226 = vst [vmem:[#allocation80_spill] sm:$0xff] %v14766_v24  ;;  %v3908_v11 = vand.u32 4294901760, %v3849_v40  ;;  %v1957_v57 = vld [vmem:[%s14166_s17 + $0xc8] sm:$0xff]  ;;  %v1959_v35 = vld [vmem:[%s14166_s17 + $0xd8] sm:$0xff] }
 0x1a0   : > { %11870 = vmatpush1.bf16.msra.mxu1 %v14652_v14  ;;  %20229 = vst [vmem:[#allocation81_spill] sm:$0xff] %v14773_v52  ;;  %v2012_v22 = vand.u32 4294901760, %v1957_v57  ;;  %v2016_v29 = vand.u32 4294901760, %v1959_v35  ;;  %v20272_v14 = vld [vmem:[#allocation39_spill] sm:$0xff] }
 0x1a1   : > { %11872 = vmatprep.subr.bf16.mxu1 %v14661_v20  ;;  %v1962_v20 = vld [vmem:[%s14166_s17 + $0xf0] sm:$0xff] }
 0x1a3   : > { %11232 = vmatmul.mubr.msk.f32.vlgmr.msra.gmra.mrb[0].mxu0 %vm909_vm0, %v14598_v18 }
 0x1a4   : > { %11874 = vmatpush1.bf16.msra.mxu1 %v14671_v62  ;;  %11236 = vmatprep.mubr.msk.f32.mxu0 %vm909_vm0, %v14588_v58  ;;  %v20201_v58 = vand.u32 4294901760, %v14491_v21  ;;  %v1491_v21 = vand.u32 4294901760, %v1490_v42  ;;  %v2002_v42 = vand.u32 4294901760, %v1950_v60 }
 0x1a5   : > { %11235 = vmatpush3.msra.mxu0 %v14226_v7  ;;  %11876 = vmatprep.subr.bf16.mxu1 %v14678_v47 }
 0x1a6   : > { %11239 = vmatprep.subr.mxu0 %v14226_v7  ;;  %v14706_v13 = vpack.c.bf16 %v20201_v58, %v20200_v5  ;;  %v3845_v5 = vld [vmem:[%s14174_s20 + $0xc8] sm:$0xff]  ;;  %v3847_v58 = vld [vmem:[%s14174_s20 + $0xd8] sm:$0xff] }
 0x1a7   : > { %v3900_v15 = vand.u32 4294901760, %v3845_v5  ;;  %v3904_v16 = vand.u32 4294901760, %v3847_v58 }
 0x1a8   : > { %11878 = vmatpush1.bf16.msra.mxu1 %v14687_v49  ;;  %20202 = vst [vmem:[#allocation72_spill] sm:$0xff] %v14706_v13  ;;  %v14831_v49 = vsub.f32 %v1949_v43, %v1996_v44  ;;  %v14848_v43 = vpack.c.bf16 %v2016_v29, %v2012_v22 }
 0x1a9   : > { %11880 = vmatprep.subr.bf16.mxu1 %v14697_v12  ;;  %v19333_v12 = vand.u32 4294901760, %v14284_v27  ;;  %v14842_v47 = vsub.f32 %v3847_v58, %v3904_v16  ;;  %v1961_v58 = vld [vmem:[%s14166_s17 + $0xe8] sm:$0xff] }
 0x1aa   : > { %20240 = vst [vmem:[#allocation92_spill] sm:$0xff] %v14848_v43 }
 0x1ab   : > { %11237 = vmatmul.mubr.msk.f32.vlgmr.msra.gmra.mrb[0].mxu0 %vm909_vm0, %v14598_v18  ;;  %v14744_v18 = vpack.c.bf16 %v20216_v32, %v20215_v31  ;;  %v14801_v31 = vpack.c.bf16 %v3904_v16, %v3900_v15  ;;  %v2004_v32 = vand.u32 4294901760, %v14795_v0  ;;  %20237 = vst [vmem:[#allocation89_spill] sm:$0xff] %v14842_v47 }
 0x1ac   : > { %11882 = vmatpush1.bf16.msra.mxu1 %v14706_v13  ;;  %11240 = vmatpush3.msra.mxu0 %v14226_v7 }
 0x1ad   : > { %11241 = vmatprep.mubr.f32.mxu0 %v1481_v36  ;;  %11480 = vmatprep.subr.bf16.mxu0 %v14713_v53  ;;  %20217 = vst [vmem:[#allocation77_spill] sm:$0xff] %v14744_v18  ;;  %v14787_v36 = vpack.c.bf16 %v2000_v48, %v1996_v44  ;;  %20233 = vst [vmem:[#allocation85_spill] sm:$0xff] %v14801_v31  ;;  %v14817_v7 = vpack.c.bf16 %v2008_v50, %v2004_v32 }
 0x1ae   : > { %11884 = vmatprep.subr.bf16.mxu1 %v14719_v45 }
 0x1af   : > { %11242 = vmatmul.mubr.f32.vlgmr.msra.gmra.mrb[2].mxu0 %v1491_v21  ;;  %20231 = vst [vmem:[#allocation83_spill] sm:$0xff] %v14787_v36  ;;  %v14792_v21 = vpack.c.bf16 %v2002_v42, %v1998_v63  ;;  %20235 = vst [vmem:[#allocation87_spill] sm:$0xff] %v14817_v7 }
 0x1b0   : > { %11482 = vmatpush1.bf16.msra.mxu0 %v14729_v2  ;;  %2060 = vmatprep.mubr.f32.mxu0 %v20187_v23 }
 0x1b1   : > { %11484 = vmatprep.subr.bf16.mxu0 %v14736_v37  ;;  %11886 = vmatpush1.bf16.msra.mxu1 %v14783_v4  ;;  %20232 = vst [vmem:[#allocation84_spill] sm:$0xff] %v14792_v21  ;;  %v3850_v4 = vld [vmem:[%s14174_s20 + $0xf0] sm:$0xff]  ;;  %v14874_v37 = vsub.f32 %v14795_v0, %v2004_v32  ;;  %v14893_v0 = vsub.f32 %v1957_v57, %v2012_v22  ;;  %v20262_v22 = vld [vmem:[#allocation32_spill] sm:$0xff] }
 0x1b2   : > { %11888 = vmatprep.subr.bf16.mxu1 %v14801_v31  ;;  %v3914_v13 = vand.u32 4294901760, %v3850_v4  ;;  %v1956_v31 = vld [vmem:[%s14166_s17 + $0xc0] sm:$0xff]  ;;  %v14895_v32 = vsub.f32 %v1959_v35, %v2016_v29  ;;  %v20263_v29 = vld [vmem:[#allocation33_spill] sm:$0xff] }
 0x1b3   : > { %20249 = vst [vmem:[#allocation100_spill] sm:$0xff] %v14893_v0 }
 0x1b4   : > { %11486 = vmatpush1.bf16.msra.mxu0 %v14744_v18  ;;  %v14837_v18 = vsub.f32 %v1950_v60, %v2002_v42  ;;  %v14853_v60 = vsub.f32 %v3844_v46, %v3902_v25  ;;  %v3986_v42 = vsub.f32 %v14284_v27, %v19333_v12  ;;  %v2020_v25 = vand.u32 4294901760, %v1961_v58  ;;  %20250 = vst [vmem:[#allocation101_spill] sm:$0xff] %v14895_v32 }
 0x1b5   : > { %11488 = vmatprep.subr.bf16.mxu0 %v14752_v1  ;;  %11890 = vmatpush1.bf16.msra.mxu1 %v14808_v55  ;;  %v14833_v55 = vsub.f32 %v1951_v39, %v2000_v48  ;;  %v14835_v1 = vsub.f32 %v1948_v3, %v1998_v63  ;;  %v2014_v39 = vand.u32 4294901760, %v1956_v31  ;;  %v20241_v48 = vand.u32 4294901760, %v14279_v26 }
 0x1b6   : > { %20242 = vst [vmem:[#allocation93_spill] sm:$0xff] %v14853_v60  ;;  %v14855_v63 = vsub.f32 %v3846_v61, %v3906_v30  ;;  %v1960_v30 = vld [vmem:[%s14166_s17 + $0xe0] sm:$0xff]  ;;  %v14884_v61 = vsub.f32 %v3849_v40, %v3908_v11  ;;  %v20259_v40 = vld [vmem:[#allocation31_spill] sm:$0xff] }
 0x1b7   : > { %v3974_v3 = vsub.f32 %v14279_v26, %v20241_v48  ;;  %v3987_v48 = vand.u32 4294901760, %v3986_v42 }
 0x1b8   : > { %11490 = vmatpush1.bf16.msra.mxu0 %v14759_v17  ;;  %20243 = vst [vmem:[#allocation94_spill] sm:$0xff] %v14855_v63  ;;  %20247 = vst [vmem:[#allocation98_spill] sm:$0xff] %v14884_v61 }
 0x1b9   : > { %11492 = vmatprep.subr.bf16.mxu0 %v14766_v24  ;;  %v1958_v24 = vld [vmem:[%s14166_s17 + $0xd0] sm:$0xff]  ;;  %v3975_v46 = vand.u32 4294901760, %v3974_v3  ;;  %v14881_v3 = vsub.f32 %v1954_v54, %v2010_v41 }
 0x1ba   : > { %v2018_v44 = vand.u32 4294901760, %v1958_v24 }
 0x1bb   : > { %20246 = vst [vmem:[#allocation97_spill] sm:$0xff] %v14881_v3 }
 0x1bc   : > { %11494 = vmatpush1.bf16.msra.mxu0 %v14773_v52  ;;  %v3912_v52 = vand.u32 4294901760, %v3851_v59  ;;  %v14866_v16 = vpack.c.bf16 %v2018_v44, %v2014_v39 }
 0x1bd   : > { %11496 = vmatprep.subr.bf16.mxu0 %v14787_v36  ;;  %v14822_v36 = vpack.c.bf16 %v2010_v41, %v2006_v19 }
 0x1be   : > { %v14844_v62 = vpack.c.bf16 %v3912_v52, %v3908_v11  ;;  %20244 = vst [vmem:[#allocation95_spill] sm:$0xff] %v14866_v16  ;;  %v14886_v42 = vsub.f32 %v3851_v59, %v3912_v52  ;;  %v20253_v11 = vand.u32 4294901760, %v14304_v33  ;;  %v19349_v59 = vand.u32 4294901760, %v20259_v40 }
 0x1bf   : > { %20236 = vst [vmem:[#allocation88_spill] sm:$0xff] %v14822_v36 }
 0x1c0   : > { %11498 = vmatpush1.bf16.msra.mxu0 %v14792_v21  ;;  %v3848_v21 = vld [vmem:[%s14174_s20 + $0xe0] sm:$0xff]  ;;  %20238 = vst [vmem:[#allocation90_spill] sm:$0xff] %v14844_v62  ;;  %11892 = vmatprep.subr.bf16.mxu1 %v14844_v62  ;;  %v2022_v62 = vand.u32 4294901760, %v1960_v30  ;;  %20248 = vst [vmem:[#allocation99_spill] sm:$0xff] %v14886_v42  ;;  %v3992_v52 = vsub.f32 %v14304_v33, %v20253_v11 }
 0x1c1   : > { %v3910_v45 = vand.u32 4294901760, %v3848_v21  ;;  %11500 = vmatprep.subr.bf16.mxu0 %v14817_v7  ;;  %v14840_v7 = vsub.f32 %v3845_v5, %v3900_v15  ;;  %v19346_v5 = vand.u32 4294901760, %v14289_v28  ;;  %v1963_v15 = vld [vmem:[%s14166_s17 + $0xf8] sm:$0xff] }
 0x1c3   : > { %v14846_v17 = vpack.c.bf16 %v3914_v13, %v3910_v45  ;;  %v3980_v12 = vsub.f32 %v14289_v28, %v19346_v5  ;;  %v14888_v2 = vsub.f32 %v3848_v21, %v3910_v45  ;;  %v14890_v5 = vsub.f32 %v3850_v4, %v3914_v13 }
 0x1c4   : > { %11502 = vmatpush1.bf16.msra.mxu0 %v14822_v36  ;;  %v2024_v36 = vand.u32 4294901760, %v1963_v15  ;;  %v14906_v45 = vsub.f32 %v1961_v58, %v2020_v25  ;;  %v2026_v4 = vand.u32 4294901760, %v1962_v20  ;;  %v14910_v21 = vsub.f32 %v1960_v30, %v2022_v62 }
 0x1c5   : > { %20239 = vst [vmem:[#allocation91_spill] sm:$0xff] %v14846_v17  ;;  %11894 = vmatpush1.bf16.msra.mxu1 %v14846_v17  ;;  %11504 = vmatprep.subr.bf16.mxu0 %v14848_v43  ;;  %v14877_v17 = vsub.f32 %v14798_v10, %v2008_v50  ;;  %v14879_v43 = vsub.f32 %v1952_v51, %v2006_v19  ;;  %v3981_v54 = vand.u32 4294901760, %v3980_v12  ;;  %v20258_v12 = vld [vmem:[#allocation30_spill] sm:$0xff] }
 0x1c6   : > { %v14897_v10 = vsub.f32 %v1956_v31, %v2014_v39  ;;  %v14899_v50 = vsub.f32 %v1958_v24, %v2018_v44  ;;  %v11895_v51 = vpack.c.bf16 %v3987_v48, %v3975_v46  ;;  %v14904_v19 = vpack.c.bf16 %v2024_v36, %v2020_v25  ;;  %20255 = vst [vmem:[#allocation105_spill] sm:$0xff] %v14906_v45  ;;  %v20265_v25 = vld [vmem:[#allocation34_spill] sm:$0xff]  ;;  %v20266_v48 = vld [vmem:[#allocation35_spill] sm:$0xff] }
 0x1c7   : > { %20245 = vst [vmem:[#allocation96_spill] sm:$0xff] %v14879_v43  ;;  %v14908_v13 = vsub.f32 %v1963_v15, %v2024_v36  ;;  %20257 = vst [vmem:[#allocation107_spill] sm:$0xff] %v14910_v21  ;;  %v3993_v31 = vand.u32 4294901760, %v3992_v52  ;;  %v19351_v24 = vand.u32 4294901760, %v14309_v34  ;;  %v19350_v41 = vand.u32 4294901760, %v20258_v12 }
 0x1c8   : > { %11506 = vmatpush1.bf16.msra.mxu0 %v14866_v16  ;;  %20251 = vst [vmem:[#allocation102_spill] sm:$0xff] %v14897_v10  ;;  %20252 = vst [vmem:[#allocation103_spill] sm:$0xff] %v14899_v50  ;;  %11896 = vmatprep.subr.bf16.mxu1 %v11895_v51  ;;  %v14916_v57 = vpack.c.bf16 %v2026_v4, %v2022_v62  ;;  %v14918_v35 = vsub.f32 %v1962_v20, %v2026_v4  ;;  %v19352_v36 = vand.u32 4294901760, %v20262_v22  ;;  %v20267_v4 = vld [vmem:[#allocation36_spill] sm:$0xff] }
 0x1c9   : > { %20254 = vst [vmem:[#allocation104_spill] sm:$0xff] %v14904_v19  ;;  %20256 = vst [vmem:[#allocation106_spill] sm:$0xff] %v14908_v13  ;;  %11508 = vmatprep.subr.bf16.mxu0 %v14904_v19  ;;  %v19353_v39 = vand.u32 4294901760, %v20263_v29  ;;  %v14922_v44 = vpack.c.bf16 %v3993_v31, %v3981_v54  ;;  %v3998_v58 = vsub.f32 %v14309_v34, %v19351_v24  ;;  %v19362_v30 = vand.u32 4294901760, %v20265_v25  ;;  %v20332_v34 = vld [vmem:[#allocation55_spill] sm:$0xff] }
 0x1ca   : > { %20260 = vst [vmem:[#allocation108_spill] sm:$0xff] %v14916_v57  ;;  %20261 = vst [vmem:[#allocation109_spill] sm:$0xff] %v14918_v35  ;;  %v4010_v15 = vsub.f32 %v20258_v12, %v19350_v41  ;;  %v4004_v62 = vsub.f32 %v20259_v40, %v19349_v59  ;;  %v4016_v20 = vsub.f32 %v20262_v22, %v19352_v36  ;;  %v19366_v51 = vand.u32 4294901760, %v20266_v48  ;;  %v20330_v22 = vld [vmem:[#allocation53_spill] sm:$0xff] }
 0x1cb   : > { %20264 = vst [vmem:[#allocation110_spill] sm:$0xff] %v14922_v44  ;;  %v2086_v46 = vsub.f32 %v20263_v29, %v19353_v39  ;;  %v3999_v54 = vand.u32 4294901760, %v3998_v58  ;;  %v19365_v31 = vand.u32 4294901760, %v20267_v4  ;;  %v2098_v24 = vsub.f32 %v20265_v25, %v19362_v30  ;;  %v20324_v25 = vld [vmem:[#allocation47_spill] sm:$0xff]  ;;  %v20334_v29 = vld [vmem:[#allocation57_spill] sm:$0xff] }
 0x1cc   : > { %11510 = vmatpush1.bf16.msra.mxu0 %v14916_v57  ;;  %v4011_v11 = vand.u32 4294901760, %v4010_v15  ;;  %v4005_v52 = vand.u32 4294901760, %v4004_v62  ;;  %v4017_v59 = vand.u32 4294901760, %v4016_v20  ;;  %v2092_v36 = vsub.f32 %v20266_v48, %v19366_v51  ;;  %v20269_v15 = vld [vmem:[#allocation37_spill] sm:$0xff]  ;;  %v20270_v57 = vld [vmem:[#allocation38_spill] sm:$0xff] }
 0x1cd   : > { %v2087_v41 = vand.u32 4294901760, %v2086_v46  ;;  %v2104_v58 = vsub.f32 %v20267_v4, %v19365_v31  ;;  %v19373_v62 = vand.u32 4294901760, %v20269_v15  ;;  %v19374_v19 = vand.u32 4294901760, %v20270_v57  ;;  %v20273_v31 = vld [vmem:[#allocation40_spill] sm:$0xff] }
 0x1ce   : > { %v14949_v39 = vpack.c.bf16 %v4011_v11, %v3999_v54  ;;  %v14956_v20 = vpack.c.bf16 %v4017_v59, %v4005_v52  ;;  %v2099_v46 = vand.u32 4294901760, %v2098_v24  ;;  %v2093_v16 = vand.u32 4294901760, %v2092_v36  ;;  %v20274_v24 = vld [vmem:[#allocation41_spill] sm:$0xff]  ;;  %v20275_v52 = vld [vmem:[#allocation42_spill] sm:$0xff] }
 0x1cf   : > { %v19375_v30 = vand.u32 4294901760, %v20272_v14  ;;  %v2105_v53 = vand.u32 4294901760, %v2104_v58  ;;  %v4022_v54 = vsub.f32 %v20269_v15, %v19373_v62  ;;  %v4034_v11 = vsub.f32 %v20270_v57, %v19374_v19 }
 0x1d0   : > { %20268 = vst [vmem:[#allocation111_spill] sm:$0xff] %v14949_v39  ;;  %20271 = vst [vmem:[#allocation37_spill] sm:$0xff] %v14956_v20  ;;  %v19377_v51 = vand.u32 4294901760, %v20273_v31  ;;  %v11511_v38 = vpack.c.bf16 %v2099_v46, %v2087_v41  ;;  %v19378_v36 = vand.u32 4294901760, %v20274_v24  ;;  %v19380_v56 = vand.u32 4294901760, %v20275_v52 }
 0x1d1   : > { %v4028_v59 = vsub.f32 %v20272_v14, %v19375_v30  ;;  %v14971_v58 = vpack.c.bf16 %v2105_v53, %v2093_v16  ;;  %v4023_v6 = vand.u32 4294901760, %v4022_v54  ;;  %v4035_v20 = vand.u32 4294901760, %v4034_v11  ;;  %v20277_v30 = vld [vmem:[#allocation43_spill] sm:$0xff]  ;;  %v20279_v54 = vld [vmem:[#allocation44_spill] sm:$0xff] }
 0x1d2   : > { %v4040_v62 = vsub.f32 %v20273_v31, %v19377_v51  ;;  %11512 = vmatprep.subr.bf16.mxu0 %v11511_v38  ;;  %v2110_v41 = vsub.f32 %v20274_v24, %v19378_v36  ;;  %v2122_v46 = vsub.f32 %v20275_v52, %v19380_v56  ;;  %v19381_v39 = vand.u32 4294901760, %v20277_v30  ;;  %v20281_v36 = vld [vmem:[#allocation46_spill] sm:$0xff]  ;;  %v20329_v14 = vld [vmem:[#allocation52_spill] sm:$0xff] }
 0x1d3   : > { %20276 = vst [vmem:[#allocation38_spill] sm:$0xff] %v14971_v58  ;;  %v4029_v19 = vand.u32 4294901760, %v4028_v59  ;;  %v14983_v53 = vpack.c.bf16 %v4035_v20, %v4023_v6  ;;  %v19382_v11 = vand.u32 4294901760, %v20279_v54  ;;  %v20280_v58 = vld [vmem:[#allocation45_spill] sm:$0xff]  ;;  %v19387_v44 = vand.u32 4294901760, %v20281_v36  ;;  %v20283_v20 = vld [vmem:[#allocation47_spill] sm:$0xff] }
 0x1d4   : > { %v4041_v16 = vand.u32 4294901760, %v4040_v62  ;;  %v19385_v23 = vand.u32 4294901760, %v20280_v58  ;;  %v2111_v51 = vand.u32 4294901760, %v2110_v41  ;;  %v2123_v38 = vand.u32 4294901760, %v2122_v46 }
 0x1d5   : > { %20278 = vst [vmem:[#allocation112_spill] sm:$0xff] %v14983_v53  ;;  %v2116_v59 = vsub.f32 %v20277_v30, %v19381_v39  ;;  %v2128_v6 = vsub.f32 %v20279_v54, %v19382_v11  ;;  %v19389_v56 = vand.u32 4294901760, %v20283_v20  ;;  %v4058_v39 = vsub.f32 %v20281_v36, %v19387_v44  ;;  %v20285_v53 = vld [vmem:[#allocation48_spill] sm:$0xff]  ;;  %v20286_v54 = vld [vmem:[#allocation49_spill] sm:$0xff] }
 0x1d6   : > { %v14991_v24 = vpack.c.bf16 %v4041_v16, %v4029_v19  ;;  %v4046_v62 = vsub.f32 %v20280_v58, %v19385_v23  ;;  %v15000_v41 = vpack.c.bf16 %v2123_v38, %v2111_v51  ;;  %v19391_v19 = vand.u32 4294901760, %v20285_v53  ;;  %v20287_v38 = vld [vmem:[#allocation50_spill] sm:$0xff] }
 0x1d7   : > { %v2117_v46 = vand.u32 4294901760, %v2116_v59  ;;  %v2129_v16 = vand.u32 4294901760, %v2128_v6  ;;  %v4052_v11 = vsub.f32 %v20283_v20, %v19389_v56  ;;  %v19393_v30 = vand.u32 4294901760, %v20286_v54 }
 0x1d8   : > { %20282 = vst [vmem:[#allocation113_spill] sm:$0xff] %v14991_v24  ;;  %20284 = vst [vmem:[#allocation114_spill] sm:$0xff] %v15000_v41  ;;  %v4047_v24 = vand.u32 4294901760, %v4046_v62  ;;  %v4059_v23 = vand.u32 4294901760, %v4058_v39  ;;  %v4064_v51 = vsub.f32 %v20285_v53, %v19391_v19  ;;  %v19396_v59 = vand.u32 4294901760, %v20287_v38  ;;  %v20288_v41 = vld [vmem:[#allocation51_spill] sm:$0xff] }
 0x1d9   : > { %v19397_v58 = vand.u32 4294901760, %v20288_v41  ;;  %v15015_v44 = vpack.c.bf16 %v2129_v16, %v2117_v46  ;;  %v4053_v36 = vand.u32 4294901760, %v4052_v11  ;;  %v2134_v6 = vsub.f32 %v20286_v54, %v19393_v30  ;;  %v20290_v62 = vld [vmem:[#allocation52_spill] sm:$0xff]  ;;  %v20292_v16 = vld [vmem:[#allocation53_spill] sm:$0xff] }
 0x1da   : > { %v19398_v56 = vand.u32 4294901760, %v20290_v62  ;;  %v15021_v20 = vpack.c.bf16 %v4059_v23, %v4047_v24  ;;  %v4065_v39 = vand.u32 4294901760, %v4064_v51  ;;  %v2146_v19 = vsub.f32 %v20287_v38, %v19396_v59 }
 0x1db   : > { %20289 = vst [vmem:[#allocation115_spill] sm:$0xff] %v15015_v44  ;;  %v2140_v53 = vsub.f32 %v20288_v41, %v19397_v58  ;;  %v2135_v46 = vand.u32 4294901760, %v2134_v6  ;;  %v19402_v30 = vand.u32 4294901760, %v20292_v16  ;;  %v20293_v44 = vld [vmem:[#allocation54_spill] sm:$0xff] }
 0x1dc   : > { %20291 = vst [vmem:[#allocation116_spill] sm:$0xff] %v15021_v20  ;;  %v2152_v11 = vsub.f32 %v20290_v62, %v19398_v56  ;;  %v19403_v54 = vand.u32 4294901760, %v20293_v44  ;;  %v15034_v23 = vpack.c.bf16 %v4065_v39, %v4053_v36  ;;  %v2147_v24 = vand.u32 4294901760, %v2146_v19  ;;  %v20295_v20 = vld [vmem:[#allocation55_spill] sm:$0xff]  ;;  %v20296_v56 = vld [vmem:[#allocation56_spill] sm:$0xff]  ;;  %v20299_v39 = vld [vmem:[#allocation58_spill] sm:$0xff] }
 0x1dd   : > { %v2141_v51 = vand.u32 4294901760, %v2140_v53  ;;  %v19405_v52 = vand.u32 4294901760, %v20295_v20  ;;  %v4070_v58 = vsub.f32 %v20292_v16, %v19402_v30  ;;  %v19408_v62 = vand.u32 4294901760, %v20296_v56  ;;  %v20298_v53 = vld [vmem:[#allocation57_spill] sm:$0xff] }
 0x1de   : > { %20294 = vst [vmem:[#allocation117_spill] sm:$0xff] %v15034_v23  ;;  %v2153_v59 = vand.u32 4294901760, %v2152_v11  ;;  %v4082_v6 = vsub.f32 %v20293_v44, %v19403_v54  ;;  %v15044_v41 = vpack.c.bf16 %v2147_v24, %v2135_v46  ;;  %v19409_v19 = vand.u32 4294901760, %v20298_v53 }
 0x1df   : > { %v4076_v36 = vsub.f32 %v20295_v20, %v19405_v52  ;;  %v19413_v11 = vand.u32 4294901760, %v20299_v39  ;;  %v4071_v38 = vand.u32 4294901760, %v4070_v58  ;;  %v4088_v54 = vsub.f32 %v20296_v56, %v19408_v62  ;;  %v20301_v52 = vld [vmem:[#allocation59_spill] sm:$0xff]  ;;  %v20303_v58 = vld [vmem:[#allocation60_spill] sm:$0xff] }
 0x1e0   : > { %20297 = vst [vmem:[#allocation118_spill] sm:$0xff] %v15044_v41  ;;  %v15051_v23 = vpack.c.bf16 %v2153_v59, %v2141_v51  ;;  %v4083_v30 = vand.u32 4294901760, %v4082_v6  ;;  %v2158_v46 = vsub.f32 %v20298_v53, %v19409_v19  ;;  %v19412_v41 = vand.u32 4294901760, %v20301_v52  ;;  %v20304_v6 = vld [vmem:[#allocation61_spill] sm:$0xff]  ;;  %v20305_v19 = vld [vmem:[#allocation62_spill] sm:$0xff] }
 0x1e1   : > { %v4077_v44 = vand.u32 4294901760, %v4076_v36  ;;  %v2170_v24 = vsub.f32 %v20299_v39, %v19413_v11  ;;  %v4089_v59 = vand.u32 4294901760, %v4088_v54  ;;  %v19414_v51 = vand.u32 4294901760, %v20303_v58 }
 0x1e2   : > { %20300 = vst [vmem:[#allocation58_spill] sm:$0xff] %v15051_v23  ;;  %v15063_v20 = vpack.c.bf16 %v4083_v30, %v4071_v38  ;;  %v19415_v23 = vand.u32 4294901760, %v20304_v6  ;;  %v2159_v16 = vand.u32 4294901760, %v2158_v46  ;;  %v2164_v36 = vsub.f32 %v20301_v52, %v19412_v41 }
 0x1e3   : > { %v2171_v62 = vand.u32 4294901760, %v2170_v24  ;;  %v19416_v53 = vand.u32 4294901760, %v20305_v19  ;;  %v15071_v56 = vpack.c.bf16 %v4089_v59, %v4077_v44  ;;  %v2176_v30 = vsub.f32 %v20303_v58, %v19414_v51 }
 0x1e4   : > { %20302 = vst [vmem:[#allocation59_spill] sm:$0xff] %v15063_v20  ;;  %v4094_v54 = vsub.f32 %v20304_v6, %v19415_v23  ;;  %v19417_v38 = vand.u32 4294901760, %v14812_v9  ;;  %v2165_v24 = vand.u32 4294901760, %v2164_v36  ;;  %v19418_v44 = vand.u32 4294901760, %v14814_v8 }
 0x1e5   : > { %20306 = vst [vmem:[#allocation60_spill] sm:$0xff] %v15071_v56  ;;  %v15080_v46 = vpack.c.bf16 %v2171_v62, %v2159_v16  ;;  %v4106_v41 = vsub.f32 %v20305_v19, %v19416_v53  ;;  %v2177_v59 = vand.u32 4294901760, %v2176_v30  ;;  %v19419_v56 = vand.u32 4294901760, %v14831_v49 }
 0x1e6   : > { %v4095_v11 = vand.u32 4294901760, %v4094_v54  ;;  %v4100_v51 = vsub.f32 %v14812_v9, %v19417_v38  ;;  %v4112_v62 = vsub.f32 %v14814_v8, %v19418_v44  ;;  %v19420_v16 = vand.u32 4294901760, %v14833_v55 }
 0x1e7   : > { %20307 = vst [vmem:[#allocation61_spill] sm:$0xff] %v15080_v46  ;;  %v4107_v23 = vand.u32 4294901760, %v4106_v41  ;;  %v19421_v36 = vand.u32 4294901760, %v14835_v1  ;;  %v15095_v53 = vpack.c.bf16 %v2177_v59, %v2165_v24  ;;  %v2182_v30 = vsub.f32 %v14831_v49, %v19419_v56 }
 0x1e8   : > { %v4101_v46 = vand.u32 4294901760, %v4100_v51  ;;  %v19422_v54 = vand.u32 4294901760, %v14837_v18  ;;  %v4113_v41 = vand.u32 4294901760, %v4112_v62  ;;  %v2194_v44 = vsub.f32 %v14833_v55, %v19420_v16 }
 0x1e9   : > { %20308 = vst [vmem:[#allocation62_spill] sm:$0xff] %v15095_v53  ;;  %v15101_v38 = vpack.c.bf16 %v4107_v23, %v4095_v11  ;;  %v2188_v20 = vsub.f32 %v14835_v1, %v19421_v36  ;;  %v2183_v24 = vand.u32 4294901760, %v2182_v30  ;;  %v19423_v59 = vand.u32 4294901760, %v14840_v7 }
 0x1ea   : > { %v2200_v51 = vsub.f32 %v14837_v18, %v19422_v54  ;;  %v19424_v56 = vand.u32 4294901760, %v14842_v47  ;;  %v15114_v23 = vpack.c.bf16 %v4113_v41, %v4101_v46  ;;  %v2195_v11 = vand.u32 4294901760, %v2194_v44 }
 0x1eb   : > { %20309 = vst [vmem:[#allocation119_spill] sm:$0xff] %v15101_v38  ;;  %v2189_v62 = vand.u32 4294901760, %v2188_v20  ;;  %v19425_v53 = vand.u32 4294901760, %v14853_v60  ;;  %v4118_v36 = vsub.f32 %v14840_v7, %v19423_v59  ;;  %v19426_v54 = vand.u32 4294901760, %v14855_v63 }
 0x1ec   : > { %20310 = vst [vmem:[#allocation120_spill] sm:$0xff] %v15114_v23  ;;  %v2201_v16 = vand.u32 4294901760, %v2200_v51  ;;  %v4130_v30 = vsub.f32 %v14842_v47, %v19424_v56  ;;  %v15124_v38 = vpack.c.bf16 %v2195_v11, %v2183_v24  ;;  %v19427_v20 = vand.u32 4294901760, %v14874_v37 }
 0x1ed   : > { %v4124_v46 = vsub.f32 %v14853_v60, %v19425_v53  ;;  %v19429_v44 = vand.u32 4294901760, %v14877_v17  ;;  %v4119_v51 = vand.u32 4294901760, %v4118_v36  ;;  %v4136_v56 = vsub.f32 %v14855_v63, %v19426_v54 }
 0x1ee   : > { %20311 = vst [vmem:[#allocation121_spill] sm:$0xff] %v15124_v38  ;;  %v15131_v41 = vpack.c.bf16 %v2201_v16, %v2189_v62  ;;  %v4131_v59 = vand.u32 4294901760, %v4130_v30  ;;  %v2206_v24 = vsub.f32 %v14874_v37, %v19427_v20  ;;  %v19428_v53 = vand.u32 4294901760, %v14879_v43 }
 0x1ef   : > { %v4125_v23 = vand.u32 4294901760, %v4124_v46  ;;  %v2218_v11 = vsub.f32 %v14877_v17, %v19429_v44  ;;  %v4137_v16 = vand.u32 4294901760, %v4136_v56  ;;  %v19430_v36 = vand.u32 4294901760, %v14881_v3 }
 0x1f0   : > { %20312 = vst [vmem:[#allocation122_spill] sm:$0xff] %v15131_v41  ;;  %v15143_v38 = vpack.c.bf16 %v4131_v59, %v4119_v51  ;;  %v19431_v62 = vand.u32 4294901760, %v14884_v61  ;;  %v2207_v30 = vand.u32 4294901760, %v2206_v24  ;;  %v2212_v46 = vsub.f32 %v14879_v43, %v19428_v53 }
 0x1f1   : > { %v2219_v54 = vand.u32 4294901760, %v2218_v11  ;;  %v19432_v20 = vand.u32 4294901760, %v14886_v42  ;;  %v15151_v41 = vpack.c.bf16 %v4137_v16, %v4125_v23  ;;  %v2224_v59 = vsub.f32 %v14881_v3, %v19430_v36 }
 0x1f2   : > { %20313 = vst [vmem:[#allocation123_spill] sm:$0xff] %v15143_v38  ;;  %v4142_v56 = vsub.f32 %v14884_v61, %v19431_v62  ;;  %v19433_v51 = vand.u32 4294901760, %v14888_v2  ;;  %v2213_v11 = vand.u32 4294901760, %v2212_v46  ;;  %v19434_v23 = vand.u32 4294901760, %v14890_v5 }
 0x1f3   : > { %20314 = vst [vmem:[#allocation124_spill] sm:$0xff] %v15151_v41  ;;  %v15160_v24 = vpack.c.bf16 %v2219_v54, %v2207_v30  ;;  %v4154_v53 = vsub.f32 %v14886_v42, %v19432_v20  ;;  %v2225_v16 = vand.u32 4294901760, %v2224_v59  ;;  %v19435_v41 = vand.u32 4294901760, %v14893_v0 }
 0x1f4   : > { %v4143_v44 = vand.u32 4294901760, %v4142_v56  ;;  %v4148_v36 = vsub.f32 %v14888_v2, %v19433_v51  ;;  %v4160_v54 = vsub.f32 %v14890_v5, %v19434_v23  ;;  %v19436_v30 = vand.u32 4294901760, %v14895_v32 }
 0x1f5   : > { %20315 = vst [vmem:[#allocation125_spill] sm:$0xff] %v15160_v24  ;;  %v4155_v62 = vand.u32 4294901760, %v4154_v53  ;;  %v19437_v46 = vand.u32 4294901760, %v14897_v10  ;;  %v15175_v20 = vpack.c.bf16 %v2225_v16, %v2213_v11  ;;  %v2230_v59 = vsub.f32 %v14893_v0, %v19435_v41 }
 0x1f6   : > { %v4149_v24 = vand.u32 4294901760, %v4148_v36  ;;  %v19438_v56 = vand.u32 4294901760, %v14899_v50  ;;  %v4161_v53 = vand.u32 4294901760, %v4160_v54  ;;  %v2242_v23 = vsub.f32 %v14895_v32, %v19436_v30 }
 0x1f7   : > { %20316 = vst [vmem:[#allocation126_spill] sm:$0xff] %v15175_v20  ;;  %v15181_v51 = vpack.c.bf16 %v4155_v62, %v4143_v44  ;;  %v2236_v38 = vsub.f32 %v14897_v10, %v19437_v46  ;;  %v2231_v11 = vand.u32 4294901760, %v2230_v59  ;;  %v19439_v30 = vand.u32 4294901760, %v14906_v45  ;;  %v20331_v44 = vld [vmem:[#allocation54_spill] sm:$0xff] }
 0x1f8   : > { %v2248_v36 = vsub.f32 %v14899_v50, %v19438_v56  ;;  %v15196_v62 = vpack.c.bf16 %v4161_v53, %v4149_v24  ;;  %v2243_v54 = vand.u32 4294901760, %v2242_v23  ;;  %v19440_v46 = vand.u32 4294901760, %v14908_v13 }
 0x1f9   : > { %20317 = vst [vmem:[#allocation127_spill] sm:$0xff] %v15181_v51  ;;  %v2237_v41 = vand.u32 4294901760, %v2236_v38  ;;  %v19441_v59 = vand.u32 4294901760, %v14910_v21  ;;  %v19444_v51 = vand.u32 4294901760, %v14918_v35  ;;  %v2254_v16 = vsub.f32 %v14906_v45, %v19439_v30  ;;  %v20323_v30 = vld [vmem:[#allocation46_spill] sm:$0xff] }
 0x1fa   : > { %v2249_v20 = vand.u32 4294901760, %v2248_v36  ;;  %v15202_v56 = vpack.c.bf16 %v2243_v54, %v2231_v11  ;;  %v2266_v53 = vsub.f32 %v14908_v13, %v19440_v46 }
 0x1fb   : > { %v2260_v11 = vsub.f32 %v14910_v21, %v19441_v59  ;;  %v2272_v36 = vsub.f32 %v14918_v35, %v19444_v51  ;;  %v2255_v54 = vand.u32 4294901760, %v2254_v16  ;;  %v20328_v59 = vld [vmem:[#allocation51_spill] sm:$0xff]  ;;  %v20333_v51 = vld [vmem:[#allocation56_spill] sm:$0xff] }
 0x1fc   : > { %v15211_v23 = vpack.c.bf16 %v2249_v20, %v2237_v41  ;;  %v2267_v38 = vand.u32 4294901760, %v2266_v53  ;;  %v20325_v20 = vld [vmem:[#allocation48_spill] sm:$0xff] }
 0x1fd   : > { %v2261_v46 = vand.u32 4294901760, %v2260_v11  ;;  %v2273_v24 = vand.u32 4294901760, %v2272_v36  ;;  %v20326_v11 = vld [vmem:[#allocation49_spill] sm:$0xff]  ;;  %v20327_v36 = vld [vmem:[#allocation50_spill] sm:$0xff] }
 0x1fe   : > { %v15238_v4 = vpack.c.bf16 %v2267_v38, %v2255_v54 }
 0x1ff   : > { %v15240_v53 = vpack.c.bf16 %v2273_v24, %v2261_v46 }
 0x26e   : > { %v11268_v40 = vpop.f32.mrb[0].mxu1 }
 0x26f   : > { %v1890_v46 = vpop.f32.mrb[1].mxu1 }
 0x27e   : > { %v11238_v48 = vpop.f32.mrb[0].mxu0 }
 0x27f   : > { %v15282_v41 = vand.u32 4294901760, %v11238_v48  ;;  %v1395_v24 = vpop.f32.mrb[1].mxu0 }
 0x280   : > { %v15284_v43 = vand.u32 4294901760, %v1395_v24 }
 0x281   : > { %20335 = vst [vmem:[#allocation46_spill] sm:$0xff] %v15282_v41  ;;  %v15287_v54 = vsub.f32 %v11238_v48, %v15282_v41 }
 0x282   : > { %20336 = vst [vmem:[#allocation47_spill] sm:$0xff] %v15284_v43  ;;  %v15290_v31 = vsub.f32 %v1395_v24, %v15284_v43  ;;  %v11243_v16 = vpop.f32.mrb[2].mxu0 }
 0x283   : > { %20337 = vst [vmem:[#allocation48_spill] sm:$0xff] %v15287_v54  ;;  %v13207_v10 = vadd.f32 %v11268_v40, %v11243_v16  ;;  %v1483_v12 = vpop.f32.mrb[3].mxu0  ;;  %v15296_v21 = vand.u32 4294901760, %v15287_v54 }
 0x284   : > { %20338 = vst [vmem:[#allocation49_spill] sm:$0xff] %v15290_v31  ;;  %v15293_v45 = vand.u32 4294901760, %v15290_v31  ;;  %v13208_v38 = vadd.f32 %v1890_v46, %v1483_v12 }
 0x285   : > { %20340 = vst [vmem:[#allocation51_spill] sm:$0xff] %v15296_v21  ;;  %v15298_v35 = vand.u32 4294901760, %v13207_v10  ;;  %v2979_v12 = vsub.f32 %v15287_v54, %v15296_v21  ;;  %v20353_v54 = vld [vmem:[#allocation37_spill] sm:$0xff] }
 0x286   : > { %20339 = vst [vmem:[#allocation50_spill] sm:$0xff] %v15293_v45  ;;  %v15300_v13 = vand.u32 4294901760, %v13208_v38  ;;  %v2968_v48 = vsub.f32 %v15290_v31, %v15293_v45  ;;  %v20348_v45 = vld [vmem:[#allocation110_spill] sm:$0xff]  ;;  %v20350_v31 = vld [vmem:[#allocation111_spill] sm:$0xff] }
 0x287   : > { %20341 = vst [vmem:[#allocation52_spill] sm:$0xff] %v15298_v35  ;;  %v15305_v24 = vsub.f32 %v13207_v10, %v15298_v35  ;;  %v20349_v10 = vmov 0.0  }
 0x288   : > { %20342 = vst [vmem:[#allocation53_spill] sm:$0xff] %v15300_v13  ;;  %v15308_v40 = vsub.f32 %v13208_v38, %v15300_v13  ;;  %v15310_v16 = vand.u32 4294901760, %v2968_v48  ;;  %v15324_v38 = vand.u32 4294901760, %v2979_v12  ;;  %v20356_v12 = vld [vmem:[#allocation114_spill] sm:$0xff] }
 0x289   : > { %20343 = vst [vmem:[#allocation54_spill] sm:$0xff] %v15305_v24  ;;  %v15319_v50 = vand.u32 4294901760, %v15305_v24 }
 0x28a   : > { %20344 = vst [vmem:[#allocation55_spill] sm:$0xff] %v15308_v40  ;;  %20345 = vst [vmem:[#allocation56_spill] sm:$0xff] %v15310_v16  ;;  %v15315_v46 = vand.u32 4294901760, %v15308_v40  ;;  %3954 = vmatmul.mubr.f32.vlgmr.msra.gmra.mrb[2].mxu1 %v15310_v16 }
 0x28b   : > { %20347 = vst [vmem:[#allocation128_spill] sm:$0xff] %v15319_v50  ;;  %11898 = vmatpush1.bf16.msra.mxu1 %v20348_v45  ;;  %3959 = vmatprep.mubr.f32.mxu1 %v20349_v10  ;;  %20351 = vst [vmem:[#allocation110_spill] sm:$0xff] %v15324_v38  ;;  %v2075_v16 = vsub.f32 %v15305_v24, %v15319_v50  ;;  %v20354_v45 = vld [vmem:[#allocation112_spill] sm:$0xff]  ;;  %v20371_v24 = vld [vmem:[#allocation123_spill] sm:$0xff] }
 0x28c   : > { %20346 = vst [vmem:[#allocation57_spill] sm:$0xff] %v15315_v46  ;;  %11900 = vmatprep.subr.bf16.mxu1 %v20350_v31  ;;  %v2064_v48 = vsub.f32 %v15308_v40, %v15315_v46  ;;  %v20355_v31 = vld [vmem:[#allocation38_spill] sm:$0xff]  ;;  %v20359_v50 = vld [vmem:[#allocation116_spill] sm:$0xff] }
 0x28d   : > { %v20364_v46 = vld [vmem:[#allocation58_spill] sm:$0xff] }
 0x28e   : > { %3965 = vmatmul.mubr.f32.gmra.mrb[4].mxu1 %v15324_v38  ;;  %v15329_v21 = vand.u32 4294901760, %v2064_v48  ;;  %v15340_v38 = vand.u32 4294901760, %v2075_v16  ;;  %v20358_v48 = vld [vmem:[#allocation113_spill] sm:$0xff] }
 0x28f   : > { %11902 = vmatpush1.bf16.msra.mxu1 %v20353_v54  ;;  %4195 = vmatprep.mubr.f32.mxu1 %v20349_v10  ;;  %v20360_v54 = vld [vmem:[#allocation115_spill] sm:$0xff]  ;;  %v20365_v16 = vld [vmem:[#allocation61_spill] sm:$0xff] }
 0x290   : > { %20352 = vst [vmem:[#allocation111_spill] sm:$0xff] %v15329_v21  ;;  %2066 = vmatmul.mubr.f32.vlgmr.msra.gmra.mrb[4].mxu0 %v15329_v21  ;;  %11904 = vmatprep.subr.bf16.mxu1 %v20354_v45  ;;  %20357 = vst [vmem:[#allocation37_spill] sm:$0xff] %v15340_v38  ;;  %v20361_v21 = vld [vmem:[#allocation118_spill] sm:$0xff]  ;;  %v20362_v45 = vld [vmem:[#allocation117_spill] sm:$0xff] }
 0x291   : > { %11514 = vmatpush1.bf16.msra.mxu0 %v20355_v31  ;;  %2071 = vmatprep.mubr.f32.mxu0 %v20349_v10  ;;  %v20363_v31 = vld [vmem:[#allocation59_spill] sm:$0xff] }
 0x292   : > { %11516 = vmatprep.subr.bf16.mxu0 %v20356_v12  ;;  %v20366_v12 = vld [vmem:[#allocation60_spill] sm:$0xff] }
 0x293   : > { %11906 = vmatpush1.bf16.msra.mxu1 %v20358_v48  ;;  %v20367_v48 = vld [vmem:[#allocation119_spill] sm:$0xff] }
 0x294   : > { %2077 = vmatmul.mubr.f32.gmra.mrb[6].mxu0 %v15340_v38  ;;  %11908 = vmatprep.subr.bf16.mxu1 %v20359_v50  ;;  %v20368_v38 = vld [vmem:[#allocation62_spill] sm:$0xff]  ;;  %v20369_v50 = vld [vmem:[#allocation121_spill] sm:$0xff] }
 0x295   : > { %11518 = vmatpush1.bf16.msra.mxu0 %v20360_v54  ;;  %2307 = vmatprep.mubr.f32.mxu0 %v20349_v10  ;;  %v20370_v54 = vld [vmem:[#allocation120_spill] sm:$0xff] }
 0x296   : > { %11520 = vmatprep.subr.bf16.mxu0 %v20361_v21  ;;  %v20372_v21 = vld [vmem:[#allocation122_spill] sm:$0xff] }
 0x297   : > { %11910 = vmatpush1.bf16.msra.mxu1 %v20362_v45  ;;  %v20373_v45 = vld [vmem:[#allocation125_spill] sm:$0xff] }
 0x298   : > { %11912 = vmatprep.subr.bf16.mxu1 %v20363_v31  ;;  %v20374_v31 = vld [vmem:[#allocation124_spill] sm:$0xff] }
 0x299   : > { %11522 = vmatpush1.bf16.msra.mxu0 %v20364_v46  ;;  %v20375_v46 = vld [vmem:[#allocation127_spill] sm:$0xff] }
 0x29a   : > { %11524 = vmatprep.subr.bf16.mxu0 %v20365_v16  ;;  %v20376_v16 = vld [vmem:[#allocation126_spill] sm:$0xff] }
 0x29b   : > { %11914 = vmatpush1.bf16.msra.mxu1 %v20366_v12  ;;  %v20379_v12 = vld [vmem:[#allocation30_spill] sm:$0xff] }
 0x29c   : > { %11916 = vmatprep.subr.bf16.mxu1 %v20367_v48 }
 0x29d   : > { %11526 = vmatpush1.bf16.msra.mxu0 %v20368_v38  ;;  %v20377_v38 = vpack.c.bf16 %v14284_v27, %v14279_v26 }
 0x29e   : > { %11528 = vmatprep.subr.bf16.mxu0 %v20369_v50 }
 0x29f   : > { %11918 = vmatpush1.bf16.msra.mxu1 %v20370_v54  ;;  %v20385_v54 = vld [vmem:[#allocation32_spill] sm:$0xff] }
 0x2a0   : > { %11920 = vmatprep.subr.bf16.mxu1 %v20371_v24  ;;  %v20378_v24 = vpack.c.bf16 %v14304_v33, %v14289_v28 }
 0x2a1   : > { %11530 = vmatpush1.bf16.msra.mxu0 %v20372_v21 }
 0x2a2   : > { %11532 = vmatprep.subr.bf16.mxu0 %v20373_v45  ;;  %v20388_v45 = vpack.c.bf16 %v20270_v57, %v20269_v15 }
 0x2a3   : > { %11922 = vmatpush1.bf16.msra.mxu1 %v20374_v31  ;;  %v20389_v31 = vld [vmem:[#allocation36_spill] sm:$0xff] }
 0x2a4   : > { %11924 = vmatprep.subr.bf16.mxu1 %v20375_v46 }
 0x2a5   : > { %11534 = vmatpush1.bf16.msra.mxu0 %v20376_v16  ;;  %v20392_v16 = vld [vmem:[#allocation42_spill] sm:$0xff] }
 0x2a6   : > { %11536 = vmatprep.subr.bf16.mxu0 %v15202_v56  ;;  %v20380_v56 = vld [vmem:[#allocation29_spill] sm:$0xff] }
 0x2a7   : > { %11926 = vmatpush1.bf16.msra.mxu1 %v15196_v62  ;;  %v20381_v48 = vpack.c.bf16 %v20379_v12, %v20380_v56  ;;  %v20382_v62 = vld [vmem:[#allocation34_spill] sm:$0xff] }
 0x2a8   : > { %11928 = vmatprep.subr.bf16.mxu1 %v20377_v38  ;;  %v20393_v38 = vld [vmem:[#allocation41_spill] sm:$0xff] }
 0x2a9   : > { %11538 = vmatpush1.bf16.msra.mxu0 %v15211_v23  ;;  %v20383_v23 = vld [vmem:[#allocation33_spill] sm:$0xff] }
 0x2aa   : > { %4197 = vmatmul.mubr.f32.vlgmr.msra.gmra.mrb[2].mxu1 %v15284_v43  ;;  %11540 = vmatprep.subr.bf16.mxu0 %v15238_v4  ;;  %v20384_v50 = vpack.c.bf16 %v20382_v62, %v20383_v23  ;;  %v20386_v4 = vld [vmem:[#allocation31_spill] sm:$0xff] }
 0x2ab   : > { %11930 = vmatpush1.bf16.msra.mxu1 %v20378_v24  ;;  %4202 = vmatprep.mubr.f32.mxu1 %v20349_v10  ;;  %v20387_v21 = vpack.c.bf16 %v20385_v54, %v20386_v4  ;;  %v20394_v24 = vpack.c.bf16 %v20392_v16, %v20393_v38  ;;  %v20401_v43 = vld [vmem:[#allocation43_spill] sm:$0xff] }
 0x2ac   : > { %11932 = vmatprep.subr.bf16.mxu1 %v20381_v48  ;;  %v20395_v48 = vld [vmem:[#allocation40_spill] sm:$0xff] }
 0x2ad   : > { %11542 = vmatpush1.bf16.msra.mxu0 %v15240_v53  ;;  %v20390_v53 = vld [vmem:[#allocation35_spill] sm:$0xff] }
 0x2ae   : > { %4204 = vmatmul.mubr.f32.gmra.mrb[4].mxu1 %v15282_v41  ;;  %11544 = vmatprep.subr.bf16.mxu0 %v20384_v50  ;;  %v20391_v46 = vpack.c.bf16 %v20389_v31, %v20390_v53  ;;  %v20396_v50 = vld [vmem:[#allocation39_spill] sm:$0xff] }
 0x2af   : > { %11934 = vmatpush1.bf16.msra.mxu1 %v20387_v21  ;;  %4338 = vmatprep.mubr.f32.mxu1 %v20349_v10  ;;  %v20397_v21 = vpack.c.bf16 %v20395_v48, %v20396_v50 }
 0x2b0   : > { %2309 = vmatmul.mubr.f32.vlgmr.msra.gmra.mrb[4].mxu0 %v15300_v13  ;;  %11936 = vmatprep.subr.bf16.mxu1 %v20388_v45  ;;  %v20398_v13 = vld [vmem:[#allocation45_spill] sm:$0xff]  ;;  %v20400_v45 = vld [vmem:[#allocation44_spill] sm:$0xff] }
 0x2b1   : > { %11546 = vmatpush1.bf16.msra.mxu0 %v20391_v46  ;;  %2314 = vmatprep.mubr.f32.mxu0 %v20349_v10  ;;  %v20399_v41 = vpack.c.bf16 %v20323_v30, %v20398_v13  ;;  %v20402_v31 = vpack.c.bf16 %v20400_v45, %v20401_v43  ;;  %v20403_v46 = vpack.c.bf16 %v20327_v36, %v20326_v11 }
 0x2b2   : > { %11548 = vmatprep.subr.bf16.mxu0 %v20394_v24  ;;  %v20404_v24 = vpack.c.bf16 %v20325_v20, %v20324_v25 }
 0x2b3   : > { %11938 = vmatpush1.bf16.msra.mxu1 %v20397_v21  ;;  %v20405_v21 = vpack.c.bf16 %v20331_v44, %v20330_v22 }
 0x2b4   : > { %2316 = vmatmul.mubr.f32.gmra.mrb[6].mxu0 %v15298_v35  ;;  %11940 = vmatprep.subr.bf16.mxu1 %v20399_v41  ;;  %v20406_v41 = vpack.c.bf16 %v20329_v14, %v20328_v59  ;;  %v20408_v35 = vpack.c.bf16 %v20333_v51, %v20332_v34 }
 0x2b5   : > { %11550 = vmatpush1.bf16.msra.mxu0 %v20402_v31  ;;  %2450 = vmatprep.mubr.f32.mxu0 %v20349_v10  ;;  %v20407_v31 = vpack.c.bf16 %v20299_v39, %v20334_v29 }
 0x2b6   : > { %11552 = vmatprep.subr.bf16.mxu0 %v20403_v46  ;;  %v20409_v46 = vpack.c.bf16 %v20305_v19, %v20304_v6 }
 0x2b7   : > { %11942 = vmatpush1.bf16.msra.mxu1 %v20404_v24  ;;  %v20410_v24 = vpack.c.bf16 %v20303_v58, %v20301_v52 }
 0x2b8   : > { %11944 = vmatprep.subr.bf16.mxu1 %v20405_v21  ;;  %v20411_v21 = vpack.c.bf16 %v14833_v55, %v14831_v49 }
 0x2b9   : > { %11554 = vmatpush1.bf16.msra.mxu0 %v20406_v41  ;;  %v20412_v41 = vpack.c.bf16 %v14814_v8, %v14812_v9 }
 0x2ba   : > { %11556 = vmatprep.subr.bf16.mxu0 %v20407_v31  ;;  %v20413_v31 = vpack.c.bf16 %v14842_v47, %v14840_v7 }
 0x2bb   : > { %11946 = vmatpush1.bf16.msra.mxu1 %v20408_v35  ;;  %v20414_v35 = vpack.c.bf16 %v14837_v18, %v14835_v1 }
 0x2bc   : > { %11948 = vmatprep.subr.bf16.mxu1 %v20409_v46  ;;  %v20415_v46 = vpack.c.bf16 %v14877_v17, %v14874_v37 }
 0x2bd   : > { %11558 = vmatpush1.bf16.msra.mxu0 %v20410_v24  ;;  %v20416_v24 = vpack.c.bf16 %v14855_v63, %v14853_v60  ;;  %v20423_v63 = vld [vmem:[#allocation103_spill] sm:$0xff] }
 0x2be   : > { %11560 = vmatprep.subr.bf16.mxu0 %v20411_v21  ;;  %v20417_v21 = vpack.c.bf16 %v14886_v42, %v14884_v61  ;;  %v20426_v42 = vld [vmem:[#allocation49_spill] sm:$0xff] }
 0x2bf   : > { %11950 = vmatpush1.bf16.msra.mxu1 %v20412_v41  ;;  %v20418_v41 = vld [vmem:[#allocation96_spill] sm:$0xff]  ;;  %v20428_v61 = vld [vmem:[#allocation105_spill] sm:$0xff] }
 0x2c0   : > { %11952 = vmatprep.subr.bf16.mxu1 %v20413_v31  ;;  %v20419_v47 = vpack.c.bf16 %v14881_v3, %v20418_v41  ;;  %v20420_v31 = vpack.c.bf16 %v14895_v32, %v14893_v0  ;;  %v20432_v32 = vld [vmem:[#allocation109_spill] sm:$0xff] }
 0x2c1   : > { %11562 = vmatpush1.bf16.msra.mxu0 %v20414_v35  ;;  %v20421_v35 = vpack.c.bf16 %v14890_v5, %v14888_v2 }
 0x2c2   : > { %11564 = vmatprep.subr.bf16.mxu0 %v20415_v46  ;;  %v20422_v46 = vld [vmem:[#allocation63_spill] sm:$0xff] }
 0x2c3   : > { %11954 = vmatpush1.bf16.msra.mxu1 %v20416_v24  ;;  %v20424_v24 = vld [vmem:[#allocation102_spill] sm:$0xff] }
 0x2c4   : > { %11956 = vmatprep.subr.bf16.mxu1 %v20417_v21  ;;  %v20425_v60 = vpack.c.bf16 %v20423_v63, %v20424_v24  ;;  %v20427_v21 = vld [vmem:[#allocation106_spill] sm:$0xff]  ;;  %v20436_v63 = vld [vmem:[#allocation73_spill] sm:$0xff] }
 0x2c5   : > { %11566 = vmatpush1.bf16.msra.mxu0 %v20419_v47  ;;  %v20429_v3 = vpack.c.bf16 %v20427_v21, %v20428_v61  ;;  %v20430_v47 = vld [vmem:[#allocation64_spill] sm:$0xff]  ;;  %v20469_v21 = vld [vmem:[#allocation95_spill] sm:$0xff] }
 0x2c6   : > { %11568 = vmatprep.subr.bf16.mxu0 %v20420_v31  ;;  %v20431_v31 = vld [vmem:[#allocation65_spill] sm:$0xff] }
 0x2c7   : > { %11958 = vmatpush1.bf16.msra.mxu1 %v20421_v35  ;;  %v20433_v35 = vld [vmem:[#allocation107_spill] sm:$0xff] }
 0x2c8   : > { %11960 = vmatprep.subr.bf16.mxu1 %v20422_v46  ;;  %v20434_v0 = vpack.c.bf16 %v20432_v32, %v20433_v35  ;;  %v20435_v46 = vld [vmem:[#allocation48_spill] sm:$0xff]  ;;  %v20455_v35 = vld [vmem:[#allocation85_spill] sm:$0xff] }
 0x2c9   : > { %11570 = vmatpush1.bf16.msra.mxu0 %v20425_v60  ;;  %v20437_v60 = vld [vmem:[#allocation66_spill] sm:$0xff]  ;;  %v20449_v32 = vld [vmem:[#allocation80_spill] sm:$0xff] }
 0x2ca   : > { %4341 = vmatmul.mubr.f32.vlgmr.msra.gmra.mrb[2].mxu1 %v20426_v42  ;;  %11572 = vmatprep.subr.bf16.mxu0 %v20429_v3  ;;  %v20438_v3 = vld [vmem:[#allocation67_spill] sm:$0xff] }
 0x2cb   : > { %11962 = vmatpush1.bf16.msra.mxu1 %v20430_v47  ;;  %4346 = vmatprep.mubr.f32.mxu1 %v20349_v10  ;;  %v20439_v42 = vld [vmem:[#allocation75_spill] sm:$0xff]  ;;  %v20441_v47 = vld [vmem:[#allocation68_spill] sm:$0xff] }
 0x2cc   : > { %11964 = vmatprep.subr.bf16.mxu1 %v20431_v31  ;;  %v20440_v31 = vld [vmem:[#allocation76_spill] sm:$0xff] }
 0x2cd   : > { %11574 = vmatpush1.bf16.msra.mxu0 %v20434_v0  ;;  %v20442_v0 = vld [vmem:[#allocation54_spill] sm:$0xff] }
 0x2ce   : > { %4349 = vmatmul.mubr.f32.gmra.mrb[4].mxu1 %v20435_v46  ;;  %11576 = vmatprep.subr.bf16.mxu0 %v20436_v63  ;;  %v20443_v46 = vld [vmem:[#allocation69_spill] sm:$0xff] }
 0x2cf   : > { %11966 = vmatpush1.bf16.msra.mxu1 %v20437_v60  ;;  %4451 = vmatprep.mubr.f32.mxu1 %v20349_v10  ;;  %v20444_v63 = vld [vmem:[#allocation77_spill] sm:$0xff]  ;;  %v20445_v60 = vld [vmem:[#allocation78_spill] sm:$0xff] }
 0x2d0   : > { %2453 = vmatmul.mubr.f32.vlgmr.msra.gmra.mrb[4].mxu0 %v15308_v40  ;;  %11968 = vmatprep.subr.bf16.mxu1 %v20438_v3  ;;  %v20446_v40 = vld [vmem:[#allocation70_spill] sm:$0xff]  ;;  %v20447_v3 = vld [vmem:[#allocation71_spill] sm:$0xff] }
 0x2d1   : > { %11578 = vmatpush1.bf16.msra.mxu0 %v20439_v42  ;;  %2458 = vmatprep.mubr.f32.mxu0 %v20349_v10  ;;  %v20448_v42 = vld [vmem:[#allocation79_spill] sm:$0xff] }
 0x2d2   : > { %11580 = vmatprep.subr.bf16.mxu0 %v20440_v31  ;;  %v20450_v31 = vld [vmem:[#allocation72_spill] sm:$0xff] }
 0x2d3   : > { %11970 = vmatpush1.bf16.msra.mxu1 %v20441_v47  ;;  %v20451_v47 = vld [vmem:[#allocation74_spill] sm:$0xff] }
 0x2d4   : > { %2461 = vmatmul.mubr.f32.gmra.mrb[6].mxu0 %v20442_v0  ;;  %11972 = vmatprep.subr.bf16.mxu1 %v20443_v46  ;;  %v20452_v0 = vld [vmem:[#allocation81_spill] sm:$0xff]  ;;  %v20453_v46 = vld [vmem:[#allocation83_spill] sm:$0xff] }
 0x2d5   : > { %11582 = vmatpush1.bf16.msra.mxu0 %v20444_v63  ;;  %2563 = vmatprep.mubr.f32.mxu0 %v20349_v10  ;;  %v20454_v63 = vld [vmem:[#allocation82_spill] sm:$0xff] }
 0x2d6   : > { %11584 = vmatprep.subr.bf16.mxu0 %v20445_v60  ;;  %v20456_v60 = vld [vmem:[#allocation84_spill] sm:$0xff] }
 0x2d7   : > { %11974 = vmatpush1.bf16.msra.mxu1 %v20446_v40  ;;  %v20457_v40 = vld [vmem:[#allocation87_spill] sm:$0xff] }
 0x2d8   : > { %11976 = vmatprep.subr.bf16.mxu1 %v20447_v3  ;;  %v20458_v3 = vld [vmem:[#allocation86_spill] sm:$0xff] }
 0x2d9   : > { %11586 = vmatpush1.bf16.msra.mxu0 %v20448_v42  ;;  %v20459_v42 = vld [vmem:[#allocation90_spill] sm:$0xff] }
 0x2da   : > { %11588 = vmatprep.subr.bf16.mxu0 %v20449_v32 }
 0x2db   : > { %11978 = vmatpush1.bf16.msra.mxu1 %v20450_v31  ;;  %v20460_v31 = vand.u32 4294901760, %v14279_v26 }
 0x2dc   : > { %11980 = vmatprep.subr.bf16.mxu1 %v20451_v47  ;;  %v20461_v47 = vand.u32 4294901760, %v14284_v27  ;;  %v20470_v27 = vld [vmem:[#allocation50_spill] sm:$0xff] }
 0x2dd   : > { %11590 = vmatpush1.bf16.msra.mxu0 %v20452_v0  ;;  %v20462_v0 = vld [vmem:[#allocation88_spill] sm:$0xff] }
 0x2de   : > { %11592 = vmatprep.subr.bf16.mxu0 %v20453_v46  ;;  %v11991_v32 = vpack.c.bf16 %v20461_v47, %v20460_v31  ;;  %v20463_v46 = vld [vmem:[#allocation92_spill] sm:$0xff]  ;;  %v20472_v31 = vand.u32 4294901760, %v20383_v23  ;;  %v20479_v23 = vand.u32 4294901760, %v20390_v53  ;;  %v20487_v53 = vld [vmem:[#allocation57_spill] sm:$0xff] }
 0x2df   : > { %11982 = vmatpush1.bf16.msra.mxu1 %v20454_v63  ;;  %v20464_v63 = vld [vmem:[#allocation91_spill] sm:$0xff]  ;;  %v20471_v47 = vld [vmem:[#allocation104_spill] sm:$0xff] }
 0x2e0   : > { %11984 = vmatprep.subr.bf16.mxu1 %v20455_v35  ;;  %v20465_v35 = vand.u32 4294901760, %v14289_v28 }
 0x2e1   : > { %11594 = vmatpush1.bf16.msra.mxu0 %v20456_v60  ;;  %v20466_v60 = vand.u32 4294901760, %v14304_v33  ;;  %v20474_v33 = vand.u32 4294901760, %v20386_v4  ;;  %v20483_v4 = vand.u32 4294901760, %v20393_v38  ;;  %v20491_v38 = vand.u32 4294901760, %v20400_v45 }
 0x2e2   : > { %11596 = vmatprep.subr.bf16.mxu0 %v20457_v40  ;;  %v20498_v45 = vand.u32 4294901760, %v20331_v44  ;;  %v20504_v44 = vand.u32 4294901760, %v20333_v51  ;;  %v20510_v51 = vand.u32 4294901760, %v14833_v55  ;;  %v20517_v55 = vand.u32 4294901760, %v14837_v18 }
 0x2e3   : > { %11986 = vmatpush1.bf16.msra.mxu1 %v20458_v3  ;;  %v11993_v40 = vpack.c.bf16 %v20466_v60, %v20465_v35  ;;  %v20467_v3 = vand.u32 4294901760, %v20380_v56  ;;  %v20477_v56 = vand.u32 4294901760, %v20270_v57  ;;  %v20478_v60 = vld [vmem:[#allocation108_spill] sm:$0xff]  ;;  %v20486_v57 = vand.u32 4294901760, %v20395_v48 }
 0x2e4   : > { %11988 = vmatprep.subr.bf16.mxu1 %v20459_v42  ;;  %v20468_v42 = vand.u32 4294901760, %v20379_v12  ;;  %v20492_v48 = vand.u32 4294901760, %v20326_v11  ;;  %v20499_v11 = vand.u32 4294901760, %v20328_v59  ;;  %v20506_v59 = vand.u32 4294901760, %v20305_v19 }
 0x2e5   : > { %11598 = vmatpush1.bf16.msra.mxu0 %v20462_v0  ;;  %v20512_v19 = vand.u32 4294901760, %v14814_v8  ;;  %v20518_v8 = vand.u32 4294901760, %v14874_v37 }
 0x2e6   : > { %11600 = vmatprep.subr.bf16.mxu0 %v20463_v46  ;;  %v11995_v26 = vpack.c.bf16 %v20468_v42, %v20467_v3  ;;  %v20476_v42 = vand.u32 4294901760, %v20269_v15  ;;  %v20482_v3 = vld [vmem:[#allocation51_spill] sm:$0xff]  ;;  %v20485_v15 = vand.u32 4294901760, %v20396_v50 }
 0x2e7   : > { %11990 = vmatpush1.bf16.msra.mxu1 %v20464_v63  ;;  %v20473_v63 = vand.u32 4294901760, %v20382_v62  ;;  %v20480_v62 = vld [vmem:[#allocation36_spill] sm:$0xff] }
 0x2e8   : > { %11992 = vmatprep.subr.bf16.mxu1 %v11991_v32  ;;  %v20475_v32 = vand.u32 4294901760, %v20385_v54  ;;  %v11999_v35 = vpack.c.bf16 %v20477_v56, %v20476_v42  ;;  %v20484_v54 = vand.u32 4294901760, %v20392_v16  ;;  %v20490_v16 = vand.u32 4294901760, %v20401_v43 }
 0x2e9   : > { %11602 = vmatpush1.bf16.msra.mxu0 %v20469_v21  ;;  %v11607_v28 = vpack.c.bf16 %v20473_v63, %v20472_v31  ;;  %v20481_v63 = vand.u32 4294901760, %v20480_v62  ;;  %v12001_v31 = vpack.c.bf16 %v20486_v57, %v20485_v15  ;;  %v20497_v43 = vand.u32 4294901760, %v20330_v22 }
 0x2ea   : > { %4455 = vmatmul.mubr.f32.vlgmr.msra.gmra.mrb[2].mxu1 %v20470_v27  ;;  %11604 = vmatprep.subr.bf16.mxu0 %v20471_v47  ;;  %v11997_v12 = vpack.c.bf16 %v20475_v32, %v20474_v33  ;;  %v20488_v33 = vand.u32 4294901760, %v20398_v13  ;;  %v11613_v50 = vpack.c.bf16 %v20491_v38, %v20490_v16  ;;  %v20494_v13 = vand.u32 4294901760, %v20324_v25  ;;  %v3788_v16 = vld [vmem:[%s14172_s25] sm:$0xff]  ;;  %v3790_v38 = vld [vmem:[%s14172_s25 + $0x10] sm:$0xff] }
 0x2eb   : > { %11994 = vmatpush1.bf16.msra.mxu1 %v11993_v40  ;;  %4460 = vmatprep.mubr.f32.mxu1 %v20349_v10  ;;  %v11609_v40 = vpack.c.bf16 %v20481_v63, %v20479_v23  ;;  %v12007_v23 = vpack.c.bf16 %v20498_v45, %v20497_v43  ;;  %v20501_v25 = vand.u32 4294901760, %v20334_v29  ;;  %v20503_v22 = vand.u32 4294901760, %v20332_v34 }
 0x2ec   : > { %11996 = vmatprep.subr.bf16.mxu1 %v11995_v26  ;;  %v11611_v26 = vpack.c.bf16 %v20484_v54, %v20483_v4  ;;  %v20507_v29 = vand.u32 4294901760, %v20301_v52  ;;  %v20509_v34 = vand.u32 4294901760, %v14831_v49  ;;  %v20513_v57 = vand.u32 4294901760, %v14840_v7  ;;  %v20514_v52 = vld [vmem:[#allocation89_spill] sm:$0xff] }
 0x2ed   : > { %11606 = vmatpush1.bf16.msra.mxu0 %v20478_v60  ;;  %v20516_v49 = vand.u32 4294901760, %v14835_v1  ;;  %v20522_v1 = vld [vmem:[#allocation94_spill] sm:$0xff] }
 0x2ee   : > { %4464 = vmatmul.mubr.f32.gmra.mrb[4].mxu1 %v20482_v3  ;;  %11608 = vmatprep.subr.bf16.mxu0 %v11607_v28  ;;  %v20489_v28 = vand.u32 4294901760, %v20323_v30  ;;  %v20495_v30 = vand.u32 4294901760, %v20325_v20  ;;  %v20502_v20 = vand.u32 4294901760, %v20299_v39  ;;  %v20508_v39 = vand.u32 4294901760, %v20303_v58 }
 0x2ef   : > { %11998 = vmatpush1.bf16.msra.mxu1 %v11997_v12  ;;  %4630 = vmatprep.mubr.f32.mxu1 %v20349_v10  ;;  %v20493_v12 = vand.u32 4294901760, %v20327_v36  ;;  %v20500_v36 = vand.u32 4294901760, %v20329_v14  ;;  %v20505_v14 = vand.u32 4294901760, %v20304_v6  ;;  %v20511_v6 = vand.u32 4294901760, %v14812_v9  ;;  %v3791_v9 = vld [vmem:[%s14172_s25 + $0x18] sm:$0xff] }
 0x2f0   : > { %2567 = vmatmul.mubr.f32.vlgmr.msra.gmra.mrb[4].mxu0 %v20487_v53  ;;  %12000 = vmatprep.subr.bf16.mxu1 %v11999_v35  ;;  %v12003_v32 = vpack.c.bf16 %v20489_v28, %v20488_v33  ;;  %v12005_v56 = vpack.c.bf16 %v20495_v30, %v20494_v13  ;;  %v20496_v35 = vld [vmem:[#allocation128_spill] sm:$0xff]  ;;  %v11619_v63 = vpack.c.bf16 %v20502_v20, %v20501_v25  ;;  %v3789_v28 = vld [vmem:[%s14172_s25 + $0x8] sm:$0xff]  ;;  %v20524_v13 = vld [vmem:[#allocation98_spill] sm:$0xff]  ;;  %v4760_v45 = vand.u32 4294901760, %v3791_v9 }
 0x2f1   : > { %11610 = vmatpush1.bf16.msra.mxu0 %v11609_v40  ;;  %2572 = vmatprep.mubr.f32.mxu0 %v20349_v10  ;;  %v11615_v42 = vpack.c.bf16 %v20493_v12, %v20492_v48  ;;  %v11617_v62 = vpack.c.bf16 %v20500_v36, %v20499_v11  ;;  %v12009_v40 = vpack.c.bf16 %v20504_v44, %v20503_v22  ;;  %v20523_v12 = vand.u32 4294901760, %v20522_v1  ;;  %v3792_v11 = vld [vmem:[%s14172_s25 + $0x20] sm:$0xff]  ;;  %v3794_v36 = vld [vmem:[%s14172_s25 + $0x30] sm:$0xff]  ;;  %v20529_v25 = vld [vmem:[#allocation97_spill] sm:$0xff] }
 0x2f2   : > { %11612 = vmatprep.subr.bf16.mxu0 %v11611_v26  ;;  %v12011_v4 = vpack.c.bf16 %v20506_v59, %v20505_v14  ;;  %v11621_v54 = vpack.c.bf16 %v20508_v39, %v20507_v29  ;;  %v11623_v26 = vpack.c.bf16 %v20510_v51, %v20509_v34  ;;  %v12013_v15 = vpack.c.bf16 %v20512_v19, %v20511_v6  ;;  %v20533_v29 = vld [vmem:[#allocation100_spill] sm:$0xff]  ;;  %v20587_v53 = vld [vmem:[#allocation75_spill] sm:$0xff] }
 0x2f3   : > { %12002 = vmatpush1.bf16.msra.mxu1 %v12001_v31  ;;  %v20515_v31 = vand.u32 4294901760, %v20514_v52  ;;  %v11625_v33 = vpack.c.bf16 %v20517_v55, %v20516_v49  ;;  %v20525_v30 = vand.u32 4294901760, %v20524_v13  ;;  %v20530_v20 = vand.u32 4294901760, %v20529_v25  ;;  %v1902_v52 = vld [vmem:[%s14159_s9 + $0x10] sm:$0xff] }
 0x2f4   : > { %2576 = vmatmul.mubr.f32.gmra.mrb[6].mxu0 %v20496_v35  ;;  %12004 = vmatprep.subr.bf16.mxu1 %v12003_v32  ;;  %v20519_v32 = vand.u32 4294901760, %v14877_v17  ;;  %v4756_v17 = vand.u32 4294901760, %v3789_v28  ;;  %v4758_v22 = vand.u32 4294901760, %v3788_v16  ;;  %v4762_v44 = vand.u32 4294901760, %v3790_v38  ;;  %v20541_v55 = vld [vmem:[#allocation106_spill] sm:$0xff] }
 0x2f5   : > { %11614 = vmatpush1.bf16.msra.mxu0 %v11613_v50  ;;  %2742 = vmatprep.mubr.f32.mxu0 %v20349_v10  ;;  %v12015_v58 = vpack.c.bf16 %v20515_v31, %v20513_v57  ;;  %v20520_v50 = vld [vmem:[#allocation93_spill] sm:$0xff]  ;;  %v20531_v14 = vand.u32 4294901760, %v14888_v2  ;;  %v20532_v59 = vand.u32 4294901760, %v14890_v5  ;;  %v20534_v39 = vand.u32 4294901760, %v20533_v29  ;;  %v1900_v57 = vld [vmem:[%s14159_s9] sm:$0xff] }
 0x2f6   : > { %11616 = vmatprep.subr.bf16.mxu0 %v11615_v42  ;;  %v11627_v7 = vpack.c.bf16 %v20519_v32, %v20518_v8  ;;  %v20521_v48 = vand.u32 4294901760, %v20520_v50  ;;  %v3793_v42 = vld [vmem:[%s14172_s25 + $0x28] sm:$0xff]  ;;  %v4766_v31 = vand.u32 4294901760, %v3792_v11  ;;  %v20540_v49 = vand.u32 4294901760, %v20428_v61  ;;  %v20543_v8 = vld [vmem:[#allocation107_spill] sm:$0xff] }
 0x2f7   : > { %12006 = vmatpush1.bf16.msra.mxu1 %v12005_v56  ;;  %v20526_v56 = vld [vmem:[#allocation99_spill] sm:$0xff]  ;;  %v4764_v2 = vand.u32 4294901760, %v3793_v42  ;;  %v20544_v32 = vand.u32 4294901760, %v20543_v8  ;;  %v15660_v1 = vpack.c.bf16 %v4760_v45, %v4756_v17  ;;  %v15663_v13 = vpack.c.bf16 %v4762_v44, %v4758_v22 }
 0x2f8   : > { %12008 = vmatprep.subr.bf16.mxu1 %v12007_v23  ;;  %v12017_v18 = vpack.c.bf16 %v20523_v12, %v20521_v48  ;;  %v20527_v43 = vand.u32 4294901760, %v20526_v56  ;;  %v3795_v23 = vld [vmem:[%s14172_s25 + $0x38] sm:$0xff]  ;;  %v2870_v56 = vand.u32 4294901760, %v1900_v57  ;;  %v2874_v61 = vand.u32 4294901760, %v1902_v52 }
 0x2f9   : > { %11618 = vmatpush1.bf16.msra.mxu0 %v11617_v62  ;;  %v20528_v62 = vand.u32 4294901760, %v20418_v41  ;;  %v20537_v41 = vand.u32 4294901760, %v20424_v24  ;;  %v4768_v5 = vand.u32 4294901760, %v3795_v23  ;;  %20547 = vst [vmem:[#allocation112_spill] sm:$0xff] %v15660_v1  ;;  %20548 = vst [vmem:[#allocation38_spill] sm:$0xff] %v15663_v13  ;;  %v15668_v25 = vsub.f32 %v3789_v28, %v4756_v17  ;;  %v1907_v28 = vld [vmem:[%s14159_s9 + $0x38] sm:$0xff] }
 0x2fa   : > { %11620 = vmatprep.subr.bf16.mxu0 %v11619_v63  ;;  %v12019_v37 = vpack.c.bf16 %v20527_v43, %v20525_v30  ;;  %v3799_v43 = vld [vmem:[%s14172_s25 + $0x58] sm:$0xff]  ;;  %v15678_v29 = vsub.f32 %v3793_v42, %v4764_v2 }
 0x2fb   : > { %12010 = vmatpush1.bf16.msra.mxu1 %v12009_v40  ;;  %v11629_v63 = vpack.c.bf16 %v20530_v20, %v20528_v62  ;;  %v1901_v40 = vld [vmem:[%s14159_s9 + $0x8] sm:$0xff]  ;;  %v3798_v62 = vld [vmem:[%s14172_s25 + $0x50] sm:$0xff]  ;;  %20549 = vst [vmem:[#allocation114_spill] sm:$0xff] %v15668_v25  ;;  %v15670_v20 = vsub.f32 %v3791_v9, %v4760_v45  ;;  %v20557_v17 = vld [vmem:[#allocation63_spill] sm:$0xff]  ;;  %v4776_v45 = vand.u32 4294901760, %v3799_v43 }
 0x2fc   : > { %12012 = vmatprep.subr.bf16.mxu1 %v12011_v4  ;;  %v12021_v4 = vpack.c.bf16 %v20532_v59, %v20531_v14  ;;  %v2868_v12 = vand.u32 4294901760, %v1901_v40  ;;  %v15672_v14 = vsub.f32 %v3788_v16, %v4758_v22  ;;  %v15676_v59 = vpack.c.bf16 %v4768_v5, %v4764_v2  ;;  %20554 = vst [vmem:[#allocation117_spill] sm:$0xff] %v15678_v29  ;;  %v1904_v22 = vld [vmem:[%s14159_s9 + $0x20] sm:$0xff] }
 0x2fd   : > { %11622 = vmatpush1.bf16.msra.mxu0 %v11621_v54  ;;  %v20535_v54 = vld [vmem:[#allocation101_spill] sm:$0xff]  ;;  %20550 = vst [vmem:[#allocation113_spill] sm:$0xff] %v15670_v20 }
 0x2fe   : > { %11624 = vmatprep.subr.bf16.mxu0 %v11623_v26  ;;  %v20536_v34 = vand.u32 4294901760, %v20535_v54  ;;  %v20538_v26 = vld [vmem:[#allocation103_spill] sm:$0xff]  ;;  %20551 = vst [vmem:[#allocation116_spill] sm:$0xff] %v15672_v14  ;;  %20553 = vst [vmem:[#allocation118_spill] sm:$0xff] %v15676_v59 }
 0x2ff   : > { %12014 = vmatpush1.bf16.msra.mxu1 %v12013_v15  ;;  %v20539_v6 = vand.u32 4294901760, %v20538_v26  ;;  %v1903_v15 = vld [vmem:[%s14159_s9 + $0x18] sm:$0xff]  ;;  %v15698_v26 = vsub.f32 %v1901_v40, %v2868_v12  ;;  %v3800_v40 = vld [vmem:[%s14172_s25 + $0x60] sm:$0xff] }
 0x300   : > { %12016 = vmatprep.subr.bf16.mxu1 %v12015_v58  ;;  %v11631_v51 = vpack.c.bf16 %v20536_v34, %v20534_v39  ;;  %v4770_v58 = vand.u32 4294901760, %v3794_v36  ;;  %v2872_v30 = vand.u32 4294901760, %v1903_v15  ;;  %v15680_v39 = vsub.f32 %v3795_v23, %v4768_v5  ;;  %v1905_v34 = vld [vmem:[%s14159_s9 + $0x28] sm:$0xff] }
 0x301   : > { %11626 = vmatpush1.bf16.msra.mxu0 %v11625_v33  ;;  %v11633_v19 = vpack.c.bf16 %v20539_v6, %v20537_v41  ;;  %v20542_v33 = vand.u32 4294901760, %v20541_v55  ;;  %v20562_v41 = vld [vmem:[#allocation47_spill] sm:$0xff]  ;;  %20563 = vst [vmem:[#allocation121_spill] sm:$0xff] %v15698_v26  ;;  %v2876_v2 = vand.u32 4294901760, %v1905_v34  ;;  %v2880_v5 = vand.u32 4294901760, %v1907_v28 }
 0x302   : > { %11628 = vmatprep.subr.bf16.mxu0 %v11627_v7  ;;  %v20545_v7 = vld [vmem:[#allocation109_spill] sm:$0xff]  ;;  %20555 = vst [vmem:[#allocation59_spill] sm:$0xff] %v15680_v39  ;;  %v15682_v54 = vpack.c.bf16 %v4770_v58, %v4766_v31  ;;  %v15691_v42 = vsub.f32 %v3794_v36, %v4770_v58  ;;  %v15693_v23 = vpack.c.bf16 %v2872_v30, %v2868_v12 }
 0x303   : > { %12018 = vmatpush1.bf16.msra.mxu1 %v12017_v18  ;;  %v11635_v24 = vpack.c.bf16 %v20542_v33, %v20540_v49  ;;  %v20546_v50 = vand.u32 4294901760, %v20545_v7  ;;  %v3797_v18 = vld [vmem:[%s14172_s25 + $0x48] sm:$0xff]  ;;  %v15700_v6 = vsub.f32 %v1903_v15, %v2872_v30  ;;  %v15706_v36 = vsub.f32 %v1900_v57, %v2870_v56  ;;  %v3802_v33 = vld [vmem:[%s14172_s25 + $0x70] sm:$0xff] }
 0x304   : > { %12020 = vmatprep.subr.bf16.mxu1 %v12019_v37  ;;  %v3796_v37 = vld [vmem:[%s14172_s25 + $0x40] sm:$0xff]  ;;  %20556 = vst [vmem:[#allocation58_spill] sm:$0xff] %v15682_v54  ;;  %v4772_v9 = vand.u32 4294901760, %v3797_v18  ;;  %20559 = vst [vmem:[#allocation60_spill] sm:$0xff] %v15691_v42  ;;  %v15708_v58 = vsub.f32 %v1902_v52, %v2874_v61  ;;  %v2878_v49 = vand.u32 4294901760, %v1904_v22  ;;  %v20568_v15 = vld [vmem:[#allocation65_spill] sm:$0xff] }
 0x305   : > { %v11637_v48 = vpack.c.bf16 %v20546_v50, %v20544_v32  ;;  %11630 = vmatpush1.bf16.msra.mxu0 %v11629_v63  ;;  %v15674_v63 = vsub.f32 %v3790_v38, %v4762_v44  ;;  %v4774_v16 = vand.u32 4294901760, %v3796_v37  ;;  %v4778_v38 = vand.u32 4294901760, %v3798_v62  ;;  %v1906_v44 = vld [vmem:[%s14159_s9 + $0x30] sm:$0xff]  ;;  %20560 = vst [vmem:[#allocation119_spill] sm:$0xff] %v15693_v23  ;;  %20564 = vst [vmem:[#allocation120_spill] sm:$0xff] %v15700_v6  ;;  %v1909_v30 = vld [vmem:[%s14159_s9 + $0x48] sm:$0xff] }
 0x306   : > { %11632 = vmatprep.subr.bf16.mxu0 %v11631_v51  ;;  %v15695_v51 = vpack.c.bf16 %v2874_v61, %v2870_v56  ;;  %20566 = vst [vmem:[#allocation123_spill] sm:$0xff] %v15706_v36  ;;  %20567 = vst [vmem:[#allocation122_spill] sm:$0xff] %v15708_v58  ;;  %v2882_v55 = vand.u32 4294901760, %v1906_v44  ;;  %v15715_v8 = vsub.f32 %v3797_v18, %v4772_v9  ;;  %v1911_v56 = vld [vmem:[%s14159_s9 + $0x58] sm:$0xff]  ;;  %v20575_v61 = vld [vmem:[#allocation46_spill] sm:$0xff] }
 0x307   : > { %20552 = vst [vmem:[#allocation115_spill] sm:$0xff] %v15674_v63  ;;  %12022 = vmatpush1.bf16.msra.mxu1 %v12021_v4  ;;  %v15689_v4 = vsub.f32 %v3792_v11, %v4766_v31  ;;  %v3803_v11 = vld [vmem:[%s14172_s25 + $0x78] sm:$0xff]  ;;  %v20565_v31 = vld [vmem:[#allocation64_spill] sm:$0xff]  ;;  %v15717_v32 = vsub.f32 %v3799_v43, %v4776_v45  ;;  %v15719_v57 = vpack.c.bf16 %v4778_v38, %v4774_v16  ;;  %v20576_v18 = vld [vmem:[#allocation73_spill] sm:$0xff]  ;;  %v2888_v35 = vand.u32 4294901760, %v1911_v56 }
 0x308   : > { %12024 = vmatprep.subr.bf16.mxu1 %v20557_v17  ;;  %20561 = vst [vmem:[#allocation62_spill] sm:$0xff] %v15695_v51  ;;  %20570 = vst [vmem:[#allocation124_spill] sm:$0xff] %v15715_v8  ;;  %v15721_v52 = vsub.f32 %v3796_v37, %v4774_v16  ;;  %v15723_v7 = vsub.f32 %v3798_v62, %v4778_v38  ;;  %v4784_v12 = vand.u32 4294901760, %v3803_v11  ;;  %v1908_v37 = vld [vmem:[%s14159_s9 + $0x40] sm:$0xff]  ;;  %v1910_v62 = vld [vmem:[%s14159_s9 + $0x50] sm:$0xff] }
 0x309   : > { %11634 = vmatpush1.bf16.msra.mxu0 %v11633_v19  ;;  %20558 = vst [vmem:[#allocation61_spill] sm:$0xff] %v15689_v4  ;;  %v3801_v19 = vld [vmem:[%s14172_s25 + $0x68] sm:$0xff]  ;;  %20571 = vst [vmem:[#allocation127_spill] sm:$0xff] %v15717_v32  ;;  %v15729_v43 = vpack.c.bf16 %v2880_v5, %v2876_v2  ;;  %v15731_v17 = vsub.f32 %v1905_v34, %v2876_v2  ;;  %v15737_v16 = vsub.f32 %v1907_v28, %v2880_v5  ;;  %v20584_v2 = vld [vmem:[#allocation67_spill] sm:$0xff] }
 0x30a   : > { %4632 = vmatmul.mubr.f32.vlgmr.msra.gmra.mrb[2].mxu1 %v20562_v41  ;;  %11636 = vmatprep.subr.bf16.mxu0 %v11635_v24  ;;  %v15713_v24 = vpack.c.bf16 %v4776_v45, %v4772_v9  ;;  %20572 = vst [vmem:[#allocation126_spill] sm:$0xff] %v15719_v57  ;;  %20573 = vst [vmem:[#allocation30_spill] sm:$0xff] %v15721_v52  ;;  %v4780_v50 = vand.u32 4294901760, %v3801_v19  ;;  %v4782_v9 = vand.u32 4294901760, %v3800_v40  ;;  %v20579_v45 = vld [vmem:[#allocation66_spill] sm:$0xff]  ;;  %v20583_v34 = vld [vmem:[#allocation53_spill] sm:$0xff] }
 0x30b   : > { %12026 = vmatpush1.bf16.msra.mxu1 %v20565_v31  ;;  %4637 = vmatprep.mubr.f32.mxu1 %v20349_v10  ;;  %20574 = vst [vmem:[#allocation29_spill] sm:$0xff] %v15723_v7  ;;  %20577 = vst [vmem:[#allocation34_spill] sm:$0xff] %v15729_v43  ;;  %v15739_v38 = vpack.c.bf16 %v2882_v55, %v2878_v49  ;;  %v15741_v31 = vsub.f32 %v1904_v22, %v2878_v49  ;;  %v3804_v28 = vld [vmem:[%s14172_s25 + $0x80] sm:$0xff]  ;;  %v3806_v5 = vld [vmem:[%s14172_s25 + $0x90] sm:$0xff] }
 0x30c   : > { %12028 = vmatprep.subr.bf16.mxu1 %v20568_v15  ;;  %20569 = vst [vmem:[#allocation125_spill] sm:$0xff] %v15713_v24  ;;  %20578 = vst [vmem:[#allocation33_spill] sm:$0xff] %v15731_v17  ;;  %v3805_v15 = vld [vmem:[%s14172_s25 + $0x88] sm:$0xff]  ;;  %v15747_v3 = vsub.f32 %v1906_v44, %v2882_v55  ;;  %v15749_v27 = vsub.f32 %v3801_v19, %v4780_v50  ;;  %v15755_v22 = vpack.c.bf16 %v4784_v12, %v4780_v50  ;;  %v20590_v19 = vld [vmem:[#allocation76_spill] sm:$0xff] }
 0x30d   : > { %11638 = vmatpush1.bf16.msra.mxu0 %v11637_v48  ;;  %v4786_v48 = vand.u32 4294901760, %v3802_v33  ;;  %20580 = vst [vmem:[#allocation32_spill] sm:$0xff] %v15737_v16  ;;  %20581 = vst [vmem:[#allocation31_spill] sm:$0xff] %v15739_v38  ;;  %v15757_v49 = vsub.f32 %v3803_v11, %v4784_v12  ;;  %v2886_v44 = vand.u32 4294901760, %v1908_v37  ;;  %v2890_v55 = vand.u32 4294901760, %v1910_v62  ;;  %v1915_v16 = vld [vmem:[%s14159_s9 + $0x78] sm:$0xff] }
 0x30e   : > { %4639 = vmatmul.mubr.f32.gmra.mrb[4].mxu1 %v20575_v61  ;;  %11640 = vmatprep.subr.bf16.mxu0 %v20576_v18  ;;  %20582 = vst [vmem:[#allocation35_spill] sm:$0xff] %v15741_v31  ;;  %v3807_v18 = vld [vmem:[%s14172_s25 + $0x98] sm:$0xff]  ;;  %20585 = vst [vmem:[#allocation42_spill] sm:$0xff] %v15747_v3  ;;  %v4788_v3 = vand.u32 4294901760, %v3805_v15  ;;  %v20593_v50 = vld [vmem:[#allocation68_spill] sm:$0xff]  ;;  %v4790_v12 = vand.u32 4294901760, %v3804_v28  ;;  %v15777_v7 = vsub.f32 %v1911_v56, %v2888_v35 }
 0x30f   : > { %12030 = vmatpush1.bf16.msra.mxu1 %v20579_v45  ;;  %4741 = vmatprep.mubr.f32.mxu1 %v20349_v10  ;;  %20586 = vst [vmem:[#allocation41_spill] sm:$0xff] %v15749_v27  ;;  %v2884_v45 = vand.u32 4294901760, %v1909_v30  ;;  %20588 = vst [vmem:[#allocation40_spill] sm:$0xff] %v15755_v22  ;;  %v15762_v27 = vsub.f32 %v3800_v40, %v4782_v9  ;;  %v4792_v31 = vand.u32 4294901760, %v3807_v18  ;;  %v20596_v40 = vld [vmem:[#allocation52_spill] sm:$0xff]  ;;  %v20610_v52 = vld [vmem:[#allocation71_spill] sm:$0xff] }
 0x310   : > { %2744 = vmatmul.mubr.f32.vlgmr.msra.gmra.mrb[4].mxu0 %v20583_v34  ;;  %12032 = vmatprep.subr.bf16.mxu1 %v20584_v2  ;;  %20589 = vst [vmem:[#allocation39_spill] sm:$0xff] %v15757_v49  ;;  %v15760_v2 = vpack.c.bf16 %v4786_v48, %v4782_v9  ;;  %v15767_v17 = vsub.f32 %v3802_v33, %v4786_v48  ;;  %v4794_v49 = vand.u32 4294901760, %v3806_v5  ;;  %v20597_v9 = vld [vmem:[#allocation69_spill] sm:$0xff]  ;;  %20599 = vst [vmem:[#allocation105_spill] sm:$0xff] %v15777_v7 }
 0x311   : > { %11642 = vmatpush1.bf16.msra.mxu0 %v20587_v53  ;;  %2749 = vmatprep.mubr.f32.mxu0 %v20349_v10  ;;  %20592 = vst [vmem:[#allocation44_spill] sm:$0xff] %v15762_v27  ;;  %v1913_v53 = vld [vmem:[%s14159_s9 + $0x68] sm:$0xff]  ;;  %v15769_v11 = vsub.f32 %v1909_v30, %v2884_v45  ;;  %v15775_v27 = vpack.c.bf16 %v2888_v35, %v2884_v45  ;;  %v3811_v30 = vld [vmem:[%s14172_s25 + $0xb8] sm:$0xff]  ;;  %v3808_v45 = vld [vmem:[%s14172_s25 + $0xa0] sm:$0xff] }
 0x312   : > { %11644 = vmatprep.subr.bf16.mxu0 %v20590_v19  ;;  %20591 = vst [vmem:[#allocation45_spill] sm:$0xff] %v15760_v2  ;;  %20594 = vst [vmem:[#allocation43_spill] sm:$0xff] %v15767_v17  ;;  %v1912_v19 = vld [vmem:[%s14159_s9 + $0x60] sm:$0xff]  ;;  %v1914_v2 = vld [vmem:[%s14159_s9 + $0x70] sm:$0xff]  ;;  %v15779_v38 = vsub.f32 %v1908_v37, %v2886_v44  ;;  %v2892_v17 = vand.u32 4294901760, %v1913_v53  ;;  %v15792_v56 = vpack.c.bf16 %v4792_v31, %v4788_v3 }
 0x313   : > { %12034 = vmatpush1.bf16.msra.mxu1 %v20593_v50  ;;  %20595 = vst [vmem:[#allocation96_spill] sm:$0xff] %v15769_v11  ;;  %20598 = vst [vmem:[#allocation102_spill] sm:$0xff] %v15775_v27  ;;  %v3809_v33 = vld [vmem:[%s14172_s25 + $0xa8] sm:$0xff]  ;;  %v15785_v50 = vpack.c.bf16 %v2890_v55, %v2886_v44  ;;  %v15787_v11 = vsub.f32 %v1910_v62, %v2890_v55  ;;  %v3810_v27 = vld [vmem:[%s14172_s25 + $0xb0] sm:$0xff]  ;;  %v15794_v37 = vsub.f32 %v3805_v15, %v4788_v3 }
 0x314   : > { %2751 = vmatmul.mubr.f32.gmra.mrb[6].mxu0 %v20596_v40  ;;  %12036 = vmatprep.subr.bf16.mxu1 %v20597_v9  ;;  %20600 = vst [vmem:[#allocation88_spill] sm:$0xff] %v15779_v38  ;;  %v20601_v48 = vld [vmem:[#allocation77_spill] sm:$0xff]  ;;  %v2896_v9 = vand.u32 4294901760, %v1915_v16  ;;  %v20604_v35 = vld [vmem:[#allocation78_spill] sm:$0xff]  ;;  %20605 = vst [vmem:[#allocation104_spill] sm:$0xff] %v15792_v56  ;;  %v2898_v38 = vand.u32 4294901760, %v1914_v2  ;;  %v15798_v62 = vsub.f32 %v3807_v18, %v4792_v31 }
 0x315   : > { %11646 = vmatpush1.bf16.msra.mxu0 %v20601_v48  ;;  %2853 = vmatprep.mubr.f32.mxu0 %v20349_v10  ;;  %20602 = vst [vmem:[#allocation92_spill] sm:$0xff] %v15785_v50  ;;  %20603 = vst [vmem:[#allocation95_spill] sm:$0xff] %v15787_v11  ;;  %v2894_v48 = vand.u32 4294901760, %v1912_v19  ;;  %v1917_v7 = vld [vmem:[%s14159_s9 + $0x88] sm:$0xff]  ;;  %v20607_v44 = vld [vmem:[#allocation70_spill] sm:$0xff]  ;;  %v15800_v55 = vpack.c.bf16 %v4794_v49, %v4790_v12  ;;  %v4796_v11 = vand.u32 4294901760, %v3809_v33 }
 0x316   : > { %11648 = vmatprep.subr.bf16.mxu0 %v20604_v35  ;;  %20606 = vst [vmem:[#allocation108_spill] sm:$0xff] %v15794_v37  ;;  %20608 = vst [vmem:[#allocation36_spill] sm:$0xff] %v15798_v62  ;;  %v4800_v50 = vand.u32 4294901760, %v3811_v30  ;;  %v1919_v35 = vld [vmem:[%s14159_s9 + $0x98] sm:$0xff]  ;;  %v15804_v56 = vsub.f32 %v3804_v28, %v4790_v12  ;;  %v15806_v3 = vsub.f32 %v3806_v5, %v4794_v49  ;;  %v4798_v15 = vand.u32 4294901760, %v3808_v45  ;;  %v1918_v31 = vld [vmem:[%s14159_s9 + $0x90] sm:$0xff] }
 0x317   : > { %12038 = vmatpush1.bf16.msra.mxu1 %v20607_v44  ;;  %20609 = vst [vmem:[#allocation89_spill] sm:$0xff] %v15800_v55  ;;  %v4802_v37 = vand.u32 4294901760, %v3810_v27  ;;  %v1916_v44 = vld [vmem:[%s14159_s9 + $0x80] sm:$0xff]  ;;  %v20613_v18 = vld [vmem:[#allocation79_spill] sm:$0xff]  ;;  %v15811_v62 = vpack.c.bf16 %v2896_v9, %v2892_v17  ;;  %v15813_v55 = vsub.f32 %v1913_v53, %v2892_v17  ;;  %v15815_v32 = vsub.f32 %v1915_v16, %v2896_v9  ;;  %v20645_v40 = vld [vmem:[#allocation86_spill] sm:$0xff] }
 0x318   : > { %12040 = vmatprep.subr.bf16.mxu1 %v20610_v52  ;;  %20611 = vst [vmem:[#allocation93_spill] sm:$0xff] %v15804_v56  ;;  %20612 = vst [vmem:[#allocation94_spill] sm:$0xff] %v15806_v3  ;;  %v2900_v22 = vand.u32 4294901760, %v1917_v7  ;;  %v3813_v52 = vld [vmem:[%s14172_s25 + $0xc8] sm:$0xff]  ;;  %v3815_v28 = vld [vmem:[%s14172_s25 + $0xd8] sm:$0xff]  ;;  %v15820_v5 = vpack.c.bf16 %v2898_v38, %v2894_v48  ;;  %v15822_v49 = vsub.f32 %v1912_v19, %v2894_v48  ;;  %v2902_v9 = vand.u32 4294901760, %v1916_v44 }
 0x319   : > { %11650 = vmatpush1.bf16.msra.mxu0 %v20613_v18  ;;  %20614 = vst [vmem:[#allocation98_spill] sm:$0xff] %v15811_v62  ;;  %20615 = vst [vmem:[#allocation99_spill] sm:$0xff] %v15813_v55  ;;  %v20617_v12 = vld [vmem:[#allocation80_spill] sm:$0xff]  ;;  %v15824_v3 = vsub.f32 %v1914_v2, %v2898_v38  ;;  %v2904_v18 = vand.u32 4294901760, %v1919_v35  ;;  %v3814_v62 = vld [vmem:[%s14172_s25 + $0xd0] sm:$0xff]  ;;  %v15829_v16 = vpack.c.bf16 %v4800_v50, %v4796_v11  ;;  %v4804_v38 = vand.u32 4294901760, %v3813_v52 }
 0x31a   : > { %20616 = vst [vmem:[#allocation97_spill] sm:$0xff] %v15815_v32  ;;  %11652 = vmatprep.subr.bf16.mxu0 %v20617_v12  ;;  %20618 = vst [vmem:[#allocation100_spill] sm:$0xff] %v15820_v5  ;;  %v3812_v56 = vld [vmem:[%s14172_s25 + $0xc0] sm:$0xff]  ;;  %v15831_v53 = vsub.f32 %v3809_v33, %v4796_v11  ;;  %v2906_v12 = vand.u32 4294901760, %v1918_v31  ;;  %v20624_v32 = vld [vmem:[#allocation74_spill] sm:$0xff]  ;;  %v15834_v19 = vsub.f32 %v3811_v30, %v4800_v50  ;;  %v4808_v2 = vand.u32 4294901760, %v3815_v28 }
 0x31b   : > { %20619 = vst [vmem:[#allocation101_spill] sm:$0xff] %v15822_v49  ;;  %20620 = vst [vmem:[#allocation103_spill] sm:$0xff] %v15824_v3  ;;  %v20621_v17 = vld [vmem:[#allocation72_spill] sm:$0xff]  ;;  %v15836_v48 = vpack.c.bf16 %v4802_v37, %v4798_v15  ;;  %v1921_v3 = vld [vmem:[%s14159_s9 + $0xa8] sm:$0xff]  ;;  %v15841_v55 = vsub.f32 %v3808_v45, %v4798_v15  ;;  %v15843_v11 = vsub.f32 %v3810_v27, %v4802_v37  ;;  %v4806_v33 = vand.u32 4294901760, %v3812_v56 }
 0x31c   : > { %12042 = vmatpush1.bf16.msra.mxu1 %v20621_v17  ;;  %20622 = vst [vmem:[#allocation106_spill] sm:$0xff] %v15829_v16  ;;  %20623 = vst [vmem:[#allocation107_spill] sm:$0xff] %v15831_v53  ;;  %v1923_v17 = vld [vmem:[%s14159_s9 + $0xb8] sm:$0xff]  ;;  %v20627_v49 = vld [vmem:[#allocation81_spill] sm:$0xff]  ;;  %v4810_v53 = vand.u32 4294901760, %v3814_v62  ;;  %v15852_v5 = vsub.f32 %v1919_v35, %v2904_v18  ;;  %v15859_v15 = vpack.c.bf16 %v2906_v12, %v2902_v9 }
 0x31d   : > { %12044 = vmatprep.subr.bf16.mxu1 %v20624_v32  ;;  %20625 = vst [vmem:[#allocation109_spill] sm:$0xff] %v15834_v19  ;;  %20626 = vst [vmem:[#allocation63_spill] sm:$0xff] %v15836_v48  ;;  %11654 = vmatpush1.bf16.msra.mxu0 %v20627_v49  ;;  %v1920_v32 = vld [vmem:[%s14159_s9 + $0xa0] sm:$0xff]  ;;  %v1922_v30 = vld [vmem:[%s14159_s9 + $0xb0] sm:$0xff]  ;;  %v15848_v19 = vpack.c.bf16 %v2904_v18, %v2900_v22  ;;  %v15850_v48 = vsub.f32 %v1917_v7, %v2900_v22 }
 0x31e   : > { %20628 = vst [vmem:[#allocation64_spill] sm:$0xff] %v15841_v55  ;;  %20629 = vst [vmem:[#allocation65_spill] sm:$0xff] %v15843_v11  ;;  %v20630_v50 = vld [vmem:[#allocation83_spill] sm:$0xff]  ;;  %v15854_v49 = vsub.f32 %v1916_v44, %v2902_v9  ;;  %v3817_v27 = vld [vmem:[%s14172_s25 + $0xe8] sm:$0xff]  ;;  %v15861_v11 = vsub.f32 %v1918_v31, %v2906_v12  ;;  %v2908_v55 = vand.u32 4294901760, %v1921_v3  ;;  %v15866_v22 = vpack.c.bf16 %v4808_v2, %v4804_v38 }
 0x31f   : > { %11656 = vmatprep.subr.bf16.mxu0 %v20630_v50  ;;  %20631 = vst [vmem:[#allocation73_spill] sm:$0xff] %v15848_v19  ;;  %20632 = vst [vmem:[#allocation66_spill] sm:$0xff] %v15850_v48  ;;  %v3819_v45 = vld [vmem:[%s14172_s25 + $0xf8] sm:$0xff]  ;;  %v20635_v37 = vld [vmem:[#allocation82_spill] sm:$0xff]  ;;  %v2912_v50 = vand.u32 4294901760, %v1923_v17  ;;  %v15868_v35 = vsub.f32 %v3813_v52, %v4804_v38  ;;  %v2910_v44 = vand.u32 4294901760, %v1920_v32  ;;  %v15873_v31 = vsub.f32 %v3815_v28, %v4808_v2 }
 0x320   : > { %20633 = vst [vmem:[#allocation67_spill] sm:$0xff] %v15852_v5  ;;  %20634 = vst [vmem:[#allocation75_spill] sm:$0xff] %v15854_v49  ;;  %12046 = vmatpush1.bf16.msra.mxu1 %v20635_v37  ;;  %v3816_v16 = vld [vmem:[%s14172_s25 + $0xe0] sm:$0xff]  ;;  %v3818_v19 = vld [vmem:[%s14172_s25 + $0xf0] sm:$0xff]  ;;  %v2914_v18 = vand.u32 4294901760, %v1922_v30  ;;  %v15875_v12 = vpack.c.bf16 %v4810_v53, %v4806_v33  ;;  %v4816_v5 = vand.u32 4294901760, %v3819_v45  ;;  %v15887_v28 = vsub.f32 %v1921_v3, %v2908_v55 }
 0x321   : > { %20636 = vst [vmem:[#allocation76_spill] sm:$0xff] %v15859_v15  ;;  %20637 = vst [vmem:[#allocation68_spill] sm:$0xff] %v15861_v11  ;;  %v20638_v7 = vld [vmem:[#allocation85_spill] sm:$0xff]  ;;  %v1927_v37 = vld [vmem:[%s14159_s9 + $0xd8] sm:$0xff]  ;;  %v4812_v11 = vand.u32 4294901760, %v3817_v27  ;;  %v15880_v15 = vsub.f32 %v3814_v62, %v4810_v53  ;;  %v4814_v52 = vand.u32 4294901760, %v3816_v16  ;;  %v15885_v57 = vpack.c.bf16 %v2912_v50, %v2908_v55 }
 0x322   : > { %12048 = vmatprep.subr.bf16.mxu1 %v20638_v7  ;;  %20639 = vst [vmem:[#allocation69_spill] sm:$0xff] %v15866_v22  ;;  %20640 = vst [vmem:[#allocation77_spill] sm:$0xff] %v15868_v35  ;;  %v1925_v49 = vld [vmem:[%s14159_s9 + $0xc8] sm:$0xff]  ;;  %v20641_v9 = vld [vmem:[#allocation84_spill] sm:$0xff]  ;;  %v15878_v7 = vsub.f32 %v3812_v56, %v4806_v33  ;;  %v4818_v38 = vand.u32 4294901760, %v3818_v19  ;;  %v15892_v56 = vpack.c.bf16 %v2914_v18, %v2910_v44  ;;  %s20939_s25 = sld [smem:[#allocation154_spill]] }
 0x323   : > { %11658 = vmatpush1.bf16.msra.mxu0 %v20641_v9  ;;  %20642 = vst [vmem:[#allocation78_spill] sm:$0xff] %v15873_v31  ;;  %20643 = vst [vmem:[#allocation70_spill] sm:$0xff] %v15875_v12  ;;  %v20644_v48 = vld [vmem:[#allocation87_spill] sm:$0xff]  ;;  %v1924_v35 = vld [vmem:[%s14159_s9 + $0xc0] sm:$0xff]  ;;  %v2916_v2 = vand.u32 4294901760, %v1925_v49  ;;  %v2920_v9 = vand.u32 4294901760, %v1927_v37  ;;  %v15890_v12 = vsub.f32 %v1923_v17, %v2912_v50  ;;  %v15894_v62 = vsub.f32 %v1920_v32, %v2910_v44 }
 0x324   : > { %11660 = vmatprep.subr.bf16.mxu0 %v20644_v48  ;;  %v1926_v22 = vld [vmem:[%s14159_s9 + $0xd0] sm:$0xff]  ;;  %12050 = vmatpush1.bf16.msra.mxu1 %v20645_v40  ;;  %20646 = vst [vmem:[#allocation71_spill] sm:$0xff] %v15885_v57  ;;  %20648 = vst [vmem:[#allocation79_spill] sm:$0xff] %v15892_v56  ;;  %v15896_v53 = vsub.f32 %v1922_v30, %v2914_v18  ;;  %v15899_v48 = vpack.c.bf16 %v4816_v5, %v4812_v11  ;;  %v2918_v55 = vand.u32 4294901760, %v1924_v35  ;;  %v20651_v30 = vld [vmem:[#allocation91_spill] sm:$0xff] }
 0x325   : > { %v20647_v31 = vld [vmem:[#allocation90_spill] sm:$0xff]  ;;  %v15901_v40 = vsub.f32 %v3817_v27, %v4812_v11  ;;  %v2922_v3 = vand.u32 4294901760, %v1926_v22  ;;  %v15904_v33 = vsub.f32 %v3819_v45, %v4816_v5  ;;  %v15906_v17 = vpack.c.bf16 %v4818_v38, %v4814_v52 }
 0x326   : > { %12052 = vmatprep.subr.bf16.mxu1 %v20647_v31  ;;  %20649 = vst [vmem:[#allocation80_spill] sm:$0xff] %v15899_v48  ;;  %v15908_v50 = vsub.f32 %v3816_v16, %v4814_v52  ;;  %v19552_v32 = vand.u32 4294901760, %v15668_v25  ;;  %v15914_v11 = vpack.c.bf16 %v2920_v9, %v2916_v2  ;;  %v15916_v27 = vsub.f32 %v1925_v49, %v2916_v2 }
 0x327   : > { %11662 = vmatpush1.bf16.msra.mxu0 %v20462_v0  ;;  %20650 = vst [vmem:[#allocation72_spill] sm:$0xff] %v15906_v17  ;;  %v15912_v0 = vsub.f32 %v3818_v19, %v4818_v38  ;;  %v15918_v44 = vsub.f32 %v1927_v37, %v2920_v9  ;;  %v19553_v5 = vand.u32 4294901760, %v15670_v20  ;;  %v19554_v16 = vand.u32 4294901760, %v15672_v14  ;;  %v1929_v19 = vld [vmem:[%s14159_s9 + $0xe8] sm:$0xff]  ;;  %v1931_v37 = vld [vmem:[%s14159_s9 + $0xf8] sm:$0xff]  ;;  %v1928_v38 = vld [vmem:[%s14159_s9 + $0xe0] sm:$0xff] }
 0x328   : > { %11664 = vmatprep.subr.bf16.mxu0 %v20463_v46  ;;  %12054 = vmatpush1.bf16.msra.mxu1 %v20651_v30  ;;  %20653 = vst [vmem:[#allocation81_spill] sm:$0xff] %v15914_v11  ;;  %v15921_v46 = vsub.f32 %v1924_v35, %v2918_v55  ;;  %v19555_v45 = vand.u32 4294901760, %v15674_v63  ;;  %v15928_v18 = vpack.c.bf16 %v2922_v3, %v2918_v55  ;;  %v19560_v31 = vand.u32 4294901760, %v15678_v29 }
 0x329   : > { %20652 = vst [vmem:[#allocation74_spill] sm:$0xff] %v15912_v0  ;;  %12056 = vmatprep.subr.bf16.mxu1 %v15660_v1  ;;  %v15930_v49 = vsub.f32 %v1926_v22, %v2922_v3  ;;  %v19561_v52 = vand.u32 4294901760, %v15680_v39  ;;  %v15940_v35 = vsub.f32 %v15668_v25, %v19552_v32  ;;  %v2924_v55 = vand.u32 4294901760, %v1929_v19  ;;  %v20713_v25 = vld [vmem:[#allocation76_spill] sm:$0xff] }
 0x32a   : > { %20654 = vst [vmem:[#allocation83_spill] sm:$0xff] %v15928_v18  ;;  %v4890_v32 = vsub.f32 %v15670_v20, %v19553_v5  ;;  %v4884_v9 = vsub.f32 %v15672_v14, %v19554_v16  ;;  %v4896_v22 = vsub.f32 %v15674_v63, %v19555_v45  ;;  %v2928_v2 = vand.u32 4294901760, %v1931_v37  ;;  %v20698_v63 = vld [vmem:[#allocation106_spill] sm:$0xff] }
 0x32b   : > { %11666 = vmatpush1.bf16.msra.mxu0 %v20469_v21  ;;  %4743 = vmatmul.mubr.f32.vlgmr.msra.gmra.mrb[2].mxu1 %v20562_v41  ;;  %v1930_v21 = vld [vmem:[%s14159_s9 + $0xf0] sm:$0xff]  ;;  %v2926_v3 = vand.u32 4294901760, %v1928_v38  ;;  %v4902_v30 = vsub.f32 %v15678_v29, %v19560_v31  ;;  %v4914_v5 = vsub.f32 %v15680_v39, %v19561_v52  ;;  %v20655_v16 = vand.u32 4294901760, %v15689_v4 }
 0x32c   : > { %11668 = vmatprep.subr.bf16.mxu0 %v20471_v47  ;;  %12058 = vmatpush1.bf16.msra.mxu1 %v15663_v13  ;;  %v2930_v47 = vand.u32 4294901760, %v1930_v21  ;;  %v20657_v13 = vand.u32 4294901760, %v15698_v26  ;;  %v4879_v52 = vand.u32 4294901760, %v15940_v35  ;;  %v15994_v35 = vsub.f32 %v1929_v19, %v2924_v55  ;;  %v20663_v19 = vld [vmem:[#allocation126_spill] sm:$0xff] }
 0x32d   : > { %4748 = vmatprep.mubr.f32.mxu1 %v20349_v10  ;;  %12060 = vmatprep.subr.bf16.mxu1 %v15676_v59  ;;  %v4908_v45 = vsub.f32 %v15689_v4, %v20655_v16  ;;  %v20659_v16 = vand.u32 4294901760, %v15706_v36 }
 0x32e   : > { %v2990_v31 = vsub.f32 %v15698_v26, %v20657_v13  ;;  %v4891_v13 = vand.u32 4294901760, %v4890_v32  ;;  %v20670_v26 = vld [vmem:[#allocation31_spill] sm:$0xff] }
 0x32f   : > { %11670 = vmatpush1.bf16.msra.mxu0 %v20478_v60  ;;  %4750 = vmatmul.mubr.f32.gmra.mrb[4].mxu1 %v20575_v61  ;;  %v20656_v60 = vand.u32 4294901760, %v15691_v42  ;;  %v2996_v61 = vsub.f32 %v15706_v36, %v20659_v16  ;;  %v16000_v16 = vsub.f32 %v1931_v37, %v2928_v2  ;;  %v16002_v36 = vpack.c.bf16 %v2930_v47, %v2926_v3  ;;  %v20665_v37 = vld [vmem:[#allocation40_spill] sm:$0xff] }
 0x330   : > { %11672 = vmatprep.subr.bf16.mxu0 %v15693_v23  ;;  %12062 = vmatpush1.bf16.msra.mxu1 %v15682_v54  ;;  %v20658_v23 = vand.u32 4294901760, %v15700_v6  ;;  %v4885_v54 = vand.u32 4294901760, %v4884_v9  ;;  %v2991_v9 = vand.u32 4294901760, %v2990_v31 }
 0x331   : > { %v4920_v59 = vsub.f32 %v15691_v42, %v20656_v60  ;;  %4852 = vmatprep.mubr.f32.mxu1 %v20349_v10  ;;  %v20660_v60 = vand.u32 4294901760, %v15708_v58  ;;  %12064 = vmatprep.subr.bf16.mxu1 %v15713_v24  ;;  %v4897_v42 = vand.u32 4294901760, %v4896_v22  ;;  %20662 = vst [vmem:[#allocation85_spill] sm:$0xff] %v16002_v36  ;;  %v4909_v24 = vand.u32 4294901760, %v4908_v45  ;;  %v20669_v45 = vld [vmem:[#allocation30_spill] sm:$0xff] }
 0x332   : > { %v3002_v1 = vsub.f32 %v15700_v6, %v20658_v23  ;;  %2855 = vmatmul.mubr.f32.vlgmr.msra.gmra.mrb[4].mxu0 %v20583_v34  ;;  %v15998_v23 = vpack.c.bf16 %v2928_v2, %v2924_v55  ;;  %v2997_v4 = vand.u32 4294901760, %v2996_v61  ;;  %v20664_v55 = vld [vmem:[#allocation52_spill] sm:$0xff]  ;;  %v16009_v2 = vsub.f32 %v1928_v38, %v2926_v3  ;;  %v20672_v61 = vld [vmem:[#allocation33_spill] sm:$0xff]  ;;  %v20673_v38 = vld [vmem:[#allocation102_spill] sm:$0xff] }
 0x333   : > { %v3008_v41 = vsub.f32 %v15708_v58, %v20660_v60  ;;  %11674 = vmatpush1.bf16.msra.mxu0 %v15695_v51  ;;  %2860 = vmatprep.mubr.f32.mxu0 %v20349_v10  ;;  %v4903_v60 = vand.u32 4294901760, %v4902_v30  ;;  %v4915_v58 = vand.u32 4294901760, %v4914_v5  ;;  %v4921_v32 = vand.u32 4294901760, %v4920_v59  ;;  %v20692_v34 = vld [vmem:[#allocation105_spill] sm:$0xff] }
 0x334   : > { %20661 = vst [vmem:[#allocation82_spill] sm:$0xff] %v15998_v23  ;;  %11676 = vmatprep.subr.bf16.mxu0 %v15729_v43  ;;  %12066 = vmatpush1.bf16.msra.mxu1 %v20663_v19  ;;  %v3003_v51 = vand.u32 4294901760, %v3002_v1  ;;  %20666 = vst [vmem:[#allocation84_spill] sm:$0xff] %v16009_v2  ;;  %v16011_v30 = vsub.f32 %v1930_v21, %v2930_v47  ;;  %v20668_v43 = vld [vmem:[#allocation127_spill] sm:$0xff]  ;;  %v16016_v22 = vpack.c.bf16 %v4891_v13, %v4879_v52  ;;  %v20671_v1 = vld [vmem:[#allocation29_spill] sm:$0xff] }
 0x335   : > { %v3009_v6 = vand.u32 4294901760, %v3008_v41  ;;  %12068 = vmatprep.subr.bf16.mxu1 %v20665_v37  ;;  %v16018_v31 = vpack.c.bf16 %v4897_v42, %v4885_v54  ;;  %v16024_v21 = vpack.c.bf16 %v4915_v58, %v4903_v60  ;;  %v16026_v47 = vpack.c.bf16 %v4921_v32, %v4909_v24  ;;  %v20675_v52 = vld [vmem:[#allocation32_spill] sm:$0xff]  ;;  %v20676_v54 = vld [vmem:[#allocation45_spill] sm:$0xff]  ;;  %v20677_v41 = vld [vmem:[#allocation35_spill] sm:$0xff] }
 0x336   : > { %2862 = vmatmul.mubr.f32.gmra.mrb[6].mxu0 %v20664_v55  ;;  %20667 = vst [vmem:[#allocation87_spill] sm:$0xff] %v16011_v30  ;;  %v20674_v3 = vand.u32 4294901760, %v15715_v8  ;;  %v16033_v42 = vpack.c.bf16 %v3003_v51, %v2991_v9  ;;  %v20679_v58 = vld [vmem:[#allocation104_spill] sm:$0xff]  ;;  %v20680_v24 = vand.u32 4294901760, %v20668_v43  ;;  %v20681_v32 = vand.u32 4294901760, %v20669_v45  ;;  %v20682_v13 = vld [vmem:[#allocation41_spill] sm:$0xff] }
 0x337   : > { %11678 = vmatpush1.bf16.msra.mxu0 %v20670_v26  ;;  %2964 = vmatprep.mubr.f32.mxu0 %v20349_v10  ;;  %v16035_v5 = vpack.c.bf16 %v3009_v6, %v2997_v4  ;;  %v20678_v26 = vld [vmem:[#allocation42_spill] sm:$0xff]  ;;  %v20683_v51 = vld [vmem:[#allocation39_spill] sm:$0xff]  ;;  %v20684_v4 = vld [vmem:[#allocation92_spill] sm:$0xff]  ;;  %v20685_v6 = vand.u32 4294901760, %v20671_v1  ;;  %v20686_v37 = vand.u32 4294901760, %v20672_v61  ;;  %v20699_v39 = vand.u32 4294901760, %v20682_v13 }
 0x338   : > { %11680 = vmatprep.subr.bf16.mxu0 %v20673_v38  ;;  %v4926_v59 = vsub.f32 %v15715_v8, %v20674_v3  ;;  %12070 = vmatpush1.bf16.msra.mxu1 %v20676_v54  ;;  %v4938_v60 = vsub.f32 %v20668_v43, %v20680_v24  ;;  %v4932_v3 = vsub.f32 %v20669_v45, %v20681_v32  ;;  %v20687_v19 = vld [vmem:[#allocation44_spill] sm:$0xff]  ;;  %v20688_v55 = vld [vmem:[#allocation43_spill] sm:$0xff]  ;;  %v20689_v8 = vld [vmem:[#allocation98_spill] sm:$0xff]  ;;  %v20690_v54 = vand.u32 4294901760, %v20675_v52 }
 0x339   : > { %12072 = vmatprep.subr.bf16.mxu1 %v20679_v58  ;;  %v4944_v38 = vsub.f32 %v20671_v1, %v20685_v6  ;;  %v3014_v58 = vsub.f32 %v20672_v61, %v20686_v37  ;;  %v20693_v6 = vld [vmem:[#allocation89_spill] sm:$0xff]  ;;  %v20694_v1 = vand.u32 4294901760, %v20677_v41  ;;  %v20695_v24 = vand.u32 4294901760, %v20678_v26  ;;  %v20697_v61 = vld [vmem:[#allocation95_spill] sm:$0xff]  ;;  %v20715_v2 = vld [vmem:[#allocation94_spill] sm:$0xff] }
 0x33a   : > { %v4927_v32 = vand.u32 4294901760, %v4926_v59  ;;  %v3026_v9 = vsub.f32 %v20675_v52, %v20690_v54  ;;  %v4939_v54 = vand.u32 4294901760, %v4938_v60  ;;  %v4933_v45 = vand.u32 4294901760, %v4932_v3  ;;  %v20704_v3 = vld [vmem:[#allocation73_spill] sm:$0xff] }
 0x33b   : > { %11682 = vmatpush1.bf16.msra.mxu0 %v20684_v4  ;;  %v20691_v4 = vld [vmem:[#allocation96_spill] sm:$0xff]  ;;  %v3020_v37 = vsub.f32 %v20677_v41, %v20694_v1  ;;  %v3032_v43 = vsub.f32 %v20678_v26, %v20695_v24  ;;  %v20700_v52 = vand.u32 4294901760, %v20683_v51  ;;  %v4945_v14 = vand.u32 4294901760, %v4944_v38 }
 0x33c   : > { %11684 = vmatprep.subr.bf16.mxu0 %v20689_v8  ;;  %12074 = vmatpush1.bf16.msra.mxu1 %v20693_v6  ;;  %v20696_v8 = vld [vmem:[#allocation88_spill] sm:$0xff]  ;;  %v4950_v6 = vsub.f32 %v20682_v13, %v20699_v39  ;;  %v3015_v24 = vand.u32 4294901760, %v3014_v58  ;;  %v20702_v59 = vand.u32 4294901760, %v20687_v19  ;;  %v3027_v26 = vand.u32 4294901760, %v3026_v9 }
 0x33d   : > { %12076 = vmatprep.subr.bf16.mxu1 %v20698_v63  ;;  %v4962_v1 = vsub.f32 %v20683_v51, %v20700_v52  ;;  %v20701_v41 = vld [vmem:[#allocation100_spill] sm:$0xff]  ;;  %v20703_v63 = vand.u32 4294901760, %v20688_v55  ;;  %v20705_v39 = vand.u32 4294901760, %v20691_v4  ;;  %v20706_v52 = vand.u32 4294901760, %v20692_v34  ;;  %v20708_v51 = vld [vmem:[#allocation63_spill] sm:$0xff] }
 0x33e   : > { %v4956_v29 = vsub.f32 %v20687_v19, %v20702_v59  ;;  %v20707_v58 = vld [vmem:[#allocation108_spill] sm:$0xff]  ;;  %v3021_v59 = vand.u32 4294901760, %v3020_v37  ;;  %v3033_v19 = vand.u32 4294901760, %v3032_v43  ;;  %v20709_v20 = vand.u32 4294901760, %v20696_v8 }
 0x33f   : > { %11686 = vmatpush1.bf16.msra.mxu0 %v20701_v41  ;;  %v4968_v60 = vsub.f32 %v20688_v55, %v20703_v63  ;;  %v3038_v13 = vsub.f32 %v20691_v4, %v20705_v39  ;;  %v3050_v38 = vsub.f32 %v20692_v34, %v20706_v52  ;;  %v20710_v9 = vand.u32 4294901760, %v20697_v61  ;;  %v20711_v55 = vld [vmem:[#allocation69_spill] sm:$0xff]  ;;  %v20712_v34 = vld [vmem:[#allocation36_spill] sm:$0xff] }
 0x340   : > { %11688 = vmatprep.subr.bf16.mxu0 %v20704_v3  ;;  %12078 = vmatpush1.bf16.msra.mxu1 %v20708_v51  ;;  %v3044_v63 = vsub.f32 %v20696_v8, %v20709_v20  ;;  %v16102_v39 = vpack.c.bf16 %v4939_v54, %v4927_v32  ;;  %v4951_v4 = vand.u32 4294901760, %v4950_v6  ;;  %v4963_v52 = vand.u32 4294901760, %v4962_v1  ;;  %v20714_v51 = vld [vmem:[#allocation93_spill] sm:$0xff]  ;;  %v20717_v54 = vld [vmem:[#allocation70_spill] sm:$0xff] }
 0x341   : > { %v3056_v3 = vsub.f32 %v20697_v61, %v20710_v9  ;;  %12080 = vmatprep.subr.bf16.mxu1 %v20711_v55  ;;  %v19619_v41 = vand.u32 4294901760, %v20712_v34  ;;  %v4957_v37 = vand.u32 4294901760, %v4956_v29  ;;  %v4969_v43 = vand.u32 4294901760, %v4968_v60 }
 0x342   : > { %v16109_v8 = vpack.c.bf16 %v4945_v14, %v4933_v45  ;;  %v3039_v9 = vand.u32 4294901760, %v3038_v13  ;;  %v3051_v55 = vand.u32 4294901760, %v3050_v38  ;;  %v20716_v32 = vand.u32 4294901760, %v20707_v58  ;;  %v20718_v45 = vld [vmem:[#allocation99_spill] sm:$0xff]  ;;  %v20719_v38 = vld [vmem:[#allocation97_spill] sm:$0xff]  ;;  %v20730_v13 = vld [vmem:[#allocation66_spill] sm:$0xff] }
 0x343   : > { %11690 = vmatpush1.bf16.msra.mxu0 %v20713_v25  ;;  %v16115_v1 = vpack.c.bf16 %v3027_v26, %v3015_v24  ;;  %v16117_v29 = vpack.c.bf16 %v3033_v19, %v3021_v59  ;;  %v3045_v60 = vand.u32 4294901760, %v3044_v63  ;;  %v3057_v30 = vand.u32 4294901760, %v3056_v3  ;;  %v20722_v59 = vld [vmem:[#allocation101_spill] sm:$0xff] }
 0x344   : > { %11692 = vmatprep.subr.bf16.mxu0 %v15885_v57  ;;  %v4974_v6 = vsub.f32 %v20707_v58, %v20716_v32  ;;  %12082 = vmatpush1.bf16.msra.mxu1 %v20717_v54  ;;  %v16120_v20 = vpack.c.bf16 %v4963_v52, %v4951_v4  ;;  %v4986_v14 = vsub.f32 %v20712_v34, %v19619_v41  ;;  %v20720_v19 = vand.u32 4294901760, %v20714_v51  ;;  %v20723_v32 = vld [vmem:[#allocation103_spill] sm:$0xff]  ;;  %v20726_v54 = vld [vmem:[#allocation64_spill] sm:$0xff] }
 0x345   : > { %12084 = vmatprep.subr.bf16.mxu1 %v15899_v48  ;;  %v16128_v26 = vpack.c.bf16 %v4969_v43, %v4957_v37  ;;  %v20721_v3 = vand.u32 4294901760, %v20715_v2  ;;  %v16138_v52 = vpack.c.bf16 %v3051_v55, %v3039_v9  ;;  %v16143_v43 = vpack.c.bf16 %v3057_v30, %v3045_v60 }
 0x346   : > { %v4980_v24 = vsub.f32 %v20714_v51, %v20720_v19  ;;  %v4975_v41 = vand.u32 4294901760, %v4974_v6  ;;  %v20725_v19 = vld [vmem:[#allocation109_spill] sm:$0xff]  ;;  %v4987_v63 = vand.u32 4294901760, %v4986_v14  ;;  %v20728_v55 = vand.u32 4294901760, %v20718_v45 }
 0x347   : > { %11694 = vmatpush1.bf16.msra.mxu0 %v15892_v56  ;;  %v4992_v4 = vsub.f32 %v20715_v2, %v20721_v3  ;;  %v20724_v56 = vld [vmem:[#allocation107_spill] sm:$0xff]  ;;  %v20727_v3 = vld [vmem:[#allocation65_spill] sm:$0xff]  ;;  %v20729_v6 = vand.u32 4294901760, %v20719_v38  ;;  %v20731_v57 = vand.u32 4294901760, %v20722_v59  ;;  %v20739_v14 = vand.u32 4294901760, %v20726_v54 }
 0x348   : > { %11696 = vmatprep.subr.bf16.mxu0 %v15914_v11  ;;  %12086 = vmatpush1.bf16.msra.mxu1 %v15906_v17  ;;  %v3062_v9 = vsub.f32 %v20718_v45, %v20728_v55  ;;  %v4981_v60 = vand.u32 4294901760, %v4980_v24  ;;  %v20733_v17 = vld [vmem:[#allocation111_spill] sm:$0xff]  ;;  %v20734_v55 = vand.u32 4294901760, %v20723_v32  ;;  %v20735_v30 = vand.u32 4294901760, %v20724_v56  ;;  %v20737_v11 = vld [vmem:[#allocation68_spill] sm:$0xff] }
 0x349   : > { %12088 = vmatprep.subr.bf16.mxu1 %v16016_v22  ;;  %v3074_v37 = vsub.f32 %v20719_v38, %v20729_v6  ;;  %v4993_v48 = vand.u32 4294901760, %v4992_v4  ;;  %v3068_v25 = vsub.f32 %v20722_v59, %v20731_v57  ;;  %v20732_v22 = vld [vmem:[#allocation67_spill] sm:$0xff]  ;;  %v20738_v57 = vand.u32 4294901760, %v20725_v19 }
 0x34a   : > { %v3080_v6 = vsub.f32 %v20723_v32, %v20734_v55  ;;  %v20736_v24 = vld [vmem:[#allocation75_spill] sm:$0xff]  ;;  %v5004_v55 = vsub.f32 %v20726_v54, %v20739_v14  ;;  %v16183_v4 = vpack.c.bf16 %v4987_v63, %v4975_v41  ;;  %v3063_v2 = vand.u32 4294901760, %v3062_v9 }
 0x34b   : > { %11698 = vmatpush1.bf16.msra.mxu0 %v15928_v18  ;;  %4858 = vmatmul.mubr.f32.vlgmr.msra.gmra.mrb[2].mxu1 %v20733_v17  ;;  %v4998_v18 = vsub.f32 %v20724_v56, %v20735_v30  ;;  %v5010_v17 = vsub.f32 %v20725_v19, %v20738_v57  ;;  %v20741_v32 = vand.u32 4294901760, %v20730_v13  ;;  %v16189_v57 = vpack.c.bf16 %v4993_v48, %v4981_v60 }
 0x34c   : > { %11700 = vmatprep.subr.bf16.mxu0 %v15998_v23  ;;  %12090 = vmatpush1.bf16.msra.mxu1 %v16018_v31  ;;  %v20740_v23 = vand.u32 4294901760, %v20727_v3  ;;  %v3075_v31 = vand.u32 4294901760, %v3074_v37  ;;  %v3069_v19 = vand.u32 4294901760, %v3068_v25  ;;  %v20742_v14 = vand.u32 4294901760, %v20732_v22  ;;  %v20747_v25 = vld [vmem:[#allocation78_spill] sm:$0xff] }
 0x34d   : > { %4863 = vmatprep.mubr.f32.mxu1 %v20349_v10  ;;  %12092 = vmatprep.subr.bf16.mxu1 %v16024_v21  ;;  %v3086_v59 = vsub.f32 %v20730_v13, %v20741_v32  ;;  %v20744_v21 = vld [vmem:[#allocation37_spill] sm:$0xff]  ;;  %v3081_v41 = vand.u32 4294901760, %v3080_v6  ;;  %v20745_v63 = vand.u32 4294901760, %v20736_v24  ;;  %v20746_v37 = vand.u32 4294901760, %v20737_v11 }
 0x34e   : > { %v5016_v30 = vsub.f32 %v20727_v3, %v20740_v23  ;;  %v3098_v54 = vsub.f32 %v20732_v22, %v20742_v14  ;;  %v20743_v23 = vld [vmem:[#allocation77_spill] sm:$0xff]  ;;  %v19659_v9 = vand.u32 4294901760, %v20747_v25  ;;  %v4999_v60 = vand.u32 4294901760, %v4998_v18 }
 0x34f   : > { %11702 = vmatpush1.bf16.msra.mxu0 %v16002_v36  ;;  %4869 = vmatmul.mubr.f32.gmra.mrb[4].mxu1 %v20744_v21  ;;  %v3092_v32 = vsub.f32 %v20736_v24, %v20745_v63  ;;  %v3104_v48 = vsub.f32 %v20737_v11, %v20746_v37  ;;  %v5011_v14 = vand.u32 4294901760, %v5010_v17  ;;  %v5005_v3 = vand.u32 4294901760, %v5004_v55  ;;  %v20750_v55 = vld [vmem:[#allocation110_spill] sm:$0xff] }
 0x350   : > { %11704 = vmatprep.subr.bf16.mxu0 %v16033_v42  ;;  %12094 = vmatpush1.bf16.msra.mxu1 %v16026_v47  ;;  %v5017_v36 = vand.u32 4294901760, %v5016_v30  ;;  %v20748_v42 = vld [vmem:[#allocation56_spill] sm:$0xff]  ;;  %v11715_v6 = vpack.c.bf16 %v3075_v31, %v3063_v2  ;;  %v3087_v21 = vand.u32 4294901760, %v3086_v59  ;;  %v19651_v63 = vand.u32 4294901760, %v15887_v28 }
 0x351   : > { %5099 = vmatprep.mubr.f32.mxu1 %v20349_v10  ;;  %12096 = vmatprep.subr.bf16.mxu1 %v16102_v39  ;;  %v19649_v37 = vand.u32 4294901760, %v15890_v12  ;;  %v3099_v18 = vand.u32 4294901760, %v3098_v54  ;;  %v20749_v47 = vand.u32 4294901760, %v20743_v23  ;;  %v19644_v30 = vand.u32 4294901760, %v15880_v15 }
 0x352   : > { %2970 = vmatmul.mubr.f32.vlgmr.msra.gmra.mrb[4].mxu0 %v20748_v42  ;;  %v11717_v2 = vpack.c.bf16 %v3081_v41, %v3069_v19  ;;  %v3093_v39 = vand.u32 4294901760, %v3092_v32  ;;  %v3105_v59 = vand.u32 4294901760, %v3104_v48  ;;  %v12107_v54 = vpack.c.bf16 %v5011_v14, %v4999_v60 }
 0x353   : > { %11706 = vmatpush1.bf16.msra.mxu0 %v16035_v5  ;;  %2975 = vmatprep.mubr.f32.mxu0 %v20349_v10  ;;  %v5022_v17 = vsub.f32 %v20743_v23, %v20749_v47  ;;  %v5034_v5 = vsub.f32 %v20747_v25, %v19659_v9  ;;  %v12109_v31 = vpack.c.bf16 %v5017_v36, %v5005_v3  ;;  %v19643_v42 = vand.u32 4294901760, %v15894_v62 }
 0x354   : > { %11708 = vmatprep.subr.bf16.mxu0 %v16115_v1  ;;  %12098 = vmatpush1.bf16.msra.mxu1 %v16109_v8  ;;  %v19642_v47 = vand.u32 4294901760, %v15896_v53  ;;  %v3110_v1 = vsub.f32 %v15887_v28, %v19651_v63  ;;  %v3122_v19 = vsub.f32 %v15890_v12, %v19649_v37  ;;  %v19647_v8 = vand.u32 4294901760, %v15901_v40 }
 0x355   : > { %12100 = vmatprep.subr.bf16.mxu1 %v16120_v20  ;;  %v19645_v36 = vand.u32 4294901760, %v15904_v33  ;;  %v11719_v3 = vpack.c.bf16 %v3099_v18, %v3087_v21  ;;  %v5023_v41 = vand.u32 4294901760, %v5022_v17  ;;  %v20751_v32 = vand.u32 4294901760, %v15878_v7 }
 0x356   : > { %2981 = vmatmul.mubr.f32.gmra.mrb[6].mxu0 %v20750_v55  ;;  %v5040_v48 = vsub.f32 %v15880_v15, %v19644_v30  ;;  %v11721_v60 = vpack.c.bf16 %v3105_v59, %v3093_v39  ;;  %v5035_v14 = vand.u32 4294901760, %v5034_v5  ;;  %v19646_v55 = vand.u32 4294901760, %v15916_v27 }
 0x357   : > { %11710 = vmatpush1.bf16.msra.mxu0 %v16117_v29  ;;  %v5028_v20 = vsub.f32 %v15878_v7, %v20751_v32  ;;  %3211 = vmatprep.mubr.f32.mxu0 %v20349_v10  ;;  %v19648_v29 = vand.u32 4294901760, %v15918_v44  ;;  %v3116_v21 = vsub.f32 %v15894_v62, %v19643_v42  ;;  %v3128_v18 = vsub.f32 %v15896_v53, %v19642_v47 }
 0x358   : > { %11712 = vmatprep.subr.bf16.mxu0 %v16138_v52  ;;  %12102 = vmatpush1.bf16.msra.mxu1 %v16128_v26  ;;  %v19650_v17 = vand.u32 4294901760, %v15908_v50  ;;  %v19652_v52 = vand.u32 4294901760, %v15912_v0  ;;  %v3111_v39 = vand.u32 4294901760, %v3110_v1  ;;  %v3123_v59 = vand.u32 4294901760, %v3122_v19 }
 0x359   : > { %12104 = vmatprep.subr.bf16.mxu1 %v16183_v4  ;;  %v5046_v26 = vsub.f32 %v15901_v40, %v19647_v8  ;;  %v5058_v5 = vsub.f32 %v15904_v33, %v19645_v36  ;;  %v5029_v32 = vand.u32 4294901760, %v5028_v20  ;;  %v5041_v47 = vand.u32 4294901760, %v5040_v48 }
 0x35a   : > { %v19654_v42 = vand.u32 4294901760, %v15921_v46  ;;  %v19653_v30 = vand.u32 4294901760, %v15930_v49  ;;  %v3134_v4 = vsub.f32 %v15916_v27, %v19646_v55  ;;  %v3146_v1 = vsub.f32 %v15918_v44, %v19648_v29 }
 0x35b   : > { %11714 = vmatpush1.bf16.msra.mxu0 %v16143_v43  ;;  %v19658_v19 = vand.u32 4294901760, %v15994_v35  ;;  %v19655_v36 = vand.u32 4294901760, %v16000_v16  ;;  %v12111_v43 = vpack.c.bf16 %v5035_v14, %v5023_v41  ;;  %v3117_v20 = vand.u32 4294901760, %v3116_v21  ;;  %v20752_v14 = vld [vmem:[#allocation84_spill] sm:$0xff] }
 0x35c   : > { %11716 = vmatprep.subr.bf16.mxu0 %v11715_v6  ;;  %12106 = vmatpush1.bf16.msra.mxu1 %v16189_v57  ;;  %v5052_v6 = vsub.f32 %v15908_v50, %v19650_v17  ;;  %v5064_v48 = vsub.f32 %v15912_v0, %v19652_v52  ;;  %v11723_v55 = vpack.c.bf16 %v3123_v59, %v3111_v39  ;;  %v3129_v8 = vand.u32 4294901760, %v3128_v18  ;;  %v20753_v17 = vld [vmem:[#allocation87_spill] sm:$0xff] }
 0x35d   : > { %12108 = vmatprep.subr.bf16.mxu1 %v12107_v54  ;;  %v5047_v29 = vand.u32 4294901760, %v5046_v26  ;;  %v5059_v37 = vand.u32 4294901760, %v5058_v5  ;;  %v3140_v57 = vsub.f32 %v15921_v46, %v19654_v42  ;;  %v3152_v41 = vsub.f32 %v15930_v49, %v19653_v30 }
 0x35e   : > { %v19657_v21 = vand.u32 4294901760, %v20752_v14  ;;  %v19656_v63 = vand.u32 4294901760, %v20753_v17  ;;  %v3135_v52 = vand.u32 4294901760, %v3134_v4  ;;  %v3147_v54 = vand.u32 4294901760, %v3146_v1 }
 0x35f   : > { %11718 = vmatpush1.bf16.msra.mxu0 %v11717_v2  ;;  %v3158_v18 = vsub.f32 %v15994_v35, %v19658_v19  ;;  %v3170_v2 = vsub.f32 %v16000_v16, %v19655_v36  ;;  %v12113_v39 = vpack.c.bf16 %v5041_v47, %v5029_v32  ;;  %v5053_v59 = vand.u32 4294901760, %v5052_v6  ;;  %v20777_v19 = vld [vmem:[#allocation35_spill] sm:$0xff] }
 0x360   : > { %11720 = vmatprep.subr.bf16.mxu0 %v11719_v3  ;;  %12110 = vmatpush1.bf16.msra.mxu1 %v12109_v31  ;;  %v5065_v26 = vand.u32 4294901760, %v5064_v48  ;;  %v11725_v5 = vpack.c.bf16 %v3129_v8, %v3117_v20  ;;  %v12115_v30 = vpack.c.bf16 %v5059_v37, %v5047_v29  ;;  %v3141_v42 = vand.u32 4294901760, %v3140_v57  ;;  %v20754_v8 = vld [vmem:[#allocation114_spill] sm:$0xff]  ;;  %v20755_v37 = vld [vmem:[#allocation113_spill] sm:$0xff]  ;;  %v20756_v48 = vld [vmem:[#allocation116_spill] sm:$0xff] }
 0x361   : > { %12112 = vmatprep.subr.bf16.mxu1 %v12111_v43  ;;  %v3153_v3 = vand.u32 4294901760, %v3152_v41  ;;  %v3164_v4 = vsub.f32 %v20752_v14, %v19657_v21  ;;  %v3176_v1 = vsub.f32 %v20753_v17, %v19656_v63  ;;  %v11727_v36 = vpack.c.bf16 %v3147_v54, %v3135_v52  ;;  %v20757_v57 = vld [vmem:[#allocation115_spill] sm:$0xff]  ;;  %v20775_v63 = vld [vmem:[#allocation41_spill] sm:$0xff] }
 0x362   : > { %v3159_v31 = vand.u32 4294901760, %v3158_v18  ;;  %v3171_v47 = vand.u32 4294901760, %v3170_v2  ;;  %v12117_v32 = vpack.c.bf16 %v5065_v26, %v5053_v59  ;;  %v12121_v41 = vpack.c.bf16 %v20757_v57, %v20756_v48  ;;  %v20759_v52 = vld [vmem:[#allocation59_spill] sm:$0xff]  ;;  %v20761_v2 = vld [vmem:[#allocation121_spill] sm:$0xff]  ;;  %v20764_v59 = vld [vmem:[#allocation60_spill] sm:$0xff] }
 0x363   : > { %11722 = vmatpush1.bf16.msra.mxu0 %v11721_v60  ;;  %v12119_v60 = vpack.c.bf16 %v20755_v37, %v20754_v8  ;;  %v11729_v29 = vpack.c.bf16 %v3153_v3, %v3141_v42  ;;  %v3165_v43 = vand.u32 4294901760, %v3164_v4  ;;  %v3177_v20 = vand.u32 4294901760, %v3176_v1  ;;  %v20766_v3 = vld [vmem:[#allocation127_spill] sm:$0xff] }
 0x364   : > { %11724 = vmatprep.subr.bf16.mxu0 %v11723_v55  ;;  %12114 = vmatpush1.bf16.msra.mxu1 %v12113_v39  ;;  %v11731_v6 = vpack.c.bf16 %v3171_v47, %v3159_v31  ;;  %v20758_v55 = vld [vmem:[#allocation117_spill] sm:$0xff]  ;;  %v20762_v39 = vld [vmem:[#allocation120_spill] sm:$0xff]  ;;  %v20767_v1 = vld [vmem:[#allocation123_spill] sm:$0xff] }
 0x365   : > { %12116 = vmatprep.subr.bf16.mxu1 %v12115_v30  ;;  %v12123_v54 = vpack.c.bf16 %v20759_v52, %v20758_v55  ;;  %v11733_v18 = vpack.c.bf16 %v3177_v20, %v3165_v43  ;;  %v20760_v30 = vld [vmem:[#allocation53_spill] sm:$0xff]  ;;  %v11735_v42 = vpack.c.bf16 %v20762_v39, %v20761_v2  ;;  %v20768_v31 = vld [vmem:[#allocation122_spill] sm:$0xff] }
 0x366   : > { %v11737_v47 = vpack.c.bf16 %v20768_v31, %v20767_v1  ;;  %v20772_v20 = vld [vmem:[#allocation30_spill] sm:$0xff] }
 0x367   : > { %11726 = vmatpush1.bf16.msra.mxu0 %v11725_v5  ;;  %v20765_v5 = vld [vmem:[#allocation124_spill] sm:$0xff] }
 0x368   : > { %11728 = vmatprep.subr.bf16.mxu0 %v11727_v36  ;;  %12118 = vmatpush1.bf16.msra.mxu1 %v12117_v32  ;;  %v20763_v36 = vld [vmem:[#allocation61_spill] sm:$0xff]  ;;  %v12127_v4 = vpack.c.bf16 %v20766_v3, %v20765_v5  ;;  %v20769_v32 = vld [vmem:[#allocation52_spill] sm:$0xff] }
 0x369   : > { %12120 = vmatprep.subr.bf16.mxu1 %v12119_v60  ;;  %v12125_v26 = vpack.c.bf16 %v20764_v59, %v20763_v36  ;;  %v20770_v60 = vld [vmem:[#allocation33_spill] sm:$0xff] }
 0x36b   : > { %11730 = vmatpush1.bf16.msra.mxu0 %v11729_v29  ;;  %5101 = vmatmul.mubr.f32.vlgmr.msra.gmra.mrb[2].mxu1 %v20760_v30  ;;  %v20771_v29 = vld [vmem:[#allocation32_spill] sm:$0xff] }
 0x36c   : > { %11732 = vmatprep.subr.bf16.mxu0 %v11731_v6  ;;  %12122 = vmatpush1.bf16.msra.mxu1 %v12121_v41  ;;  %v11739_v43 = vpack.c.bf16 %v20771_v29, %v20770_v60  ;;  %v20773_v6 = vld [vmem:[#allocation29_spill] sm:$0xff]  ;;  %v20783_v60 = vld [vmem:[#allocation46_spill] sm:$0xff] }
 0x36d   : > { %5106 = vmatprep.mubr.f32.mxu1 %v20349_v10  ;;  %12124 = vmatprep.subr.bf16.mxu1 %v12123_v54  ;;  %v12129_v41 = vpack.c.bf16 %v20773_v6, %v20772_v20  ;;  %v20774_v54 = vld [vmem:[#allocation47_spill] sm:$0xff]  ;;  %v20781_v6 = vld [vmem:[#allocation44_spill] sm:$0xff] }
 0x36e   : > { %v20782_v20 = vld [vmem:[#allocation43_spill] sm:$0xff] }
 0x36f   : > { %11734 = vmatpush1.bf16.msra.mxu0 %v11733_v18  ;;  %5108 = vmatmul.mubr.f32.gmra.mrb[4].mxu1 %v20769_v32  ;;  %v20776_v18 = vld [vmem:[#allocation39_spill] sm:$0xff]  ;;  %v20779_v32 = vld [vmem:[#allocation96_spill] sm:$0xff]  ;;  %v12133_v29 = vpack.c.bf16 %v20782_v20, %v20781_v6 }
 0x370   : > { %11736 = vmatprep.subr.bf16.mxu0 %v11735_v42  ;;  %12126 = vmatpush1.bf16.msra.mxu1 %v12125_v26  ;;  %v12131_v21 = vpack.c.bf16 %v20776_v18, %v20775_v63  ;;  %v20778_v42 = vld [vmem:[#allocation42_spill] sm:$0xff]  ;;  %v20780_v26 = vld [vmem:[#allocation105_spill] sm:$0xff] }
 0x371   : > { %5242 = vmatprep.mubr.f32.mxu1 %v20349_v10  ;;  %12128 = vmatprep.subr.bf16.mxu1 %v12127_v4  ;;  %v11741_v9 = vpack.c.bf16 %v20778_v42, %v20777_v19  ;;  %v11743_v30 = vpack.c.bf16 %v20780_v26, %v20779_v32  ;;  %v12135_v4 = vpack.c.bf16 %v20712_v34, %v20707_v58  ;;  %v20787_v34 = vld [vmem:[#allocation101_spill] sm:$0xff] }
 0x372   : > { %3213 = vmatmul.mubr.f32.vlgmr.msra.gmra.mrb[4].mxu0 %v20774_v54 }
 0x373   : > { %11738 = vmatpush1.bf16.msra.mxu0 %v11737_v47  ;;  %3218 = vmatprep.mubr.f32.mxu0 %v20349_v10  ;;  %v20784_v47 = vld [vmem:[#allocation88_spill] sm:$0xff] }
 0x374   : > { %11740 = vmatprep.subr.bf16.mxu0 %v11739_v43  ;;  %12130 = vmatpush1.bf16.msra.mxu1 %v12129_v41  ;;  %v11745_v54 = vpack.c.bf16 %v20697_v61, %v20784_v47  ;;  %v11747_v43 = vpack.c.bf16 %v20719_v38, %v20718_v45  ;;  %v20785_v41 = vld [vmem:[#allocation94_spill] sm:$0xff]  ;;  %v11751_v61 = vpack.c.bf16 %v20732_v22, %v20730_v13  ;;  %v20790_v47 = vld [vmem:[#allocation65_spill] sm:$0xff] }
 0x375   : > { %12132 = vmatprep.subr.bf16.mxu1 %v12131_v21  ;;  %v12137_v20 = vpack.c.bf16 %v20785_v41, %v20714_v51  ;;  %v20786_v21 = vld [vmem:[#allocation109_spill] sm:$0xff] }
 0x376   : > { %3220 = vmatmul.mubr.f32.gmra.mrb[6].mxu0 %v20783_v60  ;;  %v12139_v60 = vpack.c.bf16 %v20786_v21, %v20724_v56 }
 0x377   : > { %11742 = vmatpush1.bf16.msra.mxu0 %v11741_v9  ;;  %3354 = vmatprep.mubr.f32.mxu0 %v20349_v10  ;;  %v20788_v9 = vld [vmem:[#allocation103_spill] sm:$0xff] }
 0x378   : > { %11744 = vmatprep.subr.bf16.mxu0 %v11743_v30  ;;  %12134 = vmatpush1.bf16.msra.mxu1 %v12133_v29  ;;  %v11749_v58 = vpack.c.bf16 %v20788_v9, %v20787_v34  ;;  %v20789_v30 = vld [vmem:[#allocation64_spill] sm:$0xff]  ;;  %v12143_v29 = vpack.c.bf16 %v20747_v25, %v20743_v23 }
 0x379   : > { %12136 = vmatprep.subr.bf16.mxu1 %v12135_v4  ;;  %v12141_v38 = vpack.c.bf16 %v20790_v47, %v20789_v30  ;;  %v11753_v4 = vpack.c.bf16 %v20737_v11, %v20736_v24 }
 0x37b   : > { %11746 = vmatpush1.bf16.msra.mxu0 %v11745_v54  ;;  %v11755_v54 = vpack.c.bf16 %v15890_v12, %v15887_v28 }
 0x37c   : > { %11748 = vmatprep.subr.bf16.mxu0 %v11747_v43  ;;  %12138 = vmatpush1.bf16.msra.mxu1 %v12137_v20  ;;  %v12145_v43 = vpack.c.bf16 %v15880_v15, %v15878_v7  ;;  %v12147_v20 = vpack.c.bf16 %v15904_v33, %v15901_v40 }
 0x37d   : > { %12140 = vmatprep.subr.bf16.mxu1 %v12139_v60  ;;  %v11757_v60 = vpack.c.bf16 %v15896_v53, %v15894_v62 }
 0x37f   : > { %11750 = vmatpush1.bf16.msra.mxu0 %v11749_v58  ;;  %v11759_v58 = vpack.c.bf16 %v15918_v44, %v15916_v27 }
 0x380   : > { %11752 = vmatprep.subr.bf16.mxu0 %v11751_v61  ;;  %12142 = vmatpush1.bf16.msra.mxu1 %v12141_v38  ;;  %v12149_v61 = vpack.c.bf16 %v15912_v0, %v15908_v50  ;;  %v11761_v38 = vpack.c.bf16 %v15930_v49, %v15921_v46  ;;  %v20793_v0 = vld [vmem:[#allocation38_spill] sm:$0xff] }
 0x381   : > { %12144 = vmatprep.subr.bf16.mxu1 %v12143_v29  ;;  %v11763_v29 = vpack.c.bf16 %v16000_v16, %v15994_v35 }
 0x383   : > { %11754 = vmatpush1.bf16.msra.mxu0 %v11753_v4  ;;  %v20791_v4 = vld [vmem:[#allocation112_spill] sm:$0xff] }
 0x384   : > { %11756 = vmatprep.subr.bf16.mxu0 %v11755_v54  ;;  %12146 = vmatpush1.bf16.msra.mxu1 %v12145_v43  ;;  %v11765_v54 = vpack.c.bf16 %v20753_v17, %v20752_v14  ;;  %v20792_v43 = vld [vmem:[#allocation55_spill] sm:$0xff]  ;;  %v20799_v17 = vld [vmem:[#allocation125_spill] sm:$0xff] }
 0x385   : > { %12148 = vmatprep.subr.bf16.mxu1 %v12147_v20  ;;  %v20794_v20 = vld [vmem:[#allocation118_spill] sm:$0xff]  ;;  %v20816_v14 = vld [vmem:[#allocation69_spill] sm:$0xff] }
 0x387   : > { %11758 = vmatpush1.bf16.msra.mxu0 %v11757_v60  ;;  %v20795_v60 = vld [vmem:[#allocation54_spill] sm:$0xff] }
 0x388   : > { %11760 = vmatprep.subr.bf16.mxu0 %v11759_v58  ;;  %12150 = vmatpush1.bf16.msra.mxu1 %v12149_v61  ;;  %v20796_v58 = vld [vmem:[#allocation119_spill] sm:$0xff]  ;;  %v20797_v61 = vld [vmem:[#allocation58_spill] sm:$0xff] }
 0x389   : > { %12152 = vmatprep.subr.bf16.mxu1 %v20791_v4  ;;  %v20830_v4 = vld [vmem:[#allocation83_spill] sm:$0xff] }
 0x38b   : > { %11762 = vmatpush1.bf16.msra.mxu0 %v11761_v38  ;;  %5245 = vmatmul.mubr.f32.vlgmr.msra.gmra.mrb[2].mxu1 %v20792_v43  ;;  %v20798_v38 = vld [vmem:[#allocation49_spill] sm:$0xff]  ;;  %v20801_v43 = vld [vmem:[#allocation34_spill] sm:$0xff] }
 0x38c   : > { %11764 = vmatprep.subr.bf16.mxu0 %v11763_v29  ;;  %12154 = vmatpush1.bf16.msra.mxu1 %v20793_v0  ;;  %v20800_v29 = vld [vmem:[#allocation62_spill] sm:$0xff] }
 0x38d   : > { %5250 = vmatprep.mubr.f32.mxu1 %v20349_v10  ;;  %12156 = vmatprep.subr.bf16.mxu1 %v20794_v20  ;;  %v20802_v20 = vld [vmem:[#allocation126_spill] sm:$0xff] }
 0x38e   : > { %v20810_v0 = vld [vmem:[#allocation98_spill] sm:$0xff] }
 0x38f   : > { %11766 = vmatpush1.bf16.msra.mxu0 %v11765_v54  ;;  %5253 = vmatmul.mubr.f32.gmra.mrb[4].mxu1 %v20795_v60  ;;  %v20803_v54 = vld [vmem:[#allocation48_spill] sm:$0xff] }
 0x390   : > { %11768 = vmatprep.subr.bf16.mxu0 %v20796_v58  ;;  %12158 = vmatpush1.bf16.msra.mxu1 %v20797_v61  ;;  %v20804_v60 = vld [vmem:[#allocation40_spill] sm:$0xff]  ;;  %v20805_v58 = vld [vmem:[#allocation31_spill] sm:$0xff]  ;;  %v20806_v61 = vld [vmem:[#allocation102_spill] sm:$0xff] }
 0x391   : > { %5355 = vmatprep.mubr.f32.mxu1 %v20349_v10  ;;  %12160 = vmatprep.subr.bf16.mxu1 %v20799_v17  ;;  %v20808_v17 = vld [vmem:[#allocation104_spill] sm:$0xff] }
 0x392   : > { %3357 = vmatmul.mubr.f32.vlgmr.msra.gmra.mrb[4].mxu0 %v20798_v38  ;;  %v20807_v38 = vld [vmem:[#allocation45_spill] sm:$0xff] }
 0x393   : > { %11770 = vmatpush1.bf16.msra.mxu0 %v20800_v29  ;;  %3362 = vmatprep.mubr.f32.mxu0 %v20349_v10  ;;  %v20809_v29 = vld [vmem:[#allocation92_spill] sm:$0xff] }
 0x394   : > { %11772 = vmatprep.subr.bf16.mxu0 %v20801_v43  ;;  %12162 = vmatpush1.bf16.msra.mxu1 %v20802_v20  ;;  %v20811_v43 = vld [vmem:[#allocation89_spill] sm:$0xff]  ;;  %v20812_v20 = vld [vmem:[#allocation106_spill] sm:$0xff] }
 0x395   : > { %12164 = vmatprep.subr.bf16.mxu1 %v20804_v60  ;;  %v20814_v60 = vld [vmem:[#allocation73_spill] sm:$0xff] }
 0x396   : > { %3365 = vmatmul.mubr.f32.gmra.mrb[6].mxu0 %v20803_v54  ;;  %v20813_v54 = vld [vmem:[#allocation100_spill] sm:$0xff] }
 0x397   : > { %11774 = vmatpush1.bf16.msra.mxu0 %v20805_v58  ;;  %3467 = vmatprep.mubr.f32.mxu0 %v20349_v10  ;;  %v20815_v58 = vld [vmem:[#allocation63_spill] sm:$0xff] }
 0x398   : > { %11776 = vmatprep.subr.bf16.mxu0 %v20806_v61  ;;  %12166 = vmatpush1.bf16.msra.mxu1 %v20807_v38  ;;  %v20817_v61 = vld [vmem:[#allocation76_spill] sm:$0xff]  ;;  %v20818_v38 = vld [vmem:[#allocation71_spill] sm:$0xff] }
 0x399   : > { %12168 = vmatprep.subr.bf16.mxu1 %v20808_v17  ;;  %v20819_v17 = vld [vmem:[#allocation70_spill] sm:$0xff] }
 0x39b   : > { %11778 = vmatpush1.bf16.msra.mxu0 %v20809_v29  ;;  %v20820_v29 = vld [vmem:[#allocation80_spill] sm:$0xff] }
 0x39c   : > { %11780 = vmatprep.subr.bf16.mxu0 %v20810_v0  ;;  %12170 = vmatpush1.bf16.msra.mxu1 %v20811_v43  ;;  %v20821_v43 = vand.u32 4294901760, %v20754_v8 }
 0x39d   : > { %12172 = vmatprep.subr.bf16.mxu1 %v20812_v20  ;;  %v20822_v20 = vand.u32 4294901760, %v20755_v37  ;;  %v20831_v37 = vld [vmem:[#allocation57_spill] sm:$0xff] }
 0x39f   : > { %11782 = vmatpush1.bf16.msra.mxu0 %v20813_v54  ;;  %v12183_v0 = vpack.c.bf16 %v20822_v20, %v20821_v43  ;;  %v20823_v54 = vld [vmem:[#allocation79_spill] sm:$0xff]  ;;  %v20832_v20 = vld [vmem:[#allocation82_spill] sm:$0xff]  ;;  %v20833_v43 = vand.u32 4294901760, %v20761_v2  ;;  %v20840_v2 = vand.u32 4294901760, %v20767_v1 }
 0x3a0   : > { %11784 = vmatprep.subr.bf16.mxu0 %v20814_v60  ;;  %12174 = vmatpush1.bf16.msra.mxu1 %v20815_v58  ;;  %v20824_v60 = vld [vmem:[#allocation81_spill] sm:$0xff]  ;;  %v20825_v58 = vld [vmem:[#allocation72_spill] sm:$0xff]  ;;  %v20851_v1 = vld [vmem:[#allocation50_spill] sm:$0xff] }
 0x3a1   : > { %12176 = vmatprep.subr.bf16.mxu1 %v20816_v14  ;;  %v20826_v14 = vand.u32 4294901760, %v20756_v48 }
 0x3a3   : > { %11786 = vmatpush1.bf16.msra.mxu0 %v20817_v61  ;;  %v20827_v61 = vand.u32 4294901760, %v20757_v57 }
 0x3a4   : > { %11788 = vmatprep.subr.bf16.mxu0 %v20818_v38  ;;  %12178 = vmatpush1.bf16.msra.mxu1 %v20819_v17  ;;  %v20828_v17 = vand.u32 4294901760, %v20758_v55  ;;  %v20838_v55 = vand.u32 4294901760, %v20766_v3  ;;  %v20849_v3 = vld [vmem:[#allocation29_spill] sm:$0xff] }
 0x3a5   : > { %12180 = vmatprep.subr.bf16.mxu1 %v20820_v29  ;;  %v12185_v38 = vpack.c.bf16 %v20827_v61, %v20826_v14  ;;  %v20829_v29 = vand.u32 4294901760, %v20759_v52  ;;  %v20836_v14 = vand.u32 4294901760, %v20764_v59  ;;  %v20839_v61 = vld [vmem:[#allocation85_spill] sm:$0xff]  ;;  %v20845_v59 = vld [vmem:[#allocation32_spill] sm:$0xff] }
 0x3a7   : > { %11790 = vmatpush1.bf16.msra.mxu0 %v20823_v54  ;;  %v12187_v8 = vpack.c.bf16 %v20829_v29, %v20828_v17  ;;  %v20837_v17 = vand.u32 4294901760, %v20765_v5  ;;  %v20842_v29 = vld [vmem:[#allocation128_spill] sm:$0xff]  ;;  %v20847_v5 = vld [vmem:[#allocation30_spill] sm:$0xff] }
 0x3a8   : > { %11792 = vmatprep.subr.bf16.mxu0 %v20824_v60  ;;  %12182 = vmatpush1.bf16.msra.mxu1 %v20825_v58  ;;  %v20834_v58 = vand.u32 4294901760, %v20762_v39  ;;  %v20841_v39 = vand.u32 4294901760, %v20768_v31  ;;  %v20852_v31 = vand.u32 4294901760, %v20775_v63  ;;  %v20858_v63 = vand.u32 4294901760, %v20781_v6 }
 0x3a9   : > { %12184 = vmatprep.subr.bf16.mxu1 %v12183_v0  ;;  %v20835_v0 = vand.u32 4294901760, %v20763_v36  ;;  %v12191_v52 = vpack.c.bf16 %v20838_v55, %v20837_v17  ;;  %v20843_v36 = vld [vmem:[#allocation33_spill] sm:$0xff]  ;;  %v20855_v55 = vand.u32 4294901760, %v20778_v42  ;;  %v20870_v6 = vand.u32 4294901760, %v20718_v45 }
 0x3aa   : > { %v11799_v48 = vpack.c.bf16 %v20834_v58, %v20833_v43  ;;  %v11801_v58 = vpack.c.bf16 %v20841_v39, %v20840_v2  ;;  %v20848_v43 = vand.u32 4294901760, %v20847_v5  ;;  %v20856_v39 = vand.u32 4294901760, %v20779_v32 }
 0x3ab   : > { %11794 = vmatpush1.bf16.msra.mxu0 %v20830_v4  ;;  %5359 = vmatmul.mubr.f32.vlgmr.msra.gmra.mrb[2].mxu1 %v20831_v37  ;;  %v12189_v57 = vpack.c.bf16 %v20836_v14, %v20835_v0  ;;  %v20846_v37 = vand.u32 4294901760, %v20845_v59  ;;  %v20850_v0 = vand.u32 4294901760, %v20849_v3  ;;  %v20862_v59 = vld [vmem:[#allocation108_spill] sm:$0xff]  ;;  %v20878_v45 = vand.u32 4294901760, %v20788_v9 }
 0x3ac   : > { %11796 = vmatprep.subr.bf16.mxu0 %v20832_v20  ;;  %12186 = vmatpush1.bf16.msra.mxu1 %v12185_v38  ;;  %v20844_v38 = vand.u32 4294901760, %v20843_v36  ;;  %v20885_v9 = vand.u32 4294901760, %v20736_v24  ;;  %v20892_v24 = vand.u32 4294901760, %v15904_v33  ;;  %v20900_v33 = vand.u32 4294901760, %v15921_v46  ;;  %v20910_v46 = vld [vmem:[#allocation38_spill] sm:$0xff] }
 0x3ad   : > { %5364 = vmatprep.mubr.f32.mxu1 %v20349_v10  ;;  %12188 = vmatprep.subr.bf16.mxu1 %v12187_v8  ;;  %v12193_v14 = vpack.c.bf16 %v20850_v0, %v20848_v43  ;;  %v20868_v43 = vld [vmem:[#allocation95_spill] sm:$0xff]  ;;  %v20871_v0 = vld [vmem:[#allocation97_spill] sm:$0xff] }
 0x3ae   : > { %v11803_v8 = vpack.c.bf16 %v20846_v37, %v20844_v38  ;;  %v20864_v37 = vld [vmem:[#allocation36_spill] sm:$0xff] }
 0x3af   : > { %11798 = vmatpush1.bf16.msra.mxu0 %v20839_v61  ;;  %5368 = vmatmul.mubr.f32.gmra.mrb[4].mxu1 %v20842_v29  ;;  %v20857_v29 = vand.u32 4294901760, %v20780_v26  ;;  %v20865_v42 = vand.u32 4294901760, %v20864_v37  ;;  %v20869_v26 = vand.u32 4294901760, %v20868_v43  ;;  %v20904_v43 = vld [vmem:[#allocation112_spill] sm:$0xff] }
 0x3b0   : > { %11800 = vmatprep.subr.bf16.mxu0 %v11799_v48  ;;  %12190 = vmatpush1.bf16.msra.mxu1 %v12189_v57  ;;  %v20853_v48 = vand.u32 4294901760, %v20776_v18  ;;  %v20854_v57 = vand.u32 4294901760, %v20777_v19  ;;  %v20863_v19 = vand.u32 4294901760, %v20862_v59 }
 0x3b1   : > { %5534 = vmatprep.mubr.f32.mxu1 %v20349_v10  ;;  %12192 = vmatprep.subr.bf16.mxu1 %v12191_v52  ;;  %v11807_v36 = vpack.c.bf16 %v20857_v29, %v20856_v39  ;;  %v20859_v52 = vld [vmem:[#allocation43_spill] sm:$0xff]  ;;  %v20877_v39 = vand.u32 4294901760, %v20787_v34  ;;  %v20884_v34 = vand.u32 4294901760, %v20747_v25  ;;  %v20891_v25 = vand.u32 4294901760, %v15901_v40 }
 0x3b2   : > { %3471 = vmatmul.mubr.f32.vlgmr.msra.gmra.mrb[4].mxu0 %v20851_v1  ;;  %v12195_v17 = vpack.c.bf16 %v20853_v48, %v20852_v31  ;;  %v11805_v2 = vpack.c.bf16 %v20855_v55, %v20854_v57  ;;  %v20860_v18 = vand.u32 4294901760, %v20859_v52  ;;  %v12199_v5 = vpack.c.bf16 %v20865_v42, %v20863_v19 }
 0x3b3   : > { %11802 = vmatpush1.bf16.msra.mxu0 %v11801_v58  ;;  %3476 = vmatprep.mubr.f32.mxu0 %v20349_v10  ;;  %v20861_v58 = vld [vmem:[#allocation51_spill] sm:$0xff]  ;;  %v20873_v31 = vand.u32 4294901760, %v20714_v51  ;;  %v20874_v48 = vand.u32 4294901760, %v20785_v41  ;;  %v20875_v57 = vand.u32 4294901760, %v20724_v56  ;;  %v20876_v55 = vand.u32 4294901760, %v20786_v21 }
 0x3b4   : > { %11804 = vmatprep.subr.bf16.mxu0 %v11803_v8  ;;  %12194 = vmatpush1.bf16.msra.mxu1 %v12193_v14  ;;  %v12197_v38 = vpack.c.bf16 %v20860_v18, %v20858_v63  ;;  %v20866_v8 = vld [vmem:[#allocation88_spill] sm:$0xff]  ;;  %v20872_v14 = vand.u32 4294901760, %v20871_v0  ;;  %v11813_v29 = vpack.c.bf16 %v20878_v45, %v20877_v39  ;;  %v20880_v51 = vand.u32 4294901760, %v20732_v22  ;;  %v20922_v45 = vld [vmem:[#allocation31_spill] sm:$0xff] }
 0x3b5   : > { %12196 = vmatprep.subr.bf16.mxu1 %v12195_v17  ;;  %v20867_v32 = vand.u32 4294901760, %v20866_v8  ;;  %v12201_v17 = vpack.c.bf16 %v20874_v48, %v20873_v31  ;;  %v20881_v41 = vand.u32 4294901760, %v20789_v30  ;;  %v20882_v56 = vand.u32 4294901760, %v20790_v47  ;;  %v20915_v31 = vld [vmem:[#allocation47_spill] sm:$0xff]  ;;  %v20916_v48 = vld [vmem:[#allocation125_spill] sm:$0xff]  ;;  %v20921_v39 = vld [vmem:[#allocation40_spill] sm:$0xff] }
 0x3b6   : > { %3480 = vmatmul.mubr.f32.gmra.mrb[6].mxu0 %v20861_v58  ;;  %v11811_v1 = vpack.c.bf16 %v20872_v14, %v20870_v6  ;;  %v20883_v21 = vand.u32 4294901760, %v20743_v23  ;;  %v20887_v22 = vand.u32 4294901760, %v15887_v28  ;;  %v20888_v30 = vand.u32 4294901760, %v15890_v12  ;;  %v20909_v14 = vld [vmem:[#allocation53_spill] sm:$0xff] }
 0x3b7   : > { %11806 = vmatpush1.bf16.msra.mxu0 %v11805_v2  ;;  %v11809_v3 = vpack.c.bf16 %v20869_v26, %v20867_v32  ;;  %3646 = vmatprep.mubr.f32.mxu0 %v20349_v10  ;;  %v12203_v2 = vpack.c.bf16 %v20876_v55, %v20875_v57  ;;  %v12205_v52 = vpack.c.bf16 %v20882_v56, %v20881_v41  ;;  %v20889_v47 = vand.u32 4294901760, %v15878_v7  ;;  %v20918_v57 = vld [vmem:[#allocation34_spill] sm:$0xff]  ;;  %v20928_v56 = vld [vmem:[#allocation89_spill] sm:$0xff] }
 0x3b8   : > { %11808 = vmatprep.subr.bf16.mxu0 %v11807_v36  ;;  %12198 = vmatpush1.bf16.msra.mxu1 %v12197_v38  ;;  %v20879_v36 = vand.u32 4294901760, %v20730_v13  ;;  %v12207_v18 = vpack.c.bf16 %v20884_v34, %v20883_v21  ;;  %v20886_v13 = vand.u32 4294901760, %v20737_v11  ;;  %v11819_v58 = vpack.c.bf16 %v20888_v30, %v20887_v22  ;;  %v20919_v55 = vld [vmem:[#allocation126_spill] sm:$0xff]  ;;  %v20930_v21 = vld [vmem:[#allocation100_spill] sm:$0xff]  ;;  %v20931_v34 = vld [vmem:[#allocation73_spill] sm:$0xff] }
 0x3b9   : > { %12200 = vmatprep.subr.bf16.mxu1 %v12199_v5  ;;  %v20890_v23 = vand.u32 4294901760, %v15880_v15  ;;  %v12211_v19 = vpack.c.bf16 %v20892_v24, %v20891_v25  ;;  %v20893_v11 = vand.u32 4294901760, %v15894_v62  ;;  %v20894_v28 = vand.u32 4294901760, %v15896_v53  ;;  %v20898_v5 = vld [vmem:[#allocation74_spill] sm:$0xff]  ;;  %v20937_v30 = vld [vmem:[#allocation80_spill] sm:$0xff] }
 0x3ba   : > { %v11815_v63 = vpack.c.bf16 %v20880_v51, %v20879_v36  ;;  %v11817_v38 = vpack.c.bf16 %v20886_v13, %v20885_v9  ;;  %v20895_v12 = vand.u32 4294901760, %v15916_v27  ;;  %v20896_v7 = vand.u32 4294901760, %v15918_v44  ;;  %v20924_v36 = vld [vmem:[#allocation45_spill] sm:$0xff]  ;;  %v20925_v51 = vld [vmem:[#allocation104_spill] sm:$0xff]  ;;  %v20927_v41 = vld [vmem:[#allocation98_spill] sm:$0xff] }
 0x3bb   : > { %11810 = vmatpush1.bf16.msra.mxu0 %v11809_v3  ;;  %v12209_v59 = vpack.c.bf16 %v20890_v23, %v20889_v47  ;;  %v11821_v37 = vpack.c.bf16 %v20894_v28, %v20893_v11  ;;  %v20897_v15 = vand.u32 4294901760, %v15908_v50  ;;  %v20899_v40 = vand.u32 4294901760, %v20898_v5  ;;  %v20905_v50 = vld [vmem:[#allocation84_spill] sm:$0xff]  ;;  %v20907_v3 = vld [vmem:[#allocation87_spill] sm:$0xff]  ;;  %v20933_v9 = vld [vmem:[#allocation69_spill] sm:$0xff] }
 0x3bc   : > { %11812 = vmatprep.subr.bf16.mxu0 %v11811_v1  ;;  %12202 = vmatpush1.bf16.msra.mxu1 %v12201_v17  ;;  %v11823_v42 = vpack.c.bf16 %v20896_v7, %v20895_v12  ;;  %v20901_v62 = vand.u32 4294901760, %v15930_v49  ;;  %v20902_v32 = vand.u32 4294901760, %v15994_v35  ;;  %v20903_v27 = vand.u32 4294901760, %v16000_v16  ;;  %v20911_v49 = vld [vmem:[#allocation118_spill] sm:$0xff]  ;;  %v20912_v35 = vld [vmem:[#allocation52_spill] sm:$0xff]  ;;  %v20913_v16 = vld [vmem:[#allocation119_spill] sm:$0xff] }
 0x3bd   : > { %12204 = vmatprep.subr.bf16.mxu1 %v12203_v2  ;;  %v12213_v8 = vpack.c.bf16 %v20899_v40, %v20897_v15  ;;  %v20906_v26 = vand.u32 4294901760, %v20905_v50  ;;  %v20908_v6 = vand.u32 4294901760, %v20907_v3  ;;  %v20914_v1 = vld [vmem:[#allocation58_spill] sm:$0xff]  ;;  %v20934_v13 = vld [vmem:[#allocation76_spill] sm:$0xff]  ;;  %v5660_v7 = vld [vmem:[%s14199_s4] sm:$0x3] }
 0x3be   : > { %v11825_v53 = vpack.c.bf16 %v20901_v62, %v20900_v33  ;;  %v11827_v44 = vpack.c.bf16 %v20903_v27, %v20902_v32  ;;  %v20917_v17 = vld [vmem:[#allocation62_spill] sm:$0xff]  ;;  %v6677_v62 = vld [vmem:[%s14180_s14 + $0x8] sm:$0xff]  ;;  %v16652_v32 = vld [vmem:[%s14180_s14] sm:$0xff] }
 0x3bf   : > { %11814 = vmatpush1.bf16.msra.mxu0 %v11813_v29  ;;  %v11829_v0 = vpack.c.bf16 %v20908_v6, %v20906_v26  ;;  %v20920_v2 = vld [vmem:[#allocation46_spill] sm:$0xff]  ;;  %v6679_v50 = vld [vmem:[%s14180_s14 + $0x18] sm:$0xff]  ;;  %v6791_v26 = vand.u32 4294901760, %v16652_v32 }
 0x3c0   : > { %11816 = vmatprep.subr.bf16.mxu0 %v11815_v63  ;;  %12206 = vmatpush1.bf16.msra.mxu1 %v12205_v52  ;;  %v20923_v29 = vld [vmem:[#allocation102_spill] sm:$0xff]  ;;  %v20926_v63 = vld [vmem:[#allocation92_spill] sm:$0xff]  ;;  %v16660_v3 = vld [vmem:[%s14180_s14 + $0x38] sm:$0xff] }
 0x3c1   : > { %12208 = vmatprep.subr.bf16.mxu1 %v12207_v18  ;;  %v20929_v52 = vld [vmem:[#allocation106_spill] sm:$0xff]  ;;  %v20932_v18 = vld [vmem:[#allocation63_spill] sm:$0xff] }
 0x3c2   : > { %v20936_v22 = vld [vmem:[#allocation70_spill] sm:$0xff]  ;;  %v16838_v33 = vld [vmem:[%s14180_s14 + $0xd8] sm:$0xff] }
 0x3c3   : > { %11818 = vmatpush1.bf16.msra.mxu0 %v11817_v38  ;;  %v20935_v38 = vld [vmem:[#allocation71_spill] sm:$0xff]  ;;  %v16663_v6 = vld [vmem:[%s14180_s14 + $0x50] sm:$0xff] }
 0x3c4   : > { %11820 = vmatprep.subr.bf16.mxu0 %v11819_v58  ;;  %12210 = vmatpush1.bf16.msra.mxu1 %v12209_v59  ;;  %v20938_v58 = vld [vmem:[#allocation72_spill] sm:$0xff] }
 0x3c5   : > { %12212 = vmatprep.subr.bf16.mxu1 %v12211_v19 }
 0x3c7   : > { %11822 = vmatpush1.bf16.msra.mxu0 %v11821_v37 }
 0x3c8   : > { %11824 = vmatprep.subr.bf16.mxu0 %v11823_v42  ;;  %12214 = vmatpush1.bf16.msra.mxu1 %v12213_v8  ;;  %v3772_v42 = vld [vmem:[%s14194_s10] sm:$0x3] }
 0x3c9   : > { %12216 = vmatprep.subr.bf16.mxu1 %v20904_v43 }
 0x3cb   : > { %11826 = vmatpush1.bf16.msra.mxu0 %v11825_v53  ;;  %5536 = vmatmul.mubr.f32.vlgmr.msra.gmra.mrb[2].mxu1 %v20909_v14  ;;  %v6680_v53 = vld [vmem:[%s14180_s14 + $0x20] sm:$0xff] }
 0x3cc   : > { %11828 = vmatprep.subr.bf16.mxu0 %v11827_v44  ;;  %12218 = vmatpush1.bf16.msra.mxu1 %v20910_v46  ;;  %v6789_v44 = vand.u32 4294901760, %v6677_v62  ;;  %v6793_v43 = vand.u32 4294901760, %v6680_v53  ;;  %v6797_v46 = vand.u32 4294901760, %v16660_v3 }
 0x3cd   : > { %5541 = vmatprep.mubr.f32.mxu1 %v20349_v10  ;;  %12220 = vmatprep.subr.bf16.mxu1 %v20911_v49  ;;  %v6801_v49 = vand.u32 4294901760, %v16663_v6 }
 0x3cf   : > { %11830 = vmatpush1.bf16.msra.mxu0 %v11829_v0  ;;  %5543 = vmatmul.mubr.f32.gmra.mrb[4].mxu1 %v20912_v35 }
 0x3d0   : > { %11832 = vmatprep.subr.bf16.mxu0 %v20913_v16  ;;  %12222 = vmatpush1.bf16.msra.mxu1 %v20914_v1  ;;  %v16672_v16 = vld [vmem:[%s14180_s14 + $0x48] sm:$0xff]  ;;  %v16674_v1 = vsub.f32 %v6677_v62, %v6789_v44 }
 0x3d1   : > { %5645 = vmatprep.mubr.f32.mxu1 %v20349_v10  ;;  %12224 = vmatprep.subr.bf16.mxu1 %v20916_v48  ;;  %v16679_v48 = vsub.f32 %v16652_v32, %v6791_v26  ;;  %v16734_v32 = vld [vmem:[%s14180_s14 + $0x60] sm:$0xff] }
 0x3d2   : > { %3648 = vmatmul.mubr.f32.vlgmr.msra.gmra.mrb[4].mxu0 %v20915_v31  ;;  %20945 = vst [vmem:[#allocation93_spill] sm:$0xff] %v16674_v1 }
 0x3d3   : > { %11834 = vmatpush1.bf16.msra.mxu0 %v20917_v17  ;;  %3653 = vmatprep.mubr.f32.mxu0 %v20349_v10  ;;  %20947 = vst [vmem:[#allocation107_spill] sm:$0xff] %v16679_v48 }
 0x3d4   : > { %11836 = vmatprep.subr.bf16.mxu0 %v20918_v57  ;;  %12226 = vmatpush1.bf16.msra.mxu1 %v20919_v55  ;;  %v16685_v55 = vsub.f32 %v16660_v3, %v6797_v46 }
 0x3d5   : > { %12228 = vmatprep.subr.bf16.mxu1 %v20921_v39  ;;  %v6803_v39 = vand.u32 4294901760, %v16672_v16 }
 0x3d6   : > { %3655 = vmatmul.mubr.f32.gmra.mrb[6].mxu0 %v20920_v2  ;;  %20949 = vst [vmem:[#allocation67_spill] sm:$0xff] %v16685_v55 }
 0x3d7   : > { %11838 = vmatpush1.bf16.msra.mxu0 %v20922_v45  ;;  %3757 = vmatprep.mubr.f32.mxu0 %v20349_v10  ;;  %v19679_v45 = vand.u32 4294901760, %v16674_v1 }
 0x3d8   : > { %11840 = vmatprep.subr.bf16.mxu0 %v20923_v29  ;;  %12230 = vmatpush1.bf16.msra.mxu1 %v20924_v36  ;;  %v19676_v36 = vand.u32 4294901760, %v16679_v48 }
 0x3d9   : > { %12232 = vmatprep.subr.bf16.mxu1 %v20925_v51 }
 0x3db   : > { %11842 = vmatpush1.bf16.msra.mxu0 %v20926_v63 }
 0x3dc   : > { %11844 = vmatprep.subr.bf16.mxu0 %v20927_v41  ;;  %12234 = vmatpush1.bf16.msra.mxu1 %v20928_v56  ;;  %v19672_v41 = vand.u32 4294901760, %v16685_v55 }
 0x3dd   : > { %12236 = vmatprep.subr.bf16.mxu1 %v20929_v52  ;;  %v16701_v52 = vsub.f32 %v16672_v16, %v6803_v39 }
 0x3df   : > { %11846 = vmatpush1.bf16.msra.mxu0 %v20930_v21  ;;  %20952 = vst [vmem:[#allocation68_spill] sm:$0xff] %v16701_v52  ;;  %v6937_v21 = vsub.f32 %v16674_v1, %v19679_v45 }
 0x3e0   : > { %11848 = vmatprep.subr.bf16.mxu0 %v20931_v34  ;;  %12238 = vmatpush1.bf16.msra.mxu1 %v20932_v18  ;;  %v6943_v18 = vsub.f32 %v16679_v48, %v19676_v36 }
 0x3e1   : > { %12240 = vmatprep.subr.bf16.mxu1 %v20933_v9 }
 0x3e3   : > { %11850 = vmatpush1.bf16.msra.mxu0 %v20934_v13 }
 0x3e4   : > { %11852 = vmatprep.subr.bf16.mxu0 %v20935_v38  ;;  %12242 = vmatpush1.bf16.msra.mxu1 %v20936_v22  ;;  %v6961_v38 = vsub.f32 %v16685_v55, %v19672_v41 }
 0x3e5   : > { %12244 = vmatprep.subr.bf16.mxu1 %v20937_v30  ;;  %v19667_v30 = vand.u32 4294901760, %v16701_v52 }
 0x3e7   : > { %11854 = vmatpush1.bf16.msra.mxu0 %v20823_v54 }
 0x3e8   : > { %11856 = vmatprep.subr.bf16.mxu0 %v20824_v60  ;;  %12246 = vmatpush1.bf16.msra.mxu1 %v20938_v58  ;;  %v20940_v60 = vlaneseq  ;;  %v16724_v58 = vld [vmem:[%s14180_s14 + $0x68] sm:$0xff] }
 0x3e9   : > { %v6805_v16 = vand.u32 4294901760, %v16724_v58 }
 0x3ea   : > { %v16598_v54 = vshrl.u32 %v20940_v60, 7 }
 0x3eb   : > { %11858 = vmatpush1.bf16.msra.mxu0 %v20830_v4  ;;  %5647 = vmatmul.mubr.f32.vlgmr.msra.gmra.mrb[2].mxu1 %v20909_v14  ;;  %v10828_v4 = vld [vmem:[%s20939_s25] ss:$0 sm:$0xff]  ;;  %v6795_v14 = vand.u32 4294901760, %v6679_v50 }
 0x3ec   : > { %11860 = vmatprep.subr.bf16.mxu0 %v20832_v20  ;;  %5652 = vmatprep.mubr.f32.mxu1 %v20349_v10  ;;  %20941 = vst [vmem:[#allocation86_spill] sm:$0xff] %v16598_v54  ;;  %v10830_v20 = vld [vmem:[%s20942_s2] ss:$0 sm:$0xff]  ;;  %vm898_vm5 = vcmp.eq.s32.totalorder %v16598_v54, %v10828_v4  ;;  %v16622_v28 = vsub.s32 0, %v16598_v54  ;;  %v16625_v37 = vsub.s32 1, %v16598_v54  ;;  %v6938_v4 = vand.u32 4294901760, %v6937_v21 }
 0x3ed   : > { %vm906_vm6 = vcmp.eq.s32.totalorder %v16598_v54, %v10830_v20  ;;  %v16682_v57 = vsub.f32 %v6679_v50, %v6795_v14  ;;  %v6944_v20 = vand.u32 4294901760, %v6943_v18  ;;  %v16737_v50 = vld [vmem:[%s14180_s14 + $0x78] sm:$0xff] }
 0x3ee   : > { %v16609_v47 = vsel %vm906_vm6, 1.0, %v20349_v10  ;;  %20943 = vst [vmem:[#allocation90_spill] sm:$0xff] %v16622_v28  ;;  %20944 = vst [vmem:[#allocation91_spill] sm:$0xff] %v16625_v37  ;;  %v16640_v5 = vrot.slane %v5660_v7, %v16622_v28  ;;  %v16643_v40 = vrot.slane %v5660_v7, %v16625_v37  ;;  %v16646_v8 = vrot.slane %v3772_v42, %v16622_v28  ;;  %v16743_v21 = vld [vmem:[%s14180_s14 + $0x98] sm:$0xff] }
 0x3ef   : > { %11862 = vmatpush1.bf16.msra.mxu0 %v20839_v61  ;;  %5654 = vmatmul.mubr.f32.gmra.mrb[4].mxu1 %v20912_v35  ;;  %v16606_v61 = vsel %vm898_vm5, 1.0, %v20349_v10  ;;  %v6174_v59 = vsel %vm5678_vm7, %v16609_v47, 0  ;;  %v16655_v27 = vrot.slane %v3772_v42, %v16625_v37  ;;  %v16669_v35 = vld [vmem:[%s14180_s14 + $0x30] sm:$0xff]  ;;  %20948 = vst [vmem:[#allocation66_spill] sm:$0xff] %v16682_v57  ;;  %v19674_v63 = vand.u32 4294901760, %v16682_v57 }
 0x3f0   : > { %v5680_v23 = vsel %vm5678_vm7, %v16606_v61, 0  ;;  %v16617_v24 = vsub.f32 %v6174_v59, %v6174_v59  ;;  %v6799_v17 = vand.u32 4294901760, %v16669_v35  ;;  %v6692_v59 = vld [vmem:[%s14180_s14 + $0x80] sm:$0xff]  ;;  %v6962_v42 = vand.u32 4294901760, %v6961_v38 }
 0x3f1   : > { %v16615_v25 = vsub.f32 %v5680_v23, %v5680_v23  ;;  %v6955_v13 = vsub.f32 %v16682_v57, %v19674_v63  ;;  %v6809_v38 = vand.u32 4294901760, %v6692_v59  ;;  %v16821_v63 = vld [vmem:[%s14180_s14 + $0xe0] sm:$0xff] }
 0x3f2   : > { %3759 = vmatmul.mubr.f32.vlgmr.msra.gmra.mrb[4].mxu0 %v20915_v31  ;;  %v19680_v11 = vand.u32 4294901760, %v16617_v24  ;;  %v16676_v31 = vsub.f32 %v6680_v53, %v6793_v43  ;;  %v16695_v51 = vsub.f32 %v16669_v35, %v6799_v17  ;;  %v6979_v53 = vsub.f32 %v16701_v52, %v19667_v30 }
 0x3f3   : > { %3764 = vmatprep.mubr.f32.mxu0 %v20349_v10  ;;  %v19681_v19 = vand.u32 4294901760, %v16615_v25  ;;  %v6956_v7 = vand.u32 4294901760, %v6955_v13  ;;  %v16739_v35 = vpack.c.bf16 %v6793_v43, %v6789_v44  ;;  %v16749_v30 = vsub.f32 %v16724_v58, %v6805_v16 }
 0x3f4   : > { %v16637_v15 = vsub.f32 %v16617_v24, %v19680_v11  ;;  %20946 = vst [vmem:[#allocation99_spill] sm:$0xff] %v16676_v31  ;;  %v19677_v29 = vand.u32 4294901760, %v16676_v31  ;;  %20951 = vst [vmem:[#allocation75_spill] sm:$0xff] %v16695_v51  ;;  %v19668_v9 = vand.u32 4294901760, %v16695_v51  ;;  %v6980_v13 = vand.u32 4294901760, %v6979_v53 }
 0x3f5   : > { %v16630_v12 = vsub.f32 %v16615_v25, %v19681_v19  ;;  %20953 = vst [vmem:[#allocation77_spill] sm:$0xff] %v16739_v35  ;;  %20954 = vst [vmem:[#allocation37_spill] sm:$0xff] %v16749_v30  ;;  %v6807_v44 = vand.u32 4294901760, %v16734_v32  ;;  %v6811_v43 = vand.u32 4294901760, %v16737_v50  ;;  %v19670_v58 = vand.u32 4294901760, %v16749_v30 }
 0x3f6   : > { %3766 = vmatmul.mubr.f32.gmra.mrb[6].mxu0 %v20920_v2  ;;  %v16688_v2 = vsub.f32 %v16663_v6, %v6801_v49  ;;  %v6949_v34 = vsub.f32 %v16676_v31, %v19677_v29  ;;  %v6967_v23 = vsub.f32 %v16695_v51, %v19668_v9  ;;  %v16751_v9 = vpack.c.bf16 %v6795_v14, %v6791_v26  ;;  %v17076_v51 = vld [vmem:[%s14180_s14 + $0x150] sm:$0xff] }
 0x3f7   : > { %5750 = vmatprep.mubr.f32.mxu0 %v20349_v10  ;;  %v16765_v26 = vsub.f32 %v16734_v32, %v6807_v44  ;;  %v16768_v14 = vsub.f32 %v16737_v50, %v6811_v43  ;;  %v6985_v32 = vsub.f32 %v16749_v30, %v19670_v58  ;;  %v16826_v29 = vpack.c.bf16 %v6809_v38, %v6805_v16 }
 0x3f8   : > { %20950 = vst [vmem:[#allocation111_spill] sm:$0xff] %v16688_v2  ;;  %v19671_v56 = vand.u32 4294901760, %v16688_v2  ;;  %v6950_v60 = vand.u32 4294901760, %v6949_v34  ;;  %v6968_v6 = vand.u32 4294901760, %v6967_v23  ;;  %v12361_v34 = vpack.c.bf16 %v6956_v7, %v6944_v20  ;;  %20955 = vst [vmem:[#allocation78_spill] sm:$0xff] %v16751_v9 }
 0x3f9   : > { %v16758_v20 = vsub.f32 %v6692_v59, %v6809_v38  ;;  %v16760_v23 = vpack.c.bf16 %v6801_v49, %v6797_v46  ;;  %v6813_v7 = vand.u32 4294901760, %v16743_v21  ;;  %20958 = vst [vmem:[#allocation114_spill] sm:$0xff] %v16765_v26  ;;  %20959 = vst [vmem:[#allocation113_spill] sm:$0xff] %v16768_v14  ;;  %v16780_v49 = vpack.c.bf16 %v6803_v39, %v6799_v17 }
 0x3fa   : > { %v6973_v22 = vsub.f32 %v16688_v2, %v19671_v56  ;;  %v12359_v3 = vpack.c.bf16 %v6950_v60, %v6938_v4  ;;  %v16756_v4 = vld [vmem:[%s14180_s14 + $0x90] sm:$0xff]  ;;  %v12365_v60 = vpack.c.bf16 %v6980_v13, %v6968_v6  ;;  %v19673_v50 = vand.u32 4294901760, %v16765_v26  ;;  %20965 = vst [vmem:[#allocation120_spill] sm:$0xff] %v16826_v29 }
 0x3fb   : > { %20956 = vst [vmem:[#allocation56_spill] sm:$0xff] %v16758_v20  ;;  %20957 = vst [vmem:[#allocation110_spill] sm:$0xff] %v16760_v23  ;;  %v19669_v59 = vand.u32 4294901760, %v16758_v20  ;;  %v16778_v46 = vsub.f32 %v16743_v21, %v6813_v7  ;;  %v19683_v53 = vand.u32 4294901760, %v16756_v4  ;;  %v6986_v13 = vand.u32 4294901760, %v6985_v32 }
 0x3fc   : > { %v6974_v62 = vand.u32 4294901760, %v6973_v22  ;;  %v16746_v22 = vld [vmem:[%s14180_s14 + $0xb0] sm:$0xff]  ;;  %12360 = vmatprep.subr.bf16.mxu1 %v12359_v3  ;;  %20961 = vst [vmem:[#allocation115_spill] sm:$0xff] %v16780_v49  ;;  %v19675_v3 = vand.u32 4294901760, %v16768_v14 }
 0x3fd   : > { %12362 = vmatpush1.bf16.msra.mxu1 %v12361_v34  ;;  %20960 = vst [vmem:[#allocation116_spill] sm:$0xff] %v16778_v46  ;;  %v6997_v17 = vsub.f32 %v16758_v20, %v19669_v59  ;;  %v19678_v39 = vand.u32 4294901760, %v16778_v46 }
 0x3fe   : > { %v12363_v18 = vpack.c.bf16 %v6974_v62, %v6962_v42  ;;  %v6817_v42 = vand.u32 4294901760, %v16746_v22  ;;  %v16772_v62 = vld [vmem:[%s14180_s14 + $0xa8] sm:$0xff] }
 0x3ff   : > { %v19682_v34 = vand.u32 4294901760, %v16772_v62  ;;  %v6998_v58 = vand.u32 4294901760, %v6997_v17  ;;  %v7009_v56 = vsub.f32 %v16778_v46, %v19678_v39  ;;  %v16829_v39 = vld [vmem:[%s14180_s14 + $0xc0] sm:$0xff] }
 0x400   : > { %12364 = vmatprep.subr.bf16.mxu1 %v12363_v18  ;;  %v16789_v6 = vsub.f32 %v16746_v22, %v6817_v42  ;;  %v16799_v18 = vsub.f32 %v16756_v4, %v19683_v53  ;;  %v6991_v22 = vsub.f32 %v16765_v26, %v19673_v50  ;;  %v16818_v50 = vld [vmem:[%s14180_s14 + $0xc8] sm:$0xff] }
 0x401   : > { %12366 = vmatpush1.bf16.msra.mxu1 %v12365_v60  ;;  %v7003_v60 = vsub.f32 %v16768_v14, %v19675_v3  ;;  %v16815_v32 = vsub.f32 %v16772_v62, %v19682_v34  ;;  %v12367_v45 = vpack.c.bf16 %v6998_v58, %v6986_v13  ;;  %v7010_v11 = vand.u32 4294901760, %v7009_v56 }
 0x402   : > { %20962 = vst [vmem:[#allocation117_spill] sm:$0xff] %v16789_v6  ;;  %20963 = vst [vmem:[#allocation59_spill] sm:$0xff] %v16799_v18  ;;  %v19686_v59 = vand.u32 4294901760, %v16789_v6  ;;  %v19684_v41 = vand.u32 4294901760, %v16799_v18  ;;  %v6992_v3 = vand.u32 4294901760, %v6991_v22  ;;  %v19689_v22 = vand.u32 4294901760, %v16818_v50 }
 0x403   : > { %20964 = vst [vmem:[#allocation121_spill] sm:$0xff] %v16815_v32  ;;  %v7004_v36 = vand.u32 4294901760, %v7003_v60  ;;  %v19685_v19 = vand.u32 4294901760, %v16815_v32  ;;  %v19687_v60 = vand.u32 4294901760, %v16821_v63  ;;  %12368 = vmatprep.subr.bf16.mxu1 %v12367_v45  ;;  %v16843_v58 = vpack.c.bf16 %v6811_v43, %v6807_v44 }
 0x404   : > { %v7021_v17 = vsub.f32 %v16789_v6, %v19686_v59  ;;  %v7015_v0 = vsub.f32 %v16799_v18, %v19684_v41  ;;  %v19688_v13 = vand.u32 4294901760, %v16829_v39  ;;  %v16850_v41 = vsub.f32 %v16818_v50, %v19689_v22 }
 0x405   : > { %v12369_v34 = vpack.c.bf16 %v7004_v36, %v6992_v3  ;;  %v7027_v56 = vsub.f32 %v16815_v32, %v19685_v19  ;;  %20966 = vst [vmem:[#allocation61_spill] sm:$0xff] %v16843_v58  ;;  %v19690_v43 = vand.u32 4294901760, %v16838_v33  ;;  %v16868_v19 = vpack.c.bf16 %v6817_v42, %v6813_v7 }
 0x406   : > { %v7022_v53 = vand.u32 4294901760, %v7021_v17  ;;  %v7016_v38 = vand.u32 4294901760, %v7015_v0  ;;  %20967 = vst [vmem:[#allocation60_spill] sm:$0xff] %v16850_v41  ;;  %v16855_v0 = vsub.f32 %v16821_v63, %v19687_v60 }
 0x407   : > { %12370 = vmatpush1.bf16.msra.mxu1 %v12369_v34  ;;  %v7028_v44 = vand.u32 4294901760, %v7027_v56  ;;  %v16862_v34 = vsub.f32 %v16829_v39, %v19688_v13  ;;  %20970 = vst [vmem:[#allocation123_spill] sm:$0xff] %v16868_v19  ;;  %v16874_v13 = vsub.f32 %v16838_v33, %v19690_v43 }
 0x408   : > { %v12371_v17 = vpack.c.bf16 %v7022_v53, %v7010_v11  ;;  %20968 = vst [vmem:[#allocation124_spill] sm:$0xff] %v16855_v0  ;;  %v20973_v7 = vand.u32 4294901760, %v16855_v0 }
 0x409   : > { %20969 = vst [vmem:[#allocation127_spill] sm:$0xff] %v16862_v34  ;;  %v12373_v56 = vpack.c.bf16 %v7028_v44, %v7016_v38  ;;  %v19695_v60 = vand.u32 4294901760, %v16862_v34  ;;  %20971 = vst [vmem:[#allocation122_spill] sm:$0xff] %v16874_v13 }
 0x40a   : > { %12372 = vmatprep.subr.bf16.mxu1 %v12371_v17  ;;  %v16887_v42 = vsub.f32 %v16855_v0, %v20973_v7 }
 0x40b   : > { %12374 = vmatpush1.bf16.msra.mxu1 %v12373_v56 }
 0x40c   : > { %v7046_v56 = vand.u32 4294901760, %v16887_v42 }
 0x4be   : > { %v5648_v16 = vpop.f32.mrb[2].mxu1 }
 0x4bf   : > { %v5672_v36 = vadd.f32 %v16640_v5, %v5648_v16  ;;  %v5650_v3 = vpop.f32.mrb[3].mxu1  ;;  %v20972_v16 = vand.u32 4294901760, %v16850_v41 }
 0x4c0   : > { %v5673_v45 = vadd.f32 %v16643_v40, %v5650_v3 }
 0x4c1   : > { %v5684_v11 = vand.u32 4294901760, %v5672_v36  ;;  %v16882_v21 = vsub.f32 %v16850_v41, %v20972_v16 }
 0x4c2   : > { %v5682_v59 = vand.u32 4294901760, %v5673_v45  ;;  %v5655_v3 = vpop.f32.mrb[4].mxu1 }
 0x4c3   : > { %v16876_v22 = vsub.f32 %v5672_v36, %v5684_v11  ;;  %v5674_v17 = vadd.f32 %v16640_v5, %v5655_v3  ;;  %v5657_v53 = vpop.f32.mrb[5].mxu1  ;;  %v16895_v5 = vsub.f32 %v16862_v34, %v19695_v60 }
 0x4c4   : > { %v16889_v38 = vsub.f32 %v5673_v45, %v5682_v59  ;;  %v5675_v44 = vadd.f32 %v16643_v40, %v5657_v53  ;;  %v7034_v45 = vand.u32 4294901760, %v16882_v21 }
 0x4c5   : > { %v3760_v43 = vpop.f32.mrb[4].mxu0  ;;  %v5770_v16 = vand.u32 4294901760, %v16876_v22  ;;  %v5688_v3 = vand.u32 4294901760, %v5674_v17 }
 0x4c6   : > { %v3784_v37 = vadd.f32 %v16646_v8, %v3760_v43  ;;  %v3762_v7 = vpop.f32.mrb[5].mxu0  ;;  %v5764_v28 = vand.u32 4294901760, %v16889_v38  ;;  %v5686_v40 = vand.u32 4294901760, %v5675_v44 }
 0x4c7   : > { %v3785_v53 = vadd.f32 %v16655_v27, %v3762_v7  ;;  %v5771_v60 = vsub.f32 %v16876_v22, %v5770_v16  ;;  %v16905_v54 = vpack.c.bf16 %v5688_v3, %v5684_v11  ;;  %v16907_v36 = vsub.f32 %v5674_v17, %v5688_v3 }
 0x4c8   : > { %v6178_v34 = vand.u32 4294901760, %v3784_v37  ;;  %v5775_v0 = vsub.f32 %v5675_v44, %v5686_v40  ;;  %v16909_v32 = vpack.c.bf16 %v5686_v40, %v5682_v59  ;;  %v5765_v21 = vsub.f32 %v16889_v38, %v5764_v28 }
 0x4c9   : > { %v6176_v41 = vand.u32 4294901760, %v3785_v53  ;;  %v3767_v43 = vpop.f32.mrb[6].mxu0  ;;  %v5772_v18 = vand.u32 4294901760, %v5771_v60  ;;  %v5782_v6 = vand.u32 4294901760, %v16907_v36 }
 0x4ca   : > { %v16915_v7 = vsub.f32 %v3784_v37, %v6178_v34  ;;  %v3769_v11 = vpop.f32.mrb[7].mxu0  ;;  %v5776_v46 = vand.u32 4294901760, %v5775_v0  ;;  %v3786_v44 = vadd.f32 %v16646_v8, %v3767_v43  ;;  %12248 = vmatprep.subr.bf16.mxu0 %v16909_v32  ;;  %v5766_v40 = vand.u32 4294901760, %v5765_v21 }
 0x4cb   : > { %v16917_v17 = vsub.f32 %v3785_v53, %v6176_v41  ;;  %v3787_v3 = vadd.f32 %v16655_v27, %v3769_v11  ;;  %v5783_v59 = vsub.f32 %v16907_v36, %v5782_v6  ;;  %12250 = vmatpush1.bf16.msra.mxu0 %v16905_v54  ;;  %v12255_v37 = vpack.c.bf16 %v5775_v0, %v16889_v38 }
 0x4cc   : > { %v6264_v60 = vand.u32 4294901760, %v16915_v7  ;;  %v6182_v14 = vand.u32 4294901760, %v3786_v44  ;;  %v5777_v26 = vsub.f32 %v5775_v0, %v5776_v46  ;;  %v16928_v27 = vpack.c.bf16 %v5776_v46, %v5764_v28 }
 0x4cd   : > { %v6258_v42 = vand.u32 4294901760, %v16917_v17  ;;  %v6180_v53 = vand.u32 4294901760, %v3787_v3  ;;  %v5784_v20 = vand.u32 4294901760, %v5783_v59  ;;  %v16930_v43 = vpack.c.bf16 %v5782_v6, %v5770_v16  ;;  %v16949_v16 = vld [vmem:[%s14180_s14 + $0xf8] sm:$0xff] }
 0x4ce   : > { %v6265_v8 = vsub.f32 %v16915_v7, %v6264_v60  ;;  %v16932_v11 = vpack.c.bf16 %v6182_v14, %v6178_v34  ;;  %v16934_v30 = vsub.f32 %v3786_v44, %v6182_v14  ;;  %v20974_v38 = vand.u32 4294901760, %v16630_v12 }
 0x4cf   : > { %v16936_v21 = vsub.f32 %v3787_v3, %v6180_v53  ;;  %v5778_v52 = vand.u32 4294901760, %v5777_v26  ;;  %v12253_v59 = vpack.c.bf16 %v5784_v20, %v5772_v18  ;;  %v16941_v28 = vpack.c.bf16 %v6180_v53, %v6176_v41  ;;  %v16952_v26 = vld [vmem:[%s14180_s14 + $0x110] sm:$0xff]  ;;  %v16961_v53 = vld [vmem:[%s14180_s14 + $0x108] sm:$0xff] }
 0x4d0   : > { %5756 = vmatmul.mubr.f32.vlgmr.msra.gmra.mrb[8].mxu0 %v20974_v38  ;;  %v6266_v0 = vand.u32 4294901760, %v6265_v8  ;;  %v6259_v46 = vsub.f32 %v16917_v17, %v6258_v42  ;;  %v6276_v6 = vand.u32 4294901760, %v16934_v30  ;;  %v12375_v41 = vpack.c.bf16 %v7046_v56, %v7034_v45  ;;  %v16958_v3 = vld [vmem:[%s14180_s14 + $0xf0] sm:$0xff] }
 0x4d1   : > { %5846 = vmatprep.mubr.f32.mxu0 %v20349_v10  ;;  %v6270_v34 = vand.u32 4294901760, %v16936_v21  ;;  %v12251_v12 = vpack.c.bf16 %v5778_v52, %v5766_v40  ;;  %v7040_v18 = vand.u32 4294901760, %v16895_v5  ;;  %v20975_v45 = vand.u32 4294901760, %v16874_v13 }
 0x4d2   : > { %v6260_v44 = vand.u32 4294901760, %v6259_v46  ;;  %v6277_v8 = vsub.f32 %v16934_v30, %v6276_v6  ;;  %v16967_v38 = vpack.c.bf16 %v6276_v6, %v6264_v60  ;;  %12376 = vmatprep.subr.bf16.mxu1 %v12375_v41  ;;  %v6829_v56 = vand.u32 4294901760, %v16949_v16 }
 0x4d3   : > { %12252 = vmatprep.subr.bf16.mxu0 %v12251_v12  ;;  %v6271_v52 = vsub.f32 %v16936_v21, %v6270_v34  ;;  %v16965_v40 = vpack.c.bf16 %v6270_v34, %v6258_v42  ;;  %v7051_v5 = vsub.f32 %v16874_v13, %v20975_v45  ;;  %v6833_v46 = vand.u32 4294901760, %v16952_v26  ;;  %v16983_v34 = vld [vmem:[%s14180_s14 + $0x128] sm:$0xff] }
 0x4d4   : > { %12254 = vmatpush1.bf16.msra.mxu0 %v12253_v59  ;;  %v20976_v14 = vand.u32 4294901760, %v16756_v4  ;;  %v20977_v12 = vand.u32 4294901760, %v16772_v62  ;;  %v6278_v42 = vand.u32 4294901760, %v6277_v8  ;;  %v6831_v59 = vand.u32 4294901760, %v16958_v3  ;;  %v16998_v8 = vld [vmem:[%s14180_s14 + $0x140] sm:$0xff] }
 0x4d5   : > { %12256 = vmatprep.subr.bf16.mxu0 %v12255_v37  ;;  %v6272_v60 = vand.u32 4294901760, %v6271_v52  ;;  %v6835_v6 = vand.u32 4294901760, %v16961_v53  ;;  %v7052_v41 = vand.u32 4294901760, %v7051_v5  ;;  %v16986_v45 = vsub.f32 %v16949_v16, %v6829_v56 }
 0x4d6   : > { %v16978_v20 = vpack.c.bf16 %v20977_v12, %v20976_v14  ;;  %v16989_v4 = vsub.f32 %v16952_v26, %v6833_v46  ;;  %v20981_v62 = vand.u32 4294901760, %v16818_v50  ;;  %v20982_v14 = vand.u32 4294901760, %v16821_v63  ;;  %v17013_v50 = vld [vmem:[%s14180_s14 + $0x120] sm:$0xff] }
 0x4d7   : > { %20979 = vst [vmem:[#allocation39_spill] sm:$0xff] %v16986_v45  ;;  %v17002_v52 = vpack.c.bf16 %v6272_v60, %v6260_v44  ;;  %v17004_v5 = vpack.c.bf16 %v6278_v42, %v6266_v0  ;;  %v17007_v16 = vsub.f32 %v16958_v3, %v6831_v59  ;;  %v17010_v26 = vsub.f32 %v16961_v53, %v6835_v6  ;;  %v17023_v3 = vld [vmem:[%s14180_s14 + $0x138] sm:$0xff] }
 0x4d8   : > { %20978 = vst [vmem:[#allocation41_spill] sm:$0xff] %v16978_v20  ;;  %20980 = vst [vmem:[#allocation35_spill] sm:$0xff] %v16989_v4  ;;  %v16995_v37 = vpack.c.bf16 %v20982_v14, %v20981_v62  ;;  %10844 = vmatmul.mubr.msk.f32.vlgmr.msra.gmra.mrb[8].mxu0 %vm5678_vm7, %v16606_v61  ;;  %v20986_v63 = vpack.c.bf16 %v16907_v36, %v16876_v22  ;;  %v12377_v12 = vpack.c.bf16 %v7052_v41, %v7040_v18 }
 0x4d9   : > { %20984 = vst [vmem:[#allocation96_spill] sm:$0xff] %v17007_v16  ;;  %20985 = vst [vmem:[#allocation105_spill] sm:$0xff] %v17010_v26  ;;  %5926 = vmatprep.mubr.f32.mxu0 %v20349_v10  ;;  %v19723_v44 = vand.u32 4294901760, %v16986_v45  ;;  %v19722_v0 = vand.u32 4294901760, %v16989_v4  ;;  %v6837_v42 = vand.u32 4294901760, %v16983_v34  ;;  %v19728_v53 = vand.u32 4294901760, %v17007_v16 }
 0x4da   : > { %20983 = vst [vmem:[#allocation42_spill] sm:$0xff] %v16995_v37  ;;  %12258 = vmatpush1.bf16.msra.mxu0 %v20986_v63  ;;  %v6841_v22 = vand.u32 4294901760, %v16998_v8  ;;  %v20987_v36 = vand.u32 4294901760, %v16829_v39  ;;  %v20988_v18 = vand.u32 4294901760, %v16838_v33  ;;  %12378 = vmatpush1.bf16.msra.mxu1 %v12377_v12  ;;  %v6839_v60 = vand.u32 4294901760, %v17013_v50 }
 0x4db   : > { %12260 = vmatprep.subr.bf16.mxu0 %v16909_v32  ;;  %v7057_v62 = vsub.f32 %v16986_v45, %v19723_v44  ;;  %v7069_v14 = vsub.f32 %v16989_v4, %v19722_v0  ;;  %v17042_v63 = vsub.f32 %v16983_v34, %v6837_v42  ;;  %v7063_v33 = vsub.f32 %v17007_v16, %v19728_v53  ;;  %v17060_v45 = vld [vmem:[%s14180_s14 + $0x158] sm:$0xff] }
 0x4dc   : > { %v17033_v41 = vpack.c.bf16 %v20988_v18, %v20987_v36  ;;  %v20991_v39 = vand.u32 4294901760, %v17010_v26  ;;  %v17052_v36 = vsub.f32 %v16998_v8, %v6841_v22  ;;  %v6843_v18 = vand.u32 4294901760, %v17023_v3 }
 0x4dd   : > { %20990 = vst [vmem:[#allocation94_spill] sm:$0xff] %v17042_v63  ;;  %v7058_v0 = vand.u32 4294901760, %v7057_v62  ;;  %v7070_v44 = vand.u32 4294901760, %v7069_v14  ;;  %v19738_v34 = vand.u32 4294901760, %v17042_v63  ;;  %v17057_v4 = vsub.f32 %v17013_v50, %v6839_v60 }
 0x4de   : > { %20989 = vst [vmem:[#allocation44_spill] sm:$0xff] %v17033_v41  ;;  %v7075_v12 = vsub.f32 %v17010_v26, %v20991_v39  ;;  %20992 = vst [vmem:[#allocation109_spill] sm:$0xff] %v17052_v36  ;;  %v7064_v53 = vand.u32 4294901760, %v7063_v33  ;;  %v19737_v39 = vand.u32 4294901760, %v17052_v36  ;;  %v17064_v8 = vsub.f32 %v17023_v3, %v6843_v18  ;;  %v17067_v26 = vld [vmem:[%s14180_s14 + $0x170] sm:$0xff] }
 0x4df   : > { %20993 = vst [vmem:[#allocation101_spill] sm:$0xff] %v17057_v4  ;;  %v12379_v13 = vpack.c.bf16 %v7070_v44, %v7058_v0  ;;  %v7081_v62 = vsub.f32 %v17042_v63, %v19738_v34  ;;  %v19743_v50 = vand.u32 4294901760, %v17057_v4  ;;  %v17073_v14 = vpack.c.bf16 %v6833_v46, %v6829_v56  ;;  %v17104_v63 = vld [vmem:[%s14180_s14 + $0x188] sm:$0xff] }
 0x4e0   : > { %v7076_v16 = vand.u32 4294901760, %v7075_v12  ;;  %20994 = vst [vmem:[#allocation103_spill] sm:$0xff] %v17064_v8  ;;  %5929 = vmatmul.mubr.f32.vlgmr.msra.gmra.mrb[8].mxu0 %v16615_v25  ;;  %v7093_v3 = vsub.f32 %v17052_v36, %v19737_v39  ;;  %v19744_v44 = vand.u32 4294901760, %v17064_v8  ;;  %v6845_v0 = vand.u32 4294901760, %v17060_v45  ;;  %v17085_v12 = vld [vmem:[%s14180_s14 + $0x168] sm:$0xff] }
 0x4e1   : > { %20995 = vst [vmem:[#allocation64_spill] sm:$0xff] %v17073_v14  ;;  %12262 = vmatpush1.bf16.msra.mxu0 %v16905_v54  ;;  %6003 = vmatprep.mubr.f32.mxu0 %v20349_v10  ;;  %v7082_v56 = vand.u32 4294901760, %v7081_v62  ;;  %v7087_v46 = vsub.f32 %v17057_v4, %v19743_v50  ;;  %v6847_v62 = vand.u32 4294901760, %v17076_v51  ;;  %v17107_v50 = vld [vmem:[%s14180_s14 + $0x1a0] sm:$0xff] }
 0x4e2   : > { %v12381_v33 = vpack.c.bf16 %v7076_v16, %v7064_v53  ;;  %v6849_v16 = vand.u32 4294901760, %v17067_v26  ;;  %v17093_v53 = vpack.c.bf16 %v6835_v6, %v6831_v59  ;;  %12264 = vmatprep.subr.bf16.mxu0 %v16928_v27  ;;  %12380 = vmatprep.subr.bf16.mxu1 %v12379_v13  ;;  %v7094_v39 = vand.u32 4294901760, %v7093_v3 }
 0x4e3   : > { %v7099_v34 = vsub.f32 %v17064_v8, %v19744_v44  ;;  %v17100_v36 = vsub.f32 %v17060_v45, %v6845_v0  ;;  %v7088_v59 = vand.u32 4294901760, %v7087_v46  ;;  %v6851_v27 = vand.u32 4294901760, %v17085_v12  ;;  %v17126_v46 = vld [vmem:[%s14180_s14 + $0x180] sm:$0xff] }
 0x4e4   : > { %20996 = vst [vmem:[#allocation65_spill] sm:$0xff] %v17093_v53  ;;  %12382 = vmatpush1.bf16.msra.mxu1 %v12381_v33  ;;  %v17110_v13 = vsub.f32 %v17067_v26, %v6849_v16  ;;  %v17113_v6 = vpack.c.bf16 %v6841_v22, %v6837_v42  ;;  %v12383_v3 = vpack.c.bf16 %v7094_v39, %v7082_v56  ;;  %v6853_v33 = vand.u32 4294901760, %v17104_v63  ;;  %v17129_v42 = vld [vmem:[%s14180_s14 + $0x198] sm:$0xff] }
 0x4e5   : > { %20997 = vst [vmem:[#allocation55_spill] sm:$0xff] %v17100_v36  ;;  %v7100_v45 = vand.u32 4294901760, %v7099_v34  ;;  %v19756_v44 = vand.u32 4294901760, %v17100_v36  ;;  %v17117_v8 = vsub.f32 %v17076_v51, %v6847_v62  ;;  %v17121_v2 = vsub.f32 %v17085_v12, %v6851_v27 }
 0x4e6   : > { %20998 = vst [vmem:[#allocation54_spill] sm:$0xff] %v17110_v13  ;;  %20999 = vst [vmem:[#allocation49_spill] sm:$0xff] %v17113_v6  ;;  %v19753_v4 = vand.u32 4294901760, %v17110_v13  ;;  %v6857_v26 = vand.u32 4294901760, %v17107_v50  ;;  %12384 = vmatprep.subr.bf16.mxu1 %v12383_v3  ;;  %v17135_v39 = vpack.c.bf16 %v6843_v18, %v6839_v60  ;;  %v17142_v55 = vsub.f32 %v17104_v63, %v6853_v33 }
 0x4e7   : > { %21000 = vst [vmem:[#allocation48_spill] sm:$0xff] %v17117_v8  ;;  %21001 = vst [vmem:[#allocation79_spill] sm:$0xff] %v17121_v2  ;;  %v12385_v22 = vpack.c.bf16 %v7100_v45, %v7088_v59  ;;  %v7105_v51 = vsub.f32 %v17100_v36, %v19756_v44  ;;  %v19755_v34 = vand.u32 4294901760, %v17117_v8  ;;  %v19754_v56 = vand.u32 4294901760, %v17121_v2 }
 0x4e8   : > { %21002 = vst [vmem:[#allocation81_spill] sm:$0xff] %v17135_v39  ;;  %v7117_v12 = vsub.f32 %v17110_v13, %v19753_v4  ;;  %21003 = vst [vmem:[#allocation83_spill] sm:$0xff] %v17142_v55  ;;  %v17145_v59 = vsub.f32 %v17107_v50, %v6857_v26  ;;  %v21005_v3 = vand.u32 4294901760, %v16615_v25  ;;  %v19759_v45 = vand.u32 4294901760, %v17126_v46 }
 0x4e9   : > { %12386 = vmatpush1.bf16.msra.mxu1 %v12385_v22  ;;  %v7106_v60 = vand.u32 4294901760, %v7105_v51  ;;  %v7111_v18 = vsub.f32 %v17117_v8, %v19755_v34  ;;  %v19762_v4 = vand.u32 4294901760, %v17129_v42  ;;  %v7123_v25 = vsub.f32 %v17121_v2, %v19754_v56  ;;  %v17162_v51 = vld [vmem:[%s14180_s14 + $0x1b8] sm:$0xff] }
 0x4ea   : > { %21004 = vst [vmem:[#allocation57_spill] sm:$0xff] %v17145_v59  ;;  %6007 = vmatmul.mubr.f32.vlgmr.msra.gmra.mrb[8].mxu0 %v21005_v3  ;;  %v7118_v63 = vand.u32 4294901760, %v7117_v12  ;;  %v19763_v50 = vand.u32 4294901760, %v17142_v55  ;;  %v17165_v3 = vld [vmem:[%s14180_s14 + $0x1d0] sm:$0xff]  ;;  %v17171_v12 = vsub.f32 %v17126_v46, %v19759_v45  ;;  %v17178_v34 = vpack.c.bf16 %v6849_v16, %v6845_v0 }
 0x4eb   : > { %12266 = vmatpush1.bf16.msra.mxu0 %v16930_v43  ;;  %6089 = vmatprep.mubr.f32.mxu0 %v20349_v10  ;;  %v7112_v43 = vand.u32 4294901760, %v7111_v18  ;;  %v17176_v56 = vsub.f32 %v17129_v42, %v19762_v4  ;;  %v7124_v22 = vand.u32 4294901760, %v7123_v25  ;;  %v6861_v4 = vand.u32 4294901760, %v17162_v51  ;;  %v17191_v16 = vld [vmem:[%s14180_s14 + $0x1b0] sm:$0xff] }
 0x4ec   : > { %12268 = vmatprep.subr.bf16.mxu0 %v16909_v32  ;;  %21006 = vst [vmem:[#allocation82_spill] sm:$0xff] %v17171_v12  ;;  %21008 = vst [vmem:[#allocation128_spill] sm:$0xff] %v17178_v34  ;;  %v12387_v44 = vpack.c.bf16 %v7118_v63, %v7106_v60  ;;  %v7129_v2 = vsub.f32 %v17142_v55, %v19763_v50  ;;  %v21009_v32 = vand.u32 4294901760, %v17145_v59  ;;  %v19773_v45 = vand.u32 4294901760, %v17171_v12  ;;  %v17194_v60 = vld [vmem:[%s14180_s14 + $0x1c8] sm:$0xff] }
 0x4ed   : > { %21007 = vst [vmem:[#allocation85_spill] sm:$0xff] %v17176_v56  ;;  %v19772_v8 = vand.u32 4294901760, %v17176_v56  ;;  %v6865_v0 = vand.u32 4294901760, %v17165_v3  ;;  %v12389_v63 = vpack.c.bf16 %v7124_v22, %v7112_v43  ;;  %v17205_v13 = vsub.f32 %v17162_v51, %v6861_v4 }
 0x4ee   : > { %v7141_v18 = vsub.f32 %v17145_v59, %v21009_v32  ;;  %12388 = vmatprep.subr.bf16.mxu1 %v12387_v44  ;;  %v7130_v25 = vand.u32 4294901760, %v7129_v2  ;;  %v17196_v32 = vpack.c.bf16 %v6851_v27, %v6847_v62  ;;  %v7135_v59 = vsub.f32 %v17171_v12, %v19773_v45  ;;  %v17211_v44 = vld [vmem:[%s14180_s14 + $0x1e8] sm:$0xff]  ;;  %v17214_v2 = vld [vmem:[%s14180_s14 + $0x200] sm:$0xff] }
 0x4ef   : > { %v7147_v55 = vsub.f32 %v17176_v56, %v19772_v8  ;;  %21011 = vst [vmem:[#allocation32_spill] sm:$0xff] %v17205_v13  ;;  %v17208_v36 = vsub.f32 %v17165_v3, %v6865_v0  ;;  %12390 = vmatpush1.bf16.msra.mxu1 %v12389_v63  ;;  %v6863_v27 = vand.u32 4294901760, %v17191_v16  ;;  %v6867_v22 = vand.u32 4294901760, %v17194_v60 }
 0x4f0   : > { %v7142_v50 = vand.u32 4294901760, %v7141_v18  ;;  %21010 = vst [vmem:[#allocation33_spill] sm:$0xff] %v17196_v32  ;;  %v17218_v43 = vpack.c.bf16 %v6857_v26, %v6853_v33  ;;  %v17221_v18 = vld [vmem:[%s14180_s14 + $0x1e0] sm:$0xff]  ;;  %v7136_v51 = vand.u32 4294901760, %v7135_v59  ;;  %v19778_v8 = vand.u32 4294901760, %v17205_v13  ;;  %v17238_v59 = vld [vmem:[%s14180_s14 + $0x1f8] sm:$0xff] }
 0x4f1   : > { %21012 = vst [vmem:[#allocation30_spill] sm:$0xff] %v17208_v36  ;;  %v7148_v3 = vand.u32 4294901760, %v7147_v55  ;;  %v19779_v45 = vand.u32 4294901760, %v17208_v36  ;;  %v17233_v33 = vsub.f32 %v17194_v60, %v6867_v22  ;;  %v6869_v26 = vand.u32 4294901760, %v17211_v44 }
 0x4f2   : > { %v12391_v62 = vpack.c.bf16 %v7142_v50, %v7130_v25  ;;  %21013 = vst [vmem:[#allocation29_spill] sm:$0xff] %v17218_v43  ;;  %10845 = vmatmul.mubr.msk.f32.vlgmr.msra.gmra.mrb[8].mxu0 %vm5678_vm7, %v16606_v61  ;;  %v17230_v50 = vsub.f32 %v17191_v16, %v6863_v27  ;;  %v6873_v63 = vand.u32 4294901760, %v17214_v2  ;;  %v6875_v60 = vand.u32 4294901760, %v17238_v59 }
 0x4f3   : > { %12270 = vmatpush1.bf16.msra.mxu0 %v16905_v54  ;;  %6165 = vmatprep.mubr.f32.mxu0 %v20349_v10  ;;  %21015 = vst [vmem:[#allocation43_spill] sm:$0xff] %v17233_v33  ;;  %v12393_v55 = vpack.c.bf16 %v7148_v3, %v7136_v51  ;;  %v7153_v54 = vsub.f32 %v17205_v13, %v19778_v8  ;;  %v21018_v8 = vand.u32 4294901760, %v17126_v46  ;;  %v17275_v46 = vld [vmem:[%s14180_s14 + $0x230] sm:$0xff] }
 0x4f4   : > { %21014 = vst [vmem:[#allocation50_spill] sm:$0xff] %v17230_v50  ;;  %12272 = vmatprep.subr.bf16.mxu0 %v16941_v28  ;;  %12392 = vmatprep.subr.bf16.mxu1 %v12391_v62  ;;  %v7165_v16 = vsub.f32 %v17208_v36, %v19779_v45  ;;  %v19782_v25 = vand.u32 4294901760, %v17230_v50  ;;  %v17251_v12 = vsub.f32 %v17211_v44, %v6869_v26  ;;  %v21019_v45 = vand.u32 4294901760, %v17129_v42 }
 0x4f5   : > { %v17254_v62 = vsub.f32 %v17214_v2, %v6873_v63  ;;  %12394 = vmatpush1.bf16.msra.mxu1 %v12393_v55  ;;  %v7154_v51 = vand.u32 4294901760, %v7153_v54  ;;  %v21021_v44 = vand.u32 4294901760, %v17233_v33  ;;  %v21022_v42 = vand.u32 4294901760, %v17221_v18 }
 0x4f6   : > { %21016 = vst [vmem:[#allocation51_spill] sm:$0xff] %v17251_v12  ;;  %v7166_v3 = vand.u32 4294901760, %v7165_v16  ;;  %v17260_v36 = vpack.c.bf16 %v21019_v45, %v21018_v8  ;;  %v7159_v56 = vsub.f32 %v17230_v50, %v19782_v25  ;;  %v17272_v16 = vld [vmem:[%s14180_s14 + $0x218] sm:$0xff]  ;;  %v17283_v25 = vsub.f32 %v17238_v59, %v6875_v60 }
 0x4f7   : > { %21017 = vst [vmem:[#allocation108_spill] sm:$0xff] %v17254_v62  ;;  %v7171_v2 = vsub.f32 %v17233_v33, %v21021_v44  ;;  %v17280_v45 = vsub.f32 %v17221_v18, %v21022_v42  ;;  %v17285_v44 = vpack.c.bf16 %v6865_v0, %v6861_v4  ;;  %v21026_v54 = vand.u32 4294901760, %v17251_v12  ;;  %v17300_v0 = vld [vmem:[%s14180_s14 + $0x210] sm:$0xff] }
 0x4f8   : > { %21020 = vst [vmem:[#allocation36_spill] sm:$0xff] %v17260_v36  ;;  %v12395_v8 = vpack.c.bf16 %v7166_v3, %v7154_v51  ;;  %21024 = vst [vmem:[#allocation95_spill] sm:$0xff] %v17283_v25  ;;  %v7160_v55 = vand.u32 4294901760, %v7159_v56  ;;  %v21027_v13 = vand.u32 4294901760, %v17254_v62  ;;  %v19795_v59 = vand.u32 4294901760, %v17283_v25 }
 0x4f9   : > { %21023 = vst [vmem:[#allocation88_spill] sm:$0xff] %v17280_v45  ;;  %21025 = vst [vmem:[#allocation97_spill] sm:$0xff] %v17285_v44  ;;  %v7172_v33 = vand.u32 4294901760, %v7171_v2  ;;  %v7177_v50 = vsub.f32 %v17251_v12, %v21026_v54  ;;  %v19796_v3 = vand.u32 4294901760, %v17280_v45  ;;  %v6877_v4 = vand.u32 4294901760, %v17272_v16  ;;  %v17303_v2 = vld [vmem:[%s14180_s14 + $0x228] sm:$0xff] }
 0x4fa   : > { %v7189_v51 = vsub.f32 %v17254_v62, %v21027_v13  ;;  %10846 = vmatmul.mubr.msk.f32.vlgmr.msra.gmra.mrb[8].mxu0 %vm5678_vm7, %v16606_v61  ;;  %12396 = vmatprep.subr.bf16.mxu1 %v12395_v8  ;;  %v6881_v56 = vand.u32 4294901760, %v17275_v46  ;;  %v17307_v8 = vpack.c.bf16 %v6867_v22, %v6863_v27  ;;  %v7195_v62 = vsub.f32 %v17283_v25, %v19795_v59  ;;  %v17326_v27 = vld [vmem:[%s14180_s14 + $0x260] sm:$0xff] }
 0x4fb   : > { %12274 = vmatpush1.bf16.msra.mxu0 %v16932_v11  ;;  %6244 = vmatprep.mubr.f32.mxu0 %v20349_v10  ;;  %v12397_v61 = vpack.c.bf16 %v7172_v33, %v7160_v55  ;;  %v7178_v13 = vand.u32 4294901760, %v7177_v50  ;;  %v7183_v42 = vsub.f32 %v17280_v45, %v19796_v3  ;;  %v17317_v12 = vsub.f32 %v17272_v16, %v6877_v4  ;;  %v17323_v50 = vld [vmem:[%s14180_s14 + $0x248] sm:$0xff] }
 0x4fc   : > { %v7190_v54 = vand.u32 4294901760, %v7189_v51  ;;  %21028 = vst [vmem:[#allocation74_spill] sm:$0xff] %v17307_v8  ;;  %12276 = vmatprep.subr.bf16.mxu0 %v17002_v52  ;;  %v17320_v57 = vsub.f32 %v17275_v46, %v6881_v56  ;;  %v6879_v22 = vand.u32 4294901760, %v17300_v0  ;;  %v6883_v33 = vand.u32 4294901760, %v17303_v2 }
 0x4fd   : > { %21029 = vst [vmem:[#allocation112_spill] sm:$0xff] %v17317_v12  ;;  %12398 = vmatpush1.bf16.msra.mxu1 %v12397_v61  ;;  %v17330_v55 = vpack.c.bf16 %v6873_v63, %v6869_v26  ;;  %v7184_v51 = vand.u32 4294901760, %v7183_v42  ;;  %v7196_v16 = vand.u32 4294901760, %v7195_v62  ;;  %v19801_v59 = vand.u32 4294901760, %v17317_v12  ;;  %v17346_v26 = vld [vmem:[%s14180_s14 + $0x258] sm:$0xff] }
 0x4fe   : > { %21030 = vst [vmem:[#allocation84_spill] sm:$0xff] %v17320_v57  ;;  %v12399_v52 = vpack.c.bf16 %v7190_v54, %v7178_v13  ;;  %v19802_v46 = vand.u32 4294901760, %v17320_v57  ;;  %v17335_v3 = vsub.f32 %v17300_v0, %v6879_v22  ;;  %v17338_v25 = vsub.f32 %v17303_v2, %v6883_v33  ;;  %v17343_v54 = vld [vmem:[%s14180_s14 + $0x240] sm:$0xff] }
 0x4ff   : > { %21031 = vst [vmem:[#allocation87_spill] sm:$0xff] %v17330_v55  ;;  %v6885_v61 = vand.u32 4294901760, %v17323_v50  ;;  %v6889_v13 = vand.u32 4294901760, %v17326_v27  ;;  %v12401_v63 = vpack.c.bf16 %v7196_v16, %v7184_v51  ;;  %v7201_v62 = vsub.f32 %v17317_v12, %v19801_v59 }
 0x500   : > { %12400 = vmatprep.subr.bf16.mxu1 %v12399_v52  ;;  %21032 = vst [vmem:[#allocation53_spill] sm:$0xff] %v17335_v3  ;;  %21033 = vst [vmem:[#allocation38_spill] sm:$0xff] %v17338_v25  ;;  %v7213_v0 = vsub.f32 %v17320_v57, %v19802_v46  ;;  %v21034_v2 = vand.u32 4294901760, %v17221_v18  ;;  %v19803_v52 = vand.u32 4294901760, %v17335_v3  ;;  %v19804_v45 = vand.u32 4294901760, %v17338_v25 }
 0x501   : > { %v17361_v51 = vsub.f32 %v17323_v50, %v6885_v61  ;;  %v17364_v16 = vsub.f32 %v17326_v27, %v6889_v13  ;;  %v21038_v59 = vand.u32 4294901760, %v16637_v15  ;;  %12402 = vmatpush1.bf16.msra.mxu1 %v12401_v63  ;;  %v7202_v46 = vand.u32 4294901760, %v7201_v62  ;;  %v17381_v63 = vld [vmem:[%s14180_s14 + $0x278] sm:$0xff]  ;;  %v17384_v62 = vld [vmem:[%s14180_s14 + $0x290] sm:$0xff] }
 0x502   : > { %v17356_v42 = vpack.c.bf16 %v6875_v60, %v21034_v2  ;;  %v7214_v18 = vand.u32 4294901760, %v7213_v0  ;;  %v19810_v60 = vand.u32 4294901760, %v17343_v54  ;;  %v19809_v2 = vand.u32 4294901760, %v17346_v26 }
 0x503   : > { %21036 = vst [vmem:[#allocation52_spill] sm:$0xff] %v17361_v51  ;;  %21037 = vst [vmem:[#allocation119_spill] sm:$0xff] %v17364_v16  ;;  %6250 = vmatmul.mubr.f32.vlgmr.msra.gmra.mrb[8].mxu0 %v21038_v59  ;;  %v7207_v50 = vsub.f32 %v17335_v3, %v19803_v52  ;;  %v7219_v15 = vsub.f32 %v17338_v25, %v19804_v45  ;;  %v17399_v27 = vpack.c.bf16 %v6881_v56, %v6877_v4 }
 0x504   : > { %21035 = vst [vmem:[#allocation118_spill] sm:$0xff] %v17356_v42  ;;  %12278 = vmatpush1.bf16.msra.mxu0 %v17004_v5  ;;  %6340 = vmatprep.mubr.f32.mxu0 %v20349_v10  ;;  %v21039_v5 = vpack.c.bf16 %v16936_v21, %v16917_v17  ;;  %v12403_v0 = vpack.c.bf16 %v7214_v18, %v7202_v46  ;;  %v21043_v3 = vand.u32 4294901760, %v17361_v51  ;;  %v21044_v21 = vand.u32 4294901760, %v17364_v16 }
 0x505   : > { %v17392_v52 = vsub.f32 %v17343_v54, %v19810_v60  ;;  %v17397_v45 = vsub.f32 %v17346_v26, %v19809_v2  ;;  %21042 = vst [vmem:[#allocation125_spill] sm:$0xff] %v17399_v27  ;;  %v7208_v59 = vand.u32 4294901760, %v7207_v50  ;;  %v7220_v25 = vand.u32 4294901760, %v7219_v15  ;;  %v17412_v50 = vld [vmem:[%s14180_s14 + $0x270] sm:$0xff]  ;;  %v17415_v15 = vld [vmem:[%s14180_s14 + $0x288] sm:$0xff] }
 0x506   : > { %12280 = vmatprep.subr.bf16.mxu0 %v21039_v5  ;;  %v7225_v17 = vsub.f32 %v17361_v51, %v21043_v3  ;;  %v7237_v46 = vsub.f32 %v17364_v16, %v21044_v21  ;;  %12404 = vmatprep.subr.bf16.mxu1 %v12403_v0  ;;  %v17417_v21 = vpack.c.bf16 %v6883_v33, %v6879_v22  ;;  %v21046_v56 = vand.u32 4294901760, %v17381_v63  ;;  %v17436_v22 = vld [vmem:[%s14180_s14 + $0x2a8] sm:$0xff]  ;;  %v17439_v33 = vld [vmem:[%s14180_s14 + $0x2c0] sm:$0xff] }
 0x507   : > { %21040 = vst [vmem:[#allocation58_spill] sm:$0xff] %v17392_v52  ;;  %21041 = vst [vmem:[#allocation47_spill] sm:$0xff] %v17397_v45  ;;  %v19816_v18 = vand.u32 4294901760, %v17392_v52  ;;  %v19815_v5 = vand.u32 4294901760, %v17397_v45  ;;  %v12405_v3 = vpack.c.bf16 %v7220_v25, %v7208_v59  ;;  %v21048_v51 = vand.u32 4294901760, %v17384_v62 }
 0x508   : > { %v7226_v2 = vand.u32 4294901760, %v7225_v17  ;;  %v7238_v60 = vand.u32 4294901760, %v7237_v46  ;;  %21045 = vst [vmem:[#allocation62_spill] sm:$0xff] %v17417_v21  ;;  %v17428_v16 = vsub.f32 %v17381_v63, %v21046_v56  ;;  %v19822_v17 = vand.u32 4294901760, %v17412_v50  ;;  %v17446_v56 = vld [vmem:[%s14180_s14 + $0x2a0] sm:$0xff] }
 0x509   : > { %v7231_v0 = vsub.f32 %v17392_v52, %v19816_v18  ;;  %v7243_v4 = vsub.f32 %v17397_v45, %v19815_v5  ;;  %v17433_v25 = vsub.f32 %v17384_v62, %v21048_v51  ;;  %12406 = vmatpush1.bf16.msra.mxu1 %v12405_v3  ;;  %v19821_v46 = vand.u32 4294901760, %v17415_v15  ;;  %v17469_v3 = vld [vmem:[%s14180_s14 + $0x2b8] sm:$0xff] }
 0x50a   : > { %21047 = vst [vmem:[#allocation34_spill] sm:$0xff] %v17428_v16  ;;  %v12407_v59 = vpack.c.bf16 %v7238_v60, %v7226_v2  ;;  %v17443_v5 = vpack.c.bf16 %v6889_v13, %v6885_v61  ;;  %v19823_v45 = vand.u32 4294901760, %v17428_v16  ;;  %v21051_v60 = vpack.c.bf16 %v16934_v30, %v16915_v7 }
 0x50b   : > { %21049 = vst [vmem:[#allocation126_spill] sm:$0xff] %v17433_v25  ;;  %10847 = vmatmul.mubr.msk.f32.vlgmr.msra.gmra.mrb[8].mxu0 %vm5678_vm7, %v16609_v47  ;;  %v7232_v51 = vand.u32 4294901760, %v7231_v0  ;;  %v7244_v18 = vand.u32 4294901760, %v7243_v4  ;;  %v19824_v52 = vand.u32 4294901760, %v17433_v25  ;;  %v17459_v61 = vsub.f32 %v17412_v50, %v19822_v17 }
 0x50c   : > { %21050 = vst [vmem:[#allocation46_spill] sm:$0xff] %v17443_v5  ;;  %12282 = vmatpush1.bf16.msra.mxu0 %v21051_v60  ;;  %6420 = vmatprep.mubr.f32.mxu0 %v20349_v10  ;;  %v17464_v13 = vsub.f32 %v17415_v15, %v19821_v46  ;;  %v19827_v2 = vand.u32 4294901760, %v17436_v22  ;;  %v7249_v7 = vsub.f32 %v17428_v16, %v19823_v45  ;;  %v21057_v60 = vand.u32 4294901760, %v17346_v26 }
 0x50d   : > { %12284 = vmatprep.subr.bf16.mxu0 %v16941_v28  ;;  %12408 = vmatprep.subr.bf16.mxu1 %v12407_v59  ;;  %v12409_v30 = vpack.c.bf16 %v7244_v18, %v7232_v51  ;;  %v7261_v0 = vsub.f32 %v17433_v25, %v19824_v52  ;;  %v21054_v18 = vand.u32 4294901760, %v17439_v33  ;;  %v21056_v52 = vand.u32 4294901760, %v17343_v54 }
 0x50e   : > { %21052 = vst [vmem:[#allocation40_spill] sm:$0xff] %v17464_v13  ;;  %v17484_v4 = vsub.f32 %v17436_v22, %v19827_v2  ;;  %v7250_v51 = vand.u32 4294901760, %v7249_v7  ;;  %v19830_v17 = vand.u32 4294901760, %v17469_v3  ;;  %v21059_v25 = vand.u32 4294901760, %v17459_v61 }
 0x50f   : > { %v17489_v59 = vsub.f32 %v17439_v33, %v21054_v18  ;;  %12410 = vmatpush1.bf16.msra.mxu1 %v12409_v30  ;;  %v7262_v45 = vand.u32 4294901760, %v7261_v0  ;;  %v17495_v46 = vpack.c.bf16 %v21057_v60, %v21056_v52  ;;  %v21060_v16 = vand.u32 4294901760, %v17464_v13 }
 0x510   : > { %21053 = vst [vmem:[#allocation31_spill] sm:$0xff] %v17484_v4  ;;  %v7255_v2 = vsub.f32 %v17459_v61, %v21059_v25  ;;  %v19832_v30 = vand.u32 4294901760, %v17484_v4  ;;  %v21061_v54 = vand.u32 4294901760, %v17446_v56  ;;  %v17514_v52 = vsub.f32 %v17469_v3, %v19830_v17 }
 0x511   : > { %21055 = vst [vmem:[#allocation102_spill] sm:$0xff] %v17489_v59  ;;  %21058 = vst [vmem:[#allocation45_spill] sm:$0xff] %v17495_v46  ;;  %v7267_v18 = vsub.f32 %v17464_v13, %v21060_v16  ;;  %v19831_v7 = vand.u32 4294901760, %v17489_v59  ;;  %v12411_v0 = vpack.c.bf16 %v7262_v45, %v7250_v51 }
 0x512   : > { %v17509_v26 = vsub.f32 %v17446_v56, %v21061_v54  ;;  %21063 = vst [vmem:[#allocation92_spill] sm:$0xff] %v17514_v52  ;;  %v7256_v25 = vand.u32 4294901760, %v7255_v2  ;;  %v7273_v16 = vsub.f32 %v17484_v4, %v19832_v30  ;;  %v19839_v54 = vand.u32 4294901760, %v17514_v52 }
 0x513   : > { %v7268_v60 = vand.u32 4294901760, %v7267_v18  ;;  %v7285_v45 = vsub.f32 %v17489_v59, %v19831_v7  ;;  %6423 = vmatmul.mubr.f32.vlgmr.msra.gmra.mrb[8].mxu0 %v16617_v24  ;;  %12412 = vmatprep.subr.bf16.mxu1 %v12411_v0 }
 0x514   : > { %21062 = vst [vmem:[#allocation104_spill] sm:$0xff] %v17509_v26  ;;  %v19840_v51 = vand.u32 4294901760, %v17509_v26  ;;  %12286 = vmatpush1.bf16.msra.mxu0 %v16932_v11  ;;  %6497 = vmatprep.mubr.f32.mxu0 %v20349_v10  ;;  %v7274_v18 = vand.u32 4294901760, %v7273_v16  ;;  %v7291_v0 = vsub.f32 %v17514_v52, %v19839_v54 }
 0x515   : > { %v12413_v2 = vpack.c.bf16 %v7268_v60, %v7256_v25  ;;  %v7286_v17 = vand.u32 4294901760, %v7285_v45  ;;  %12288 = vmatprep.subr.bf16.mxu0 %v16965_v40  ;;  %v21064_v25 = vand.u32 4294901760, %v16617_v24  ;;  %v6770_v24 = vld [vmem:[%s14180_s14 + $0x2f0] sm:$0xff] }
 0x516   : > { %v7279_v7 = vsub.f32 %v17509_v26, %v19840_v51  ;;  %v7292_v4 = vand.u32 4294901760, %v7291_v0  ;;  %v6766_v40 = vld [vmem:[%s14180_s14 + $0x2d0] sm:$0xff]  ;;  %v21069_v51 = vand.u32 4294901760, %v17381_v63  ;;  %v21075_v63 = vand.u32 4294901760, %v17436_v22 }
 0x517   : > { %12414 = vmatpush1.bf16.msra.mxu1 %v12413_v2  ;;  %v12415_v30 = vpack.c.bf16 %v7286_v17, %v7274_v18  ;;  %v6911_v17 = vand.u32 4294901760, %v6766_v40 }
 0x518   : > { %v7280_v59 = vand.u32 4294901760, %v7279_v7 }
 0x519   : > { %12416 = vmatprep.subr.bf16.mxu1 %v12415_v30  ;;  %v17579_v30 = vsub.f32 %v6766_v40, %v6911_v17 }
 0x51a   : > { %v12417_v13 = vpack.c.bf16 %v7292_v4, %v7280_v59 }
 0x51b   : > { %6501 = vmatmul.mubr.f32.vlgmr.msra.gmra.mrb[8].mxu0 %v21064_v25  ;;  %21067 = vst [vmem:[#allocation106_spill] sm:$0xff] %v17579_v30  ;;  %v19848_v45 = vand.u32 4294901760, %v17579_v30 }
 0x51c   : > { %12418 = vmatpush1.bf16.msra.mxu1 %v12417_v13  ;;  %12290 = vmatpush1.bf16.msra.mxu0 %v16967_v38  ;;  %v6769_v38 = vld [vmem:[%s14180_s14 + $0x2e8] sm:$0xff] }
 0x51d   : > { %6583 = vmatprep.mubr.f32.mxu0 %v20349_v10  ;;  %12292 = vmatprep.subr.bf16.mxu0 %v16941_v28  ;;  %v6913_v28 = vand.u32 4294901760, %v6770_v24  ;;  %v6915_v13 = vand.u32 4294901760, %v6769_v38  ;;  %v7303_v25 = vsub.f32 %v17579_v30, %v19848_v45 }
 0x51f   : > { %v17577_v59 = vsub.f32 %v6770_v24, %v6913_v28  ;;  %v17581_v7 = vsub.f32 %v6769_v38, %v6915_v13  ;;  %v7304_v38 = vand.u32 4294901760, %v7303_v25  ;;  %v17631_v22 = vpack.c.bf16 %v6915_v13, %v6911_v17 }
 0x521   : > { %21066 = vst [vmem:[#allocation89_spill] sm:$0xff] %v17577_v59  ;;  %21068 = vst [vmem:[#allocation100_spill] sm:$0xff] %v17581_v7  ;;  %v19845_v16 = vand.u32 4294901760, %v17577_v59  ;;  %v19849_v2 = vand.u32 4294901760, %v17581_v7 }
 0x522   : > { %21082 = vst [vmem:[#allocation70_spill] sm:$0xff] %v17631_v22 }
 0x523   : > { %10848 = vmatmul.mubr.msk.f32.vlgmr.msra.gmra.mrb[8].mxu0 %vm5678_vm7, %v16609_v47  ;;  %v7309_v0 = vsub.f32 %v17577_v59, %v19845_v16  ;;  %v21072_v16 = vand.u32 4294901760, %v17412_v50  ;;  %v12423_v50 = vpack.c.bf16 %v16676_v31, %v16674_v1  ;;  %v6687_v1 = vld [vmem:[%s14180_s14 + $0x58] sm:$0xff] }
 0x524   : > { %12294 = vmatpush1.bf16.msra.mxu0 %v16932_v11  ;;  %6659 = vmatprep.mubr.f32.mxu0 %v20349_v10 }
 0x525   : > { %12296 = vmatprep.subr.bf16.mxu0 %v16739_v35  ;;  %v7310_v40 = vand.u32 4294901760, %v7309_v0 }
 0x52b   : > { %10849 = vmatmul.mubr.msk.f32.vlgmr.msra.gmra.mrb[8].mxu0 %vm5678_vm7, %v16609_v47  ;;  %v6767_v47 = vld [vmem:[%s14180_s14 + $0x2d8] sm:$0xff] }
 0x52c   : > { %12298 = vmatpush1.bf16.msra.mxu0 %v16751_v9  ;;  %v6909_v11 = vand.u32 4294901760, %v6767_v47 }
 0x52d   : > { %12300 = vmatprep.subr.bf16.mxu0 %v16760_v23 }
 0x52e   : > { %v17575_v4 = vsub.f32 %v6767_v47, %v6909_v11  ;;  %v7315_v47 = vsub.f32 %v17581_v7, %v19849_v2  ;;  %v17828_v7 = vld [vmem:[%s14180_s14 + $0x178] sm:$0xff] }
 0x530   : > { %12302 = vmatpush1.bf16.msra.mxu0 %v16780_v49  ;;  %21065 = vst [vmem:[#allocation98_spill] sm:$0xff] %v17575_v4  ;;  %v19841_v60 = vand.u32 4294901760, %v17575_v4  ;;  %v7316_v54 = vand.u32 4294901760, %v7315_v47  ;;  %v21128_v49 = vld [vmem:[#allocation54_spill] sm:$0xff] }
 0x531   : > { %12304 = vmatprep.subr.bf16.mxu0 %v16826_v29  ;;  %v6762_v29 = vld [vmem:[%s14180_s14 + $0x2b0] sm:$0xff] }
 0x532   : > { %v7297_v18 = vsub.f32 %v17575_v4, %v19841_v60  ;;  %v21070_v60 = vand.u32 4294901760, %v17384_v62  ;;  %v12421_v2 = vpack.c.bf16 %v7316_v54, %v7304_v38  ;;  %v21076_v62 = vand.u32 4294901760, %v17439_v33  ;;  %v6726_v33 = vld [vmem:[%s14180_s14 + $0x190] sm:$0xff] }
 0x533   : > { %v8158_v23 = vand.u32 4294901760, %v6762_v29 }
 0x534   : > { %12306 = vmatpush1.bf16.msra.mxu0 %v16843_v58  ;;  %v7298_v24 = vand.u32 4294901760, %v7297_v18  ;;  %v17603_v10 = vpack.c.bf16 %v21070_v60, %v21069_v51  ;;  %v17617_v51 = vpack.c.bf16 %v21076_v62, %v21075_v63  ;;  %v6729_v60 = vld [vmem:[%s14180_s14 + $0x1a8] sm:$0xff] }
 0x535   : > { %12308 = vmatprep.subr.bf16.mxu0 %v16868_v19 }
 0x536   : > { %21071 = vst [vmem:[#allocation73_spill] sm:$0xff] %v17603_v10  ;;  %21077 = vst [vmem:[#allocation69_spill] sm:$0xff] %v17617_v51 }
 0x538   : > { %12310 = vmatpush1.bf16.msra.mxu0 %v16978_v20 }
 0x539   : > { %12312 = vmatprep.subr.bf16.mxu0 %v16995_v37 }
 0x53c   : > { %12314 = vmatpush1.bf16.msra.mxu0 %v17033_v41  ;;  %v6753_v41 = vld [vmem:[%s14180_s14 + $0x268] sm:$0xff] }
 0x53d   : > { %12316 = vmatprep.subr.bf16.mxu0 %v17073_v14  ;;  %v6750_v14 = vld [vmem:[%s14180_s14 + $0x250] sm:$0xff]  ;;  %v8149_v19 = vand.u32 4294901760, %v6753_v41 }
 0x540   : > { %12318 = vmatpush1.bf16.msra.mxu0 %v17093_v53  ;;  %v6699_v53 = vld [vmem:[%s14180_s14 + $0xb8] sm:$0xff] }
 0x541   : > { %12320 = vmatprep.subr.bf16.mxu0 %v17113_v6  ;;  %v6696_v6 = vld [vmem:[%s14180_s14 + $0xa0] sm:$0xff]  ;;  %v8095_v20 = vand.u32 4294901760, %v6699_v53 }
 0x543   : > { %v17770_v58 = vsub.f32 %v6699_v53, %v8095_v20  ;;  %v17784_v53 = vsub.f32 %v6753_v41, %v8149_v19 }
 0x544   : > { %12322 = vmatpush1.bf16.msra.mxu0 %v17135_v39 }
 0x545   : > { %12324 = vmatprep.subr.bf16.mxu0 %v17178_v34 }
 0x548   : > { %12326 = vmatpush1.bf16.msra.mxu0 %v17196_v32 }
 0x549   : > { %12328 = vmatprep.subr.bf16.mxu0 %v17218_v43 }
 0x54c   : > { %12330 = vmatpush1.bf16.msra.mxu0 %v17260_v36 }
 0x54d   : > { %12332 = vmatprep.subr.bf16.mxu0 %v17285_v44 }
 0x550   : > { %12334 = vmatpush1.bf16.msra.mxu0 %v17307_v8  ;;  %v21102_v8 = vld [vmem:[#allocation117_spill] sm:$0xff] }
 0x551   : > { %12336 = vmatprep.subr.bf16.mxu0 %v17330_v55  ;;  %v21101_v55 = vld [vmem:[#allocation116_spill] sm:$0xff] }
 0x552   : > { %v12435_v44 = vpack.c.bf16 %v21102_v8, %v21101_v55  ;;  %v21105_v55 = vld [vmem:[#allocation59_spill] sm:$0xff] }
 0x554   : > { %12338 = vmatpush1.bf16.msra.mxu0 %v17356_v42  ;;  %v6693_v42 = vld [vmem:[%s14180_s14 + $0x88] sm:$0xff] }
 0x555   : > { %12340 = vmatprep.subr.bf16.mxu0 %v17399_v27  ;;  %v6690_v27 = vld [vmem:[%s14180_s14 + $0x70] sm:$0xff]  ;;  %v8089_v34 = vand.u32 4294901760, %v6693_v42 }
 0x558   : > { %12342 = vmatpush1.bf16.msra.mxu0 %v17417_v21 }
 0x559   : > { %12344 = vmatprep.subr.bf16.mxu0 %v17443_v5  ;;  %v21073_v5 = vand.u32 4294901760, %v17415_v15  ;;  %v21079_v15 = vand.u32 4294901760, %v17469_v3 }
 0x55b   : > { %v17609_v45 = vpack.c.bf16 %v21073_v5, %v21072_v16  ;;  %v21078_v5 = vand.u32 4294901760, %v17446_v56  ;;  %v8122_v16 = vand.u32 4294901760, %v6726_v33 }
 0x55c   : > { %12346 = vmatpush1.bf16.msra.mxu0 %v17495_v46  ;;  %v12419_v46 = vpack.c.bf16 %v7310_v40, %v7298_v24 }
 0x55d   : > { %21074 = vst [vmem:[#allocation63_spill] sm:$0xff] %v17609_v45  ;;  %12348 = vmatprep.subr.bf16.mxu0 %v17603_v10  ;;  %v17625_v54 = vpack.c.bf16 %v21079_v15, %v21078_v5  ;;  %v17639_v3 = vsub.f32 %v6726_v33, %v8122_v16  ;;  %v21089_v33 = vld [vmem:[#allocation67_spill] sm:$0xff]  ;;  %v21099_v10 = vld [vmem:[#allocation113_spill] sm:$0xff] }
 0x55e   : > { %12420 = vmatprep.subr.bf16.mxu1 %v12419_v46  ;;  %v17628_v46 = vpack.c.bf16 %v6913_v28, %v6909_v11 }
 0x55f   : > { %12422 = vmatpush1.bf16.msra.mxu1 %v12421_v2  ;;  %21080 = vst [vmem:[#allocation76_spill] sm:$0xff] %v17625_v54  ;;  %v8125_v2 = vand.u32 4294901760, %v6729_v60  ;;  %21084 = vst [vmem:[#allocation72_spill] sm:$0xff] %v17639_v3  ;;  %v19851_v11 = vand.u32 4294901760, %v17639_v3 }
 0x560   : > { %12350 = vmatpush1.bf16.msra.mxu0 %v17609_v45  ;;  %12424 = vmatprep.subr.bf16.mxu1 %v12423_v50  ;;  %21081 = vst [vmem:[#allocation71_spill] sm:$0xff] %v17628_v46  ;;  %v21087_v50 = vld [vmem:[#allocation66_spill] sm:$0xff] }
 0x561   : > { %12352 = vmatprep.subr.bf16.mxu0 %v17617_v51  ;;  %v17637_v56 = vpack.c.bf16 %v8125_v2, %v8122_v16  ;;  %v17641_v18 = vsub.f32 %v6729_v60, %v8125_v2  ;;  %v8301_v17 = vsub.f32 %v17639_v3, %v19851_v11  ;;  %v12425_v5 = vpack.c.bf16 %v21087_v50, %v16679_v48  ;;  %v21090_v60 = vld [vmem:[#allocation111_spill] sm:$0xff]  ;;  %v6678_v2 = vld [vmem:[%s14180_s14 + $0x10] sm:$0xff]  ;;  %v21094_v11 = vld [vmem:[#allocation68_spill] sm:$0xff] }
 0x562   : > { %v12427_v16 = vpack.c.bf16 %v21090_v60, %v21089_v33  ;;  %v8074_v60 = vand.u32 4294901760, %v6678_v2  ;;  %v21096_v50 = vld [vmem:[#allocation37_spill] sm:$0xff]  ;;  %v21097_v48 = vld [vmem:[#allocation56_spill] sm:$0xff]  ;;  %v21098_v45 = vld [vmem:[#allocation114_spill] sm:$0xff] }
 0x563   : > { %21083 = vst [vmem:[#allocation80_spill] sm:$0xff] %v17637_v56  ;;  %21085 = vst [vmem:[#allocation129_spill] sm:$0xff] %v17641_v18  ;;  %v19850_v28 = vand.u32 4294901760, %v17641_v18  ;;  %v8302_v0 = vand.u32 4294901760, %v8301_v17  ;;  %v6681_v17 = vld [vmem:[%s14180_s14 + $0x28] sm:$0xff] }
 0x564   : > { %12354 = vmatpush1.bf16.msra.mxu0 %v17625_v54  ;;  %v8077_v33 = vand.u32 4294901760, %v6681_v17  ;;  %v6738_v54 = vld [vmem:[%s14180_s14 + $0x1f0] sm:$0xff]  ;;  %v6741_v51 = vld [vmem:[%s14180_s14 + $0x208] sm:$0xff] }
 0x565   : > { %12356 = vmatprep.subr.bf16.mxu0 %v17628_v46  ;;  %v8308_v13 = vsub.f32 %v17641_v18, %v19850_v28  ;;  %v21093_v28 = vld [vmem:[#allocation75_spill] sm:$0xff]  ;;  %v8134_v36 = vand.u32 4294901760, %v6738_v54  ;;  %v8137_v43 = vand.u32 4294901760, %v6741_v51 }
 0x566   : > { %v12429_v24 = vpack.c.bf16 %v21094_v11, %v21093_v28  ;;  %v17712_v32 = vsub.f32 %v6681_v17, %v8077_v33 }
 0x567   : > { %v8309_v25 = vand.u32 4294901760, %v8308_v13  ;;  %v17740_v37 = vsub.f32 %v6741_v51, %v8137_v43 }
 0x568   : > { %12358 = vmatpush1.bf16.msra.mxu0 %v17631_v22  ;;  %v12431_v22 = vpack.c.bf16 %v21097_v48, %v21096_v50  ;;  %v17697_v50 = vpack.c.bf16 %v8077_v33, %v8074_v60  ;;  %v21109_v33 = vld [vmem:[#allocation124_spill] sm:$0xff] }
 0x569   : > { %12680 = vmatprep.subr.bf16.mxu0 %v17637_v56  ;;  %v17652_v47 = vpack.c.bf16 %v8309_v25, %v8302_v0  ;;  %v6732_v25 = vld [vmem:[%s14180_s14 + $0x1c0] sm:$0xff] }
 0x56a   : > { %v8128_v11 = vand.u32 4294901760, %v6732_v25  ;;  %21100 = vst [vmem:[#allocation135_spill] sm:$0xff] %v17697_v50 }
 0x5fe   : > { %v6662_v40 = vpop.f32.mrb[8].mxu0 }
 0x5ff   : > { %v17656_v38 = vand.u32 4294901760, %v6662_v40  ;;  %v6664_v63 = vpop.f32.mrb[9].mxu0 }
 0x600   : > { %v17658_v62 = vand.u32 4294901760, %v6664_v63 }
 0x601   : > { %21086 = vst [vmem:[#allocation130_spill] sm:$0xff] %v17656_v38  ;;  %v17663_v15 = vsub.f32 %v6662_v40, %v17656_v38  ;;  %v6735_v40 = vld [vmem:[%s14180_s14 + $0x1d8] sm:$0xff] }
 0x602   : > { %v17670_v13 = vsub.f32 %v6664_v63, %v17658_v62  ;;  %7319 = vmatprep.mubr.f32.mxu1 %v17658_v62  ;;  %v8131_v28 = vand.u32 4294901760, %v6735_v40 }
 0x603   : > { %21088 = vst [vmem:[#allocation131_spill] sm:$0xff] %v17663_v15  ;;  %v17674_v0 = vand.u32 4294901760, %v17663_v15  ;;  %7321 = vmatmul.mubr.f32.vlgmr.msra.gmra.mrb[6].mxu1 %v17656_v38 }
 0x604   : > { %21091 = vst [vmem:[#allocation132_spill] sm:$0xff] %v17670_v13  ;;  %12426 = vmatpush1.bf16.msra.mxu1 %v12425_v5  ;;  %7521 = vmatprep.mubr.f32.mxu1 %v17670_v13  ;;  %v17683_v63 = vand.u32 4294901760, %v17670_v13  ;;  %v6684_v5 = vld [vmem:[%s14180_s14 + $0x40] sm:$0xff]  ;;  %v17717_v8 = vsub.f32 %v6735_v40, %v8131_v28 }
 0x605   : > { %21092 = vst [vmem:[#allocation133_spill] sm:$0xff] %v17674_v0  ;;  %12428 = vmatprep.subr.bf16.mxu1 %v12427_v16  ;;  %v6926_v31 = vsub.f32 %v17663_v15, %v17674_v0  ;;  %v12433_v16 = vpack.c.bf16 %v21099_v10, %v21098_v45  ;;  %v8080_v21 = vand.u32 4294901760, %v6684_v5  ;;  %v8083_v0 = vand.u32 4294901760, %v6687_v1  ;;  %v6744_v10 = vld [vmem:[%s14180_s14 + $0x220] sm:$0xff]  ;;  %v6747_v45 = vld [vmem:[%s14180_s14 + $0x238] sm:$0xff]  ;;  %v21136_v15 = vld [vmem:[#allocation85_spill] sm:$0xff] }
 0x606   : > { %21095 = vst [vmem:[#allocation134_spill] sm:$0xff] %v17683_v63  ;;  %v6920_v46 = vsub.f32 %v17670_v13, %v17683_v63  ;;  %v8143_v40 = vand.u32 4294901760, %v6747_v45  ;;  %v6759_v13 = vld [vmem:[%s14180_s14 + $0x298] sm:$0xff] }
 0x607   : > { %v17701_v56 = vand.u32 4294901760, %v6926_v31  ;;  %v17714_v31 = vsub.f32 %v6732_v25, %v8128_v11  ;;  %v17721_v39 = vpack.c.bf16 %v8083_v0, %v8080_v21  ;;  %v17727_v25 = vpack.c.bf16 %v8137_v43, %v8134_v36  ;;  %v21116_v43 = vld [vmem:[#allocation35_spill] sm:$0xff] }
 0x608   : > { %12430 = vmatpush1.bf16.msra.mxu1 %v12429_v24  ;;  %v6921_v48 = vand.u32 4294901760, %v6920_v46  ;;  %v17705_v24 = vsub.f32 %v6678_v2, %v8074_v60  ;;  %v17707_v46 = vpack.c.bf16 %v8131_v28, %v8128_v11  ;;  %v21106_v60 = vld [vmem:[#allocation121_spill] sm:$0xff]  ;;  %v21108_v11 = vld [vmem:[#allocation60_spill] sm:$0xff]  ;;  %v8140_v28 = vand.u32 4294901760, %v6744_v10 }
 0x609   : > { %12432 = vmatprep.subr.bf16.mxu1 %v12431_v22  ;;  %v8086_v22 = vand.u32 4294901760, %v6690_v27  ;;  %v12437_v2 = vpack.c.bf16 %v21106_v60, %v21105_v55  ;;  %21107 = vst [vmem:[#allocation138_spill] sm:$0xff] %v17721_v39  ;;  %v12439_v17 = vpack.c.bf16 %v21109_v33, %v21108_v11  ;;  %21110 = vst [vmem:[#allocation139_spill] sm:$0xff] %v17727_v25  ;;  %v8092_v11 = vand.u32 4294901760, %v6696_v6 }
 0x60a   : > { %6922 = vmatprep.mubr.f32.mxu0 %v6921_v48  ;;  %21103 = vst [vmem:[#allocation136_spill] sm:$0xff] %v17705_v24  ;;  %21104 = vst [vmem:[#allocation137_spill] sm:$0xff] %v17707_v46  ;;  %v17732_v60 = vsub.f32 %v6687_v1, %v8083_v0  ;;  %v17734_v55 = vsub.f32 %v6738_v54, %v8134_v36  ;;  %v17749_v36 = vsub.f32 %v6693_v42, %v8089_v34  ;;  %v21115_v54 = vld [vmem:[#allocation39_spill] sm:$0xff] }
 0x60b   : > { %6928 = vmatmul.mubr.f32.vlgmr.msra.gmra.mrb[10].mxu0 %v17701_v56  ;;  %v17742_v33 = vpack.c.bf16 %v8089_v34, %v8086_v22  ;;  %v17747_v1 = vsub.f32 %v6690_v27, %v8086_v22  ;;  %v12443_v51 = vpack.c.bf16 %v21116_v43, %v21115_v54  ;;  %v17754_v0 = vpack.c.bf16 %v8143_v40, %v8140_v28  ;;  %v6711_v43 = vld [vmem:[%s14180_s14 + $0x118] sm:$0xff] }
 0x60c   : > { %12434 = vmatpush1.bf16.msra.mxu1 %v12433_v16  ;;  %12682 = vmatpush3.bf16.msra.mxu0 %v17697_v50  ;;  %v17730_v16 = vsub.f32 %v6684_v5, %v8080_v21  ;;  %v21112_v50 = vld [vmem:[#allocation127_spill] sm:$0xff]  ;;  %v6705_v21 = vld [vmem:[%s14180_s14 + $0xe8] sm:$0xff]  ;;  %v21118_v5 = vld [vmem:[#allocation96_spill] sm:$0xff]  ;;  %v17760_v27 = vsub.f32 %v6744_v10, %v8140_v28  ;;  %v17762_v34 = vsub.f32 %v6747_v45, %v8143_v40  ;;  %v8155_v18 = vand.u32 4294901760, %v6759_v13 }
 0x60d   : > { %8174 = vmatprep.mubr.f32.mxu0 %v6921_v48  ;;  %12436 = vmatprep.subr.bf16.mxu1 %v12435_v44  ;;  %v21113_v48 = vld [vmem:[#allocation122_spill] sm:$0xff]  ;;  %21114 = vst [vmem:[#allocation141_spill] sm:$0xff] %v17742_v33  ;;  %21117 = vst [vmem:[#allocation142_spill] sm:$0xff] %v17754_v0  ;;  %v8101_v22 = vand.u32 4294901760, %v6705_v21  ;;  %v17766_v54 = vpack.c.bf16 %v8095_v20, %v8092_v11  ;;  %v21123_v45 = vld [vmem:[#allocation101_spill] sm:$0xff] }
 0x60e   : > { %12684 = vmatprep.subr.bf16.mxu0 %v17707_v46  ;;  %21111 = vst [vmem:[#allocation140_spill] sm:$0xff] %v17730_v16  ;;  %v12441_v44 = vpack.c.bf16 %v21113_v48, %v21112_v50  ;;  %v6702_v46 = vld [vmem:[%s14180_s14 + $0xd0] sm:$0xff]  ;;  %v21119_v48 = vld [vmem:[#allocation105_spill] sm:$0xff]  ;;  %v21124_v28 = vld [vmem:[#allocation103_spill] sm:$0xff] }
 0x60f   : > { %v12445_v50 = vpack.c.bf16 %v21119_v48, %v21118_v5  ;;  %v8098_v42 = vand.u32 4294901760, %v6702_v46  ;;  %21120 = vst [vmem:[#allocation143_spill] sm:$0xff] %v17766_v54  ;;  %v21121_v48 = vld [vmem:[#allocation94_spill] sm:$0xff]  ;;  %v21122_v5 = vld [vmem:[#allocation109_spill] sm:$0xff]  ;;  %v12449_v40 = vpack.c.bf16 %v21124_v28, %v21123_v45  ;;  %v17792_v28 = vsub.f32 %v6705_v21, %v8101_v22  ;;  %v21127_v45 = vld [vmem:[#allocation55_spill] sm:$0xff] }
 0x610   : > { %12438 = vmatpush1.bf16.msra.mxu1 %v12437_v2  ;;  %12686 = vmatpush3.bf16.msra.mxu0 %v17721_v39  ;;  %v8146_v2 = vand.u32 4294901760, %v6750_v14  ;;  %v6756_v39 = vld [vmem:[%s14180_s14 + $0x280] sm:$0xff]  ;;  %v12447_v38 = vpack.c.bf16 %v21122_v5, %v21121_v48  ;;  %v6714_v5 = vld [vmem:[%s14180_s14 + $0x130] sm:$0xff]  ;;  %v6717_v48 = vld [vmem:[%s14180_s14 + $0x148] sm:$0xff] }
 0x611   : > { %12440 = vmatprep.subr.bf16.mxu1 %v12439_v17  ;;  %12688 = vmatprep.subr.bf16.mxu0 %v17727_v25  ;;  %v6708_v17 = vld [vmem:[%s14180_s14 + $0x100] sm:$0xff]  ;;  %v17768_v25 = vsub.f32 %v6696_v6, %v8092_v11  ;;  %v8152_v3 = vand.u32 4294901760, %v6756_v39  ;;  %v6765_v6 = vld [vmem:[%s14180_s14 + $0x2c8] sm:$0xff]  ;;  %v8110_v21 = vand.u32 4294901760, %v6714_v5 }
 0x612   : > { %v17775_v10 = vsub.f32 %v6750_v14, %v8146_v2  ;;  %v17782_v20 = vpack.c.bf16 %v8149_v19, %v8146_v2  ;;  %v8104_v11 = vand.u32 4294901760, %v6708_v17  ;;  %v17788_v14 = vpack.c.bf16 %v8101_v22, %v8098_v42  ;;  %v21129_v2 = vld [vmem:[#allocation48_spill] sm:$0xff]  ;;  %v21130_v19 = vld [vmem:[#allocation79_spill] sm:$0xff] }
 0x613   : > { %v12453_v41 = vpack.c.bf16 %v21130_v19, %v21129_v2  ;;  %v8161_v63 = vand.u32 4294901760, %v6765_v6  ;;  %v17801_v9 = vpack.c.bf16 %v8155_v18, %v8152_v3  ;;  %v6768_v19 = vld [vmem:[%s14180_s14 + $0x2e0] sm:$0xff]  ;;  %v6771_v2 = vld [vmem:[%s14180_s14 + $0x2f8] sm:$0xff] }
 0x614   : > { %12442 = vmatpush1.bf16.msra.mxu1 %v12441_v44  ;;  %12690 = vmatpush3.bf16.msra.mxu0 %v17742_v33  ;;  %21125 = vst [vmem:[#allocation144_spill] sm:$0xff] %v17782_v20  ;;  %v8107_v44 = vand.u32 4294901760, %v6711_v43  ;;  %21126 = vst [vmem:[#allocation145_spill] sm:$0xff] %v17788_v14  ;;  %v17790_v33 = vsub.f32 %v6702_v46, %v8098_v42  ;;  %v17803_v46 = vsub.f32 %v6759_v13, %v8155_v18  ;;  %v21133_v18 = vld [vmem:[#allocation83_spill] sm:$0xff]  ;;  %v21134_v13 = vld [vmem:[#allocation57_spill] sm:$0xff] }
 0x615   : > { %12444 = vmatprep.subr.bf16.mxu1 %v12443_v51  ;;  %12692 = vmatprep.subr.bf16.mxu0 %v17754_v0  ;;  %v12451_v51 = vpack.c.bf16 %v21128_v49, %v21127_v45  ;;  %v17796_v0 = vsub.f32 %v6756_v39, %v8152_v3  ;;  %21131 = vst [vmem:[#allocation146_spill] sm:$0xff] %v17801_v9  ;;  %v8113_v42 = vand.u32 4294901760, %v6717_v48  ;;  %v8164_v3 = vand.u32 4294901760, %v6768_v19 }
 0x616   : > { %v17806_v39 = vpack.c.bf16 %v8107_v44, %v8104_v11  ;;  %v17808_v22 = vsub.f32 %v6708_v17, %v8104_v11  ;;  %v17814_v49 = vsub.f32 %v6711_v43, %v8107_v44  ;;  %v12455_v45 = vpack.c.bf16 %v21134_v13, %v21133_v18  ;;  %v6720_v11 = vld [vmem:[%s14180_s14 + $0x160] sm:$0xff]  ;;  %v21142_v13 = vld [vmem:[#allocation30_spill] sm:$0xff] }
 0x617   : > { %v17822_v35 = vpack.c.bf16 %v8161_v63, %v8158_v23  ;;  %v17824_v17 = vsub.f32 %v6765_v6, %v8161_v63  ;;  %v17833_v44 = vpack.c.bf16 %v8113_v42, %v8110_v21  ;;  %v21139_v63 = vand.u32 4294901760, %v17705_v24 }
 0x618   : > { %12446 = vmatpush1.bf16.msra.mxu1 %v12445_v50  ;;  %12694 = vmatpush3.bf16.msra.mxu0 %v17766_v54  ;;  %21132 = vst [vmem:[#allocation147_spill] sm:$0xff] %v17806_v39  ;;  %v17818_v54 = vsub.f32 %v6762_v29, %v8158_v23  ;;  %v17835_v29 = vsub.f32 %v6714_v5, %v8110_v21  ;;  %v21140_v43 = vand.u32 4294901760, %v17712_v32  ;;  %v8116_v50 = vand.u32 4294901760, %v6720_v11 }
 0x619   : > { %12448 = vmatprep.subr.bf16.mxu1 %v12447_v38  ;;  %12696 = vmatprep.subr.bf16.mxu0 %v17782_v20  ;;  %v21135_v38 = vld [vmem:[#allocation82_spill] sm:$0xff]  ;;  %21137 = vst [vmem:[#allocation148_spill] sm:$0xff] %v17822_v35  ;;  %21138 = vst [vmem:[#allocation149_spill] sm:$0xff] %v17833_v44  ;;  %v17838_v23 = vsub.f32 %v6717_v48, %v8113_v42  ;;  %v8189_v6 = vsub.f32 %v17705_v24, %v21139_v63  ;;  %v21144_v42 = vld [vmem:[#allocation43_spill] sm:$0xff]  ;;  %v21146_v24 = vand.u32 4294901760, %v17717_v8 }
 0x61a   : > { %v12457_v20 = vpack.c.bf16 %v21136_v15, %v21135_v38  ;;  %v8167_v15 = vand.u32 4294901760, %v6771_v2  ;;  %v21143_v48 = vld [vmem:[#allocation50_spill] sm:$0xff]  ;;  %v17862_v21 = vsub.f32 %v6768_v19, %v8164_v3  ;;  %v21150_v19 = vand.u32 4294901760, %v17730_v16 }
 0x61c   : > { %12450 = vmatpush1.bf16.msra.mxu1 %v12449_v40  ;;  %12698 = vmatpush3.bf16.msra.mxu0 %v17788_v14  ;;  %v8196_v40 = vsub.f32 %v17712_v32, %v21140_v43  ;;  %v21145_v14 = vand.u32 4294901760, %v17714_v31  ;;  %v8322_v43 = vsub.f32 %v17717_v8, %v21146_v24  ;;  %v17860_v5 = vpack.c.bf16 %v8167_v15, %v8164_v3  ;;  %v21152_v3 = vld [vmem:[#allocation51_spill] sm:$0xff] }
 0x61d   : > { %12452 = vmatprep.subr.bf16.mxu1 %v12451_v51  ;;  %12700 = vmatprep.subr.bf16.mxu0 %v17801_v9  ;;  %v21141_v51 = vld [vmem:[#allocation32_spill] sm:$0xff]  ;;  %v12461_v9 = vpack.c.bf16 %v21144_v42, %v21143_v48  ;;  %v17864_v38 = vsub.f32 %v6771_v2, %v8167_v15  ;;  %v8190_v42 = vand.u32 4294901760, %v8189_v6  ;;  %v21148_v24 = vand.u32 4294901760, %v17828_v7 }
 0x61e   : > { %v12459_v18 = vpack.c.bf16 %v21142_v13, %v21141_v51  ;;  %v8315_v63 = vsub.f32 %v17714_v31, %v21145_v14  ;;  %21147 = vst [vmem:[#allocation150_spill] sm:$0xff] %v17860_v5  ;;  %v8197_v48 = vand.u32 4294901760, %v8196_v40  ;;  %v17873_v51 = vsub.f32 %v6720_v11, %v8116_v50  ;;  %v21153_v6 = vld [vmem:[#allocation108_spill] sm:$0xff]  ;;  %v21155_v11 = vld [vmem:[#allocation95_spill] sm:$0xff] }
 0x61f   : > { %v8203_v15 = vsub.f32 %v17730_v16, %v21150_v19  ;;  %v12463_v40 = vpack.c.bf16 %v21153_v6, %v21152_v3  ;;  %v21160_v3 = vand.u32 4294901760, %v17747_v1 }
 0x620   : > { %12454 = vmatpush1.bf16.msra.mxu1 %v12453_v41  ;;  %12702 = vmatpush3.bf16.msra.mxu0 %v17806_v39  ;;  %v17871_v41 = vpack.c.bf16 %v21148_v24, %v8116_v50  ;;  %v8316_v14 = vand.u32 4294901760, %v8315_v63  ;;  %v21154_v50 = vld [vmem:[#allocation88_spill] sm:$0xff]  ;;  %v21156_v63 = vand.u32 4294901760, %v17734_v55 }
 0x621   : > { %12456 = vmatprep.subr.bf16.mxu1 %v12455_v45  ;;  %12704 = vmatprep.subr.bf16.mxu0 %v17822_v35  ;;  %v21151_v45 = vand.u32 4294901760, %v17732_v60  ;;  %v8323_v35 = vand.u32 4294901760, %v8322_v43  ;;  %v12465_v24 = vpack.c.bf16 %v21155_v11, %v21154_v50  ;;  %v8204_v6 = vand.u32 4294901760, %v8203_v15  ;;  %v21158_v50 = vld [vmem:[#allocation53_spill] sm:$0xff] }
 0x622   : > { %21149 = vst [vmem:[#allocation151_spill] sm:$0xff] %v17871_v41  ;;  %v8329_v43 = vsub.f32 %v17734_v55, %v21156_v63  ;;  %v8217_v63 = vsub.f32 %v17747_v1, %v21160_v3  ;;  %v21161_v15 = vand.u32 4294901760, %v17749_v36 }
 0x623   : > { %v8210_v2 = vsub.f32 %v17732_v60, %v21151_v45  ;;  %v12713_v45 = vpack.c.bf16 %v8197_v48, %v8190_v42  ;;  %v12715_v16 = vpack.c.bf16 %v8323_v35, %v8316_v14  ;;  %v21159_v48 = vld [vmem:[#allocation38_spill] sm:$0xff]  ;;  %v21163_v35 = vand.u32 4294901760, %v17762_v34 }
 0x624   : > { %12458 = vmatpush1.bf16.msra.mxu1 %v12457_v20  ;;  %12706 = vmatpush3.bf16.msra.mxu0 %v17833_v44  ;;  %v21157_v20 = vand.u32 4294901760, %v17740_v37  ;;  %v12469_v42 = vpack.c.bf16 %v21159_v48, %v21158_v50  ;;  %v8330_v39 = vand.u32 4294901760, %v8329_v43 }
 0x625   : > { %12460 = vmatprep.subr.bf16.mxu1 %v12459_v18  ;;  %12708 = vmatprep.subr.bf16.mxu0 %v17860_v5  ;;  %v8211_v11 = vand.u32 4294901760, %v8210_v2  ;;  %v12467_v18 = vpack.c.bf16 %v17320_v57, %v17317_v12  ;;  %v8224_v2 = vsub.f32 %v17749_v36, %v21161_v15  ;;  %v8350_v14 = vsub.f32 %v17762_v34, %v21163_v35  ;;  %v21164_v57 = vld [vmem:[#allocation52_spill] sm:$0xff]  ;;  %v21165_v15 = vld [vmem:[#allocation119_spill] sm:$0xff] }
 0x626   : > { %v8336_v13 = vsub.f32 %v17740_v37, %v21157_v20  ;;  %v21162_v20 = vand.u32 4294901760, %v17760_v27  ;;  %v12471_v12 = vpack.c.bf16 %v21165_v15, %v21164_v57  ;;  %v21167_v5 = vand.u32 4294901760, %v17770_v58 }
 0x627   : > { %v12717_v50 = vpack.c.bf16 %v8211_v11, %v8204_v6  ;;  %v8225_v11 = vand.u32 4294901760, %v8224_v2  ;;  %v8351_v48 = vand.u32 4294901760, %v8350_v14  ;;  %v21172_v14 = vld [vmem:[#allocation126_spill] sm:$0xff]  ;;  %v21175_v15 = vand.u32 4294901760, %v17796_v0 }
 0x628   : > { %12462 = vmatpush1.bf16.msra.mxu1 %v12461_v9  ;;  %12710 = vmatpush3.bf16.msra.mxu0 %v17871_v41  ;;  %v8343_v19 = vsub.f32 %v17760_v27, %v21162_v20  ;;  %v8337_v3 = vand.u32 4294901760, %v8336_v13  ;;  %v19966_v9 = vand.u32 4294901760, %v17775_v10  ;;  %v21166_v41 = vand.u32 4294901760, %v17768_v25 }
 0x629   : > { %12464 = vmatprep.subr.bf16.mxu1 %v12463_v40  ;;  %12712 = vmatprep.subr.bf16.mxu0 %v17652_v47  ;;  %v8238_v40 = vsub.f32 %v17770_v58, %v21167_v5  ;;  %v8218_v47 = vand.u32 4294901760, %v8217_v63  ;;  %v21168_v63 = vand.u32 4294901760, %v17784_v53 }
 0x62a   : > { %v8231_v20 = vsub.f32 %v17768_v25, %v21166_v41  ;;  %v8344_v35 = vand.u32 4294901760, %v8343_v19  ;;  %v12719_v5 = vpack.c.bf16 %v8337_v3, %v8330_v39  ;;  %v21171_v19 = vld [vmem:[#allocation34_spill] sm:$0xff]  ;;  %v21174_v3 = vand.u32 4294901760, %v17792_v28 }
 0x62b   : > { %8180 = vmatmul.mubr.f32.vlgmr.msra.gmra.mrb[12].mxu0 %v17701_v56  ;;  %v8357_v56 = vsub.f32 %v17775_v10, %v19966_v9  ;;  %v8364_v43 = vsub.f32 %v17784_v53, %v21168_v63  ;;  %v12475_v6 = vpack.c.bf16 %v21172_v14, %v21171_v19  ;;  %v8239_v13 = vand.u32 4294901760, %v8238_v40 }
 0x62c   : > { %12466 = vmatpush1.bf16.msra.mxu1 %v12465_v24  ;;  %12714 = vmatpush3.bf16.msra.mxu0 %v12713_v45  ;;  %v21169_v24 = vld [vmem:[#allocation58_spill] sm:$0xff]  ;;  %v21170_v45 = vld [vmem:[#allocation47_spill] sm:$0xff]  ;;  %v8232_v41 = vand.u32 4294901760, %v8231_v20  ;;  %v8252_v9 = vsub.f32 %v17792_v28, %v21174_v3  ;;  %v12723_v14 = vpack.c.bf16 %v8351_v48, %v8344_v35  ;;  %v21176_v20 = vand.u32 4294901760, %v17803_v46  ;;  %v21178_v48 = vld [vmem:[#allocation40_spill] sm:$0xff] }
 0x62d   : > { %8410 = vmatprep.mubr.f32.mxu0 %v17658_v62  ;;  %12468 = vmatprep.subr.bf16.mxu1 %v12467_v18  ;;  %v12473_v2 = vpack.c.bf16 %v21170_v45, %v21169_v24  ;;  %v21173_v18 = vand.u32 4294901760, %v17790_v33  ;;  %v12721_v45 = vpack.c.bf16 %v8225_v11, %v8218_v47  ;;  %v8358_v19 = vand.u32 4294901760, %v8357_v56  ;;  %v21179_v11 = vld [vmem:[#allocation31_spill] sm:$0xff]  ;;  %v21180_v35 = vld [vmem:[#allocation102_spill] sm:$0xff] }
 0x62e   : > { %12716 = vmatprep.subr.bf16.mxu0 %v12715_v16  ;;  %v8371_v16 = vsub.f32 %v17796_v0, %v21175_v15  ;;  %v8378_v40 = vsub.f32 %v17803_v46, %v21176_v20  ;;  %v8365_v3 = vand.u32 4294901760, %v8364_v43  ;;  %v21177_v63 = vand.u32 4294901760, %v17828_v7 }
 0x62f   : > { %v8245_v39 = vsub.f32 %v17790_v33, %v21173_v18  ;;  %v19967_v18 = vand.u32 4294901760, %v17814_v49  ;;  %v12725_v47 = vpack.c.bf16 %v8239_v13, %v8232_v41  ;;  %v12479_v20 = vpack.c.bf16 %v21180_v35, %v21179_v11 }
 0x630   : > { %12470 = vmatpush1.bf16.msra.mxu1 %v12469_v42  ;;  %12718 = vmatpush3.bf16.msra.mxu0 %v12717_v50  ;;  %v17962_v50 = vsub.f32 %v17828_v7, %v21177_v63  ;;  %v12477_v42 = vpack.c.bf16 %v21178_v48, %v17459_v61  ;;  %v8372_v56 = vand.u32 4294901760, %v8371_v16  ;;  %v21181_v43 = vand.u32 4294901760, %v17808_v22 }
 0x631   : > { %12472 = vmatprep.subr.bf16.mxu1 %v12471_v12  ;;  %12720 = vmatprep.subr.bf16.mxu0 %v12719_v5  ;;  %v8246_v12 = vand.u32 4294901760, %v8245_v39  ;;  %v8253_v5 = vand.u32 4294901760, %v8252_v9  ;;  %v8379_v15 = vand.u32 4294901760, %v8378_v40  ;;  %v8266_v7 = vsub.f32 %v17814_v49, %v19967_v18 }
 0x632   : > { %v8259_v24 = vsub.f32 %v17808_v22, %v21181_v43  ;;  %v19972_v63 = vand.u32 4294901760, %v17835_v29  ;;  %v19968_v13 = vand.u32 4294901760, %v17838_v23  ;;  %v12727_v41 = vpack.c.bf16 %v8365_v3, %v8358_v19 }
 0x633   : > { %v21182_v9 = vand.u32 4294901760, %v17818_v54  ;;  %v21183_v16 = vand.u32 4294901760, %v17824_v17  ;;  %v12481_v43 = vpack.c.bf16 %v17514_v52, %v17509_v26  ;;  %v12729_v18 = vpack.c.bf16 %v8253_v5, %v8246_v12  ;;  %v21246_v52 = vld [vmem:[#allocation147_spill] sm:$0xff] }
 0x634   : > { %12474 = vmatpush1.bf16.msra.mxu1 %v12473_v2  ;;  %12722 = vmatpush3.bf16.msra.mxu0 %v12721_v45  ;;  %v19969_v2 = vand.u32 4294901760, %v17862_v21  ;;  %v8260_v19 = vand.u32 4294901760, %v8259_v24  ;;  %v8267_v3 = vand.u32 4294901760, %v8266_v7  ;;  %v19971_v5 = vand.u32 4294901760, %v17873_v51 }
 0x635   : > { %12476 = vmatprep.subr.bf16.mxu1 %v12475_v6  ;;  %12724 = vmatprep.subr.bf16.mxu0 %v12723_v14  ;;  %v8385_v39 = vsub.f32 %v17818_v54, %v21182_v9  ;;  %v8392_v45 = vsub.f32 %v17824_v17, %v21183_v16  ;;  %v12483_v6 = vpack.c.bf16 %v17577_v59, %v17575_v4  ;;  %v19970_v24 = vand.u32 4294901760, %v17962_v50  ;;  %v21242_v59 = vld [vmem:[#allocation107_spill] sm:$0xff] }
 0x636   : > { %v12731_v14 = vpack.c.bf16 %v8379_v15, %v8372_v56  ;;  %v8273_v9 = vsub.f32 %v17835_v29, %v19972_v63  ;;  %v8280_v16 = vsub.f32 %v17838_v23, %v19968_v13  ;;  %v8399_v15 = vsub.f32 %v17862_v21, %v19969_v2  ;;  %v21185_v56 = vld [vmem:[#allocation100_spill] sm:$0xff] }
 0x637   : > { %v8386_v40 = vand.u32 4294901760, %v8385_v39  ;;  %v8393_v12 = vand.u32 4294901760, %v8392_v45  ;;  %v12733_v7 = vpack.c.bf16 %v8267_v3, %v8260_v19  ;;  %v8287_v13 = vsub.f32 %v17873_v51, %v19971_v5  ;;  %v21187_v3 = vld [vmem:[#allocation131_spill] sm:$0xff]  ;;  %v21205_v63 = vld [vmem:[#allocation64_spill] sm:$0xff] }
 0x638   : > { %12478 = vmatpush1.bf16.msra.mxu1 %v12477_v42  ;;  %12726 = vmatpush3.bf16.msra.mxu0 %v12725_v47  ;;  %v21184_v42 = vand.u32 4294901760, %v17864_v38  ;;  %v8281_v45 = vand.u32 4294901760, %v8280_v16  ;;  %v8294_v2 = vsub.f32 %v17962_v50, %v19970_v24  ;;  %v21189_v16 = vld [vmem:[#allocation134_spill] sm:$0xff]  ;;  %v12753_v5 = vpack.c.bf16 %v17749_v36, %v17747_v1 }
 0x639   : > { %12480 = vmatprep.subr.bf16.mxu1 %v12479_v20  ;;  %12728 = vmatprep.subr.bf16.mxu0 %v12727_v41  ;;  %v12485_v20 = vpack.c.bf16 %v21185_v56, %v17579_v30  ;;  %v8274_v41 = vand.u32 4294901760, %v8273_v9  ;;  %v12735_v39 = vpack.c.bf16 %v8393_v12, %v8386_v40  ;;  %v21188_v9 = vld [vmem:[#allocation78_spill] sm:$0xff]  ;;  %v21243_v4 = vand.u32 4294901760, %v21242_v59 }
 0x63a   : > { %v8406_v47 = vsub.f32 %v17864_v38, %v21184_v42  ;;  %v8400_v42 = vand.u32 4294901760, %v8399_v15  ;;  %v21190_v12 = vld [vmem:[#allocation110_spill] sm:$0xff] }
 0x63b   : > { %v12737_v19 = vpack.c.bf16 %v8281_v45, %v8274_v41  ;;  %v21195_v41 = vld [vmem:[#allocation72_spill] sm:$0xff]  ;;  %v12747_v45 = vpack.c.bf16 %v17717_v8, %v17714_v31  ;;  %v21203_v24 = vld [vmem:[#allocation42_spill] sm:$0xff] }
 0x63c   : > { %12482 = vmatpush1.bf16.msra.mxu1 %v12481_v43  ;;  %12730 = vmatpush3.bf16.msra.mxu0 %v12729_v18  ;;  %v8407_v43 = vand.u32 4294901760, %v8406_v47  ;;  %v21186_v18 = vld [vmem:[#allocation77_spill] sm:$0xff]  ;;  %v21191_v47 = vld [vmem:[#allocation115_spill] sm:$0xff]  ;;  %v21240_v30 = vld [vmem:[#allocation146_spill] sm:$0xff] }
 0x63d   : > { %12484 = vmatprep.subr.bf16.mxu1 %v12483_v6  ;;  %12732 = vmatprep.subr.bf16.mxu0 %v12731_v14  ;;  %v8288_v6 = vand.u32 4294901760, %v8287_v13  ;;  %v8295_v14 = vand.u32 4294901760, %v8294_v2  ;;  %v21194_v2 = vld [vmem:[#allocation129_spill] sm:$0xff] }
 0x63e   : > { %v12739_v40 = vpack.c.bf16 %v8407_v43, %v8400_v42  ;;  %v21197_v42 = vld [vmem:[#allocation130_spill] sm:$0xff]  ;;  %v21198_v43 = vld [vmem:[#allocation61_spill] sm:$0xff] }
 0x63f   : > { %v12741_v15 = vpack.c.bf16 %v8295_v14, %v8288_v6  ;;  %v21200_v6 = vld [vmem:[#allocation140_spill] sm:$0xff] }
 0x640   : > { %12486 = vmatpush1.bf16.msra.mxu1 %v12485_v20  ;;  %12734 = vmatpush3.bf16.msra.mxu0 %v12733_v7  ;;  %v21192_v20 = vld [vmem:[#allocation120_spill] sm:$0xff]  ;;  %v12749_v14 = vpack.c.bf16 %v17732_v60, %v21200_v6 }
 0x641   : > { %12488 = vmatprep.subr.bf16.mxu1 %v21186_v18  ;;  %12736 = vmatprep.subr.bf16.mxu0 %v12735_v39  ;;  %v21193_v7 = vld [vmem:[#allocation136_spill] sm:$0xff]  ;;  %v21196_v39 = vpack.c.bf16 %v21194_v2, %v21195_v41  ;;  %v21238_v18 = vld [vmem:[#allocation99_spill] sm:$0xff] }
 0x642   : > { %v12745_v13 = vpack.c.bf16 %v17712_v32, %v21193_v7 }
 0x643   : > { %7524 = vmatmul.mubr.f32.vlgmr.msra.gmra.mrb[6].mxu1 %v21187_v3 }
 0x644   : > { %12490 = vmatpush1.bf16.msra.mxu1 %v21188_v9  ;;  %7661 = vmatprep.mubr.f32.mxu1 %v21189_v16 }
 0x645   : > { %12738 = vmatpush3.bf16.msra.mxu0 %v12737_v19  ;;  %12492 = vmatprep.subr.bf16.mxu1 %v21190_v12  ;;  %v21199_v19 = vld [vmem:[#allocation132_spill] sm:$0xff]  ;;  %v21235_v12 = vld [vmem:[#allocation71_spill] sm:$0xff] }
 0x646   : > { %12740 = vmatprep.subr.bf16.mxu0 %v12739_v40  ;;  %v21201_v40 = vld [vmem:[#allocation123_spill] sm:$0xff] }
 0x648   : > { %12494 = vmatpush1.bf16.msra.mxu1 %v21191_v47  ;;  %v21233_v47 = vld [vmem:[#allocation76_spill] sm:$0xff] }
 0x649   : > { %12742 = vmatpush3.bf16.msra.mxu0 %v12741_v15  ;;  %12496 = vmatprep.subr.bf16.mxu1 %v21192_v20  ;;  %v12751_v15 = vpack.c.bf16 %v17740_v37, %v17734_v55  ;;  %v21231_v20 = vld [vmem:[#allocation69_spill] sm:$0xff] }
 0x64a   : > { %12744 = vmatprep.subr.bf16.mxu0 %v21196_v39  ;;  %v21202_v39 = vld [vmem:[#allocation41_spill] sm:$0xff] }
 0x64c   : > { %8412 = vmatmul.mubr.f32.vlgmr.msra.gmra.mrb[14].mxu0 %v21197_v42  ;;  %12498 = vmatpush1.bf16.msra.mxu1 %v21198_v43  ;;  %v21228_v43 = vld [vmem:[#allocation142_spill] sm:$0xff] }
 0x64d   : > { %12746 = vmatpush3.bf16.msra.mxu0 %v12745_v13  ;;  %8547 = vmatprep.mubr.f32.mxu0 %v21199_v19  ;;  %v12755_v13 = vpack.c.bf16 %v17762_v34, %v17760_v27  ;;  %v21204_v19 = vld [vmem:[#allocation44_spill] sm:$0xff] }
 0x64e   : > { %12500 = vmatprep.subr.bf16.mxu1 %v21201_v40  ;;  %12748 = vmatprep.subr.bf16.mxu0 %v12747_v45  ;;  %v12757_v45 = vpack.c.bf16 %v17770_v58, %v17768_v25  ;;  %v21218_v40 = vld [vmem:[#allocation135_spill] sm:$0xff] }
 0x650   : > { %12502 = vmatpush1.bf16.msra.mxu1 %v21202_v39  ;;  %v21207_v39 = vld [vmem:[#allocation49_spill] sm:$0xff] }
 0x651   : > { %12750 = vmatpush3.bf16.msra.mxu0 %v12749_v14  ;;  %12504 = vmatprep.subr.bf16.mxu1 %v21203_v24  ;;  %v12759_v14 = vpack.c.bf16 %v17784_v53, %v17775_v10  ;;  %v21206_v24 = vld [vmem:[#allocation65_spill] sm:$0xff] }
 0x652   : > { %12752 = vmatprep.subr.bf16.mxu0 %v12751_v15  ;;  %v12761_v15 = vpack.c.bf16 %v17792_v28, %v17790_v33 }
 0x654   : > { %12506 = vmatpush1.bf16.msra.mxu1 %v21204_v19  ;;  %v21209_v19 = vld [vmem:[#allocation128_spill] sm:$0xff] }
 0x655   : > { %12754 = vmatpush3.bf16.msra.mxu0 %v12753_v5  ;;  %12508 = vmatprep.subr.bf16.mxu1 %v21205_v63  ;;  %v12763_v5 = vpack.c.bf16 %v17803_v46, %v17796_v0  ;;  %v21208_v63 = vld [vmem:[#allocation81_spill] sm:$0xff] }
 0x656   : > { %12756 = vmatprep.subr.bf16.mxu0 %v12755_v13  ;;  %v12765_v13 = vpack.c.bf16 %v17814_v49, %v17808_v22 }
 0x658   : > { %12510 = vmatpush1.bf16.msra.mxu1 %v21206_v24  ;;  %v21211_v24 = vld [vmem:[#allocation29_spill] sm:$0xff] }
 0x659   : > { %12758 = vmatpush3.bf16.msra.mxu0 %v12757_v45  ;;  %12512 = vmatprep.subr.bf16.mxu1 %v21207_v39  ;;  %v12767_v45 = vpack.c.bf16 %v17824_v17, %v17818_v54  ;;  %v21210_v39 = vld [vmem:[#allocation33_spill] sm:$0xff] }
 0x65a   : > { %12760 = vmatprep.subr.bf16.mxu0 %v12759_v14  ;;  %v12769_v14 = vpack.c.bf16 %v17838_v23, %v17835_v29 }
 0x65c   : > { %12514 = vmatpush1.bf16.msra.mxu1 %v21208_v63  ;;  %v21213_v63 = vld [vmem:[#allocation97_spill] sm:$0xff] }
 0x65d   : > { %12762 = vmatpush3.bf16.msra.mxu0 %v12761_v15  ;;  %12516 = vmatprep.subr.bf16.mxu1 %v21209_v19  ;;  %v12771_v15 = vpack.c.bf16 %v17864_v38, %v17862_v21  ;;  %v21212_v19 = vld [vmem:[#allocation36_spill] sm:$0xff] }
 0x65e   : > { %12764 = vmatprep.subr.bf16.mxu0 %v12763_v5  ;;  %v12773_v5 = vpack.c.bf16 %v17962_v50, %v17873_v51 }
 0x660   : > { %12518 = vmatpush1.bf16.msra.mxu1 %v21210_v39  ;;  %v21214_v39 = vld [vmem:[#allocation74_spill] sm:$0xff] }
 0x661   : > { %12766 = vmatpush3.bf16.msra.mxu0 %v12765_v13  ;;  %12520 = vmatprep.subr.bf16.mxu1 %v21211_v24  ;;  %v21215_v13 = vld [vmem:[#allocation87_spill] sm:$0xff]  ;;  %v21216_v24 = vld [vmem:[#allocation80_spill] sm:$0xff] }
 0x662   : > { %12768 = vmatprep.subr.bf16.mxu0 %v12767_v45  ;;  %v21217_v45 = vld [vmem:[#allocation118_spill] sm:$0xff] }
 0x664   : > { %12522 = vmatpush1.bf16.msra.mxu1 %v21212_v19  ;;  %v21225_v19 = vld [vmem:[#allocation45_spill] sm:$0xff] }
 0x665   : > { %12770 = vmatpush3.bf16.msra.mxu0 %v12769_v14  ;;  %12524 = vmatprep.subr.bf16.mxu1 %v21213_v63  ;;  %v21219_v14 = vld [vmem:[#allocation125_spill] sm:$0xff] }
 0x666   : > { %12772 = vmatprep.subr.bf16.mxu0 %v12771_v15  ;;  %v21220_v63 = vld [vmem:[#allocation137_spill] sm:$0xff]  ;;  %v21221_v15 = vld [vmem:[#allocation62_spill] sm:$0xff] }
 0x668   : > { %12526 = vmatpush1.bf16.msra.mxu1 %v21214_v39  ;;  %v21222_v39 = vld [vmem:[#allocation138_spill] sm:$0xff] }
 0x669   : > { %12774 = vmatpush3.bf16.msra.mxu0 %v12773_v5  ;;  %12528 = vmatprep.subr.bf16.mxu1 %v21215_v13  ;;  %v21223_v5 = vld [vmem:[#allocation46_spill] sm:$0xff]  ;;  %v21224_v13 = vld [vmem:[#allocation139_spill] sm:$0xff] }
 0x66a   : > { %12776 = vmatprep.subr.bf16.mxu0 %v21216_v24 }
 0x66c   : > { %8550 = vmatmul.mubr.f32.vlgmr.msra.gmra.mrb[16].mxu0 %v21187_v3  ;;  %12530 = vmatpush1.bf16.msra.mxu1 %v21217_v45  ;;  %v21226_v3 = vld [vmem:[#allocation141_spill] sm:$0xff] }
 0x66d   : > { %12778 = vmatpush3.bf16.msra.mxu0 %v21218_v40  ;;  %8654 = vmatprep.mubr.f32.mxu0 %v21189_v16  ;;  %v21227_v45 = vld [vmem:[#allocation73_spill] sm:$0xff]  ;;  %v21229_v16 = vld [vmem:[#allocation63_spill] sm:$0xff] }
 0x66e   : > { %12532 = vmatprep.subr.bf16.mxu1 %v21219_v14  ;;  %12780 = vmatprep.subr.bf16.mxu0 %v21220_v63  ;;  %v21230_v14 = vld [vmem:[#allocation143_spill] sm:$0xff] }
 0x670   : > { %12534 = vmatpush1.bf16.msra.mxu1 %v21221_v15  ;;  %v21232_v15 = vld [vmem:[#allocation144_spill] sm:$0xff] }
 0x671   : > { %12782 = vmatpush3.bf16.msra.mxu0 %v21222_v39  ;;  %12536 = vmatprep.subr.bf16.mxu1 %v21223_v5  ;;  %v21234_v5 = vld [vmem:[#allocation145_spill] sm:$0xff] }
 0x672   : > { %12784 = vmatprep.subr.bf16.mxu0 %v21224_v13 }
 0x674   : > { %12538 = vmatpush1.bf16.msra.mxu1 %v21225_v19  ;;  %v21236_v19 = vld [vmem:[#allocation93_spill] sm:$0xff] }
 0x675   : > { %12786 = vmatpush3.bf16.msra.mxu0 %v21226_v3  ;;  %12540 = vmatprep.subr.bf16.mxu1 %v21227_v45  ;;  %v21237_v9 = vand.u32 4294901760, %v21236_v19  ;;  %v21239_v45 = vand.u32 4294901760, %v21238_v18  ;;  %v21252_v18 = vld [vmem:[#allocation133_spill] sm:$0xff] }
 0x676   : > { %12788 = vmatprep.subr.bf16.mxu0 %v21228_v43  ;;  %v21251_v43 = vld [vmem:[#allocation148_spill] sm:$0xff] }
 0x677   : > { %v12551_v56 = vpack.c.bf16 %v21239_v45, %v21237_v9  ;;  %v21253_v9 = vld [vmem:[#allocation75_spill] sm:$0xff]  ;;  %v21255_v45 = vld [vmem:[#allocation68_spill] sm:$0xff] }
 0x678   : > { %12542 = vmatpush1.bf16.msra.mxu1 %v21229_v16  ;;  %v21241_v16 = vld [vmem:[#allocation70_spill] sm:$0xff]  ;;  %v21254_v59 = vand.u32 4294901760, %v21253_v9 }
 0x679   : > { %12790 = vmatpush3.bf16.msra.mxu0 %v21230_v14  ;;  %12544 = vmatprep.subr.bf16.mxu1 %v21231_v20  ;;  %v21244_v20 = vld [vmem:[#allocation66_spill] sm:$0xff] }
 0x67a   : > { %12792 = vmatprep.subr.bf16.mxu0 %v21232_v15  ;;  %v21245_v14 = vand.u32 4294901760, %v21244_v20  ;;  %v21256_v20 = vand.u32 4294901760, %v21255_v45  ;;  %v21264_v9 = vld [vmem:[#allocation114_spill] sm:$0xff]  ;;  %v21266_v45 = vld [vmem:[#allocation113_spill] sm:$0xff] }
 0x67c   : > { %12546 = vmatpush1.bf16.msra.mxu1 %v21233_v47  ;;  %v12553_v15 = vpack.c.bf16 %v21245_v14, %v21243_v4  ;;  %v21247_v47 = vld [vmem:[#allocation67_spill] sm:$0xff]  ;;  %v12557_v4 = vpack.c.bf16 %v21256_v20, %v21254_v59  ;;  %v21259_v14 = vld [vmem:[#allocation56_spill] sm:$0xff]  ;;  %v21267_v59 = vand.u32 4294901760, %v21266_v45 }
 0x67d   : > { %12794 = vmatpush3.bf16.msra.mxu0 %v21234_v5  ;;  %12548 = vmatprep.subr.bf16.mxu1 %v21235_v12  ;;  %v21248_v5 = vand.u32 4294901760, %v21247_v47  ;;  %v21249_v12 = vld [vmem:[#allocation111_spill] sm:$0xff] }
 0x67e   : > { %12796 = vmatprep.subr.bf16.mxu0 %v21240_v30  ;;  %v21250_v26 = vand.u32 4294901760, %v21249_v12  ;;  %v21260_v12 = vand.u32 4294901760, %v21259_v14  ;;  %v21271_v14 = vld [vmem:[#allocation116_spill] sm:$0xff] }
 0x680   : > { %12550 = vmatpush1.bf16.msra.mxu1 %v21241_v16  ;;  %v12555_v19 = vpack.c.bf16 %v21250_v26, %v21248_v5  ;;  %v21261_v5 = vld [vmem:[#allocation150_spill] sm:$0xff]  ;;  %v21262_v16 = vand.u32 4294901760, %v21195_v41  ;;  %v21272_v41 = vand.u32 4294901760, %v21271_v14 }
 0x681   : > { %12798 = vmatpush3.bf16.msra.mxu0 %v21246_v52  ;;  %12552 = vmatprep.subr.bf16.mxu1 %v12551_v56  ;;  %v21257_v56 = vld [vmem:[#allocation37_spill] sm:$0xff]  ;;  %v21265_v52 = vand.u32 4294901760, %v21264_v9 }
 0x682   : > { %12800 = vmatprep.subr.bf16.mxu0 %v21251_v43  ;;  %v21258_v47 = vand.u32 4294901760, %v21257_v56  ;;  %v21270_v56 = vand.u32 4294901760, %v17712_v32 }
 0x683   : > { %7665 = vmatmul.mubr.f32.vlgmr.msra.gmra.mrb[6].mxu1 %v21252_v18  ;;  %v12561_v20 = vpack.c.bf16 %v21267_v59, %v21265_v52  ;;  %v21277_v52 = vld [vmem:[#allocation59_spill] sm:$0xff]  ;;  %v21282_v59 = vand.u32 4294901760, %v17732_v60  ;;  %v21293_v60 = vand.u32 4294901760, %v17747_v1 }
 0x684   : > { %12554 = vmatpush1.bf16.msra.mxu1 %v12553_v15  ;;  %7928 = vmatprep.mubr.f32.mxu1 %v17658_v62  ;;  %v12559_v26 = vpack.c.bf16 %v21260_v12, %v21258_v47  ;;  %v21263_v15 = vand.u32 4294901760, %v21194_v2  ;;  %v21273_v12 = vld [vmem:[#allocation117_spill] sm:$0xff] }
 0x685   : > { %12802 = vmatpush3.bf16.msra.mxu0 %v17833_v44  ;;  %12556 = vmatprep.subr.bf16.mxu1 %v12555_v19  ;;  %v21268_v44 = vld [vmem:[#allocation151_spill] sm:$0xff]  ;;  %v21269_v19 = vand.u32 4294901760, %v21193_v7  ;;  %v21274_v2 = vand.u32 4294901760, %v21273_v12  ;;  %v21279_v7 = vld [vmem:[#allocation121_spill] sm:$0xff] }
 0x686   : > { %12804 = vmatprep.subr.bf16.mxu0 %v21261_v5  ;;  %v12807_v43 = vpack.c.bf16 %v21263_v15, %v21262_v16  ;;  %v21276_v15 = vand.u32 4294901760, %v17717_v8  ;;  %v21280_v45 = vand.u32 4294901760, %v21279_v7  ;;  %v21285_v8 = vld [vmem:[#allocation124_spill] sm:$0xff]  ;;  %v21297_v7 = vld [vmem:[#allocation35_spill] sm:$0xff] }
 0x687   : > { %v12809_v47 = vpack.c.bf16 %v21270_v56, %v21269_v19  ;;  %v12563_v16 = vpack.c.bf16 %v21274_v2, %v21272_v41  ;;  %v21286_v14 = vand.u32 4294901760, %v21285_v8  ;;  %v21306_v8 = vand.u32 4294901760, %v17770_v58 }
 0x688   : > { %12558 = vmatpush1.bf16.msra.mxu1 %v12557_v4  ;;  %v21275_v4 = vand.u32 4294901760, %v17714_v31  ;;  %v21283_v31 = vld [vmem:[#allocation60_spill] sm:$0xff]  ;;  %v21317_v58 = vand.u32 4294901760, %v17790_v33 }
 0x689   : > { %12806 = vmatpush3.bf16.msra.mxu0 %v21268_v44  ;;  %12560 = vmatprep.subr.bf16.mxu1 %v12559_v26  ;;  %v21278_v26 = vand.u32 4294901760, %v21277_v52  ;;  %v21284_v56 = vand.u32 4294901760, %v21283_v31  ;;  %v21294_v52 = vand.u32 4294901760, %v17749_v36  ;;  %v21303_v31 = vld [vmem:[#allocation105_spill] sm:$0xff]  ;;  %v21305_v36 = vand.u32 4294901760, %v17768_v25 }
 0x68a   : > { %12808 = vmatprep.subr.bf16.mxu0 %v12807_v43  ;;  %v12811_v9 = vpack.c.bf16 %v21276_v15, %v21275_v4  ;;  %v21281_v43 = vand.u32 4294901760, %v21200_v6  ;;  %v21291_v4 = vld [vmem:[#allocation122_spill] sm:$0xff] }
 0x68b   : > { %v12565_v32 = vpack.c.bf16 %v21280_v45, %v21278_v26  ;;  %v12567_v41 = vpack.c.bf16 %v21286_v14, %v21284_v56  ;;  %v21292_v6 = vand.u32 4294901760, %v21291_v4  ;;  %v12817_v26 = vpack.c.bf16 %v21294_v52, %v21293_v60  ;;  %v21313_v4 = vld [vmem:[#allocation101_spill] sm:$0xff] }
 0x68c   : > { %8658 = vmatmul.mubr.f32.vlgmr.msra.gmra.mrb[18].mxu0 %v21252_v18  ;;  %12562 = vmatpush1.bf16.msra.mxu1 %v12561_v20  ;;  %v12813_v19 = vpack.c.bf16 %v21282_v59, %v21281_v43  ;;  %v21287_v18 = vand.u32 4294901760, %v17734_v55  ;;  %v21288_v20 = vand.u32 4294901760, %v17740_v37  ;;  %v21298_v55 = vand.u32 4294901760, %v21297_v7  ;;  %v21301_v59 = vld [vmem:[#allocation96_spill] sm:$0xff]  ;;  %v21321_v7 = vld [vmem:[#allocation54_spill] sm:$0xff] }
 0x68d   : > { %12810 = vmatpush3.bf16.msra.mxu0 %v12809_v47  ;;  %8824 = vmatprep.mubr.f32.mxu0 %v17658_v62  ;;  %v21289_v47 = vld [vmem:[#allocation127_spill] sm:$0xff]  ;;  %v21299_v37 = vand.u32 4294901760, %v17760_v27  ;;  %v21304_v56 = vand.u32 4294901760, %v21303_v31  ;;  %v12821_v14 = vpack.c.bf16 %v21306_v8, %v21305_v36  ;;  %v21318_v52 = vand.u32 4294901760, %v17792_v28  ;;  %v21333_v8 = vld [vmem:[#allocation57_spill] sm:$0xff] }
 0x68e   : > { %12564 = vmatprep.subr.bf16.mxu1 %v12563_v16  ;;  %12812 = vmatprep.subr.bf16.mxu0 %v12811_v9  ;;  %v12815_v12 = vpack.c.bf16 %v21288_v20, %v21287_v18  ;;  %v21290_v2 = vand.u32 4294901760, %v21289_v47  ;;  %v21295_v16 = vld [vmem:[#allocation39_spill] sm:$0xff]  ;;  %v21309_v20 = vld [vmem:[#allocation109_spill] sm:$0xff]  ;;  %v21312_v47 = vand.u32 4294901760, %v17784_v53  ;;  %v21323_v53 = vand.u32 4294901760, %v17796_v0 }
 0x68f   : > { %v21296_v9 = vand.u32 4294901760, %v21295_v16  ;;  %v21310_v27 = vand.u32 4294901760, %v21309_v20  ;;  %v21319_v16 = vld [vmem:[#allocation55_spill] sm:$0xff]  ;;  %v21329_v28 = vand.u32 4294901760, %v17808_v22  ;;  %v21330_v31 = vand.u32 4294901760, %v17814_v49  ;;  %v21337_v20 = vld [vmem:[#allocation82_spill] sm:$0xff] }
 0x690   : > { %12566 = vmatpush1.bf16.msra.mxu1 %v12565_v32  ;;  %v12569_v15 = vpack.c.bf16 %v21292_v6, %v21290_v2  ;;  %v21300_v32 = vand.u32 4294901760, %v17762_v34  ;;  %v21311_v34 = vand.u32 4294901760, %v17775_v10  ;;  %v21314_v6 = vand.u32 4294901760, %v21313_v4  ;;  %v21343_v4 = vld [vmem:[#allocation32_spill] sm:$0xff] }
 0x691   : > { %12814 = vmatpush3.bf16.msra.mxu0 %v12813_v19  ;;  %12568 = vmatprep.subr.bf16.mxu1 %v12567_v41  ;;  %v12571_v45 = vpack.c.bf16 %v21298_v55, %v21296_v9  ;;  %v21302_v19 = vand.u32 4294901760, %v21301_v59  ;;  %v21307_v41 = vld [vmem:[#allocation94_spill] sm:$0xff]  ;;  %v21320_v9 = vand.u32 4294901760, %v21319_v16  ;;  %v21322_v10 = vand.u32 4294901760, %v21321_v7  ;;  %v21327_v59 = vld [vmem:[#allocation79_spill] sm:$0xff] }
 0x692   : > { %12816 = vmatprep.subr.bf16.mxu0 %v12815_v12  ;;  %v12819_v43 = vpack.c.bf16 %v21300_v32, %v21299_v37  ;;  %v21308_v18 = vand.u32 4294901760, %v21307_v41  ;;  %v12823_v2 = vpack.c.bf16 %v21312_v47, %v21311_v34  ;;  %v21325_v32 = vld [vmem:[#allocation48_spill] sm:$0xff]  ;;  %v21334_v0 = vand.u32 4294901760, %v21333_v8  ;;  %v21351_v16 = vld [vmem:[#allocation43_spill] sm:$0xff] }
 0x693   : > { %v12573_v1 = vpack.c.bf16 %v21304_v56, %v21302_v19  ;;  %v12579_v55 = vpack.c.bf16 %v21322_v10, %v21320_v9  ;;  %v21328_v19 = vand.u32 4294901760, %v21327_v59  ;;  %v12829_v56 = vpack.c.bf16 %v21330_v31, %v21329_v28 }
 0x694   : > { %12570 = vmatpush1.bf16.msra.mxu1 %v12569_v15  ;;  %v12575_v12 = vpack.c.bf16 %v21310_v27, %v21308_v18  ;;  %v21315_v15 = vld [vmem:[#allocation103_spill] sm:$0xff]  ;;  %v21336_v41 = vand.u32 4294901760, %v17824_v17  ;;  %v21338_v27 = vand.u32 4294901760, %v21337_v20  ;;  %v21341_v49 = vand.u32 4294901760, %v17835_v29 }
 0x695   : > { %12818 = vmatpush3.bf16.msra.mxu0 %v12817_v26  ;;  %12572 = vmatprep.subr.bf16.mxu1 %v12571_v45  ;;  %v21316_v60 = vand.u32 4294901760, %v21315_v15  ;;  %v12825_v26 = vpack.c.bf16 %v21318_v52, %v21317_v58  ;;  %v21324_v45 = vand.u32 4294901760, %v17803_v46  ;;  %v21335_v46 = vand.u32 4294901760, %v17818_v54  ;;  %v21345_v15 = vld [vmem:[#allocation30_spill] sm:$0xff] }
 0x696   : > { %12820 = vmatprep.subr.bf16.mxu0 %v12819_v43  ;;  %v21326_v43 = vand.u32 4294901760, %v21325_v32  ;;  %v21342_v47 = vand.u32 4294901760, %v17838_v23  ;;  %v21346_v54 = vand.u32 4294901760, %v21345_v15  ;;  %v21347_v17 = vand.u32 4294901760, %v17862_v21  ;;  %v21349_v52 = vld [vmem:[#allocation50_spill] sm:$0xff] }
 0x697   : > { %v12577_v25 = vpack.c.bf16 %v21316_v60, %v21314_v6  ;;  %v12827_v37 = vpack.c.bf16 %v21324_v45, %v21323_v53  ;;  %v12831_v18 = vpack.c.bf16 %v21336_v41, %v21335_v46  ;;  %v21344_v6 = vand.u32 4294901760, %v21343_v4  ;;  %v21357_v45 = vld [vmem:[#allocation108_spill] sm:$0xff] }
 0x698   : > { %12574 = vmatpush1.bf16.msra.mxu1 %v12573_v1  ;;  %v12581_v33 = vpack.c.bf16 %v21328_v19, %v21326_v43  ;;  %v21331_v1 = vld [vmem:[#allocation83_spill] sm:$0xff]  ;;  %v21352_v9 = vand.u32 4294901760, %v21351_v16  ;;  %v21353_v23 = vand.u32 4294901760, %v17873_v51  ;;  %v21354_v7 = vand.u32 4294901760, %v17962_v50  ;;  %v21363_v51 = vld [vmem:[#allocation112_spill] sm:$0xff]  ;;  %v21397_v16 = vld [vmem:[#allocation106_spill] sm:$0xff] }
 0x699   : > { %12822 = vmatpush3.bf16.msra.mxu0 %v12821_v14  ;;  %12576 = vmatprep.subr.bf16.mxu1 %v12575_v12  ;;  %v21332_v36 = vand.u32 4294901760, %v21331_v1  ;;  %v21339_v12 = vld [vmem:[#allocation85_spill] sm:$0xff]  ;;  %v12587_v60 = vpack.c.bf16 %v21346_v54, %v21344_v6  ;;  %v21358_v21 = vand.u32 4294901760, %v21357_v45  ;;  %v21361_v43 = vld [vmem:[#allocation95_spill] sm:$0xff]  ;;  %v21365_v50 = vld [vmem:[#allocation84_spill] sm:$0xff]  ;;  %v21384_v6 = vand.u32 4294901760, %v21179_v11 }
 0x69a   : > { %12824 = vmatprep.subr.bf16.mxu0 %v12823_v2  ;;  %v21340_v34 = vand.u32 4294901760, %v21339_v12  ;;  %v12833_v2 = vpack.c.bf16 %v21342_v47, %v21341_v49  ;;  %v12837_v10 = vpack.c.bf16 %v21354_v7, %v21353_v23  ;;  %v21362_v59 = vand.u32 4294901760, %v21361_v43  ;;  %v21380_v49 = vld [vmem:[#allocation126_spill] sm:$0xff]  ;;  %v21404_v45 = vld [vmem:[#allocation148_spill] sm:$0xff] }
 0x69b   : > { %v12583_v14 = vpack.c.bf16 %v21334_v0, %v21332_v36  ;;  %v21366_v28 = vand.u32 4294901760, %v21365_v50  ;;  %v21369_v36 = vld [vmem:[#allocation38_spill] sm:$0xff]  ;;  %v21381_v47 = vand.u32 4294901760, %v21380_v49  ;;  %v21409_v50 = vld [vmem:[#allocation120_spill] sm:$0xff] }
 0x69c   : > { %12578 = vmatpush1.bf16.msra.mxu1 %v12577_v25  ;;  %v12585_v22 = vpack.c.bf16 %v21340_v34, %v21338_v27  ;;  %v21348_v25 = vand.u32 4294901760, %v17864_v38  ;;  %v21359_v38 = vld [vmem:[#allocation88_spill] sm:$0xff]  ;;  %v21370_v8 = vand.u32 4294901760, %v21369_v36  ;;  %v21376_v27 = vld [vmem:[#allocation47_spill] sm:$0xff]  ;;  %v21386_v54 = vld [vmem:[#allocation142_spill] sm:$0xff] }
 0x69d   : > { %12826 = vmatpush3.bf16.msra.mxu0 %v12825_v26  ;;  %12580 = vmatprep.subr.bf16.mxu1 %v12579_v55  ;;  %v21350_v26 = vand.u32 4294901760, %v21349_v52  ;;  %v21355_v55 = vld [vmem:[#allocation51_spill] sm:$0xff]  ;;  %v21360_v32 = vand.u32 4294901760, %v21359_v38  ;;  %v21377_v12 = vand.u32 4294901760, %v21376_v27  ;;  %v21394_v52 = vld [vmem:[#allocation89_spill] sm:$0xff]  ;;  %v21405_v38 = vld [vmem:[#allocation78_spill] sm:$0xff] }
 0x69e   : > { %12828 = vmatprep.subr.bf16.mxu0 %v12827_v37  ;;  %v12835_v58 = vpack.c.bf16 %v21348_v25, %v21347_v17  ;;  %v21356_v53 = vand.u32 4294901760, %v21355_v55  ;;  %v21389_v17 = vld [vmem:[#allocation92_spill] sm:$0xff]  ;;  %v21395_v11 = vand.u32 4294901760, %v21394_v52  ;;  %v21402_v55 = vld [vmem:[#allocation147_spill] sm:$0xff]  ;;  %v18327_v36 = vld [vmem:[%s14182_s26 + $0x88] sm:$0xff] }
 0x69f   : > { %v12589_v29 = vpack.c.bf16 %v21352_v9, %v21350_v26  ;;  %v12593_v19 = vpack.c.bf16 %v21362_v59, %v21360_v32  ;;  %v21390_v25 = vand.u32 4294901760, %v21389_v17  ;;  %v21398_v9 = vand.u32 4294901760, %v21397_v16  ;;  %v21406_v32 = vld [vmem:[#allocation149_spill] sm:$0xff]  ;;  %v21417_v49 = vld [vmem:[#allocation44_spill] sm:$0xff] }
 0x6a0   : > { %12582 = vmatpush1.bf16.msra.mxu1 %v12581_v33  ;;  %v12591_v37 = vpack.c.bf16 %v21358_v21, %v21356_v53  ;;  %v21364_v33 = vand.u32 4294901760, %v21363_v51  ;;  %v21403_v53 = vld [vmem:[#allocation77_spill] sm:$0xff]  ;;  %v8937_v21 = vld [vmem:[%s14182_s26 + $0x10] sm:$0xff]  ;;  %v8946_v51 = vld [vmem:[%s14182_s26 + $0x58] sm:$0xff] }
 0x6a1   : > { %12830 = vmatpush3.bf16.msra.mxu0 %v12829_v56  ;;  %12584 = vmatprep.subr.bf16.mxu1 %v12583_v14  ;;  %v21367_v56 = vld [vmem:[#allocation53_spill] sm:$0xff]  ;;  %v21371_v14 = vand.u32 4294901760, %v21164_v57  ;;  %v9856_v43 = vand.u32 4294901760, %v8937_v21 }
 0x6a2   : > { %12832 = vmatprep.subr.bf16.mxu0 %v12831_v18  ;;  %v12595_v31 = vpack.c.bf16 %v21366_v28, %v21364_v33  ;;  %v21368_v1 = vand.u32 4294901760, %v21367_v56  ;;  %v21374_v18 = vld [vmem:[#allocation58_spill] sm:$0xff]  ;;  %v21408_v33 = vld [vmem:[#allocation115_spill] sm:$0xff]  ;;  %v19995_v56 = vmov 0.0|0.0   ;;  %v21427_v52 = vld [vmem:[#allocation81_spill] sm:$0xff] }
 0x6a3   : > { %v21375_v20 = vand.u32 4294901760, %v21374_v18  ;;  %v21414_v18 = vld [vmem:[#allocation41_spill] sm:$0xff] }
 0x6a4   : > { %12586 = vmatpush1.bf16.msra.mxu1 %v12585_v22  ;;  %v12597_v0 = vpack.c.bf16 %v21370_v8, %v21368_v1  ;;  %v8949_v1 = vld [vmem:[%s14182_s26 + $0x70] sm:$0xff] }
 0x6a5   : > { %12834 = vmatpush3.bf16.msra.mxu0 %v12833_v2  ;;  %12588 = vmatprep.subr.bf16.mxu1 %v12587_v60  ;;  %v12601_v34 = vpack.c.bf16 %v21377_v12, %v21375_v20  ;;  %v21382_v2 = vand.u32 4294901760, %v17459_v61  ;;  %v21387_v60 = vld [vmem:[#allocation104_spill] sm:$0xff]  ;;  %v21415_v20 = vld [vmem:[#allocation42_spill] sm:$0xff] }
 0x6a6   : > { %12836 = vmatprep.subr.bf16.mxu0 %v12835_v58 }
 0x6a8   : > { %12590 = vmatpush1.bf16.msra.mxu1 %v12589_v29  ;;  %v21399_v29 = vld [vmem:[#allocation100_spill] sm:$0xff] }
 0x6a9   : > { %12838 = vmatpush3.bf16.msra.mxu0 %v12837_v10  ;;  %12592 = vmatprep.subr.bf16.mxu1 %v12591_v37  ;;  %v21400_v23 = vand.u32 4294901760, %v21399_v29  ;;  %v21401_v10 = vld [vmem:[#allocation145_spill] sm:$0xff] }
 0x6aa   : > { %12840 = vmatprep.subr.bf16.mxu0 %v21216_v24  ;;  %v21372_v24 = vld [vmem:[#allocation119_spill] sm:$0xff]  ;;  %v8940_v37 = vld [vmem:[%s14182_s26 + $0x28] sm:$0xff] }
 0x6ab   : > { %v21373_v46 = vand.u32 4294901760, %v21372_v24  ;;  %v12613_v7 = vpack.c.bf16 %v21400_v23, %v21398_v9  ;;  %v9859_v59 = vand.u32 4294901760, %v8940_v37  ;;  %v8955_v24 = vld [vmem:[%s14182_s26 + $0xa0] sm:$0xff] }
 0x6ac   : > { %8826 = vmatmul.mubr.f32.vlgmr.msra.gmra.mrb[20].mxu0 %v21197_v42  ;;  %12594 = vmatpush1.bf16.msra.mxu1 %v12593_v19  ;;  %v8943_v19 = vld [vmem:[%s14182_s26 + $0x40] sm:$0xff]  ;;  %v9874_v12 = vand.u32 4294901760, %v8955_v24 }
 0x6ad   : > { %12842 = vmatpush3.bf16.msra.mxu0 %v21218_v40  ;;  %8928 = vmatprep.mubr.f32.mxu0 %v17658_v62  ;;  %v12599_v41 = vpack.c.bf16 %v21373_v46, %v21371_v14  ;;  %v21378_v40 = vld [vmem:[#allocation34_spill] sm:$0xff]  ;;  %v9862_v28 = vand.u32 4294901760, %v8943_v19  ;;  %v9871_v14 = vand.u32 4294901760, %v18327_v36  ;;  %v18339_v46 = vld [vmem:[%s14182_s26 + $0xb8] sm:$0xff] }
 0x6ae   : > { %12596 = vmatprep.subr.bf16.mxu1 %v12595_v31  ;;  %12844 = vmatprep.subr.bf16.mxu0 %v21220_v63  ;;  %v21379_v22 = vand.u32 4294901760, %v21378_v40  ;;  %v21383_v63 = vand.u32 4294901760, %v21178_v48  ;;  %v21391_v48 = vld [vmem:[#allocation143_spill] sm:$0xff]  ;;  %v9865_v31 = vand.u32 4294901760, %v8946_v51  ;;  %v18351_v40 = vld [vmem:[%s14182_s26 + $0xd0] sm:$0xff] }
 0x6b0   : > { %12598 = vmatpush1.bf16.msra.mxu1 %v12597_v0  ;;  %v12603_v57 = vpack.c.bf16 %v21381_v47, %v21379_v22  ;;  %v12605_v4 = vpack.c.bf16 %v21383_v63, %v21382_v2  ;;  %v18333_v8 = vpack.c.bf16 %v9865_v31, %v9862_v28  ;;  %v9868_v0 = vand.u32 4294901760, %v8949_v1  ;;  %v18354_v22 = vld [vmem:[%s14182_s26 + $0xe8] sm:$0xff]  ;;  %v21418_v47 = vld [vmem:[#allocation64_spill] sm:$0xff] }
 0x6b1   : > { %12846 = vmatpush3.bf16.msra.mxu0 %v21222_v39  ;;  %12600 = vmatprep.subr.bf16.mxu1 %v12599_v41  ;;  %v21385_v39 = vand.u32 4294901760, %v21180_v35  ;;  %v21396_v35 = vld [vmem:[#allocation144_spill] sm:$0xff]  ;;  %v21413_v41 = vmov 0.0   ;;  %v9880_v2 = vand.u32 4294901760, %v18351_v40  ;;  %v9883_v63 = vand.u32 4294901760, %v18354_v22 }
 0x6b2   : > { %12848 = vmatprep.subr.bf16.mxu0 %v21224_v13  ;;  %v21388_v13 = vand.u32 4294901760, %v21387_v60  ;;  %21412 = vst [vmem:[#allocation52_spill] sm:$0xff] %v18333_v8  ;;  %v18346_v27 = vpack.c.bf16 %v9871_v14, %v9868_v0  ;;  %v21423_v60 = vld [vmem:[#allocation49_spill] sm:$0xff] }
 0x6b3   : > { %v12607_v15 = vpack.c.bf16 %v21385_v39, %v21384_v6  ;;  %v18368_v6 = vld [vmem:[%s14182_s26 + $0x118] sm:$0xff]  ;;  %v18370_v39 = vsub.f32 %v8937_v21, %v9856_v43 }
 0x6b4   : > { %12602 = vmatpush1.bf16.msra.mxu1 %v12601_v34  ;;  %v12609_v61 = vpack.c.bf16 %v21390_v25, %v21388_v13  ;;  %21416 = vst [vmem:[#allocation40_spill] sm:$0xff] %v18346_v27  ;;  %v9877_v34 = vand.u32 4294901760, %v18339_v46  ;;  %v18377_v13 = vpack.c.bf16 %v9883_v63, %v9880_v2  ;;  %v9889_v25 = vand.u32 4294901760, %v18368_v6 }
 0x6b5   : > { %12850 = vmatpush3.bf16.msra.mxu0 %v21226_v3  ;;  %12604 = vmatprep.subr.bf16.mxu1 %v12603_v57  ;;  %v21392_v3 = vld [vmem:[#allocation98_spill] sm:$0xff]  ;;  %21420 = vst [vmem:[#allocation102_spill] sm:$0xff] %v18370_v39 }
 0x6b6   : > { %12852 = vmatprep.subr.bf16.mxu0 %v21386_v54  ;;  %v21393_v58 = vand.u32 4294901760, %v21392_v3  ;;  %v18359_v57 = vpack.c.bf16 %v9877_v34, %v9874_v12  ;;  %v21422_v54 = vld [vmem:[#allocation65_spill] sm:$0xff]  ;;  %21424 = vst [vmem:[#allocation134_spill] sm:$0xff] %v18377_v13  ;;  %v18388_v3 = vsub.f32 %v8943_v19, %v9862_v28 }
 0x6b8   : > { %12606 = vmatpush1.bf16.msra.mxu1 %v12605_v4  ;;  %v12611_v26 = vpack.c.bf16 %v21395_v11, %v21393_v58  ;;  %21419 = vst [vmem:[#allocation31_spill] sm:$0xff] %v18359_v57  ;;  %v18365_v4 = vld [vmem:[%s14182_s26 + $0x100] sm:$0xff]  ;;  %21425 = vst [vmem:[#allocation136_spill] sm:$0xff] %v18388_v3  ;;  %v18390_v58 = vsub.f32 %v8946_v51, %v9865_v31  ;;  %v19994_v11 = vand.u32 4294901760, %v18370_v39 }
 0x6b9   : > { %12854 = vmatpush3.bf16.msra.mxu0 %v21391_v48  ;;  %12608 = vmatprep.subr.bf16.mxu1 %v12607_v15  ;;  %v18372_v15 = vsub.f32 %v8940_v37, %v9859_v59  ;;  %v9886_v17 = vand.u32 4294901760, %v18365_v4  ;;  %v18386_v48 = vld [vmem:[%s14182_s26 + $0x148] sm:$0xff] }
 0x6ba   : > { %12856 = vmatprep.subr.bf16.mxu0 %v21396_v35  ;;  %21426 = vst [vmem:[#allocation129_spill] sm:$0xff] %v18390_v58  ;;  %v21428_v35 = vld [vmem:[#allocation128_spill] sm:$0xff]  ;;  %v9895_v29 = vand.u32 4294901760, %v18386_v48  ;;  %v9950_v21 = vsub.f32 %v18370_v39, %v19994_v11 }
 0x6bb   : > { %21421 = vst [vmem:[#allocation131_spill] sm:$0xff] %v18372_v15  ;;  %v18397_v16 = vpack.c.bf16 %v9889_v25, %v9886_v17 }
 0x6bc   : > { %12610 = vmatpush1.bf16.msra.mxu1 %v12609_v61  ;;  %v18383_v61 = vld [vmem:[%s14182_s26 + $0x130] sm:$0xff]  ;;  %v9951_v28 = vand.u32 4294901760, %v9950_v21 }
 0x6bd   : > { %12858 = vmatpush3.bf16.msra.mxu0 %v21401_v10  ;;  %12612 = vmatprep.subr.bf16.mxu1 %v12611_v26  ;;  %v19993_v26 = vand.u32 4294901760, %v18372_v15  ;;  %21429 = vst [vmem:[#allocation72_spill] sm:$0xff] %v18397_v16  ;;  %v9892_v9 = vand.u32 4294901760, %v18383_v61  ;;  %v18408_v10 = vld [vmem:[%s14182_s26 + $0x178] sm:$0xff] }
 0x6be   : > { %12860 = vmatprep.subr.bf16.mxu0 %v21240_v30  ;;  %v21407_v30 = vld [vmem:[#allocation110_spill] sm:$0xff]  ;;  %v9901_v51 = vand.u32 4294901760, %v18408_v10 }
 0x6bf   : > { %v9957_v37 = vsub.f32 %v18372_v15, %v19993_v26 }
 0x6c0   : > { %12614 = vmatpush1.bf16.msra.mxu1 %v12613_v7  ;;  %v18405_v7 = vld [vmem:[%s14182_s26 + $0x160] sm:$0xff] }
 0x6c1   : > { %12862 = vmatpush3.bf16.msra.mxu0 %v21402_v55  ;;  %12616 = vmatprep.subr.bf16.mxu1 %v21403_v53  ;;  %v18410_v55 = vsub.f32 %v8949_v1, %v9868_v0  ;;  %v9898_v19 = vand.u32 4294901760, %v18405_v7  ;;  %v9958_v31 = vand.u32 4294901760, %v9957_v37 }
 0x6c2   : > { %12864 = vmatprep.subr.bf16.mxu0 %v21404_v45  ;;  %v21433_v45 = vld [vmem:[#allocation33_spill] sm:$0xff] }
 0x6c3   : > { %7930 = vmatmul.mubr.f32.vlgmr.msra.gmra.mrb[6].mxu1 %v21197_v42  ;;  %21431 = vst [vmem:[#allocation132_spill] sm:$0xff] %v18410_v55  ;;  %v18451_v0 = vpack.c.bf16 %v9901_v51, %v9898_v19 }
 0x6c4   : > { %12618 = vmatpush1.bf16.msra.mxu1 %v21405_v38  ;;  %8065 = vmatprep.mubr.f32.mxu1 %v17658_v62  ;;  %v18322_v62 = vpack.c.bf16 %v9859_v59, %v9856_v43  ;;  %v19992_v38 = vand.u32 4294901760, %v18388_v3  ;;  %v21435_v43 = vld [vmem:[#allocation29_spill] sm:$0xff]  ;;  %v18428_v59 = vpack.c.bf16 %v9895_v29, %v9892_v9 }
 0x6c5   : > { %12866 = vmatpush3.bf16.msra.mxu0 %v21406_v32  ;;  %12620 = vmatprep.subr.bf16.mxu1 %v21407_v30  ;;  %v19990_v32 = vand.u32 4294901760, %v18390_v58  ;;  %v18424_v30 = vsub.f32 %v18327_v36, %v9871_v14  ;;  %21441 = vst [vmem:[#allocation139_spill] sm:$0xff] %v18451_v0  ;;  %v19988_v14 = vand.u32 4294901760, %v18410_v55 }
 0x6c6   : > { %12868 = vmatprep.subr.bf16.mxu0 %v21261_v5  ;;  %v21410_v5 = vld [vmem:[#allocation61_spill] sm:$0xff]  ;;  %21436 = vst [vmem:[#allocation135_spill] sm:$0xff] %v18428_v59  ;;  %v9964_v1 = vsub.f32 %v18388_v3, %v19992_v38 }
 0x6c7   : > { %21434 = vst [vmem:[#allocation80_spill] sm:$0xff] %v18424_v30  ;;  %v9971_v36 = vsub.f32 %v18390_v58, %v19990_v32  ;;  %v21460_v32 = vld [vmem:[#allocation70_spill] sm:$0xff] }
 0x6c8   : > { %12622 = vmatpush1.bf16.msra.mxu1 %v21408_v33  ;;  %v18433_v33 = vsub.f32 %v8955_v24, %v9874_v12  ;;  %v19987_v24 = vand.u32 4294901760, %v18424_v30  ;;  %v13088_v12 = vpack.c.bf16 %v9958_v31, %v9951_v28  ;;  %v21449_v31 = vld [vmem:[#allocation62_spill] sm:$0xff] }
 0x6c9   : > { %12870 = vmatpush3.bf16.msra.mxu0 %v21268_v44  ;;  %12624 = vmatprep.subr.bf16.mxu1 %v21409_v50  ;;  %v21411_v44 = vld [vmem:[#allocation123_spill] sm:$0xff]  ;;  %v21438_v50 = vld [vmem:[#allocation36_spill] sm:$0xff] }
 0x6ca   : > { %13063 = vmatprep.subr.bf16.mxu0 %v19995_v56  ;;  %21437 = vst [vmem:[#allocation137_spill] sm:$0xff] %v18433_v33 }
 0x6cc   : > { %8930 = vmatmul.mubr.f32.vlgmr.msra.gmra.mrb[22].mxu0 %v21197_v42  ;;  %12626 = vmatpush1.bf16.msra.mxu1 %v21410_v5  ;;  %v18443_v5 = vsub.f32 %v18339_v46, %v9877_v34  ;;  %v18460_v46 = vsub.f32 %v18354_v22, %v9883_v63  ;;  %v9965_v34 = vand.u32 4294901760, %v9964_v1  ;;  %v19986_v22 = vand.u32 4294901760, %v18433_v33 }
 0x6cd   : > { %13065 = vmatpush3.bf16.msra.mxu0 %v18322_v62  ;;  %12628 = vmatprep.subr.bf16.mxu1 %v21411_v44  ;;  %v21440_v44 = vld [vmem:[#allocation97_spill] sm:$0xff]  ;;  %v18475_v63 = vsub.f32 %v18365_v4, %v9886_v17  ;;  %v18495_v17 = vsub.f32 %v18383_v61, %v9892_v9  ;;  %v21450_v61 = vld [vmem:[#allocation46_spill] sm:$0xff] }
 0x6ce   : > { %13066 = vmatprep.subr.bf16.mxu0 %v19995_v56  ;;  %11301 = vmatprep.mubr.msk.f32.mxu0 %vm13776_vm8, %v21413_v41  ;;  %21439 = vst [vmem:[#allocation138_spill] sm:$0xff] %v18443_v5  ;;  %21443 = vst [vmem:[#allocation93_spill] sm:$0xff] %v18460_v46  ;;  %v19983_v37 = vand.u32 4294901760, %v18460_v46  ;;  %v9992_v4 = vsub.f32 %v18433_v33, %v19986_v22 }
 0x6d0   : > { %12630 = vmatpush1.bf16.msra.mxu1 %v21414_v18  ;;  %v18457_v18 = vsub.f32 %v18351_v40, %v9880_v2  ;;  %v9985_v40 = vsub.f32 %v18424_v30, %v19987_v24  ;;  %v19985_v2 = vand.u32 4294901760, %v18443_v5 }
 0x6d1   : > { %13068 = vmatpush3.bf16.msra.mxu0 %v18333_v8  ;;  %12632 = vmatprep.subr.bf16.mxu1 %v21415_v20  ;;  %v21444_v20 = vld [vmem:[#allocation74_spill] sm:$0xff]  ;;  %v8975_v8 = vld [vmem:[%s14182_s26 + $0x140] sm:$0xff] }
 0x6d2   : > { %13069 = vmatprep.subr.bf16.mxu0 %v19995_v56  ;;  %21442 = vst [vmem:[#allocation141_spill] sm:$0xff] %v18457_v18  ;;  %v19984_v21 = vand.u32 4294901760, %v18457_v18  ;;  %v9986_v28 = vand.u32 4294901760, %v9985_v40 }
 0x6d4   : > { %12634 = vmatpush1.bf16.msra.mxu1 %v21417_v49  ;;  %v9972_v49 = vand.u32 4294901760, %v9971_v36  ;;  %v10006_v1 = vsub.f32 %v18457_v18, %v19984_v21  ;;  %v10013_v36 = vsub.f32 %v18460_v46, %v19983_v37  ;;  %v8941_v21 = vld [vmem:[%s14182_s26 + $0x30] sm:$0xff] }
 0x6d5   : > { %13071 = vmatpush3.bf16.msra.mxu0 %v18346_v27  ;;  %12636 = vmatprep.subr.bf16.mxu1 %v21418_v47  ;;  %v21445_v47 = vld [vmem:[#allocation87_spill] sm:$0xff]  ;;  %v9010_v38 = vand.u32 4294901760, %v8941_v21 }
 0x6d6   : > { %13072 = vmatprep.subr.bf16.mxu0 %v19995_v56 }
 0x6d8   : > { %12638 = vmatpush1.bf16.msra.mxu1 %v21422_v54  ;;  %v9978_v54 = vsub.f32 %v18410_v55, %v19988_v14 }
 0x6d9   : > { %13074 = vmatpush3.bf16.msra.mxu0 %v18359_v57  ;;  %12640 = vmatprep.subr.bf16.mxu1 %v21423_v60  ;;  %v18478_v60 = vsub.f32 %v18368_v6, %v9889_v25  ;;  %v9999_v6 = vsub.f32 %v18443_v5, %v19985_v2  ;;  %v18498_v25 = vsub.f32 %v18386_v48, %v9895_v29  ;;  %v9993_v48 = vand.u32 4294901760, %v9992_v4  ;;  %v8936_v4 = vld [vmem:[%s14182_s26 + $0x8] sm:$0xff] }
 0x6da   : > { %13075 = vmatprep.subr.bf16.mxu0 %v19995_v56  ;;  %v8944_v2 = vld [vmem:[%s14182_s26 + $0x48] sm:$0xff] }
 0x6db   : > { %v10000_v29 = vand.u32 4294901760, %v9999_v6  ;;  %v8939_v6 = vld [vmem:[%s14182_s26 + $0x20] sm:$0xff]  ;;  %v9014_v26 = vand.u32 4294901760, %v8944_v2  ;;  %v8956_v57 = vld [vmem:[%s14182_s26 + $0xa8] sm:$0xff] }
 0x6dc   : > { %12642 = vmatpush1.bf16.msra.mxu1 %v21427_v52  ;;  %v21446_v52 = vld [vmem:[#allocation118_spill] sm:$0xff] }
 0x6dd   : > { %13077 = vmatpush3.bf16.msra.mxu0 %v18377_v13  ;;  %12644 = vmatprep.subr.bf16.mxu1 %v21428_v35  ;;  %v21447_v35 = vld [vmem:[#allocation28_spill] sm:$0xff] }
 0x6de   : > { %v18401_v23 = vpop.f32.mrb[10].mxu0  ;;  %13078 = vmatprep.subr.bf16.mxu0 %v19995_v56 }
 0x6df   : > { %21430 = vst [vmem:[#allocation130_spill] sm:$0xff] %v18401_v23  ;;  %v18412_v53 = vpop.f32.mrb[11].mxu0  ;;  %v8947_v23 = vld [vmem:[%s14182_s26 + $0x60] sm:$0xff] }
 0x6e0   : > { %21432 = vst [vmem:[#allocation140_spill] sm:$0xff] %v18412_v53  ;;  %12646 = vmatpush1.bf16.msra.mxu1 %v21433_v45  ;;  %v13091_v45 = vpack.c.bf16 %v9972_v49, %v9965_v34  ;;  %v19979_v34 = vand.u32 4294901760, %v18498_v25  ;;  %v21451_v49 = vld [vmem:[#allocation45_spill] sm:$0xff] }
 0x6e1   : > { %13080 = vmatpush3.bf16.msra.mxu0 %v18397_v16  ;;  %12648 = vmatprep.subr.bf16.mxu1 %v21435_v43  ;;  %v21448_v43 = vld [vmem:[#allocation125_spill] sm:$0xff]  ;;  %v9018_v16 = vand.u32 4294901760, %v8947_v23 }
 0x6e2   : > { %13081 = vmatprep.subr.bf16.mxu0 %v19995_v56 }
 0x6e4   : > { %12650 = vmatpush1.bf16.msra.mxu1 %v21438_v50  ;;  %v9979_v50 = vand.u32 4294901760, %v9978_v54  ;;  %v10014_v54 = vand.u32 4294901760, %v10013_v36  ;;  %v8935_v36 = vld [vmem:[%s14182_s26] sm:$0xff] }
 0x6e5   : > { %13083 = vmatpush3.bf16.msra.mxu0 %v18428_v59  ;;  %12652 = vmatprep.subr.bf16.mxu1 %v21440_v44  ;;  %v19982_v44 = vand.u32 4294901760, %v18475_v63  ;;  %v18603_v59 = vpack.c.bf16 %v9014_v26, %v9010_v38 }
 0x6e6   : > { %13084 = vmatprep.subr.bf16.mxu0 %v19995_v56  ;;  %v13094_v9 = vpack.c.bf16 %v9986_v28, %v9979_v50  ;;  %v21452_v50 = vld [vmem:[#allocation73_spill] sm:$0xff]  ;;  %v13097_v28 = vpack.c.bf16 %v10000_v29, %v9993_v48  ;;  %v9000_v48 = vand.u32 4294901760, %v8936_v4  ;;  %v9004_v29 = vand.u32 4294901760, %v8939_v6 }
 0x6e7   : > { %v10020_v40 = vsub.f32 %v18475_v63, %v19982_v44  ;;  %v21456_v44 = vld [vmem:[#allocation71_spill] sm:$0xff]  ;;  %21467 = vst [vmem:[#allocation133_spill] sm:$0xff] %v18603_v59 }
 0x6e8   : > { %12654 = vmatpush1.bf16.msra.mxu1 %v21444_v20  ;;  %v19981_v20 = vand.u32 4294901760, %v18478_v60  ;;  %v18560_v37 = vpack.c.bf16 %v9004_v29, %v9000_v48 }
 0x6e9   : > { %13086 = vmatpush3.bf16.msra.mxu0 %v18451_v0  ;;  %12656 = vmatprep.subr.bf16.mxu1 %v21445_v47  ;;  %v10007_v47 = vand.u32 4294901760, %v10006_v1 }
 0x6ea   : > { %13087 = vmatprep.subr.bf16.mxu0 %v19995_v56  ;;  %21457 = vst [vmem:[#allocation99_spill] sm:$0xff] %v18560_v37 }
 0x6ec   : > { %12658 = vmatpush1.bf16.msra.mxu1 %v21446_v52  ;;  %11302 = vmatmul.mubr.f32.vlgmr.msra.gmra.mrb[24].mxu0 %v21447_v35  ;;  %v10027_v52 = vsub.f32 %v18478_v60, %v19981_v20 }
 0x6ed   : > { %13089 = vmatpush3.bf16.msra.mxu0 %v13088_v12  ;;  %12660 = vmatprep.subr.bf16.mxu1 %v21448_v43  ;;  %v19980_v12 = vand.u32 4294901760, %v18495_v17  ;;  %v18528_v43 = vsub.f32 %v18408_v10, %v9901_v51  ;;  %v21453_v10 = vld [vmem:[#allocation63_spill] sm:$0xff]  ;;  %v13100_v51 = vpack.c.bf16 %v10014_v54, %v10007_v47  ;;  %v9002_v54 = vand.u32 4294901760, %v8935_v36 }
 0x6ee   : > { %13090 = vmatprep.subr.bf16.mxu0 %v19995_v56  ;;  %11336 = vmatprep.mubr.msk.f32.mxu0 %vm13776_vm8, %v21413_v41  ;;  %v10028_v1 = vand.u32 4294901760, %v10027_v52 }
 0x6ef   : > { %v19991_v47 = vand.u32 4294901760, %v18528_v43 }
 0x6f0   : > { %12662 = vmatpush1.bf16.msra.mxu1 %v21449_v31  ;;  %v10021_v31 = vand.u32 4294901760, %v10020_v40 }
 0x6f1   : > { %13092 = vmatpush3.bf16.msra.mxu0 %v13091_v45  ;;  %12664 = vmatprep.subr.bf16.mxu1 %v21450_v61  ;;  %v18523_v45 = vsub.f32 %v18405_v7, %v9898_v19  ;;  %v10034_v7 = vsub.f32 %v18495_v17, %v19980_v12  ;;  %v10041_v19 = vsub.f32 %v18498_v25, %v19979_v34  ;;  %v18543_v61 = vld [vmem:[%s14182_s26 + $0x18] sm:$0xff] }
 0x6f2   : > { %13093 = vmatprep.subr.bf16.mxu0 %v19995_v56  ;;  %v9006_v40 = vand.u32 4294901760, %v18543_v61 }
 0x6f3   : > { %v19989_v34 = vand.u32 4294901760, %v18523_v45  ;;  %v10035_v52 = vand.u32 4294901760, %v10034_v7 }
 0x6f4   : > { %12666 = vmatpush1.bf16.msra.mxu1 %v21451_v49  ;;  %v18547_v49 = vld [vmem:[%s14182_s26 + $0x38] sm:$0xff]  ;;  %v18574_v24 = vpack.c.bf16 %v9006_v40, %v9002_v54 }
 0x6f5   : > { %13095 = vmatpush3.bf16.msra.mxu0 %v13094_v9  ;;  %12668 = vmatprep.subr.bf16.mxu1 %v21452_v50  ;;  %v21454_v9 = vld [vmem:[#allocation69_spill] sm:$0xff]  ;;  %v18550_v50 = vld [vmem:[%s14182_s26 + $0x50] sm:$0xff]  ;;  %v9008_v12 = vand.u32 4294901760, %v18547_v49  ;;  %v10048_v7 = vsub.f32 %v18523_v45, %v19989_v34 }
 0x6f6   : > { %13096 = vmatprep.subr.bf16.mxu0 %v19995_v56  ;;  %v9012_v20 = vand.u32 4294901760, %v18550_v50  ;;  %21459 = vst [vmem:[#allocation146_spill] sm:$0xff] %v18574_v24 }
 0x6f7   : > { %v10049_v11 = vand.u32 4294901760, %v10048_v7  ;;  %v18596_v7 = vsub.f32 %v8936_v4, %v9000_v48  ;;  %v18615_v48 = vsub.f32 %v18547_v49, %v9008_v12  ;;  %v8962_v49 = vld [vmem:[%s14182_s26 + $0xd8] sm:$0xff] }
 0x6f8   : > { %12670 = vmatpush1.bf16.msra.mxu1 %v21453_v10  ;;  %v21455_v10 = vld [vmem:[#allocation76_spill] sm:$0xff] }
 0x6f9   : > { %13098 = vmatpush3.bf16.msra.mxu0 %v13097_v28  ;;  %12672 = vmatprep.subr.bf16.mxu1 %v21454_v9  ;;  %v10042_v28 = vand.u32 4294901760, %v10041_v19  ;;  %v13103_v9 = vpack.c.bf16 %v10028_v1, %v10021_v31  ;;  %v10055_v19 = vsub.f32 %v18528_v43, %v19991_v47  ;;  %v8948_v1 = vld [vmem:[%s14182_s26 + $0x68] sm:$0xff]  ;;  %v18579_v47 = vpack.c.bf16 %v9012_v20, %v9008_v12  ;;  %v8959_v12 = vld [vmem:[%s14182_s26 + $0xc0] sm:$0xff] }
 0x6fa   : > { %13099 = vmatprep.subr.bf16.mxu0 %v19995_v56  ;;  %21470 = vst [vmem:[#allocation37_spill] sm:$0xff] %v18615_v48 }
 0x6fb   : > { %v13106_v14 = vpack.c.bf16 %v10042_v28, %v10035_v52  ;;  %21461 = vst [vmem:[#allocation107_spill] sm:$0xff] %v18579_v47  ;;  %v8950_v52 = vld [vmem:[%s14182_s26 + $0x78] sm:$0xff]  ;;  %v21463_v28 = vmov 0.0|0.0  }
 0x6fc   : > { %12674 = vmatpush1.bf16.msra.mxu1 %v21455_v10  ;;  %v8951_v10 = vld [vmem:[%s14182_s26 + $0x80] sm:$0xff]  ;;  %v9022_v13 = vand.u32 4294901760, %v8950_v52 }
 0x6fd   : > { %13101 = vmatpush3.bf16.msra.mxu0 %v13100_v51  ;;  %12676 = vmatprep.subr.bf16.mxu1 %v21456_v44  ;;  %v21458_v51 = vld [vmem:[#allocation86_spill] sm:$0xff]  ;;  %v10056_v44 = vand.u32 4294901760, %v10055_v19  ;;  %v9020_v53 = vand.u32 4294901760, %v8951_v10  ;;  %v18598_v19 = vsub.f32 %v8939_v6, %v9004_v29  ;;  %v18618_v29 = vsub.f32 %v18550_v50, %v9012_v20 }
 0x6fe   : > { %v10929_v31 = vpop.f32.mrb[12].mxu0  ;;  %13102 = vmatprep.subr.bf16.mxu0 %v19995_v56  ;;  %v9016_v56 = vand.u32 4294901760, %v8948_v1  ;;  %v21464_v0 = vsub.s32 2, %v21458_v51  ;;  %v8953_v51 = vld [vmem:[%s14182_s26 + $0x90] sm:$0xff]  ;;  %v18634_v50 = vpack.c.bf16 %v9022_v13, %v9018_v16 }
 0x6ff   : > { %v10930_v22 = vpop.f32.mrb[13].mxu0  ;;  %21465 = vst [vmem:[#allocation67_spill] sm:$0xff] %v18598_v19  ;;  %21471 = vst [vmem:[#allocation56_spill] sm:$0xff] %v18618_v29  ;;  %v18632_v20 = vsub.f32 %v8951_v10, %v9020_v53  ;;  %v8968_v10 = vld [vmem:[%s14182_s26 + $0x108] sm:$0xff] }
 0x700   : > { %v18576_v34 = vadd.f32 %v10930_v22, %v10929_v31  ;;  %12678 = vmatpush1.bf16.msra.mxu1 %v21460_v32  ;;  %v18585_v22 = vld [vmem:[%s14204_s0] sm:$0x7]  ;;  %v8957_v31 = vld [vmem:[%s14182_s26 + $0xb0] sm:$0xff]  ;;  %21474 = vst [vmem:[#allocation113_spill] sm:$0xff] %v18634_v50 }
 0x701   : > { %13104 = vmatpush3.bf16.msra.mxu0 %v13103_v9  ;;  %12872 = vmatprep.subr.bf16.mxu1 %v18560_v37  ;;  %21462 = vst [vmem:[#allocation66_spill] sm:$0xff] %v18585_v22  ;;  %v8954_v32 = vld [vmem:[%s14182_s26 + $0x98] sm:$0xff]  ;;  %v18593_v9 = vrot.slane %v18585_v22, %v21464_v0  ;;  %v18601_v37 = vsub.f32 %v8935_v36, %v9002_v54  ;;  %v9028_v6 = vand.u32 4294901760, %v8957_v31  ;;  %v8963_v54 = vld [vmem:[%s14182_s26 + $0xe0] sm:$0xff] }
 0x702   : > { %13105 = vmatprep.subr.bf16.mxu0 %v21463_v28  ;;  %v18609_v0 = vpack.c.bf16 %v9020_v53, %v9016_v56  ;;  %v9024_v4 = vand.u32 4294901760, %v8954_v32  ;;  %v18612_v36 = vsub.f32 %v18543_v61, %v9006_v40  ;;  %v18627_v22 = vsub.f32 %v8948_v1, %v9016_v56  ;;  %v8969_v56 = vld [vmem:[%s14182_s26 + $0x110] sm:$0xff] }
 0x703   : > { %8067 = vmatmul.mubr.f32.vlgmr.msra.gmra.mrb[6].mxu1 %v21197_v42  ;;  %21466 = vst [vmem:[#allocation111_spill] sm:$0xff] %v18601_v37  ;;  %v13109_v42 = vpack.c.bf16 %v10056_v44, %v10049_v11  ;;  %v8960_v11 = vld [vmem:[%s14182_s26 + $0xc8] sm:$0xff]  ;;  %v18625_v44 = vsub.f32 %v8944_v2, %v9014_v26  ;;  %v9026_v61 = vand.u32 4294901760, %v8953_v51  ;;  %v9030_v40 = vand.u32 4294901760, %v8956_v57  ;;  %v8966_v2 = vld [vmem:[%s14182_s26 + $0xf8] sm:$0xff]  ;;  %v8965_v53 = vld [vmem:[%s14182_s26 + $0xf0] sm:$0xff] }
 0x704   : > { %12874 = vmatpush1.bf16.msra.mxu1 %v18574_v24  ;;  %9096 = vmatprep.mubr.f32.mxu1 %v21413_v41  ;;  %21468 = vst [vmem:[#allocation75_spill] sm:$0xff] %v18609_v0  ;;  %21469 = vst [vmem:[#allocation68_spill] sm:$0xff] %v18612_v36  ;;  %v13112_v26 = vpack.c.bf16 %v18372_v15, %v18370_v39  ;;  %v18645_v1 = vpack.c.bf16 %v9028_v6, %v9024_v4  ;;  %v9034_v24 = vand.u32 4294901760, %v8959_v12  ;;  %v21479_v39 = vld [vmem:[#allocation25_spill] sm:$0xff] }
 0x705   : > { %13107 = vmatpush3.bf16.msra.mxu0 %v13106_v14  ;;  %12876 = vmatprep.subr.bf16.mxu1 %v18579_v47  ;;  %v18621_v14 = vsub.f32 %v8941_v21, %v9010_v38  ;;  %21473 = vst [vmem:[#allocation114_spill] sm:$0xff] %v18625_v44  ;;  %v18636_v38 = vsub.f32 %v8947_v23, %v9018_v16  ;;  %v9032_v47 = vand.u32 4294901760, %v8960_v11  ;;  %v9038_v15 = vand.u32 4294901760, %v8962_v49 }
 0x706   : > { %13108 = vmatprep.subr.bf16.mxu0 %v21463_v28  ;;  %v18643_v21 = vsub.f32 %v8950_v52, %v9022_v13  ;;  %21477 = vst [vmem:[#allocation117_spill] sm:$0xff] %v18645_v1  ;;  %v18650_v16 = vsub.f32 %v8954_v32, %v9024_v4  ;;  %v18652_v23 = vsub.f32 %v8957_v31, %v9028_v6  ;;  %v9040_v52 = vand.u32 4294901760, %v8966_v2 }
 0x707   : > { %21472 = vst [vmem:[#allocation150_spill] sm:$0xff] %v18621_v14  ;;  %21475 = vst [vmem:[#allocation151_spill] sm:$0xff] %v18636_v38  ;;  %v13115_v13 = vpack.c.bf16 %v18390_v58, %v18388_v3  ;;  %v18660_v27 = vsub.f32 %v8953_v51, %v9026_v61  ;;  %v18662_v32 = vsub.f32 %v8956_v57, %v9030_v40  ;;  %v9042_v31 = vand.u32 4294901760, %v8965_v53 }
 0x708   : > { %12878 = vmatpush1.bf16.msra.mxu1 %v18603_v59  ;;  %21476 = vst [vmem:[#allocation116_spill] sm:$0xff] %v18643_v21  ;;  %v9036_v59 = vand.u32 4294901760, %v8963_v54  ;;  %v9046_v4 = vand.u32 4294901760, %v8968_v10  ;;  %v18667_v58 = vsub.f32 %v8960_v11, %v9032_v47  ;;  %v18674_v51 = vpack.c.bf16 %v9038_v15, %v9034_v24 }
 0x709   : > { %13110 = vmatpush3.bf16.msra.mxu0 %v13109_v42  ;;  %12880 = vmatprep.subr.bf16.mxu1 %v18609_v0  ;;  %v18654_v42 = vpack.c.bf16 %v9030_v40, %v9026_v61  ;;  %v9044_v0 = vand.u32 4294901760, %v8969_v56  ;;  %v18676_v57 = vsub.f32 %v8959_v12, %v9034_v24  ;;  %v13118_v61 = vpack.c.bf16 %v18424_v30, %v18410_v55  ;;  %v18691_v40 = vld [vmem:[%s14182_s26 + $0x120] sm:$0xff]  ;;  %v18694_v24 = vld [vmem:[%s14182_s26 + $0x138] sm:$0xff] }
 0x70a   : > { %13111 = vmatprep.subr.bf16.mxu0 %v21463_v28  ;;  %v18665_v6 = vpack.c.bf16 %v9036_v59, %v9032_v47  ;;  %v18669_v3 = vsub.f32 %v8963_v54, %v9036_v59  ;;  %21481 = vst [vmem:[#allocation60_spill] sm:$0xff] %v18674_v51  ;;  %v18682_v47 = vsub.f32 %v8962_v49, %v9038_v15  ;;  %v9052_v15 = vand.u32 4294901760, %v8975_v8 }
 0x70b   : > { %21478 = vst [vmem:[#allocation59_spill] sm:$0xff] %v18654_v42  ;;  %v18684_v59 = vpack.c.bf16 %v9044_v0, %v9040_v52  ;;  %v18686_v11 = vsub.f32 %v8966_v2, %v9040_v52  ;;  %v18688_v54 = vsub.f32 %v8969_v56, %v9044_v0  ;;  %v18697_v12 = vpack.c.bf16 %v9046_v4, %v9042_v31  ;;  %v18705_v0 = vld [vmem:[%s14182_s26 + $0x158] sm:$0xff]  ;;  %v18708_v2 = vld [vmem:[%s14182_s26 + $0x170] sm:$0xff] }
 0x70c   : > { %12882 = vmatpush1.bf16.msra.mxu1 %v18634_v50  ;;  %11337 = vmatmul.mubr.f32.vlgmr.msra.gmra.mrb[24].mxu0 %v21479_v39  ;;  %21480 = vst [vmem:[#allocation121_spill] sm:$0xff] %v18665_v6  ;;  %v8972_v50 = vld [vmem:[%s14182_s26 + $0x128] sm:$0xff]  ;;  %21482 = vst [vmem:[#allocation124_spill] sm:$0xff] %v18682_v47  ;;  %v18702_v49 = vsub.f32 %v8965_v53, %v9042_v31  ;;  %v21485_v52 = vand.u32 4294901760, %v18596_v7  ;;  %v21486_v56 = vand.u32 4294901760, %v18598_v19  ;;  %v21488_v31 = vand.u32 4294901760, %v18612_v36 }
 0x70d   : > { %13113 = vmatpush3.bf16.msra.mxu0 %v13112_v26  ;;  %12884 = vmatprep.subr.bf16.mxu1 %v18645_v1  ;;  %21483 = vst [vmem:[#allocation127_spill] sm:$0xff] %v18684_v59  ;;  %21484 = vst [vmem:[#allocation122_spill] sm:$0xff] %v18697_v12  ;;  %v13121_v26 = vpack.c.bf16 %v18443_v5, %v18433_v33  ;;  %v9048_v1 = vand.u32 4294901760, %v8972_v50  ;;  %v9050_v5 = vand.u32 4294901760, %v18691_v40 }
 0x70e   : > { %13114 = vmatprep.subr.bf16.mxu0 %v21463_v28  ;;  %11371 = vmatprep.mubr.msk.f32.mxu0 %vm13776_vm8, %v21413_v41 }
 0x70f   : > { %v18724_v33 = vpack.c.bf16 %v9052_v15, %v9048_v1  ;;  %v18726_v30 = vsub.f32 %v8972_v50, %v9048_v1  ;;  %v9123_v50 = vsub.f32 %v18598_v19, %v21486_v56  ;;  %v21487_v1 = vand.u32 4294901760, %v18601_v37 }
 0x710   : > { %12886 = vmatpush1.bf16.msra.mxu1 %v18654_v42  ;;  %v9111_v42 = vsub.f32 %v18596_v7, %v21485_v52  ;;  %v21489_v52 = vand.u32 4294901760, %v18615_v48  ;;  %v21490_v56 = vand.u32 4294901760, %v18618_v29 }
 0x711   : > { %13116 = vmatpush3.bf16.msra.mxu0 %v13115_v13  ;;  %12888 = vmatprep.subr.bf16.mxu1 %v18665_v6  ;;  %v9054_v13 = vand.u32 4294901760, %v18694_v24  ;;  %v18718_v6 = vsub.f32 %v8968_v10, %v9046_v4  ;;  %v18732_v10 = vld [vmem:[%s14182_s26 + $0x150] sm:$0xff]  ;;  %v18735_v4 = vld [vmem:[%s14182_s26 + $0x168] sm:$0xff]  ;;  %v9117_v55 = vsub.f32 %v18601_v37, %v21487_v1  ;;  %v21491_v1 = vand.u32 4294901760, %v18621_v14 }
 0x712   : > { %13117 = vmatprep.subr.bf16.mxu0 %v21463_v28  ;;  %v9147_v39 = vsub.f32 %v18618_v29, %v21490_v56  ;;  %v9124_v19 = vand.u32 4294901760, %v9123_v50 }
 0x713   : > { %v18749_v53 = vpack.c.bf16 %v9054_v13, %v9050_v5  ;;  %v9141_v37 = vsub.f32 %v18621_v14, %v21491_v1  ;;  %v20063_v14 = vand.u32 4294901760, %v18636_v38 }
 0x714   : > { %12890 = vmatpush1.bf16.msra.mxu1 %v18674_v51  ;;  %v9135_v51 = vsub.f32 %v18615_v48, %v21489_v52  ;;  %v21493_v52 = vand.u32 4294901760, %v18705_v0  ;;  %v21494_v48 = vand.u32 4294901760, %v18708_v2 }
 0x715   : > { %13119 = vmatpush3.bf16.msra.mxu0 %v13118_v61  ;;  %12892 = vmatprep.subr.bf16.mxu1 %v18684_v59  ;;  %v18747_v61 = vsub.f32 %v8975_v8, %v9052_v15  ;;  %v9129_v59 = vsub.f32 %v18612_v36, %v21488_v31  ;;  %v21492_v8 = vand.u32 4294901760, %v18625_v44  ;;  %v13124_v31 = vpack.c.bf16 %v18460_v46, %v18457_v18 }
 0x716   : > { %13120 = vmatprep.subr.bf16.mxu0 %v21463_v28  ;;  %v18774_v56 = vpack.c.bf16 %v21494_v48, %v21493_v52  ;;  %v9136_v18 = vand.u32 4294901760, %v9135_v51  ;;  %v20067_v48 = vand.u32 4294901760, %v18643_v21  ;;  %v9148_v52 = vand.u32 4294901760, %v9147_v39 }
 0x717   : > { %v9153_v15 = vsub.f32 %v18625_v44, %v21492_v8  ;;  %v9112_v8 = vand.u32 4294901760, %v9111_v42  ;;  %v9118_v44 = vand.u32 4294901760, %v9117_v55  ;;  %v9130_v46 = vand.u32 4294901760, %v9129_v59 }
 0x718   : > { %12894 = vmatpush1.bf16.msra.mxu1 %v18697_v12  ;;  %21495 = vst [vmem:[#allocation39_spill] sm:$0xff] %v18774_v56  ;;  %v20062_v12 = vand.u32 4294901760, %v18632_v20  ;;  %v9142_v29 = vand.u32 4294901760, %v9141_v37  ;;  %v18788_v55 = vsub.f32 %v18691_v40, %v9050_v5  ;;  %v18791_v42 = vsub.f32 %v18694_v24, %v9054_v13 }
 0x719   : > { %13122 = vmatpush3.bf16.msra.mxu0 %v13121_v26  ;;  %12896 = vmatprep.subr.bf16.mxu1 %v18724_v33  ;;  %v9154_v36 = vand.u32 4294901760, %v9153_v15  ;;  %v21496_v26 = vand.u32 4294901760, %v18627_v22  ;;  %v21497_v51 = vand.u32 4294901760, %v18732_v10  ;;  %v21498_v59 = vand.u32 4294901760, %v18735_v4 }
 0x71a   : > { %13123 = vmatprep.subr.bf16.mxu0 %v21463_v28  ;;  %v20066_v39 = vand.u32 4294901760, %v18650_v16  ;;  %v13127_v37 = vpack.c.bf16 %v18478_v60, %v18475_v63  ;;  %v12903_v15 = vpack.c.bf16 %v9124_v19, %v9112_v8  ;;  %v9171_v5 = vsub.f32 %v18632_v20, %v20062_v12 }
 0x71b   : > { %v9159_v1 = vsub.f32 %v18627_v22, %v21496_v26  ;;  %v18797_v50 = vpack.c.bf16 %v21498_v59, %v21497_v51  ;;  %v12905_v24 = vpack.c.bf16 %v9130_v46, %v9118_v44  ;;  %v13130_v13 = vpack.c.bf16 %v18498_v25, %v18495_v17 }
 0x71c   : > { %12898 = vmatpush1.bf16.msra.mxu1 %v18749_v53  ;;  %v9177_v19 = vsub.f32 %v18643_v21, %v20067_v48  ;;  %v12907_v26 = vpack.c.bf16 %v9148_v52, %v9136_v18  ;;  %v12909_v51 = vpack.c.bf16 %v9154_v36, %v9142_v29  ;;  %v20072_v12 = vand.u32 4294901760, %v18660_v27 }
 0x71d   : > { %13125 = vmatpush3.bf16.msra.mxu0 %v13124_v31  ;;  %12900 = vmatprep.subr.bf16.mxu1 %v18774_v56  ;;  %v9165_v31 = vsub.f32 %v18636_v38, %v20063_v14  ;;  %v9160_v59 = vand.u32 4294901760, %v9159_v1  ;;  %v9183_v46 = vsub.f32 %v18650_v16, %v20066_v39  ;;  %v8182_v18 = vadd.f32 %v18576_v34, %v18593_v9 }
 0x71e   : > { %13126 = vmatprep.subr.bf16.mxu0 %v21463_v28  ;;  %v9172_v29 = vand.u32 4294901760, %v9171_v5  ;;  %v21499_v1 = vand.u32 4294901760, %v18652_v23  ;;  %v9178_v48 = vand.u32 4294901760, %v9177_v19  ;;  %v20070_v44 = vand.u32 4294901760, %v18676_v57 }
 0x71f   : > { %v10964_v8 = vpop.f32.mrb[14].mxu0  ;;  %v9166_v39 = vand.u32 4294901760, %v9165_v31  ;;  %v20068_v14 = vand.u32 4294901760, %v18682_v47  ;;  %v9189_v34 = vsub.f32 %v18660_v27, %v20072_v12  ;;  %v20069_v9 = vand.u32 4294901760, %v18686_v11 }
 0x720   : > { %v10965_v40 = vpop.f32.mrb[15].mxu0  ;;  %12902 = vmatpush1.bf16.msra.mxu1 %v18797_v50  ;;  %v9195_v52 = vsub.f32 %v18652_v23, %v21499_v1  ;;  %v21502_v19 = vand.u32 4294901760, %v18669_v3  ;;  %v21503_v1 = vand.u32 4294901760, %v18705_v0  ;;  %v21505_v12 = vand.u32 4294901760, %v18732_v10 }
 0x721   : > { %v10966_v36 = vadd.f32 %v10965_v40, %v10964_v8  ;;  %13128 = vmatpush3.bf16.msra.mxu0 %v13127_v37  ;;  %12904 = vmatprep.subr.bf16.mxu1 %v12903_v15  ;;  %v20071_v37 = vand.u32 4294901760, %v18688_v54  ;;  %v21500_v15 = vand.u32 4294901760, %v18662_v32  ;;  %v21501_v40 = vand.u32 4294901760, %v18667_v58 }
 0x722   : > { %13129 = vmatprep.subr.bf16.mxu0 %v21463_v28  ;;  %v13133_v8 = vpack.c.bf16 %v18528_v43, %v18523_v45 }
 0x723   : > { %v18832_v56 = vadd.f32 %v10966_v36, %v8182_v18  ;;  %9102 = vmatmul.mubr.f32.vlgmr.msra.gmra.mrb[6].mxu1 %v21447_v35  ;;  %v9201_v5 = vsub.f32 %v18662_v32, %v21500_v15  ;;  %v9207_v31 = vsub.f32 %v18667_v58, %v21501_v40  ;;  %v9219_v35 = vsub.f32 %v18669_v3, %v21502_v19 }
 0x724   : > { %12906 = vmatpush1.bf16.msra.mxu1 %v12905_v24  ;;  %9332 = vmatprep.mubr.f32.mxu1 %v21413_v41  ;;  %v12911_v24 = vpack.c.bf16 %v9172_v29, %v9160_v59  ;;  %v9184_v18 = vand.u32 4294901760, %v9183_v46  ;;  %v9196_v36 = vand.u32 4294901760, %v9195_v52  ;;  %v18855_v15 = vsub.f32 %v18705_v0, %v21503_v1 }
 0x725   : > { %13131 = vmatpush3.bf16.msra.mxu0 %v13130_v13  ;;  %12908 = vmatprep.subr.bf16.mxu1 %v12907_v26  ;;  %v12913_v40 = vpack.c.bf16 %v9178_v48, %v9166_v39  ;;  %v9213_v19 = vsub.f32 %v18676_v57, %v20070_v44  ;;  %v9225_v13 = vsub.f32 %v18682_v47, %v20068_v14  ;;  %v20082_v59 = vand.u32 4294901760, %v18702_v49 }
 0x726   : > { %13132 = vmatprep.subr.bf16.mxu0 %v21463_v28  ;;  %v9231_v26 = vsub.f32 %v18686_v11, %v20069_v9  ;;  %v9243_v0 = vsub.f32 %v18688_v54, %v20071_v37  ;;  %v20081_v48 = vand.u32 4294901760, %v18718_v6  ;;  %v9190_v39 = vand.u32 4294901760, %v9189_v34 }
 0x727   : > { %v9202_v46 = vand.u32 4294901760, %v9201_v5  ;;  %v9208_v29 = vand.u32 4294901760, %v9207_v31  ;;  %v9220_v52 = vand.u32 4294901760, %v9219_v35  ;;  %v21504_v1 = vand.u32 4294901760, %v18708_v2 }
 0x728   : > { %12910 = vmatpush1.bf16.msra.mxu1 %v12909_v51  ;;  %v12915_v9 = vpack.c.bf16 %v9196_v36, %v9184_v18  ;;  %v20074_v44 = vand.u32 4294901760, %v18726_v30  ;;  %v20073_v37 = vand.u32 4294901760, %v18747_v61  ;;  %v18882_v51 = vsub.f32 %v18732_v10, %v21505_v12  ;;  %v21507_v10 = vld [vmem:[#allocation26_spill] sm:$0xff] }
 0x729   : > { %v18875_v14 = vsub.f32 %v18708_v2, %v21504_v1  ;;  %13134 = vmatpush3.bf16.msra.mxu0 %v13133_v8  ;;  %12912 = vmatprep.subr.bf16.mxu1 %v12911_v24  ;;  %v21506_v34 = vand.u32 4294901760, %v18735_v4  ;;  %v9214_v2 = vand.u32 4294901760, %v9213_v19  ;;  %v9226_v31 = vand.u32 4294901760, %v9225_v13 }
 0x72a   : > { %13135 = vmatprep.subr.bf16.mxu0 %v21463_v28  ;;  %v9232_v35 = vand.u32 4294901760, %v9231_v26  ;;  %v9244_v8 = vand.u32 4294901760, %v9243_v0  ;;  %v9237_v24 = vsub.f32 %v18702_v49, %v20082_v59  ;;  %v9249_v12 = vsub.f32 %v18718_v6, %v20081_v48  ;;  %v21527_v59 = vld [vmem:[#allocation27_spill] sm:$0xff] }
 0x72b   : > { %v18887_v5 = vsub.f32 %v18735_v4, %v21506_v34  ;;  %v12917_v18 = vpack.c.bf16 %v9202_v46, %v9190_v39  ;;  %v12919_v4 = vpack.c.bf16 %v9220_v52, %v9208_v29  ;;  %v20080_v36 = vand.u32 4294901760, %v18788_v55 }
 0x72c   : > { %12914 = vmatpush1.bf16.msra.mxu1 %v12913_v40  ;;  %11372 = vmatmul.mubr.f32.vlgmr.msra.gmra.mrb[24].mxu0 %v21507_v10  ;;  %v20076_v19 = vand.u32 4294901760, %v18791_v42  ;;  %v9255_v13 = vsub.f32 %v18726_v30, %v20074_v44  ;;  %v9267_v26 = vsub.f32 %v18747_v61, %v20073_v37  ;;  %v20075_v40 = vand.u32 4294901760, %v18855_v15  ;;  %v21508_v44 = vld [vmem:[#allocation52_spill] sm:$0xff] }
 0x72d   : > { %13137 = vmatpush3.bf16.msra.mxu0 %v18322_v62  ;;  %12916 = vmatprep.subr.bf16.mxu1 %v12915_v9  ;;  %v20077_v0 = vand.u32 4294901760, %v18875_v14  ;;  %v12921_v39 = vpack.c.bf16 %v9226_v31, %v9214_v2  ;;  %v12923_v46 = vpack.c.bf16 %v9244_v8, %v9232_v35  ;;  %v9238_v9 = vand.u32 4294901760, %v9237_v24 }
 0x72e   : > { %13138 = vmatprep.subr.bf16.mxu0 %v21463_v28  ;;  %11406 = vmatprep.mubr.msk.f32.mxu0 %vm13776_vm8, %v21413_v41  ;;  %v9250_v29 = vand.u32 4294901760, %v9249_v12  ;;  %v9261_v52 = vsub.f32 %v18788_v55, %v20080_v36  ;;  %v9273_v1 = vsub.f32 %v18791_v42, %v20076_v19  ;;  %v20079_v34 = vand.u32 4294901760, %v18882_v51 }
 0x72f   : > { %v20078_v37 = vand.u32 4294901760, %v18887_v5  ;;  %v9256_v2 = vand.u32 4294901760, %v9255_v13  ;;  %v9268_v31 = vand.u32 4294901760, %v9267_v26  ;;  %v9279_v35 = vsub.f32 %v18855_v15, %v20075_v40  ;;  %v21509_v26 = vld [vmem:[#allocation40_spill] sm:$0xff] }
 0x730   : > { %12918 = vmatpush1.bf16.msra.mxu1 %v12917_v18  ;;  %v9291_v8 = vsub.f32 %v18875_v14, %v20077_v0  ;;  %v12925_v24 = vpack.c.bf16 %v9250_v29, %v9238_v9  ;;  %v9262_v12 = vand.u32 4294901760, %v9261_v52  ;;  %v9274_v18 = vand.u32 4294901760, %v9273_v1  ;;  %v21510_v52 = vld [vmem:[#allocation31_spill] sm:$0xff] }
 0x731   : > { %13140 = vmatpush3.bf16.msra.mxu0 %v21508_v44  ;;  %12920 = vmatprep.subr.bf16.mxu1 %v12919_v4  ;;  %v9285_v4 = vsub.f32 %v18882_v51, %v20079_v34  ;;  %v9297_v13 = vsub.f32 %v18887_v5, %v20078_v37  ;;  %v12927_v40 = vpack.c.bf16 %v9268_v31, %v9256_v2  ;;  %v9280_v19 = vand.u32 4294901760, %v9279_v35  ;;  %v21511_v34 = vld [vmem:[#allocation134_spill] sm:$0xff] }
 0x732   : > { %13141 = vmatprep.subr.bf16.mxu0 %v21463_v28  ;;  %v9292_v0 = vand.u32 4294901760, %v9291_v8  ;;  %v21513_v8 = vld [vmem:[#allocation111_spill] sm:$0xff] }
 0x733   : > { %v9286_v9 = vand.u32 4294901760, %v9285_v4  ;;  %v9298_v29 = vand.u32 4294901760, %v9297_v13 }
 0x734   : > { %12922 = vmatpush1.bf16.msra.mxu1 %v12921_v39  ;;  %v12929_v39 = vpack.c.bf16 %v9274_v18, %v9262_v12  ;;  %v12931_v1 = vpack.c.bf16 %v9292_v0, %v9280_v19  ;;  %v21515_v19 = vld [vmem:[#allocation72_spill] sm:$0xff]  ;;  %v21516_v0 = vld [vmem:[#allocation37_spill] sm:$0xff] }
 0x735   : > { %13143 = vmatpush3.bf16.msra.mxu0 %v21509_v26  ;;  %12924 = vmatprep.subr.bf16.mxu1 %v12923_v46  ;;  %v12933_v37 = vpack.c.bf16 %v9298_v29, %v9286_v9  ;;  %v21512_v46 = vld [vmem:[#allocation67_spill] sm:$0xff]  ;;  %v21517_v18 = vld [vmem:[#allocation56_spill] sm:$0xff]  ;;  %v21519_v9 = vld [vmem:[#allocation150_spill] sm:$0xff] }
 0x736   : > { %13144 = vmatprep.subr.bf16.mxu0 %v21463_v28  ;;  %v12935_v2 = vpack.c.bf16 %v21512_v46, %v18596_v7  ;;  %v12939_v4 = vpack.c.bf16 %v21517_v18, %v21516_v0  ;;  %v21520_v29 = vld [vmem:[#allocation114_spill] sm:$0xff] }
 0x738   : > { %12926 = vmatpush1.bf16.msra.mxu1 %v12925_v24  ;;  %v21514_v24 = vld [vmem:[#allocation68_spill] sm:$0xff] }
 0x739   : > { %13146 = vmatpush3.bf16.msra.mxu0 %v21510_v52  ;;  %12928 = vmatprep.subr.bf16.mxu1 %v12927_v40  ;;  %v12937_v12 = vpack.c.bf16 %v21514_v24, %v21513_v8 }
 0x73a   : > { %13147 = vmatprep.subr.bf16.mxu0 %v21463_v28 }
 0x73c   : > { %12930 = vmatpush1.bf16.msra.mxu1 %v12929_v39  ;;  %v21518_v39 = vld [vmem:[#allocation25_spill] sm:$0xff] }
 0x73d   : > { %13149 = vmatpush3.bf16.msra.mxu0 %v21511_v34  ;;  %12932 = vmatprep.subr.bf16.mxu1 %v12931_v1  ;;  %v21521_v1 = vld [vmem:[#allocation135_spill] sm:$0xff] }
 0x73e   : > { %13150 = vmatprep.subr.bf16.mxu0 %v21463_v28 }
 0x73f   : > { %v10999_v31 = vpop.f32.mrb[16].mxu0 }
 0x740   : > { %v11000_v35 = vpop.f32.mrb[17].mxu0  ;;  %12934 = vmatpush1.bf16.msra.mxu1 %v12933_v37  ;;  %v12941_v37 = vpack.c.bf16 %v21520_v29, %v21519_v9 }
 0x741   : > { %v11001_v40 = vadd.f32 %v11000_v35, %v10999_v31  ;;  %13152 = vmatpush3.bf16.msra.mxu0 %v21515_v19  ;;  %12936 = vmatprep.subr.bf16.mxu1 %v12935_v2  ;;  %v12943_v2 = vpack.c.bf16 %v18632_v20, %v18627_v22  ;;  %v21522_v31 = vld [vmem:[#allocation139_spill] sm:$0xff]  ;;  %v21523_v35 = vld [vmem:[#allocation102_spill] sm:$0xff] }
 0x742   : > { %13153 = vmatprep.subr.bf16.mxu0 %v21463_v28 }
 0x743   : > { %v8552_v13 = vadd.f32 %v11001_v40, %v18832_v56  ;;  %9334 = vmatmul.mubr.f32.vlgmr.msra.gmra.mrb[6].mxu1 %v21518_v39  ;;  %v12945_v56 = vpack.c.bf16 %v18643_v21, %v18636_v38  ;;  %v21525_v40 = vld [vmem:[#allocation131_spill] sm:$0xff]  ;;  %v21530_v21 = vld [vmem:[#allocation129_spill] sm:$0xff] }
 0x744   : > { %12938 = vmatpush1.bf16.msra.mxu1 %v12937_v12  ;;  %9468 = vmatprep.mubr.f32.mxu1 %v21413_v41  ;;  %v21524_v12 = vand.u32 4294901760, %v21523_v35  ;;  %v21526_v36 = vand.u32 4294901760, %v21525_v40  ;;  %v21531_v35 = vand.u32 4294901760, %v21530_v21 }
 0x745   : > { %13155 = vmatpush3.bf16.msra.mxu0 %v21521_v1  ;;  %12940 = vmatprep.subr.bf16.mxu1 %v12939_v4  ;;  %v12947_v4 = vpack.c.bf16 %v18652_v23, %v18650_v16 }
 0x746   : > { %13156 = vmatprep.subr.bf16.mxu0 %v21463_v28  ;;  %v13160_v48 = vpack.c.bf16 %v21526_v36, %v21524_v12  ;;  %v12951_v36 = vpack.c.bf16 %v18669_v3, %v18667_v58 }
 0x748   : > { %12942 = vmatpush1.bf16.msra.mxu1 %v12941_v37  ;;  %v12949_v37 = vpack.c.bf16 %v18662_v32, %v18660_v27 }
 0x749   : > { %13158 = vmatpush3.bf16.msra.mxu0 %v21522_v31  ;;  %12944 = vmatprep.subr.bf16.mxu1 %v12943_v2  ;;  %v21528_v31 = vld [vmem:[#allocation136_spill] sm:$0xff] }
 0x74a   : > { %13159 = vmatprep.subr.bf16.mxu0 %v21463_v28  ;;  %v21529_v2 = vand.u32 4294901760, %v21528_v31  ;;  %v21534_v31 = vld [vmem:[#allocation80_spill] sm:$0xff] }
 0x74b   : > { %v21535_v40 = vand.u32 4294901760, %v21534_v31 }
 0x74c   : > { %12946 = vmatpush1.bf16.msra.mxu1 %v12945_v56  ;;  %11407 = vmatmul.mubr.f32.vlgmr.msra.gmra.mrb[24].mxu0 %v21527_v59  ;;  %v13163_v38 = vpack.c.bf16 %v21531_v35, %v21529_v2  ;;  %v12953_v56 = vpack.c.bf16 %v18682_v47, %v18676_v57  ;;  %v12957_v2 = vpack.c.bf16 %v18718_v6, %v18702_v49 }
 0x74d   : > { %13161 = vmatpush3.bf16.msra.mxu0 %v13160_v48  ;;  %12948 = vmatprep.subr.bf16.mxu1 %v12947_v4  ;;  %v21532_v48 = vld [vmem:[#allocation132_spill] sm:$0xff]  ;;  %v12955_v4 = vpack.c.bf16 %v18688_v54, %v18686_v11 }
 0x74e   : > { %13162 = vmatprep.subr.bf16.mxu0 %v21463_v28  ;;  %11441 = vmatprep.mubr.msk.f32.mxu0 %vm13776_vm8, %v21413_v41  ;;  %v21533_v12 = vand.u32 4294901760, %v21532_v48  ;;  %v12959_v48 = vpack.c.bf16 %v18747_v61, %v18726_v30 }
 0x750   : > { %12950 = vmatpush1.bf16.msra.mxu1 %v12949_v37  ;;  %v13166_v21 = vpack.c.bf16 %v21535_v40, %v21533_v12  ;;  %v21536_v37 = vld [vmem:[#allocation137_spill] sm:$0xff]  ;;  %v12961_v12 = vpack.c.bf16 %v18791_v42, %v18788_v55 }
 0x751   : > { %13164 = vmatpush3.bf16.msra.mxu0 %v13163_v38  ;;  %12952 = vmatprep.subr.bf16.mxu1 %v12951_v36  ;;  %v21537_v35 = vand.u32 4294901760, %v21536_v37  ;;  %v21538_v38 = vld [vmem:[#allocation138_spill] sm:$0xff]  ;;  %v21542_v40 = vld [vmem:[#allocation93_spill] sm:$0xff]  ;;  %v12963_v37 = vpack.c.bf16 %v18875_v14, %v18855_v15 }
 0x752   : > { %13165 = vmatprep.subr.bf16.mxu0 %v21463_v28  ;;  %v21539_v36 = vand.u32 4294901760, %v21538_v38 }
 0x754   : > { %12954 = vmatpush1.bf16.msra.mxu1 %v12953_v56  ;;  %v13169_v47 = vpack.c.bf16 %v21539_v36, %v21537_v35  ;;  %v21540_v56 = vld [vmem:[#allocation141_spill] sm:$0xff]  ;;  %v12965_v35 = vpack.c.bf16 %v18887_v5, %v18882_v51 }
 0x755   : > { %13167 = vmatpush3.bf16.msra.mxu0 %v13166_v21  ;;  %12956 = vmatprep.subr.bf16.mxu1 %v12955_v4  ;;  %v21541_v31 = vand.u32 4294901760, %v21540_v56  ;;  %v21543_v21 = vand.u32 4294901760, %v21542_v40  ;;  %v21548_v40 = vand.u32 4294901760, %v18498_v25  ;;  %v21553_v25 = vld [vmem:[#allocation133_spill] sm:$0xff] }
 0x756   : > { %13168 = vmatprep.subr.bf16.mxu0 %v21463_v28 }
 0x757   : > { %v13172_v4 = vpack.c.bf16 %v21543_v21, %v21541_v31  ;;  %v21546_v31 = vld [vmem:[#allocation99_spill] sm:$0xff] }
 0x758   : > { %12958 = vmatpush1.bf16.msra.mxu1 %v12957_v2  ;;  %v21544_v2 = vand.u32 4294901760, %v18475_v63 }
 0x759   : > { %13170 = vmatpush3.bf16.msra.mxu0 %v13169_v47  ;;  %12960 = vmatprep.subr.bf16.mxu1 %v12959_v48  ;;  %v21545_v47 = vand.u32 4294901760, %v18478_v60  ;;  %v21549_v60 = vld [vmem:[#allocation146_spill] sm:$0xff] }
 0x75a   : > { %13171 = vmatprep.subr.bf16.mxu0 %v21463_v28 }
 0x75b   : > { %v13175_v38 = vpack.c.bf16 %v21545_v47, %v21544_v2  ;;  %v21556_v2 = vld [vmem:[#allocation117_spill] sm:$0xff]  ;;  %v21559_v47 = vld [vmem:[#allocation60_spill] sm:$0xff] }
 0x75c   : > { %12962 = vmatpush1.bf16.msra.mxu1 %v12961_v12  ;;  %v21547_v12 = vand.u32 4294901760, %v18495_v17 }
 0x75d   : > { %13173 = vmatpush3.bf16.msra.mxu0 %v13172_v4  ;;  %12964 = vmatprep.subr.bf16.mxu1 %v12963_v37  ;;  %v21550_v4 = vld [vmem:[#allocation107_spill] sm:$0xff]  ;;  %v21551_v37 = vand.u32 4294901760, %v18523_v45 }
 0x75e   : > { %13174 = vmatprep.subr.bf16.mxu0 %v21463_v28  ;;  %v13178_v21 = vpack.c.bf16 %v21548_v40, %v21547_v12  ;;  %v21557_v45 = vld [vmem:[#allocation59_spill] sm:$0xff]  ;;  %v21566_v40 = vand.u32 4294901760, %v21514_v24  ;;  %v21570_v24 = vand.u32 4294901760, %v21520_v29 }
 0x75f   : > { %v11034_v36 = vpop.f32.mrb[18].mxu0  ;;  %v21577_v29 = vld [vmem:[#allocation139_spill] sm:$0xff] }
 0x760   : > { %v11035_v48 = vpop.f32.mrb[19].mxu0  ;;  %12966 = vmatpush1.bf16.msra.mxu1 %v12965_v35  ;;  %v21552_v35 = vand.u32 4294901760, %v18528_v43  ;;  %v21558_v43 = vld [vmem:[#allocation121_spill] sm:$0xff] }
 0x761   : > { %v11036_v56 = vadd.f32 %v11035_v48, %v11034_v36  ;;  %13176 = vmatpush3.bf16.msra.mxu0 %v13175_v38  ;;  %12968 = vmatprep.subr.bf16.mxu1 %v21546_v31  ;;  %v21561_v38 = vld [vmem:[#allocation122_spill] sm:$0xff]  ;;  %v21564_v36 = vand.u32 4294901760, %v21512_v46 }
 0x762   : > { %13177 = vmatprep.subr.bf16.mxu0 %v21463_v28  ;;  %v13181_v17 = vpack.c.bf16 %v21552_v35, %v21551_v37 }
 0x763   : > { %v8660_v63 = vadd.f32 %v11036_v56, %v8552_v13  ;;  %9471 = vmatmul.mubr.f32.vlgmr.msra.gmra.mrb[6].mxu1 %v21507_v10  ;;  %v21554_v13 = vld [vmem:[#allocation75_spill] sm:$0xff]  ;;  %v21555_v10 = vld [vmem:[#allocation113_spill] sm:$0xff] }
 0x764   : > { %12970 = vmatpush1.bf16.msra.mxu1 %v21549_v60  ;;  %9573 = vmatprep.mubr.f32.mxu1 %v21413_v41 }
 0x765   : > { %13179 = vmatpush3.bf16.msra.mxu0 %v13178_v21  ;;  %12972 = vmatprep.subr.bf16.mxu1 %v21550_v4 }
 0x766   : > { %13180 = vmatprep.subr.bf16.mxu0 %v21463_v28 }
 0x768   : > { %12974 = vmatpush1.bf16.msra.mxu1 %v21553_v25 }
 0x769   : > { %13182 = vmatpush3.bf16.msra.mxu0 %v13181_v17  ;;  %12976 = vmatprep.subr.bf16.mxu1 %v21554_v13 }
 0x76a   : > { %13183 = vmatprep.subr.bf16.mxu0 %v21463_v28 }
 0x76c   : > { %12978 = vmatpush1.bf16.msra.mxu1 %v21555_v10  ;;  %11442 = vmatmul.mubr.f32.vlgmr.msra.gmra.mrb[24].mxu0 %v21518_v39 }
 0x76d   : > { %13185 = vmatpush3.bf16.msra.mxu0 %v18322_v62  ;;  %12980 = vmatprep.subr.bf16.mxu1 %v21556_v2  ;;  %v21560_v62 = vld [vmem:[#allocation127_spill] sm:$0xff] }
 0x76e   : > { %13186 = vmatprep.subr.bf16.mxu0 %v21463_v28  ;;  %11476 = vmatprep.mubr.msk.f32.mxu0 %vm13776_vm8, %v21413_v41 }
 0x770   : > { %12982 = vmatpush1.bf16.msra.mxu1 %v21557_v45 }
 0x771   : > { %13188 = vmatpush3.bf16.msra.mxu0 %v21508_v44  ;;  %12984 = vmatprep.subr.bf16.mxu1 %v21558_v43  ;;  %v21562_v44 = vld [vmem:[#allocation39_spill] sm:$0xff] }
 0x772   : > { %13189 = vmatprep.subr.bf16.mxu0 %v21463_v28 }
 0x774   : > { %12986 = vmatpush1.bf16.msra.mxu1 %v21559_v47 }
 0x775   : > { %13191 = vmatpush3.bf16.msra.mxu0 %v21509_v26  ;;  %12988 = vmatprep.subr.bf16.mxu1 %v21560_v62  ;;  %v21563_v26 = vand.u32 4294901760, %v18596_v7  ;;  %v21567_v7 = vand.u32 4294901760, %v21516_v0  ;;  %v21572_v0 = vand.u32 4294901760, %v18632_v20 }
 0x776   : > { %13192 = vmatprep.subr.bf16.mxu0 %v21463_v28 }
 0x777   : > { %v12999_v48 = vpack.c.bf16 %v21564_v36, %v21563_v26  ;;  %v21575_v26 = vld [vmem:[#allocation116_spill] sm:$0xff] }
 0x778   : > { %12990 = vmatpush1.bf16.msra.mxu1 %v21561_v38 }
 0x779   : > { %13194 = vmatpush3.bf16.msra.mxu0 %v21510_v52  ;;  %12992 = vmatprep.subr.bf16.mxu1 %v18724_v33  ;;  %v21565_v52 = vand.u32 4294901760, %v21513_v8  ;;  %v21569_v8 = vand.u32 4294901760, %v21519_v9  ;;  %v21576_v9 = vand.u32 4294901760, %v21575_v26  ;;  %v21604_v26 = vld [vmem:[#allocation86_spill] sm:$0xff] }
 0x77a   : > { %13195 = vmatprep.subr.bf16.mxu0 %v21463_v28 }
 0x77b   : > { %v13001_v21 = vpack.c.bf16 %v21566_v40, %v21565_v52  ;;  %v13005_v17 = vpack.c.bf16 %v21570_v24, %v21569_v8  ;;  %v21583_v52 = vand.u32 4294901760, %v18669_v3  ;;  %v21591_v3 = vand.u32 4294901760, %v18726_v30 }
 0x77c   : > { %12994 = vmatpush1.bf16.msra.mxu1 %v18749_v53  ;;  %v21593_v24 = vand.u32 4294901760, %v18788_v55  ;;  %v21598_v30 = vand.u32 4294901760, %v18887_v5 }
 0x77d   : > { %13197 = vmatpush3.bf16.msra.mxu0 %v21511_v34  ;;  %12996 = vmatprep.subr.bf16.mxu1 %v21562_v44  ;;  %v21568_v34 = vand.u32 4294901760, %v21517_v18 }
 0x77e   : > { %13198 = vmatprep.subr.bf16.mxu0 %v21463_v28 }
 0x77f   : > { %v11069_v56 = vpop.f32.mrb[20].mxu0  ;;  %v13003_v46 = vpack.c.bf16 %v21568_v34, %v21567_v7  ;;  %v21587_v7 = vand.u32 4294901760, %v18686_v11  ;;  %v21594_v11 = vand.u32 4294901760, %v18791_v42 }
 0x780   : > { %v11070_v12 = vpop.f32.mrb[21].mxu0  ;;  %12998 = vmatpush1.bf16.msra.mxu1 %v18797_v50 }
 0x781   : > { %v11071_v37 = vadd.f32 %v11070_v12, %v11069_v56  ;;  %13200 = vmatpush3.bf16.msra.mxu0 %v21515_v19  ;;  %13000 = vmatprep.subr.bf16.mxu1 %v12999_v48  ;;  %v21571_v19 = vand.u32 4294901760, %v18627_v22  ;;  %v21578_v48 = vand.u32 4294901760, %v18650_v16  ;;  %v21580_v22 = vand.u32 4294901760, %v18660_v27 }
 0x782   : > { %13201 = vmatprep.subr.bf16.mxu0 %v21463_v28  ;;  %v21582_v12 = vand.u32 4294901760, %v18667_v58  ;;  %v21584_v16 = vand.u32 4294901760, %v18676_v57  ;;  %v21588_v27 = vand.u32 4294901760, %v18688_v54  ;;  %v21590_v58 = vand.u32 4294901760, %v18718_v6 }
 0x783   : > { %v8828_v35 = vadd.f32 %v11071_v37, %v8660_v63  ;;  %9577 = vmatmul.mubr.f32.vlgmr.msra.gmra.mrb[6].mxu1 %v21527_v59  ;;  %v13007_v18 = vpack.c.bf16 %v21572_v0, %v21571_v19  ;;  %v21573_v59 = vld [vmem:[#allocation151_spill] sm:$0xff]  ;;  %v21592_v57 = vand.u32 4294901760, %v18747_v61  ;;  %v21595_v54 = vand.u32 4294901760, %v18855_v15  ;;  %v21599_v15 = vld [vmem:[#allocation90_spill] sm:$0xff] }
 0x784   : > { %13002 = vmatpush1.bf16.msra.mxu1 %v13001_v21  ;;  %9743 = vmatprep.mubr.f32.mxu1 %v21413_v41  ;;  %v21574_v63 = vand.u32 4294901760, %v21573_v59  ;;  %v13015_v40 = vpack.c.bf16 %v21583_v52, %v21582_v12  ;;  %v21585_v21 = vld [vmem:[#allocation124_spill] sm:$0xff]  ;;  %v13019_v34 = vpack.c.bf16 %v21588_v27, %v21587_v7  ;;  %v21597_v6 = vand.u32 4294901760, %v18882_v51  ;;  %v21600_v51 = vld [vmem:[#allocation66_spill] sm:$0xff] }
 0x785   : > { %13203 = vmatpush3.bf16.msra.mxu0 %v21521_v1  ;;  %13004 = vmatprep.subr.bf16.mxu1 %v13003_v46  ;;  %v21579_v1 = vand.u32 4294901760, %v18652_v23  ;;  %v21586_v23 = vand.u32 4294901760, %v21585_v21  ;;  %v13023_v8 = vpack.c.bf16 %v21592_v57, %v21591_v3  ;;  %v6777_v5 = vrot.slane %v21600_v51, %v21599_v15 }
 0x786   : > { %13204 = vmatprep.subr.bf16.mxu0 %v21463_v28  ;;  %v13009_v36 = vpack.c.bf16 %v21576_v9, %v21574_v63  ;;  %v21581_v28 = vand.u32 4294901760, %v18662_v32  ;;  %v21589_v32 = vand.u32 4294901760, %v18702_v49  ;;  %v21596_v49 = vand.u32 4294901760, %v18875_v14 }
 0x787   : > { %v13011_v56 = vpack.c.bf16 %v21579_v1, %v21578_v48  ;;  %v13017_v37 = vpack.c.bf16 %v21586_v23, %v21584_v16  ;;  %v13029_v0 = vpack.c.bf16 %v21598_v30, %v21597_v6  ;;  %v21605_v9 = vsub.s32 2, %v21604_v26 }
 0x788   : > { %13006 = vmatpush1.bf16.msra.mxu1 %v13005_v17  ;;  %v13013_v20 = vpack.c.bf16 %v21581_v28, %v21580_v22  ;;  %v13021_v46 = vpack.c.bf16 %v21590_v58, %v21589_v32  ;;  %v13025_v17 = vpack.c.bf16 %v21594_v11, %v21593_v24  ;;  %v13027_v19 = vpack.c.bf16 %v21596_v49, %v21595_v54 }
 0x789   : > { %13206 = vmatpush3.bf16.msra.mxu0 %v21577_v29  ;;  %13008 = vmatprep.subr.bf16.mxu1 %v13007_v18 }
 0x78c   : > { %11477 = vmatmul.mubr.f32.vlgmr.msra.gmra.mrb[24].mxu0 %v21518_v39  ;;  %13010 = vmatpush1.bf16.msra.mxu1 %v13009_v36 }
 0x78d   : > { %13012 = vmatprep.subr.bf16.mxu1 %v13011_v56 }
 0x790   : > { %13014 = vmatpush1.bf16.msra.mxu1 %v13013_v20 }
 0x791   : > { %13016 = vmatprep.subr.bf16.mxu1 %v13015_v40  ;;  %v13488_v40 = vld [vmem:[#allocation14] sm:$0xff] }
 0x794   : > { %13018 = vmatpush1.bf16.msra.mxu1 %v13017_v37 }
 0x795   : > { %13020 = vmatprep.subr.bf16.mxu1 %v13019_v34 }
 0x798   : > { %13022 = vmatpush1.bf16.msra.mxu1 %v13021_v46 }
 0x799   : > { %13024 = vmatprep.subr.bf16.mxu1 %v13023_v8 }
 0x79c   : > { %13026 = vmatpush1.bf16.msra.mxu1 %v13025_v17 }
 0x79d   : > { %13028 = vmatprep.subr.bf16.mxu1 %v13027_v19 }
 0x79f   : > { %v11104_v61 = vpop.f32.mrb[22].mxu0 }
 0x7a0   : > { %v11105_v18 = vpop.f32.mrb[23].mxu0  ;;  %13030 = vmatpush1.bf16.msra.mxu1 %v13029_v0 }
 0x7a1   : > { %v11106_v55 = vadd.f32 %v11105_v18, %v11104_v61  ;;  %13032 = vmatprep.subr.bf16.mxu1 %v21546_v31  ;;  %v21601_v31 = vld [vmem:[#allocation91_spill] sm:$0xff] }
 0x7a3   : > { %v8932_v42 = vadd.f32 %v11106_v55, %v8828_v35  ;;  %9745 = vmatmul.mubr.f32.vlgmr.msra.gmra.mrb[6].mxu1 %v21518_v39 }
 0x7a4   : > { %13034 = vmatpush1.bf16.msra.mxu1 %v21549_v60  ;;  %9847 = vmatprep.mubr.f32.mxu1 %v21413_v41  ;;  %v6781_v60 = vrot.slane %v21600_v51, %v21601_v31 }
 0x7a5   : > { %13036 = vmatprep.subr.bf16.mxu1 %v21550_v4  ;;  %v8983_v4 = vld [vmem:[%s14209_s5] sm:$0x7]  ;;  %s13777_s5 = smov [#allocation14]  }
 0x7a6   : > { %v8996_v36 = vrot.slane %v8983_v4, %v21605_v9  ;;  %s10525_s14 = sshll.u32 %s13777_s5, 4  ;;  %s10526_s14 = int_to_ptr.vmem [resolvable:$true] %s10525_s14 }
 0x7a7   : > { %s13669_s26 = scalar_lea.vmem %s10526_s14, 128  ;;  %p13676_p8 = scmp.lt.s32.totalorder %s10526_s14, %s10526_s14 }
 0x7a8   : > { %13038 = vmatpush1.bf16.msra.mxu1 %v21553_v25  ;;  %v21602_v25 = vld [vmem:[#allocation130_spill] sm:$0xff]  ;;  %p13670_p3 = scmp.ne.s32.totalorder %s10526_s14, %s13669_s26  ;;  %p13677_p0 = scmp.lt.s32.totalorder %s13669_s26, %s13669_s26 }
 0x7a9   : > { %13040 = vmatprep.subr.bf16.mxu1 %v21554_v13  ;;  %v6930_v13 = vadd.f32 %v21602_v25, %v6777_v5 }
 0x7aa   : > { %p13671_p7 = pnand %p13670_p3, %p13417_p10  ;;  %p13678_p6 = por %p13677_p0, %p13676_p8 }
 0x7ac   : > { %13042 = vmatpush1.bf16.msra.mxu1 %v21555_v10  ;;  %p13672_p4 = pneg %p13671_p7 }
 0x7ad   : > { %13044 = vmatprep.subr.bf16.mxu1 %v21556_v2  ;;  %v8992_v2 = vrot.slane %v8983_v4, %v21601_v31 }
 0x7ae   : > { %p13679_p5 = pnand %p13678_p6, %p13672_p4 }
 0x7b0   : > { %13046 = vmatpush1.bf16.msra.mxu1 %v21557_v45 }
 0x7b1   : > { %13048 = vmatprep.subr.bf16.mxu1 %v21558_v43 }
 0x7b4   : > { %13050 = vmatpush1.bf16.msra.mxu1 %v21559_v47 }
 0x7b5   : > { %13052 = vmatprep.subr.bf16.mxu1 %v21560_v62 }
 0x7b8   : > { %13054 = vmatpush1.bf16.msra.mxu1 %v21561_v38 }
 0x7b9   : > { %13056 = vmatprep.subr.bf16.mxu1 %v18724_v33  ;;  %v8988_v33 = vrot.slane %v8983_v4, %v21599_v15 }
 0x7bc   : > { %13058 = vmatpush1.bf16.msra.mxu1 %v18749_v53  ;;  %v21603_v53 = vld [vmem:[#allocation140_spill] sm:$0xff] }
 0x7bd   : > { %13060 = vmatprep.subr.bf16.mxu1 %v21562_v44  ;;  %v6932_v10 = vadd.f32 %v21603_v53, %v6781_v60 }
 0x7c0   : > { %13062 = vmatpush1.bf16.msra.mxu1 %v18797_v50  ;;  %v13210_v50 = vadd.f32 %v8988_v33, %v6930_v13 }
 0x7c3   : > { %9849 = vmatmul.mubr.f32.vlgmr.msra.gmra.mrb[6].mxu1 %v21518_v39  ;;  %v13213_v39 = vadd.f32 %v8992_v2, %v6932_v10 }
 0x85f   : > { %v10492_v41 = vpop.f32.mrb[24].mxu0 }
 0x860   : > { %v11478_v14 = vpop.f32.mrb[25].mxu0  ;;  %v13215_v48 = vadd.f32 %v10492_v41, %v8996_v36 }
 0x896   : > { %v9850_v45 = vpop.f32.mrb[6].mxu1 }
 0x897   : > { %v13211_v43 = vadd.f32 %v13210_v50, %v9850_v45  ;;  %v9852_v47 = vpop.f32.mrb[7].mxu1 }
 0x898   : > { %v13214_v62 = vadd.f32 %v13213_v39, %v9852_v47 }
 0x899   : > { %v10850_v38 = vmul.f32 -1.442695, %v13211_v43 }
 0x89a   : > { %v10851_v44 = vmul.f32 -1.442695, %v13214_v62 }
 0x89b   : > { %13478 = vpow2.f32 %v10850_v38 }
 0x89c   : > { %13480 = vpow2.f32 %v10851_v44 }
 0x8a5   : > { %v13479_v35 = vpop.eup %13478 }
 0x8a6   : > { %v10500_v59 = vadd.f32 1.0, %v13479_v35  ;;  %v13481_v63 = vpop.eup %13480 }
 0x8a7   : > { %v10507_v29 = vadd.f32 1.0, %v13481_v63 }
 0x8a8   : > { %13482 = vrcp.f32 %v10500_v59 }
 0x8a9   : > { %13484 = vrcp.f32 %v10507_v29 }
 0x8b2   : > { %v13483_v1 = vpop.eup %13482 }
 0x8b3   : > { %v10510_v56 = vmul.f32 %v13483_v1, %v13215_v48  ;;  %v13485_v28 = vpop.eup %13484 }
 0x8b4   : > { %v10513_v20 = vsub.f32 1.0, %v13485_v28  ;;  %v10515_v16 = vmul.f32 %v13488_v40, %v13485_v28 }
 0x8b5   : > { %v10511_v22 = vadd.f32 %v10510_v56, %v8932_v42 }
 0x8b7   : > { %13486 = vtanh.f32 %v10511_v22 }
 0x8c1   : > { %v13487_v12 = vpop.eup %13486 }
 0x8c2   : > { %v10514_v52 = vmul.f32 %v13487_v12, %v10513_v20 }
 0x8c4   : > { %v10516_v21 = vadd.f32 %v10515_v16, %v10514_v52 }
 0x8c6   : > { %10517 = vst [vmem:[#allocation14] sm:$0xff] %v10516_v21 }
 0x8c7   : > { %13682 = shalt.err (!%p13679_p5)
}
 0x8c8   : > { %s21606_s0 = sld [smem:[#allocation164_spill]] }
 0x8ce   : > { %s13683_s29 = scalar_lea.hbm %s21606_s0, 128 }
 0x8cf   : > { %p13684_p1 = scmp.ne.s32.totalorder %s21606_s0, %s13683_s29  ;;  %p13689_p13 = scmp.lt.u32.totalorder %s13683_s29, %s21606_s0 }
 0x8d1   : > { %p13685_p11 = pnand %p13684_p1, %p13417_p10 }
 0x8d3   : > { %p13686_p12 = pneg %p13685_p11 }
 0x8d5   : > { %p13691_p9 = pnand %p13689_p13, %p13686_p12 }
 0x8d7   : > { %13694 = shalt.err (!%p13691_p9)
}
 0x8d8   : > { %13394 = dma.vmem_to_hbm [thread:$0]  (%p13417_p10), %s10526_s14, 128, %s21606_s0, [#allocation5]  }
 0x8d9   : > { %13736 = dma.done.wait (%p13417_p10), [#allocation5], 128  }
 0x8da   : > { %13738 = vsyncadd (%p13417_p10), [#allocation5], 4294967168 }
 0x8db PF: > { %s21607_s12 = sld [smem:[#allocation22_spill]]  ;;  %s21608_s30 = sld [smem:[#allocation20_spill]] }
 0x8dc   : > { %s21609_s20 = sld [smem:[#allocation24_spill]]  ;;  %s21610_s3 = sld [smem:[#allocation23_spill]] }
 0x8dd   : > { %s21611_s18 = smov %s13745_s19  ;;  %s21613_s21 = smov %s13757_s22 }
 0x8e1   : > { %s38_s23 = sadd.s32 1, %s21607_s12   ;;  %s21612_s19 = smov %s21608_s30 }
 0x8e2   : > { %p35_p2 = scmp.ge.s32.totalorder %s38_s23, 4   ;;  %s21614_s22 = smov %s21610_s3 }
 0x8e4   :  { %37 = sbr.rel (!%p35_p2) target bundleno = 25 (0x19), region = 214 }
 0x8eb   :  { %10538 = vsyncpa [#allocation4], 1 }
 0x8ec   :  { %10540 = vsyncpa [#allocation4 + $0x1], 1 }
 0x8ed   :  { %10541 = vsyncpa [#allocation7], 1 }
 0x8ee   :  { %10543 = vsyncpa [#allocation7 + $0x1], 1 }
 0x8ef   :  { %10544 = vsyncpa [#allocation10], 1 }
 0x8f0   :  { %10546 = vsyncpa [#allocation10 + $0x1], 1 }
 0x8f1   :  { %10547 = vsyncpa [#allocation13], 1 }
 0x8f2   :  { %10549 = vsyncpa [#allocation13 + $0x1], 1 }
 0x8f3   :  { %10550 = vsyncpa [#allocation5], 1 }
 0x8f4   :  { %10552 = vsyncpa [#allocation5 + $0x1], 1 }

</bundles_post_ra>
